<compile_context>
chip_gen: v5e
topology: v5e:2x2
jax: 0.10.0
libtpu: 0.0.40
codegen_flags: <defaults>
</compile_context>

<pallas_src>
import functools
import math

import jax
import jax.numpy as jnp
from jax.experimental import pallas as pl
from jax.experimental.pallas import tpu as pltpu

# Precision knobs: bf16 matmul inputs + bf16 q|k|v activation storage halve
# HBM traffic on the memory-bound projection path and are MXU-native on
# v6e/v7x.  All statistics / normalization / softmax math stays in f32.
# Set both to jnp.float32 for exact parity with the f32 PyTorch module.
MATMUL_DTYPE = jnp.bfloat16          # projection matmul input dtype
ACT_DTYPE = jnp.bfloat16             # dtype of the q|k|v activation in HBM

VMEM_BUDGET_BYTES = 48 * 1024 * 1024  # fits v7x (64 MiB physical) with headroom


def _round_up(x, m):
    return ((x + m - 1) // m) * m


# ------------------------------ Pallas kernels -------------------------------


def _proj_stats_kernel(x_ref, w_ref, y_ref, sum_ref, sq_ref):
    """y = x @ w (bf16 in, f32 accumulate); activation stored in y_ref.dtype.

    Per-row-tile partial BatchNorm statistics (sum / sum-of-squares, computed
    from the f32 accumulator BEFORE the storage cast) are written to this grid
    step's own row, keeping the grid axis fully "parallel"."""
    y = jnp.dot(x_ref[...], w_ref[...], preferred_element_type=jnp.float32)
    y_ref[...] = y.astype(y_ref.dtype)
    sum_ref[...] = jnp.sum(y, axis=0, keepdims=True)
    sq_ref[...] = jnp.sum(y * y, axis=0, keepdims=True)


def _attn_fc_kernel(qkv_ref, scale_ref, shift_ref, w_ref,
                    out_ref, sum_ref, sq_ref, *, d, K, D):
    """G (batch, step) slices of multi-head attention + fused DxD output FC.

    qkv_ref     : (G, 3, d, N, K)  pre-BN q|k|v, heads on an untiled axis.
    scale/shift : (3, d, 1, K)     BN scale/shift (1/sqrt(d) folded into q).
    w_ref       : (d, K, D)        output-FC weight, resident in VMEM.
    out_ref     : (G*N, D)         pre-BN fused-FC output (single store).
    sum/sq_ref  : (1, D)           this step's partial BN statistics.
    """
    x = qkv_ref[...]                      # (G, 3, d, N, K), ACT_DTYPE
    scale = scale_ref[...]                # (3, d, 1, K) f32
    shift = shift_ref[...]
    G, N = x.shape[0], x.shape[3]

    acc = jnp.zeros((G * N, D), jnp.float32)
    for h in range(d):                    # heads indexed on untiled dims only
        qh = jnp.maximum(x[:, 0, h].astype(jnp.float32) * scale[0, h] + shift[0, h], 0.0)
        kh = jnp.maximum(x[:, 1, h].astype(jnp.float32) * scale[1, h] + shift[1, h], 0.0)
        vh = jnp.maximum(x[:, 2, h].astype(jnp.float32) * scale[2, h] + shift[2, h], 0.0)
        s = jnp.einsum("gnc,gmc->gnm", qh, kh, preferred_element_type=jnp.float32)
        s = s - jnp.max(s, axis=-1, keepdims=True)
        p = jnp.exp(s)
        p = p * pl.reciprocal(jnp.sum(p, axis=-1, keepdims=True), approx=True)
        oh = jnp.einsum("gnm,gmc->gnc", p, vh, preferred_element_type=jnp.float32)
        # Fused output FC: head h's (K, D) weight slab, accumulated in f32.
        acc = acc + jnp.dot(oh.reshape(G * N, K), w_ref[h],
                            preferred_element_type=jnp.float32)

    out_ref[...] = acc                    # single lane-contiguous store
    sum_ref[...] = jnp.sum(acc, axis=0, keepdims=True)
    sq_ref[...] = jnp.sum(acc * acc, axis=0, keepdims=True)


def _bn_relu_kernel(y_ref, scale_ref, shift_ref, o_ref):
    o_ref[...] = jnp.maximum(y_ref[...] * scale_ref[...] + shift_ref[...], 0.0)


# --------------------------------- wrappers -----------------------------------


def _proj_row_plan(M, Cin, Cout, target_rows=1024):
    """Largest row tile (multiple of 8, <= target) within the VMEM budget."""
    in_b = jnp.dtype(MATMUL_DTYPE).itemsize
    out_b = max(jnp.dtype(ACT_DTYPE).itemsize, 4)

    def vmem_use(t):  # 2x double-buffered in/out tiles + resident weight
        return 2 * t * Cin * in_b + 2 * t * Cout * out_b + Cin * Cout * in_b

    tm = min(target_rows, _round_up(M, 8))
    while tm > 8 and vmem_use(tm) > VMEM_BUDGET_BYTES:
        tm = max(8, _round_up(tm // 2, 8))
    Mp = _round_up(M, tm)
    return tm, Mp


def linear_with_stats(x, w):
    """[M, Cin] @ [Cin, Cout] -> (activation, per-channel sum, sum-of-squares)."""
    M, Cin = x.shape
    Cout = w.shape[1]
    tm, Mp = _proj_row_plan(M, Cin, Cout)
    if Mp != M:
        # No conv bias -> zero-padded rows contribute exactly 0 to both stats.
        x = jnp.pad(x, ((0, Mp - M), (0, 0)))
    ntiles = Mp // tm
    y, ps, psq = pl.pallas_call(
        _proj_stats_kernel,
        out_shape=(
            jax.ShapeDtypeStruct((Mp, Cout), ACT_DTYPE),
            jax.ShapeDtypeStruct((ntiles, Cout), jnp.float32),
            jax.ShapeDtypeStruct((ntiles, Cout), jnp.float32),
        ),
        grid=(ntiles,),
        in_specs=[
            pl.BlockSpec((tm, Cin), lambda i: (i, 0)),
            pl.BlockSpec((Cin, Cout), lambda i: (0, 0)),
        ],
        out_specs=(
            pl.BlockSpec((tm, Cout), lambda i: (i, 0)),
            pl.BlockSpec((1, Cout), lambda i: (i, 0)),   # per-tile partial stats
            pl.BlockSpec((1, Cout), lambda i: (i, 0)),
        ),
        compiler_params=pltpu.CompilerParams(
            dimension_semantics=("parallel",),           # megacore-shardable
            vmem_limit_bytes=VMEM_BUDGET_BYTES),
    )(x.astype(MATMUL_DTYPE), w.astype(MATMUL_DTYPE))
    return y, jnp.sum(ps, axis=0, keepdims=True), jnp.sum(psq, axis=0, keepdims=True)


def bn_scale_shift(s, sq, count, gamma, beta, eps=1e-5):
    """Training-mode BatchNorm (biased variance) folded into scale/shift."""
    mean = s / count
    var = jnp.maximum(sq / count - mean * mean, 0.0)
    scale = gamma * jax.lax.rsqrt(var + eps)
    shift = beta - mean * scale
    return scale, shift                      # both (1, C)


def _pick_group(BT, N, D, target_bytes=128 * 1024, max_g=64):
    """Largest divisor of B*T under a per-step input-DMA size target."""
    act_b = jnp.dtype(ACT_DTYPE).itemsize
    cap = max(1, min(BT, max_g, target_bytes // max(1, 3 * N * D * act_b)))
    g = 1
    for cand in range(1, cap + 1):
        if BT % cand == 0:
            g = cand
    if N % 8 != 0:
        g = BT     # keep the (G*N, D) output block equal to the full array
    return g


def attention_with_out_fc(qkv_heads, scale, shift, w_r, G, d, K, D):
    BT, _, _, N, _ = qkv_heads.shape
    steps = BT // G
    kernel = functools.partial(_attn_fc_kernel, d=d, K=K, D=D)
    out, ps, psq = pl.pallas_call(
        kernel,
        out_shape=(
            jax.ShapeDtypeStruct((BT * N, D), jnp.float32),
            jax.ShapeDtypeStruct((steps, D), jnp.float32),
            jax.ShapeDtypeStruct((steps, D), jnp.float32),
        ),
        grid=(steps,),
        in_specs=[
            pl.BlockSpec((G, 3, d, N, K), lambda i: (i, 0, 0, 0, 0)),
            pl.BlockSpec((3, d, 1, K), lambda i: (0, 0, 0, 0)),
            pl.BlockSpec((3, d, 1, K), lambda i: (0, 0, 0, 0)),
            pl.BlockSpec((d, K, D), lambda i: (0, 0, 0)),
        ],
        out_specs=(
            pl.BlockSpec((G * N, D), lambda i: (i, 0)),
            pl.BlockSpec((1, D), lambda i: (i, 0)),      # per-step partial stats
            pl.BlockSpec((1, D), lambda i: (i, 0)),
        ),
        compiler_params=pltpu.CompilerParams(
            dimension_semantics=("parallel",),
            vmem_limit_bytes=VMEM_BUDGET_BYTES),
    )(qkv_heads, scale, shift, w_r)
    return out, jnp.sum(ps, axis=0, keepdims=True), jnp.sum(psq, axis=0, keepdims=True)


def bn_relu(y, scale, shift):
    """Fused BatchNorm apply + ReLU over a lane-dense (width-128) slab."""
    M, C = y.shape
    if C % 128 != 0 and 128 % C == 0 and (M * C) % 128 == 0:
        rep = 128 // C
        y2 = y.reshape(M * C // 128, 128)
        sc = jnp.tile(scale, (1, rep))
        sh = jnp.tile(shift, (1, rep))
    else:
        y2, sc, sh = y, scale, shift
    R, W = y2.shape
    tm = min(1024, _round_up(R, 8))
    Rp = _round_up(R, tm)
    if Rp != R:
        y2 = jnp.pad(y2, ((0, Rp - R), (0, 0)))
    out = pl.pallas_call(
        _bn_relu_kernel,
        out_shape=jax.ShapeDtypeStruct((Rp, W), jnp.float32),
        grid=(Rp // tm,),
        in_specs=[
            pl.BlockSpec((tm, W), lambda i: (i, 0)),
            pl.BlockSpec((1, W), lambda i: (0, 0)),
            pl.BlockSpec((1, W), lambda i: (0, 0)),
        ],
        out_specs=pl.BlockSpec((tm, W), lambda i: (i, 0)),
        compiler_params=pltpu.CompilerParams(dimension_semantics=("parallel",)),
    )(y2, sc, sh)
    return out[:R].reshape(M, C)


def spatial_attention(X, STE, params, K, d, eps=1e-5):
    """X, STE: [B, T, N, D] with D = K * d.  Returns [B, T, N, D]."""
    B, T, N, D = X.shape
    assert D == K * d
    BT = B * T
    M = BT * N

    # ---- fused FC_q | FC_k | FC_v projection + in-kernel BN statistics ----
    x_flat = jnp.concatenate([X, STE], axis=-1).reshape(M, 2 * D)
    y_qkv, s1, sq1 = linear_with_stats(x_flat, params["w_qkv"])
    scale1, shift1 = bn_scale_shift(s1, sq1, float(M), params["gamma_qkv"],
                                    params["beta_qkv"], eps)

    # Fold 1/sqrt(d) into the q columns (a positive scalar commutes with ReLU).
    sm = 1.0 / math.sqrt(d)
    fold = jnp.concatenate([jnp.full((1, D), sm, jnp.float32),
                            jnp.ones((1, 2 * D), jnp.float32)], axis=1)
    scale1 = scale1 * fold
    shift1 = shift1 * fold

    # Head-major view (layout plumbing in XLA): (BT, 3 parts, d heads, N, K).
    qkv_heads = y_qkv[:M].reshape(BT, N, 3, d, K).transpose(0, 2, 3, 1, 4)
    scale1_r = scale1.reshape(3, d, K)[:, :, None, :]
    shift1_r = shift1.reshape(3, d, K)[:, :, None, :]
    w_r = params["w_out"].reshape(d, K, D).astype(jnp.float32)

    # ---- attention + fused output FC (q/k/v BN+ReLU applied in-kernel) ----
    G = _pick_group(BT, N, D)
    y_out, s2, sq2 = attention_with_out_fc(qkv_heads, scale1_r, shift1_r, w_r,
                                           G, d, K, D)
    scale2, shift2 = bn_scale_shift(s2, sq2, float(M), params["gamma_out"],
                                    params["beta_out"], eps)

    # ---- output BatchNorm + ReLU (lane-dense elementwise pass) ----
    out = bn_relu(y_out, scale2, shift2)
    return out.reshape(B, T, N, D)


# ---------------------- parameters (match the module init) --------------------


def _xavier_uniform(key, cin, cout):
    bound = math.sqrt(6.0 / (cin + cout))
    return jax.random.uniform(key, (cin, cout), jnp.float32, -bound, bound)


def init_params(key, K, d):
    D = K * d
    kq, kk, kv, ko = jax.random.split(key, 4)
    # Conv 1x1 weights stored transposed ([Cin, Cout]); q|k|v fused along Cout.
    w_qkv = jnp.concatenate(
        [_xavier_uniform(kq, 2 * D, D),
         _xavier_uniform(kk, 2 * D, D),
         _xavier_uniform(kv, 2 * D, D)], axis=1)
    # Conv biases are zero-init and cancel exactly under BatchNorm -> omitted.
    return {
        "w_qkv": w_qkv,                                   # [2D, 3D]
        "gamma_qkv": jnp.ones((3 * D,), jnp.float32),     # BN weight (q|k|v)
        "beta_qkv": jnp.zeros((3 * D,), jnp.float32),     # BN bias   (q|k|v)
        "w_out": _xavier_uniform(ko, D, D),               # [D, D]
        "gamma_out": jnp.ones((D,), jnp.float32),
        "beta_out": jnp.zeros((D,), jnp.float32),
    }


# ----------------------------- pure-JAX reference -----------------------------


def reference(X, STE, params, K, d, eps=1e-5):
    """Reference mirroring the kernel's precision choices (bf16 matmul inputs,
    bf16 q|k|v activation storage); BN stats / softmax / output FC in f32."""
    B, T, N, D = X.shape
    M = B * T * N
    x = jnp.concatenate([X, STE], axis=-1).reshape(M, 2 * D)

    # FC_q | FC_k | FC_v (fused weights; conv bias omitted -> cancels in BN).
    y = jnp.dot(x.astype(MATMUL_DTYPE), params["w_qkv"].astype(MATMUL_DTYPE),
                preferred_element_type=jnp.float32)
    mu = jnp.mean(y, axis=0, keepdims=True)
    var = jnp.mean((y - mu) ** 2, axis=0, keepdims=True)
    y = y.astype(ACT_DTYPE).astype(jnp.float32)        # mirrors HBM storage dtype
    qkv = jnp.maximum((y - mu) * jax.lax.rsqrt(var + eps) * params["gamma_qkv"]
                      + params["beta_qkv"], 0.0)

    q, k, v = qkv[:, :D], qkv[:, D:2 * D], qkv[:, 2 * D:]
    q = q.reshape(B * T, N, d, K)
    k = k.reshape(B * T, N, d, K)
    v = v.reshape(B * T, N, d, K)
    s = jnp.einsum("gnhc,gmhc->ghnm", q, k) / math.sqrt(d)
    p = jax.nn.softmax(s, axis=-1)
    o = jnp.einsum("ghnm,gmhc->gnhc", p, v).reshape(M, D)

    y2 = o @ params["w_out"]
    mu2 = jnp.mean(y2, axis=0, keepdims=True)
    var2 = jnp.mean((y2 - mu2) ** 2, axis=0, keepdims=True)
    out = jnp.maximum((y2 - mu2) * jax.lax.rsqrt(var2 + eps) * params["gamma_out"]
                      + params["beta_out"], 0.0)
    return out.reshape(B, T, N, D)


# ------------------------------------ main -------------------------------------

if __name__ == "__main__":
    K, d = 4, 8            # spec: d heads of width K (torch.split(., K, dim=-1))
    D = K * d              # 32
    B, T, N = 2, 3, 16     # batch, num_steps, num_vertices

    key = jax.random.PRNGKey(0)
    kx, kste, kp = jax.random.split(key, 3)
    X = jax.random.normal(kx, (B, T, N, D), jnp.float32)
    STE = jax.random.normal(kste, (B, T, N, D), jnp.float32)
    params = init_params(kp, K, d)

    fn = jax.jit(functools.partial(spatial_attention, K=K, d=d))
    out = fn(X, STE, params)
    jax.block_until_ready(out)
    assert out.shape == (B, T, N, D), out.shape

    ref = reference(X, STE, params, K, d)
    err = float(jnp.max(jnp.abs(out - ref)))
    assert err < 5e-2, f"max abs error vs reference: {err}"

    print("KERNEL_OK")
</pallas_src>

<mosaic_0001>
module attributes {stable_mosaic.version = 11 : i64} {
  func.func @_proj_stats_kernel(%arg0: i32, %arg1: memref<96x64xbf16, #tpu.memory_space<vmem>>, %arg2: memref<64x96xbf16, #tpu.memory_space<vmem>>, %arg3: memref<96x96xbf16, #tpu.memory_space<vmem>>, %arg4: memref<1x96xf32, #tpu.memory_space<vmem>>, %arg5: memref<1x96xf32, #tpu.memory_space<vmem>>) attributes {dimension_semantics = [#tpu.dimension_semantics<parallel>], iteration_bounds = array<i64: 1>, scalar_prefetch = 0 : i64, scratch_operands = 0 : i64, tpu.core_type = #tpu.core_type<tc>, window_params = [{transform_indices = @transform_0, window_bounds = array<i64: 96, 64>}, {pipeline_mode = #tpu.pipeline_mode<synchronous>, transform_indices = @transform_1, window_bounds = array<i64: 64, 96>}, {transform_indices = @transform_2, window_bounds = array<i64: 96, 96>}, {transform_indices = @transform_3, window_bounds = array<i64: 1, 96>}, {transform_indices = @transform_4, window_bounds = array<i64: 1, 96>}]} {
    %c0 = arith.constant 0 : index
    %c0_0 = arith.constant 0 : index
    %0 = vector.load %arg1[%c0, %c0_0] : memref<96x64xbf16, #tpu.memory_space<vmem>>, vector<96x64xbf16>
    %c0_1 = arith.constant 0 : index
    %c0_2 = arith.constant 0 : index
    %1 = vector.load %arg2[%c0_1, %c0_2] : memref<64x96xbf16, #tpu.memory_space<vmem>>, vector<64x96xbf16>
    %cst = arith.constant dense<0.000000e+00> : vector<96x96xf32>
    %2 = tpu.matmul %0, %1, %cst {dimension_numbers = #tpu.dot_dimension_numbers<[1], [0], [0], [1], [0, 0, 1, 1], [], []>} : vector<96x64xbf16>, vector<64x96xbf16>, vector<96x96xf32> -> vector<96x96xf32>
    %3 = arith.truncf %2 : vector<96x96xf32> to vector<96x96xbf16>
    %c0_3 = arith.constant 0 : index
    %c0_4 = arith.constant 0 : index
    %4 = vector.load %arg3[%c0_3, %c0_4] : memref<96x96xbf16, #tpu.memory_space<vmem>>, vector<96x96xbf16>
    tpu.vector_store %arg3[%c0_3, %c0_4], %3 {strides = array<i32>} : memref<96x96xbf16, #tpu.memory_space<vmem>>, vector<96x96xbf16>,
    %cst_5 = arith.constant dense<0.000000e+00> : vector<96xf32>
    %5 = vector.multi_reduction <add>, %2, %cst_5 [0] : vector<96x96xf32> to vector<96xf32>
    %6 = vector.shape_cast %5 : vector<96xf32> to vector<1x96xf32>
    %c0_6 = arith.constant 0 : index
    %c0_7 = arith.constant 0 : index
    %7 = vector.load %arg4[%c0_6, %c0_7] : memref<1x96xf32, #tpu.memory_space<vmem>>, vector<1x96xf32>
    tpu.vector_store %arg4[%c0_6, %c0_7], %6 {strides = array<i32>} : memref<1x96xf32, #tpu.memory_space<vmem>>, vector<1x96xf32>,
    %8 = arith.mulf %2, %2 : vector<96x96xf32>
    %cst_8 = arith.constant dense<0.000000e+00> : vector<96xf32>
    %9 = vector.multi_reduction <add>, %8, %cst_8 [0] : vector<96x96xf32> to vector<96xf32>
    %10 = vector.shape_cast %9 : vector<96xf32> to vector<1x96xf32>
    %c0_9 = arith.constant 0 : index
    %c0_10 = arith.constant 0 : index
    %11 = vector.load %arg5[%c0_9, %c0_10] : memref<1x96xf32, #tpu.memory_space<vmem>>, vector<1x96xf32>
    tpu.vector_store %arg5[%c0_9, %c0_10], %10 {strides = array<i32>} : memref<1x96xf32, #tpu.memory_space<vmem>>, vector<1x96xf32>,
    return
  }
  func.func @transform_0(%arg0: i32) -> (i32, i32) {
    %c0_i32 = arith.constant 0 : i32
    %c0_i32_0 = arith.constant 0 : i32
    return %arg0, %c0_i32 : i32, i32
  }
  func.func @transform_1(%arg0: i32) -> (i32, i32) {
    %c0_i32 = arith.constant 0 : i32
    %c0_i32_0 = arith.constant 0 : i32
    %c0_i32_1 = arith.constant 0 : i32
    return %c0_i32, %c0_i32_0 : i32, i32
  }
  func.func @transform_2(%arg0: i32) -> (i32, i32) {
    %c0_i32 = arith.constant 0 : i32
    %c0_i32_0 = arith.constant 0 : i32
    return %arg0, %c0_i32 : i32, i32
  }
  func.func @transform_3(%arg0: i32) -> (i32, i32) {
    %c0_i32 = arith.constant 0 : i32
    %c0_i32_0 = arith.constant 0 : i32
    return %arg0, %c0_i32 : i32, i32
  }
  func.func @transform_4(%arg0: i32) -> (i32, i32) {
    %c0_i32 = arith.constant 0 : i32
    %c0_i32_0 = arith.constant 0 : i32
    return %arg0, %c0_i32 : i32, i32
  }
}

module attributes {stable_mosaic.version = 11 : i64} {
  func.func @_attn_fc_kernel(%arg0: i32, %arg1: memref<6x3x8x16x4xbf16, #tpu.memory_space<vmem>>, %arg2: memref<3x8x1x4xf32, #tpu.memory_space<vmem>>, %arg3: memref<3x8x1x4xf32, #tpu.memory_space<vmem>>, %arg4: memref<8x4x32xf32, #tpu.memory_space<vmem>>, %arg5: memref<96x32xf32, #tpu.memory_space<vmem>>, %arg6: memref<1x32xf32, #tpu.memory_space<vmem>>, %arg7: memref<1x32xf32, #tpu.memory_space<vmem>>) attributes {dimension_semantics = [#tpu.dimension_semantics<parallel>], iteration_bounds = array<i64: 1>, scalar_prefetch = 0 : i64, scratch_operands = 0 : i64, tpu.core_type = #tpu.core_type<tc>, window_params = [{transform_indices = @transform_0, window_bounds = array<i64: 6, 3, 8, 16, 4>}, {pipeline_mode = #tpu.pipeline_mode<synchronous>, transform_indices = @transform_1, window_bounds = array<i64: 3, 8, 1, 4>}, {pipeline_mode = #tpu.pipeline_mode<synchronous>, transform_indices = @transform_2, window_bounds = array<i64: 3, 8, 1, 4>}, {pipeline_mode = #tpu.pipeline_mode<synchronous>, transform_indices = @transform_3, window_bounds = array<i64: 8, 4, 32>}, {transform_indices = @transform_4, window_bounds = array<i64: 96, 32>}, {transform_indices = @transform_5, window_bounds = array<i64: 1, 32>}, {transform_indices = @transform_6, window_bounds = array<i64: 1, 32>}]} {
    %c0 = arith.constant 0 : index
    %c0_0 = arith.constant 0 : index
    %c0_1 = arith.constant 0 : index
    %c0_2 = arith.constant 0 : index
    %c0_3 = arith.constant 0 : index
    %0 = vector.load %arg1[%c0, %c0_0, %c0_1, %c0_2, %c0_3] : memref<6x3x8x16x4xbf16, #tpu.memory_space<vmem>>, vector<6x3x8x16x4xbf16>
    %c0_4 = arith.constant 0 : index
    %c0_5 = arith.constant 0 : index
    %c0_6 = arith.constant 0 : index
    %c0_7 = arith.constant 0 : index
    %1 = vector.load %arg2[%c0_4, %c0_5, %c0_6, %c0_7] : memref<3x8x1x4xf32, #tpu.memory_space<vmem>>, vector<3x8x1x4xf32>
    %c0_8 = arith.constant 0 : index
    %c0_9 = arith.constant 0 : index
    %c0_10 = arith.constant 0 : index
    %c0_11 = arith.constant 0 : index
    %2 = vector.load %arg3[%c0_8, %c0_9, %c0_10, %c0_11] : memref<3x8x1x4xf32, #tpu.memory_space<vmem>>, vector<3x8x1x4xf32>
    %cst = arith.constant 0.000000e+00 : f32
    %3 = vector.broadcast %cst : f32 to vector<96x32xf32>
    %4 = vector.extract_strided_slice %0 {offsets = [0, 0, 0, 0, 0], sizes = [6, 1, 1, 16, 4], strides = [1, 1, 1, 1, 1]} : vector<6x3x8x16x4xbf16> to vector<6x1x1x16x4xbf16>
    %5 = vector.shape_cast %4 : vector<6x1x1x16x4xbf16> to vector<6x16x4xbf16>
    %6 = arith.extf %5 : vector<6x16x4xbf16> to vector<6x16x4xf32>
    %7 = vector.extract_strided_slice %1 {offsets = [0, 0, 0, 0], sizes = [1, 1, 1, 4], strides = [1, 1, 1, 1]} : vector<3x8x1x4xf32> to vector<1x1x1x4xf32>
    %8 = vector.shape_cast %7 : vector<1x1x1x4xf32> to vector<1x4xf32>
    %9 = vector.shape_cast %8 : vector<1x4xf32> to vector<1x1x4xf32>
    %10 = vector.broadcast %9 : vector<1x1x4xf32> to vector<6x16x4xf32>
    %11 = arith.mulf %6, %10 : vector<6x16x4xf32>
    %12 = vector.extract_strided_slice %2 {offsets = [0, 0, 0, 0], sizes = [1, 1, 1, 4], strides = [1, 1, 1, 1]} : vector<3x8x1x4xf32> to vector<1x1x1x4xf32>
    %13 = vector.shape_cast %12 : vector<1x1x1x4xf32> to vector<1x4xf32>
    %14 = vector.shape_cast %13 : vector<1x4xf32> to vector<1x1x4xf32>
    %15 = vector.broadcast %14 : vector<1x1x4xf32> to vector<6x16x4xf32>
    %16 = arith.addf %11, %15 : vector<6x16x4xf32>
    %cst_12 = arith.constant 0.000000e+00 : f32
    %17 = vector.broadcast %cst_12 : f32 to vector<6x16x4xf32>
    %18 = arith.maximumf %16, %17 : vector<6x16x4xf32>
    %19 = vector.extract_strided_slice %0 {offsets = [0, 1, 0, 0, 0], sizes = [6, 1, 1, 16, 4], strides = [1, 1, 1, 1, 1]} : vector<6x3x8x16x4xbf16> to vector<6x1x1x16x4xbf16>
    %20 = vector.shape_cast %19 : vector<6x1x1x16x4xbf16> to vector<6x16x4xbf16>
    %21 = arith.extf %20 : vector<6x16x4xbf16> to vector<6x16x4xf32>
    %22 = vector.extract_strided_slice %1 {offsets = [1, 0, 0, 0], sizes = [1, 1, 1, 4], strides = [1, 1, 1, 1]} : vector<3x8x1x4xf32> to vector<1x1x1x4xf32>
    %23 = vector.shape_cast %22 : vector<1x1x1x4xf32> to vector<1x4xf32>
    %24 = vector.shape_cast %23 : vector<1x4xf32> to vector<1x1x4xf32>
    %25 = vector.broadcast %24 : vector<1x1x4xf32> to vector<6x16x4xf32>
    %26 = arith.mulf %21, %25 : vector<6x16x4xf32>
    %27 = vector.extract_strided_slice %2 {offsets = [1, 0, 0, 0], sizes = [1, 1, 1, 4], strides = [1, 1, 1, 1]} : vector<3x8x1x4xf32> to vector<1x1x1x4xf32>
    %28 = vector.shape_cast %27 : vector<1x1x1x4xf32> to vector<1x4xf32>
    %29 = vector.shape_cast %28 : vector<1x4xf32> to vector<1x1x4xf32>
    %30 = vector.broadcast %29 : vector<1x1x4xf32> to vector<6x16x4xf32>
    %31 = arith.addf %26, %30 : vector<6x16x4xf32>
    %cst_13 = arith.constant 0.000000e+00 : f32
    %32 = vector.broadcast %cst_13 : f32 to vector<6x16x4xf32>
    %33 = arith.maximumf %31, %32 : vector<6x16x4xf32>
    %34 = vector.extract_strided_slice %0 {offsets = [0, 2, 0, 0, 0], sizes = [6, 1, 1, 16, 4], strides = [1, 1, 1, 1, 1]} : vector<6x3x8x16x4xbf16> to vector<6x1x1x16x4xbf16>
    %35 = vector.shape_cast %34 : vector<6x1x1x16x4xbf16> to vector<6x16x4xbf16>
    %36 = arith.extf %35 : vector<6x16x4xbf16> to vector<6x16x4xf32>
    %37 = vector.extract_strided_slice %1 {offsets = [2, 0, 0, 0], sizes = [1, 1, 1, 4], strides = [1, 1, 1, 1]} : vector<3x8x1x4xf32> to vector<1x1x1x4xf32>
    %38 = vector.shape_cast %37 : vector<1x1x1x4xf32> to vector<1x4xf32>
    %39 = vector.shape_cast %38 : vector<1x4xf32> to vector<1x1x4xf32>
    %40 = vector.broadcast %39 : vector<1x1x4xf32> to vector<6x16x4xf32>
    %41 = arith.mulf %36, %40 : vector<6x16x4xf32>
    %42 = vector.extract_strided_slice %2 {offsets = [2, 0, 0, 0], sizes = [1, 1, 1, 4], strides = [1, 1, 1, 1]} : vector<3x8x1x4xf32> to vector<1x1x1x4xf32>
    %43 = vector.shape_cast %42 : vector<1x1x1x4xf32> to vector<1x4xf32>
    %44 = vector.shape_cast %43 : vector<1x4xf32> to vector<1x1x4xf32>
    %45 = vector.broadcast %44 : vector<1x1x4xf32> to vector<6x16x4xf32>
    %46 = arith.addf %41, %45 : vector<6x16x4xf32>
    %cst_14 = arith.constant 0.000000e+00 : f32
    %47 = vector.broadcast %cst_14 : f32 to vector<6x16x4xf32>
    %48 = arith.maximumf %46, %47 : vector<6x16x4xf32>
    "tpu.trace_start"() <{level = 10 : i32, message = "gnc,gmc->gnm"}> : () -> ()
    %cst_15 = arith.constant dense<0.000000e+00> : vector<6x16x16xf32>
    %49 = tpu.matmul %18, %33, %cst_15 {dimension_numbers = #tpu.dot_dimension_numbers<[2], [2], [1], [1], [0, 0, 0, 1, 1, 1], [0], [0]>} : vector<6x16x4xf32>, vector<6x16x4xf32>, vector<6x16x16xf32> -> vector<6x16x16xf32>
    "tpu.trace_stop"() : () -> ()
    %cst_16 = arith.constant dense<0xFF800000> : vector<6x16xf32>
    %50 = vector.multi_reduction <maximumf>, %49, %cst_16 [2] : vector<6x16x16xf32> to vector<6x16xf32>
    %51 = vector.shape_cast %50 : vector<6x16xf32> to vector<6x16x1xf32>
    %52 = vector.broadcast %51 : vector<6x16x1xf32> to vector<6x16x16xf32>
    %53 = arith.subf %49, %52 : vector<6x16x16xf32>
    %54 = math.exp %53 : vector<6x16x16xf32>
    %cst_17 = arith.constant dense<0.000000e+00> : vector<6x16xf32>
    %55 = vector.multi_reduction <add>, %54, %cst_17 [2] : vector<6x16x16xf32> to vector<6x16xf32>
    %56 = vector.shape_cast %55 : vector<6x16xf32> to vector<6x16x1xf32>
    %57 = tpu.reciprocal %56 {approx = true} : vector<6x16x1xf32> -> vector<6x16x1xf32>
    %58 = vector.broadcast %57 : vector<6x16x1xf32> to vector<6x16x16xf32>
    %59 = arith.mulf %54, %58 : vector<6x16x16xf32>
    "tpu.trace_start"() <{level = 10 : i32, message = "gnm,gmc->gnc"}> : () -> ()
    %cst_18 = arith.constant dense<0.000000e+00> : vector<6x16x4xf32>
    %60 = tpu.matmul %59, %48, %cst_18 {dimension_numbers = #tpu.dot_dimension_numbers<[2], [1], [1], [2], [0, 0, 0, 1, 1, 2], [0], [0]>} : vector<6x16x16xf32>, vector<6x16x4xf32>, vector<6x16x4xf32> -> vector<6x16x4xf32>
    "tpu.trace_stop"() : () -> ()
    %61 = vector.shape_cast %60 : vector<6x16x4xf32> to vector<96x4xf32>
    %c0_19 = arith.constant 0 : index
    %c0_20 = arith.constant 0 : index
    %c0_21 = arith.constant 0 : index
    %62 = vector.load %arg4[%c0_19, %c0_20, %c0_21] : memref<8x4x32xf32, #tpu.memory_space<vmem>>, vector<1x4x32xf32>
    %63 = vector.shape_cast %62 : vector<1x4x32xf32> to vector<4x32xf32>
    %cst_22 = arith.constant dense<0.000000e+00> : vector<96x32xf32>
    %64 = tpu.matmul %61, %63, %cst_22 {dimension_numbers = #tpu.dot_dimension_numbers<[1], [0], [0], [1], [0, 0, 1, 1], [], []>} : vector<96x4xf32>, vector<4x32xf32>, vector<96x32xf32> -> vector<96x32xf32>
    %65 = arith.addf %3, %64 : vector<96x32xf32>
    %66 = vector.extract_strided_slice %0 {offsets = [0, 0, 1, 0, 0], sizes = [6, 1, 1, 16, 4], strides = [1, 1, 1, 1, 1]} : vector<6x3x8x16x4xbf16> to vector<6x1x1x16x4xbf16>
    %67 = vector.shape_cast %66 : vector<6x1x1x16x4xbf16> to vector<6x16x4xbf16>
    %68 = arith.extf %67 : vector<6x16x4xbf16> to vector<6x16x4xf32>
    %69 = vector.extract_strided_slice %1 {offsets = [0, 1, 0, 0], sizes = [1, 1, 1, 4], strides = [1, 1, 1, 1]} : vector<3x8x1x4xf32> to vector<1x1x1x4xf32>
    %70 = vector.shape_cast %69 : vector<1x1x1x4xf32> to vector<1x4xf32>
    %71 = vector.shape_cast %70 : vector<1x4xf32> to vector<1x1x4xf32>
    %72 = vector.broadcast %71 : vector<1x1x4xf32> to vector<6x16x4xf32>
    %73 = arith.mulf %68, %72 : vector<6x16x4xf32>
    %74 = vector.extract_strided_slice %2 {offsets = [0, 1, 0, 0], sizes = [1, 1, 1, 4], strides = [1, 1, 1, 1]} : vector<3x8x1x4xf32> to vector<1x1x1x4xf32>
    %75 = vector.shape_cast %74 : vector<1x1x1x4xf32> to vector<1x4xf32>
    %76 = vector.shape_cast %75 : vector<1x4xf32> to vector<1x1x4xf32>
    %77 = vector.broadcast %76 : vector<1x1x4xf32> to vector<6x16x4xf32>
    %78 = arith.addf %73, %77 : vector<6x16x4xf32>
    %cst_23 = arith.constant 0.000000e+00 : f32
    %79 = vector.broadcast %cst_23 : f32 to vector<6x16x4xf32>
    %80 = arith.maximumf %78, %79 : vector<6x16x4xf32>
    %81 = vector.extract_strided_slice %0 {offsets = [0, 1, 1, 0, 0], sizes = [6, 1, 1, 16, 4], strides = [1, 1, 1, 1, 1]} : vector<6x3x8x16x4xbf16> to vector<6x1x1x16x4xbf16>
    %82 = vector.shape_cast %81 : vector<6x1x1x16x4xbf16> to vector<6x16x4xbf16>
    %83 = arith.extf %82 : vector<6x16x4xbf16> to vector<6x16x4xf32>
    %84 = vector.extract_strided_slice %1 {offsets = [1, 1, 0, 0], sizes = [1, 1, 1, 4], strides = [1, 1, 1, 1]} : vector<3x8x1x4xf32> to vector<1x1x1x4xf32>
    %85 = vector.shape_cast %84 : vector<1x1x1x4xf32> to vector<1x4xf32>
    %86 = vector.shape_cast %85 : vector<1x4xf32> to vector<1x1x4xf32>
    %87 = vector.broadcast %86 : vector<1x1x4xf32> to vector<6x16x4xf32>
    %88 = arith.mulf %83, %87 : vector<6x16x4xf32>
    %89 = vector.extract_strided_slice %2 {offsets = [1, 1, 0, 0], sizes = [1, 1, 1, 4], strides = [1, 1, 1, 1]} : vector<3x8x1x4xf32> to vector<1x1x1x4xf32>
    %90 = vector.shape_cast %89 : vector<1x1x1x4xf32> to vector<1x4xf32>
    %91 = vector.shape_cast %90 : vector<1x4xf32> to vector<1x1x4xf32>
    %92 = vector.broadcast %91 : vector<1x1x4xf32> to vector<6x16x4xf32>
    %93 = arith.addf %88, %92 : vector<6x16x4xf32>
    %cst_24 = arith.constant 0.000000e+00 : f32
    %94 = vector.broadcast %cst_24 : f32 to vector<6x16x4xf32>
    %95 = arith.maximumf %93, %94 : vector<6x16x4xf32>
    %96 = vector.extract_strided_slice %0 {offsets = [0, 2, 1, 0, 0], sizes = [6, 1, 1, 16, 4], strides = [1, 1, 1, 1, 1]} : vector<6x3x8x16x4xbf16> to vector<6x1x1x16x4xbf16>
    %97 = vector.shape_cast %96 : vector<6x1x1x16x4xbf16> to vector<6x16x4xbf16>
    %98 = arith.extf %97 : vector<6x16x4xbf16> to vector<6x16x4xf32>
    %99 = vector.extract_strided_slice %1 {offsets = [2, 1, 0, 0], sizes = [1, 1, 1, 4], strides = [1, 1, 1, 1]} : vector<3x8x1x4xf32> to vector<1x1x1x4xf32>
    %100 = vector.shape_cast %99 : vector<1x1x1x4xf32> to vector<1x4xf32>
    %101 = vector.shape_cast %100 : vector<1x4xf32> to vector<1x1x4xf32>
    %102 = vector.broadcast %101 : vector<1x1x4xf32> to vector<6x16x4xf32>
    %103 = arith.mulf %98, %102 : vector<6x16x4xf32>
    %104 = vector.extract_strided_slice %2 {offsets = [2, 1, 0, 0], sizes = [1, 1, 1, 4], strides = [1, 1, 1, 1]} : vector<3x8x1x4xf32> to vector<1x1x1x4xf32>
    %105 = vector.shape_cast %104 : vector<1x1x1x4xf32> to vector<1x4xf32>
    %106 = vector.shape_cast %105 : vector<1x4xf32> to vector<1x1x4xf32>
    %107 = vector.broadcast %106 : vector<1x1x4xf32> to vector<6x16x4xf32>
    %108 = arith.addf %103, %107 : vector<6x16x4xf32>
    %cst_25 = arith.constant 0.000000e+00 : f32
    %109 = vector.broadcast %cst_25 : f32 to vector<6x16x4xf32>
    %110 = arith.maximumf %108, %109 : vector<6x16x4xf32>
    "tpu.trace_start"() <{level = 10 : i32, message = "gnc,gmc->gnm"}> : () -> ()
    %cst_26 = arith.constant dense<0.000000e+00> : vector<6x16x16xf32>
    %111 = tpu.matmul %80, %95, %cst_26 {dimension_numbers = #tpu.dot_dimension_numbers<[2], [2], [1], [1], [0, 0, 0, 1, 1, 1], [0], [0]>} : vector<6x16x4xf32>, vector<6x16x4xf32>, vector<6x16x16xf32> -> vector<6x16x16xf32>
    "tpu.trace_stop"() : () -> ()
    %cst_27 = arith.constant dense<0xFF800000> : vector<6x16xf32>
    %112 = vector.multi_reduction <maximumf>, %111, %cst_27 [2] : vector<6x16x16xf32> to vector<6x16xf32>
    %113 = vector.shape_cast %112 : vector<6x16xf32> to vector<6x16x1xf32>
    %114 = vector.broadcast %113 : vector<6x16x1xf32> to vector<6x16x16xf32>
    %115 = arith.subf %111, %114 : vector<6x16x16xf32>
    %116 = math.exp %115 : vector<6x16x16xf32>
    %cst_28 = arith.constant dense<0.000000e+00> : vector<6x16xf32>
    %117 = vector.multi_reduction <add>, %116, %cst_28 [2] : vector<6x16x16xf32> to vector<6x16xf32>
    %118 = vector.shape_cast %117 : vector<6x16xf32> to vector<6x16x1xf32>
    %119 = tpu.reciprocal %118 {approx = true} : vector<6x16x1xf32> -> vector<6x16x1xf32>
    %120 = vector.broadcast %119 : vector<6x16x1xf32> to vector<6x16x16xf32>
    %121 = arith.mulf %116, %120 : vector<6x16x16xf32>
    "tpu.trace_start"() <{level = 10 : i32, message = "gnm,gmc->gnc"}> : () -> ()
    %cst_29 = arith.constant dense<0.000000e+00> : vector<6x16x4xf32>
    %122 = tpu.matmul %121, %110, %cst_29 {dimension_numbers = #tpu.dot_dimension_numbers<[2], [1], [1], [2], [0, 0, 0, 1, 1, 2], [0], [0]>} : vector<6x16x16xf32>, vector<6x16x4xf32>, vector<6x16x4xf32> -> vector<6x16x4xf32>
    "tpu.trace_stop"() : () -> ()
    %123 = vector.shape_cast %122 : vector<6x16x4xf32> to vector<96x4xf32>
    %c1 = arith.constant 1 : index
    %c0_30 = arith.constant 0 : index
    %c0_31 = arith.constant 0 : index
    %124 = vector.load %arg4[%c1, %c0_30, %c0_31] : memref<8x4x32xf32, #tpu.memory_space<vmem>>, vector<1x4x32xf32>
    %125 = vector.shape_cast %124 : vector<1x4x32xf32> to vector<4x32xf32>
    %cst_32 = arith.constant dense<0.000000e+00> : vector<96x32xf32>
    %126 = tpu.matmul %123, %125, %cst_32 {dimension_numbers = #tpu.dot_dimension_numbers<[1], [0], [0], [1], [0, 0, 1, 1], [], []>} : vector<96x4xf32>, vector<4x32xf32>, vector<96x32xf32> -> vector<96x32xf32>
    %127 = arith.addf %65, %126 : vector<96x32xf32>
    %128 = vector.extract_strided_slice %0 {offsets = [0, 0, 2, 0, 0], sizes = [6, 1, 1, 16, 4], strides = [1, 1, 1, 1, 1]} : vector<6x3x8x16x4xbf16> to vector<6x1x1x16x4xbf16>
    %129 = vector.shape_cast %128 : vector<6x1x1x16x4xbf16> to vector<6x16x4xbf16>
    %130 = arith.extf %129 : vector<6x16x4xbf16> to vector<6x16x4xf32>
    %131 = vector.extract_strided_slice %1 {offsets = [0, 2, 0, 0], sizes = [1, 1, 1, 4], strides = [1, 1, 1, 1]} : vector<3x8x1x4xf32> to vector<1x1x1x4xf32>
    %132 = vector.shape_cast %131 : vector<1x1x1x4xf32> to vector<1x4xf32>
    %133 = vector.shape_cast %132 : vector<1x4xf32> to vector<1x1x4xf32>
    %134 = vector.broadcast %133 : vector<1x1x4xf32> to vector<6x16x4xf32>
    %135 = arith.mulf %130, %134 : vector<6x16x4xf32>
    %136 = vector.extract_strided_slice %2 {offsets = [0, 2, 0, 0], sizes = [1, 1, 1, 4], strides = [1, 1, 1, 1]} : vector<3x8x1x4xf32> to vector<1x1x1x4xf32>
    %137 = vector.shape_cast %136 : vector<1x1x1x4xf32> to vector<1x4xf32>
    %138 = vector.shape_cast %137 : vector<1x4xf32> to vector<1x1x4xf32>
    %139 = vector.broadcast %138 : vector<1x1x4xf32> to vector<6x16x4xf32>
    %140 = arith.addf %135, %139 : vector<6x16x4xf32>
    %cst_33 = arith.constant 0.000000e+00 : f32
    %141 = vector.broadcast %cst_33 : f32 to vector<6x16x4xf32>
    %142 = arith.maximumf %140, %141 : vector<6x16x4xf32>
    %143 = vector.extract_strided_slice %0 {offsets = [0, 1, 2, 0, 0], sizes = [6, 1, 1, 16, 4], strides = [1, 1, 1, 1, 1]} : vector<6x3x8x16x4xbf16> to vector<6x1x1x16x4xbf16>
    %144 = vector.shape_cast %143 : vector<6x1x1x16x4xbf16> to vector<6x16x4xbf16>
    %145 = arith.extf %144 : vector<6x16x4xbf16> to vector<6x16x4xf32>
    %146 = vector.extract_strided_slice %1 {offsets = [1, 2, 0, 0], sizes = [1, 1, 1, 4], strides = [1, 1, 1, 1]} : vector<3x8x1x4xf32> to vector<1x1x1x4xf32>
    %147 = vector.shape_cast %146 : vector<1x1x1x4xf32> to vector<1x4xf32>
    %148 = vector.shape_cast %147 : vector<1x4xf32> to vector<1x1x4xf32>
    %149 = vector.broadcast %148 : vector<1x1x4xf32> to vector<6x16x4xf32>
    %150 = arith.mulf %145, %149 : vector<6x16x4xf32>
    %151 = vector.extract_strided_slice %2 {offsets = [1, 2, 0, 0], sizes = [1, 1, 1, 4], strides = [1, 1, 1, 1]} : vector<3x8x1x4xf32> to vector<1x1x1x4xf32>
    %152 = vector.shape_cast %151 : vector<1x1x1x4xf32> to vector<1x4xf32>
    %153 = vector.shape_cast %152 : vector<1x4xf32> to vector<1x1x4xf32>
    %154 = vector.broadcast %153 : vector<1x1x4xf32> to vector<6x16x4xf32>
    %155 = arith.addf %150, %154 : vector<6x16x4xf32>
    %cst_34 = arith.constant 0.000000e+00 : f32
    %156 = vector.broadcast %cst_34 : f32 to vector<6x16x4xf32>
    %157 = arith.maximumf %155, %156 : vector<6x16x4xf32>
    %158 = vector.extract_strided_slice %0 {offsets = [0, 2, 2, 0, 0], sizes = [6, 1, 1, 16, 4], strides = [1, 1, 1, 1, 1]} : vector<6x3x8x16x4xbf16> to vector<6x1x1x16x4xbf16>
    %159 = vector.shape_cast %158 : vector<6x1x1x16x4xbf16> to vector<6x16x4xbf16>
    %160 = arith.extf %159 : vector<6x16x4xbf16> to vector<6x16x4xf32>
    %161 = vector.extract_strided_slice %1 {offsets = [2, 2, 0, 0], sizes = [1, 1, 1, 4], strides = [1, 1, 1, 1]} : vector<3x8x1x4xf32> to vector<1x1x1x4xf32>
    %162 = vector.shape_cast %161 : vector<1x1x1x4xf32> to vector<1x4xf32>
    %163 = vector.shape_cast %162 : vector<1x4xf32> to vector<1x1x4xf32>
    %164 = vector.broadcast %163 : vector<1x1x4xf32> to vector<6x16x4xf32>
    %165 = arith.mulf %160, %164 : vector<6x16x4xf32>
    %166 = vector.extract_strided_slice %2 {offsets = [2, 2, 0, 0], sizes = [1, 1, 1, 4], strides = [1, 1, 1, 1]} : vector<3x8x1x4xf32> to vector<1x1x1x4xf32>
    %167 = vector.shape_cast %166 : vector<1x1x1x4xf32> to vector<1x4xf32>
    %168 = vector.shape_cast %167 : vector<1x4xf32> to vector<1x1x4xf32>
    %169 = vector.broadcast %168 : vector<1x1x4xf32> to vector<6x16x4xf32>
    %170 = arith.addf %165, %169 : vector<6x16x4xf32>
    %cst_35 = arith.constant 0.000000e+00 : f32
    %171 = vector.broadcast %cst_35 : f32 to vector<6x16x4xf32>
    %172 = arith.maximumf %170, %171 : vector<6x16x4xf32>
    "tpu.trace_start"() <{level = 10 : i32, message = "gnc,gmc->gnm"}> : () -> ()
    %cst_36 = arith.constant dense<0.000000e+00> : vector<6x16x16xf32>
    %173 = tpu.matmul %142, %157, %cst_36 {dimension_numbers = #tpu.dot_dimension_numbers<[2], [2], [1], [1], [0, 0, 0, 1, 1, 1], [0], [0]>} : vector<6x16x4xf32>, vector<6x16x4xf32>, vector<6x16x16xf32> -> vector<6x16x16xf32>
    "tpu.trace_stop"() : () -> ()
    %cst_37 = arith.constant dense<0xFF800000> : vector<6x16xf32>
    %174 = vector.multi_reduction <maximumf>, %173, %cst_37 [2] : vector<6x16x16xf32> to vector<6x16xf32>
    %175 = vector.shape_cast %174 : vector<6x16xf32> to vector<6x16x1xf32>
    %176 = vector.broadcast %175 : vector<6x16x1xf32> to vector<6x16x16xf32>
    %177 = arith.subf %173, %176 : vector<6x16x16xf32>
    %178 = math.exp %177 : vector<6x16x16xf32>
    %cst_38 = arith.constant dense<0.000000e+00> : vector<6x16xf32>
    %179 = vector.multi_reduction <add>, %178, %cst_38 [2] : vector<6x16x16xf32> to vector<6x16xf32>
    %180 = vector.shape_cast %179 : vector<6x16xf32> to vector<6x16x1xf32>
    %181 = tpu.reciprocal %180 {approx = true} : vector<6x16x1xf32> -> vector<6x16x1xf32>
    %182 = vector.broadcast %181 : vector<6x16x1xf32> to vector<6x16x16xf32>
    %183 = arith.mulf %178, %182 : vector<6x16x16xf32>
    "tpu.trace_start"() <{level = 10 : i32, message = "gnm,gmc->gnc"}> : () -> ()
    %cst_39 = arith.constant dense<0.000000e+00> : vector<6x16x4xf32>
    %184 = tpu.matmul %183, %172, %cst_39 {dimension_numbers = #tpu.dot_dimension_numbers<[2], [1], [1], [2], [0, 0, 0, 1, 1, 2], [0], [0]>} : vector<6x16x16xf32>, vector<6x16x4xf32>, vector<6x16x4xf32> -> vector<6x16x4xf32>
    "tpu.trace_stop"() : () -> ()
    %185 = vector.shape_cast %184 : vector<6x16x4xf32> to vector<96x4xf32>
    %c2 = arith.constant 2 : index
    %c0_40 = arith.constant 0 : index
    %c0_41 = arith.constant 0 : index
    %186 = vector.load %arg4[%c2, %c0_40, %c0_41] : memref<8x4x32xf32, #tpu.memory_space<vmem>>, vector<1x4x32xf32>
    %187 = vector.shape_cast %186 : vector<1x4x32xf32> to vector<4x32xf32>
    %cst_42 = arith.constant dense<0.000000e+00> : vector<96x32xf32>
    %188 = tpu.matmul %185, %187, %cst_42 {dimension_numbers = #tpu.dot_dimension_numbers<[1], [0], [0], [1], [0, 0, 1, 1], [], []>} : vector<96x4xf32>, vector<4x32xf32>, vector<96x32xf32> -> vector<96x32xf32>
    %189 = arith.addf %127, %188 : vector<96x32xf32>
    %190 = vector.extract_strided_slice %0 {offsets = [0, 0, 3, 0, 0], sizes = [6, 1, 1, 16, 4], strides = [1, 1, 1, 1, 1]} : vector<6x3x8x16x4xbf16> to vector<6x1x1x16x4xbf16>
    %191 = vector.shape_cast %190 : vector<6x1x1x16x4xbf16> to vector<6x16x4xbf16>
    %192 = arith.extf %191 : vector<6x16x4xbf16> to vector<6x16x4xf32>
    %193 = vector.extract_strided_slice %1 {offsets = [0, 3, 0, 0], sizes = [1, 1, 1, 4], strides = [1, 1, 1, 1]} : vector<3x8x1x4xf32> to vector<1x1x1x4xf32>
    %194 = vector.shape_cast %193 : vector<1x1x1x4xf32> to vector<1x4xf32>
    %195 = vector.shape_cast %194 : vector<1x4xf32> to vector<1x1x4xf32>
    %196 = vector.broadcast %195 : vector<1x1x4xf32> to vector<6x16x4xf32>
    %197 = arith.mulf %192, %196 : vector<6x16x4xf32>
    %198 = vector.extract_strided_slice %2 {offsets = [0, 3, 0, 0], sizes = [1, 1, 1, 4], strides = [1, 1, 1, 1]} : vector<3x8x1x4xf32> to vector<1x1x1x4xf32>
    %199 = vector.shape_cast %198 : vector<1x1x1x4xf32> to vector<1x4xf32>
    %200 = vector.shape_cast %199 : vector<1x4xf32> to vector<1x1x4xf32>
    %201 = vector.broadcast %200 : vector<1x1x4xf32> to vector<6x16x4xf32>
    %202 = arith.addf %197, %201 : vector<6x16x4xf32>
    %cst_43 = arith.constant 0.000000e+00 : f32
    %203 = vector.broadcast %cst_43 : f32 to vector<6x16x4xf32>
    %204 = arith.maximumf %202, %203 : vector<6x16x4xf32>
    %205 = vector.extract_strided_slice %0 {offsets = [0, 1, 3, 0, 0], sizes = [6, 1, 1, 16, 4], strides = [1, 1, 1, 1, 1]} : vector<6x3x8x16x4xbf16> to vector<6x1x1x16x4xbf16>
    %206 = vector.shape_cast %205 : vector<6x1x1x16x4xbf16> to vector<6x16x4xbf16>
    %207 = arith.extf %206 : vector<6x16x4xbf16> to vector<6x16x4xf32>
    %208 = vector.extract_strided_slice %1 {offsets = [1, 3, 0, 0], sizes = [1, 1, 1, 4], strides = [1, 1, 1, 1]} : vector<3x8x1x4xf32> to vector<1x1x1x4xf32>
    %209 = vector.shape_cast %208 : vector<1x1x1x4xf32> to vector<1x4xf32>
    %210 = vector.shape_cast %209 : vector<1x4xf32> to vector<1x1x4xf32>
    %211 = vector.broadcast %210 : vector<1x1x4xf32> to vector<6x16x4xf32>
    %212 = arith.mulf %207, %211 : vector<6x16x4xf32>
    %213 = vector.extract_strided_slice %2 {offsets = [1, 3, 0, 0], sizes = [1, 1, 1, 4], strides = [1, 1, 1, 1]} : vector<3x8x1x4xf32> to vector<1x1x1x4xf32>
    %214 = vector.shape_cast %213 : vector<1x1x1x4xf32> to vector<1x4xf32>
    %215 = vector.shape_cast %214 : vector<1x4xf32> to vector<1x1x4xf32>
    %216 = vector.broadcast %215 : vector<1x1x4xf32> to vector<6x16x4xf32>
    %217 = arith.addf %212, %216 : vector<6x16x4xf32>
    %cst_44 = arith.constant 0.000000e+00 : f32
    %218 = vector.broadcast %cst_44 : f32 to vector<6x16x4xf32>
    %219 = arith.maximumf %217, %218 : vector<6x16x4xf32>
    %220 = vector.extract_strided_slice %0 {offsets = [0, 2, 3, 0, 0], sizes = [6, 1, 1, 16, 4], strides = [1, 1, 1, 1, 1]} : vector<6x3x8x16x4xbf16> to vector<6x1x1x16x4xbf16>
    %221 = vector.shape_cast %220 : vector<6x1x1x16x4xbf16> to vector<6x16x4xbf16>
    %222 = arith.extf %221 : vector<6x16x4xbf16> to vector<6x16x4xf32>
    %223 = vector.extract_strided_slice %1 {offsets = [2, 3, 0, 0], sizes = [1, 1, 1, 4], strides = [1, 1, 1, 1]} : vector<3x8x1x4xf32> to vector<1x1x1x4xf32>
    %224 = vector.shape_cast %223 : vector<1x1x1x4xf32> to vector<1x4xf32>
    %225 = vector.shape_cast %224 : vector<1x4xf32> to vector<1x1x4xf32>
    %226 = vector.broadcast %225 : vector<1x1x4xf32> to vector<6x16x4xf32>
    %227 = arith.mulf %222, %226 : vector<6x16x4xf32>
    %228 = vector.extract_strided_slice %2 {offsets = [2, 3, 0, 0], sizes = [1, 1, 1, 4], strides = [1, 1, 1, 1]} : vector<3x8x1x4xf32> to vector<1x1x1x4xf32>
    %229 = vector.shape_cast %228 : vector<1x1x1x4xf32> to vector<1x4xf32>
    %230 = vector.shape_cast %229 : vector<1x4xf32> to vector<1x1x4xf32>
    %231 = vector.broadcast %230 : vector<1x1x4xf32> to vector<6x16x4xf32>
    %232 = arith.addf %227, %231 : vector<6x16x4xf32>
    %cst_45 = arith.constant 0.000000e+00 : f32
    %233 = vector.broadcast %cst_45 : f32 to vector<6x16x4xf32>
    %234 = arith.maximumf %232, %233 : vector<6x16x4xf32>
    "tpu.trace_start"() <{level = 10 : i32, message = "gnc,gmc->gnm"}> : () -> ()
    %cst_46 = arith.constant dense<0.000000e+00> : vector<6x16x16xf32>
    %235 = tpu.matmul %204, %219, %cst_46 {dimension_numbers = #tpu.dot_dimension_numbers<[2], [2], [1], [1], [0, 0, 0, 1, 1, 1], [0], [0]>} : vector<6x16x4xf32>, vector<6x16x4xf32>, vector<6x16x16xf32> -> vector<6x16x16xf32>
    "tpu.trace_stop"() : () -> ()
    %cst_47 = arith.constant dense<0xFF800000> : vector<6x16xf32>
    %236 = vector.multi_reduction <maximumf>, %235, %cst_47 [2] : vector<6x16x16xf32> to vector<6x16xf32>
    %237 = vector.shape_cast %236 : vector<6x16xf32> to vector<6x16x1xf32>
    %238 = vector.broadcast %237 : vector<6x16x1xf32> to vector<6x16x16xf32>
    %239 = arith.subf %235, %238 : vector<6x16x16xf32>
    %240 = math.exp %239 : vector<6x16x16xf32>
    %cst_48 = arith.constant dense<0.000000e+00> : vector<6x16xf32>
    %241 = vector.multi_reduction <add>, %240, %cst_48 [2] : vector<6x16x16xf32> to vector<6x16xf32>
    %242 = vector.shape_cast %241 : vector<6x16xf32> to vector<6x16x1xf32>
    %243 = tpu.reciprocal %242 {approx = true} : vector<6x16x1xf32> -> vector<6x16x1xf32>
    %244 = vector.broadcast %243 : vector<6x16x1xf32> to vector<6x16x16xf32>
    %245 = arith.mulf %240, %244 : vector<6x16x16xf32>
    "tpu.trace_start"() <{level = 10 : i32, message = "gnm,gmc->gnc"}> : () -> ()
    %cst_49 = arith.constant dense<0.000000e+00> : vector<6x16x4xf32>
    %246 = tpu.matmul %245, %234, %cst_49 {dimension_numbers = #tpu.dot_dimension_numbers<[2], [1], [1], [2], [0, 0, 0, 1, 1, 2], [0], [0]>} : vector<6x16x16xf32>, vector<6x16x4xf32>, vector<6x16x4xf32> -> vector<6x16x4xf32>
    "tpu.trace_stop"() : () -> ()
    %247 = vector.shape_cast %246 : vector<6x16x4xf32> to vector<96x4xf32>
    %c3 = arith.constant 3 : index
    %c0_50 = arith.constant 0 : index
    %c0_51 = arith.constant 0 : index
    %248 = vector.load %arg4[%c3, %c0_50, %c0_51] : memref<8x4x32xf32, #tpu.memory_space<vmem>>, vector<1x4x32xf32>
    %249 = vector.shape_cast %248 : vector<1x4x32xf32> to vector<4x32xf32>
    %cst_52 = arith.constant dense<0.000000e+00> : vector<96x32xf32>
    %250 = tpu.matmul %247, %249, %cst_52 {dimension_numbers = #tpu.dot_dimension_numbers<[1], [0], [0], [1], [0, 0, 1, 1], [], []>} : vector<96x4xf32>, vector<4x32xf32>, vector<96x32xf32> -> vector<96x32xf32>
    %251 = arith.addf %189, %250 : vector<96x32xf32>
    %252 = vector.extract_strided_slice %0 {offsets = [0, 0, 4, 0, 0], sizes = [6, 1, 1, 16, 4], strides = [1, 1, 1, 1, 1]} : vector<6x3x8x16x4xbf16> to vector<6x1x1x16x4xbf16>
    %253 = vector.shape_cast %252 : vector<6x1x1x16x4xbf16> to vector<6x16x4xbf16>
    %254 = arith.extf %253 : vector<6x16x4xbf16> to vector<6x16x4xf32>
    %255 = vector.extract_strided_slice %1 {offsets = [0, 4, 0, 0], sizes = [1, 1, 1, 4], strides = [1, 1, 1, 1]} : vector<3x8x1x4xf32> to vector<1x1x1x4xf32>
    %256 = vector.shape_cast %255 : vector<1x1x1x4xf32> to vector<1x4xf32>
    %257 = vector.shape_cast %256 : vector<1x4xf32> to vector<1x1x4xf32>
    %258 = vector.broadcast %257 : vector<1x1x4xf32> to vector<6x16x4xf32>
    %259 = arith.mulf %254, %258 : vector<6x16x4xf32>
    %260 = vector.extract_strided_slice %2 {offsets = [0, 4, 0, 0], sizes = [1, 1, 1, 4], strides = [1, 1, 1, 1]} : vector<3x8x1x4xf32> to vector<1x1x1x4xf32>
    %261 = vector.shape_cast %260 : vector<1x1x1x4xf32> to vector<1x4xf32>
    %262 = vector.shape_cast %261 : vector<1x4xf32> to vector<1x1x4xf32>
    %263 = vector.broadcast %262 : vector<1x1x4xf32> to vector<6x16x4xf32>
    %264 = arith.addf %259, %263 : vector<6x16x4xf32>
    %cst_53 = arith.constant 0.000000e+00 : f32
    %265 = vector.broadcast %cst_53 : f32 to vector<6x16x4xf32>
    %266 = arith.maximumf %264, %265 : vector<6x16x4xf32>
    %267 = vector.extract_strided_slice %0 {offsets = [0, 1, 4, 0, 0], sizes = [6, 1, 1, 16, 4], strides = [1, 1, 1, 1, 1]} : vector<6x3x8x16x4xbf16> to vector<6x1x1x16x4xbf16>
    %268 = vector.shape_cast %267 : vector<6x1x1x16x4xbf16> to vector<6x16x4xbf16>
    %269 = arith.extf %268 : vector<6x16x4xbf16> to vector<6x16x4xf32>
    %270 = vector.extract_strided_slice %1 {offsets = [1, 4, 0, 0], sizes = [1, 1, 1, 4], strides = [1, 1, 1, 1]} : vector<3x8x1x4xf32> to vector<1x1x1x4xf32>
    %271 = vector.shape_cast %270 : vector<1x1x1x4xf32> to vector<1x4xf32>
    %272 = vector.shape_cast %271 : vector<1x4xf32> to vector<1x1x4xf32>
    %273 = vector.broadcast %272 : vector<1x1x4xf32> to vector<6x16x4xf32>
    %274 = arith.mulf %269, %273 : vector<6x16x4xf32>
    %275 = vector.extract_strided_slice %2 {offsets = [1, 4, 0, 0], sizes = [1, 1, 1, 4], strides = [1, 1, 1, 1]} : vector<3x8x1x4xf32> to vector<1x1x1x4xf32>
    %276 = vector.shape_cast %275 : vector<1x1x1x4xf32> to vector<1x4xf32>
    %277 = vector.shape_cast %276 : vector<1x4xf32> to vector<1x1x4xf32>
    %278 = vector.broadcast %277 : vector<1x1x4xf32> to vector<6x16x4xf32>
    %279 = arith.addf %274, %278 : vector<6x16x4xf32>
    %cst_54 = arith.constant 0.000000e+00 : f32
    %280 = vector.broadcast %cst_54 : f32 to vector<6x16x4xf32>
    %281 = arith.maximumf %279, %280 : vector<6x16x4xf32>
    %282 = vector.extract_strided_slice %0 {offsets = [0, 2, 4, 0, 0], sizes = [6, 1, 1, 16, 4], strides = [1, 1, 1, 1, 1]} : vector<6x3x8x16x4xbf16> to vector<6x1x1x16x4xbf16>
    %283 = vector.shape_cast %282 : vector<6x1x1x16x4xbf16> to vector<6x16x4xbf16>
    %284 = arith.extf %283 : vector<6x16x4xbf16> to vector<6x16x4xf32>
    %285 = vector.extract_strided_slice %1 {offsets = [2, 4, 0, 0], sizes = [1, 1, 1, 4], strides = [1, 1, 1, 1]} : vector<3x8x1x4xf32> to vector<1x1x1x4xf32>
    %286 = vector.shape_cast %285 : vector<1x1x1x4xf32> to vector<1x4xf32>
    %287 = vector.shape_cast %286 : vector<1x4xf32> to vector<1x1x4xf32>
    %288 = vector.broadcast %287 : vector<1x1x4xf32> to vector<6x16x4xf32>
    %289 = arith.mulf %284, %288 : vector<6x16x4xf32>
    %290 = vector.extract_strided_slice %2 {offsets = [2, 4, 0, 0], sizes = [1, 1, 1, 4], strides = [1, 1, 1, 1]} : vector<3x8x1x4xf32> to vector<1x1x1x4xf32>
    %291 = vector.shape_cast %290 : vector<1x1x1x4xf32> to vector<1x4xf32>
    %292 = vector.shape_cast %291 : vector<1x4xf32> to vector<1x1x4xf32>
    %293 = vector.broadcast %292 : vector<1x1x4xf32> to vector<6x16x4xf32>
    %294 = arith.addf %289, %293 : vector<6x16x4xf32>
    %cst_55 = arith.constant 0.000000e+00 : f32
    %295 = vector.broadcast %cst_55 : f32 to vector<6x16x4xf32>
    %296 = arith.maximumf %294, %295 : vector<6x16x4xf32>
    "tpu.trace_start"() <{level = 10 : i32, message = "gnc,gmc->gnm"}> : () -> ()
    %cst_56 = arith.constant dense<0.000000e+00> : vector<6x16x16xf32>
    %297 = tpu.matmul %266, %281, %cst_56 {dimension_numbers = #tpu.dot_dimension_numbers<[2], [2], [1], [1], [0, 0, 0, 1, 1, 1], [0], [0]>} : vector<6x16x4xf32>, vector<6x16x4xf32>, vector<6x16x16xf32> -> vector<6x16x16xf32>
    "tpu.trace_stop"() : () -> ()
    %cst_57 = arith.constant dense<0xFF800000> : vector<6x16xf32>
    %298 = vector.multi_reduction <maximumf>, %297, %cst_57 [2] : vector<6x16x16xf32> to vector<6x16xf32>
    %299 = vector.shape_cast %298 : vector<6x16xf32> to vector<6x16x1xf32>
    %300 = vector.broadcast %299 : vector<6x16x1xf32> to vector<6x16x16xf32>
    %301 = arith.subf %297, %300 : vector<6x16x16xf32>
    %302 = math.exp %301 : vector<6x16x16xf32>
    %cst_58 = arith.constant dense<0.000000e+00> : vector<6x16xf32>
    %303 = vector.multi_reduction <add>, %302, %cst_58 [2] : vector<6x16x16xf32> to vector<6x16xf32>
    %304 = vector.shape_cast %303 : vector<6x16xf32> to vector<6x16x1xf32>
    %305 = tpu.reciprocal %304 {approx = true} : vector<6x16x1xf32> -> vector<6x16x1xf32>
    %306 = vector.broadcast %305 : vector<6x16x1xf32> to vector<6x16x16xf32>
    %307 = arith.mulf %302, %306 : vector<6x16x16xf32>
    "tpu.trace_start"() <{level = 10 : i32, message = "gnm,gmc->gnc"}> : () -> ()
    %cst_59 = arith.constant dense<0.000000e+00> : vector<6x16x4xf32>
    %308 = tpu.matmul %307, %296, %cst_59 {dimension_numbers = #tpu.dot_dimension_numbers<[2], [1], [1], [2], [0, 0, 0, 1, 1, 2], [0], [0]>} : vector<6x16x16xf32>, vector<6x16x4xf32>, vector<6x16x4xf32> -> vector<6x16x4xf32>
    "tpu.trace_stop"() : () -> ()
    %309 = vector.shape_cast %308 : vector<6x16x4xf32> to vector<96x4xf32>
    %c4 = arith.constant 4 : index
    %c0_60 = arith.constant 0 : index
    %c0_61 = arith.constant 0 : index
    %310 = vector.load %arg4[%c4, %c0_60, %c0_61] : memref<8x4x32xf32, #tpu.memory_space<vmem>>, vector<1x4x32xf32>
    %311 = vector.shape_cast %310 : vector<1x4x32xf32> to vector<4x32xf32>
    %cst_62 = arith.constant dense<0.000000e+00> : vector<96x32xf32>
    %312 = tpu.matmul %309, %311, %cst_62 {dimension_numbers = #tpu.dot_dimension_numbers<[1], [0], [0], [1], [0, 0, 1, 1], [], []>} : vector<96x4xf32>, vector<4x32xf32>, vector<96x32xf32> -> vector<96x32xf32>
    %313 = arith.addf %251, %312 : vector<96x32xf32>
    %314 = vector.extract_strided_slice %0 {offsets = [0, 0, 5, 0, 0], sizes = [6, 1, 1, 16, 4], strides = [1, 1, 1, 1, 1]} : vector<6x3x8x16x4xbf16> to vector<6x1x1x16x4xbf16>
    %315 = vector.shape_cast %314 : vector<6x1x1x16x4xbf16> to vector<6x16x4xbf16>
    %316 = arith.extf %315 : vector<6x16x4xbf16> to vector<6x16x4xf32>
    %317 = vector.extract_strided_slice %1 {offsets = [0, 5, 0, 0], sizes = [1, 1, 1, 4], strides = [1, 1, 1, 1]} : vector<3x8x1x4xf32> to vector<1x1x1x4xf32>
    %318 = vector.shape_cast %317 : vector<1x1x1x4xf32> to vector<1x4xf32>
    %319 = vector.shape_cast %318 : vector<1x4xf32> to vector<1x1x4xf32>
    %320 = vector.broadcast %319 : vector<1x1x4xf32> to vector<6x16x4xf32>
    %321 = arith.mulf %316, %320 : vector<6x16x4xf32>
    %322 = vector.extract_strided_slice %2 {offsets = [0, 5, 0, 0], sizes = [1, 1, 1, 4], strides = [1, 1, 1, 1]} : vector<3x8x1x4xf32> to vector<1x1x1x4xf32>
    %323 = vector.shape_cast %322 : vector<1x1x1x4xf32> to vector<1x4xf32>
    %324 = vector.shape_cast %323 : vector<1x4xf32> to vector<1x1x4xf32>
    %325 = vector.broadcast %324 : vector<1x1x4xf32> to vector<6x16x4xf32>
    %326 = arith.addf %321, %325 : vector<6x16x4xf32>
    %cst_63 = arith.constant 0.000000e+00 : f32
    %327 = vector.broadcast %cst_63 : f32 to vector<6x16x4xf32>
    %328 = arith.maximumf %326, %327 : vector<6x16x4xf32>
    %329 = vector.extract_strided_slice %0 {offsets = [0, 1, 5, 0, 0], sizes = [6, 1, 1, 16, 4], strides = [1, 1, 1, 1, 1]} : vector<6x3x8x16x4xbf16> to vector<6x1x1x16x4xbf16>
    %330 = vector.shape_cast %329 : vector<6x1x1x16x4xbf16> to vector<6x16x4xbf16>
    %331 = arith.extf %330 : vector<6x16x4xbf16> to vector<6x16x4xf32>
    %332 = vector.extract_strided_slice %1 {offsets = [1, 5, 0, 0], sizes = [1, 1, 1, 4], strides = [1, 1, 1, 1]} : vector<3x8x1x4xf32> to vector<1x1x1x4xf32>
    %333 = vector.shape_cast %332 : vector<1x1x1x4xf32> to vector<1x4xf32>
    %334 = vector.shape_cast %333 : vector<1x4xf32> to vector<1x1x4xf32>
    %335 = vector.broadcast %334 : vector<1x1x4xf32> to vector<6x16x4xf32>
    %336 = arith.mulf %331, %335 : vector<6x16x4xf32>
    %337 = vector.extract_strided_slice %2 {offsets = [1, 5, 0, 0], sizes = [1, 1, 1, 4], strides = [1, 1, 1, 1]} : vector<3x8x1x4xf32> to vector<1x1x1x4xf32>
    %338 = vector.shape_cast %337 : vector<1x1x1x4xf32> to vector<1x4xf32>
    %339 = vector.shape_cast %338 : vector<1x4xf32> to vector<1x1x4xf32>
    %340 = vector.broadcast %339 : vector<1x1x4xf32> to vector<6x16x4xf32>
    %341 = arith.addf %336, %340 : vector<6x16x4xf32>
    %cst_64 = arith.constant 0.000000e+00 : f32
    %342 = vector.broadcast %cst_64 : f32 to vector<6x16x4xf32>
    %343 = arith.maximumf %341, %342 : vector<6x16x4xf32>
    %344 = vector.extract_strided_slice %0 {offsets = [0, 2, 5, 0, 0], sizes = [6, 1, 1, 16, 4], strides = [1, 1, 1, 1, 1]} : vector<6x3x8x16x4xbf16> to vector<6x1x1x16x4xbf16>
    %345 = vector.shape_cast %344 : vector<6x1x1x16x4xbf16> to vector<6x16x4xbf16>
    %346 = arith.extf %345 : vector<6x16x4xbf16> to vector<6x16x4xf32>
    %347 = vector.extract_strided_slice %1 {offsets = [2, 5, 0, 0], sizes = [1, 1, 1, 4], strides = [1, 1, 1, 1]} : vector<3x8x1x4xf32> to vector<1x1x1x4xf32>
    %348 = vector.shape_cast %347 : vector<1x1x1x4xf32> to vector<1x4xf32>
    %349 = vector.shape_cast %348 : vector<1x4xf32> to vector<1x1x4xf32>
    %350 = vector.broadcast %349 : vector<1x1x4xf32> to vector<6x16x4xf32>
    %351 = arith.mulf %346, %350 : vector<6x16x4xf32>
    %352 = vector.extract_strided_slice %2 {offsets = [2, 5, 0, 0], sizes = [1, 1, 1, 4], strides = [1, 1, 1, 1]} : vector<3x8x1x4xf32> to vector<1x1x1x4xf32>
    %353 = vector.shape_cast %352 : vector<1x1x1x4xf32> to vector<1x4xf32>
    %354 = vector.shape_cast %353 : vector<1x4xf32> to vector<1x1x4xf32>
    %355 = vector.broadcast %354 : vector<1x1x4xf32> to vector<6x16x4xf32>
    %356 = arith.addf %351, %355 : vector<6x16x4xf32>
    %cst_65 = arith.constant 0.000000e+00 : f32
    %357 = vector.broadcast %cst_65 : f32 to vector<6x16x4xf32>
    %358 = arith.maximumf %356, %357 : vector<6x16x4xf32>
    "tpu.trace_start"() <{level = 10 : i32, message = "gnc,gmc->gnm"}> : () -> ()
    %cst_66 = arith.constant dense<0.000000e+00> : vector<6x16x16xf32>
    %359 = tpu.matmul %328, %343, %cst_66 {dimension_numbers = #tpu.dot_dimension_numbers<[2], [2], [1], [1], [0, 0, 0, 1, 1, 1], [0], [0]>} : vector<6x16x4xf32>, vector<6x16x4xf32>, vector<6x16x16xf32> -> vector<6x16x16xf32>
    "tpu.trace_stop"() : () -> ()
    %cst_67 = arith.constant dense<0xFF800000> : vector<6x16xf32>
    %360 = vector.multi_reduction <maximumf>, %359, %cst_67 [2] : vector<6x16x16xf32> to vector<6x16xf32>
    %361 = vector.shape_cast %360 : vector<6x16xf32> to vector<6x16x1xf32>
    %362 = vector.broadcast %361 : vector<6x16x1xf32> to vector<6x16x16xf32>
    %363 = arith.subf %359, %362 : vector<6x16x16xf32>
    %364 = math.exp %363 : vector<6x16x16xf32>
    %cst_68 = arith.constant dense<0.000000e+00> : vector<6x16xf32>
    %365 = vector.multi_reduction <add>, %364, %cst_68 [2] : vector<6x16x16xf32> to vector<6x16xf32>
    %366 = vector.shape_cast %365 : vector<6x16xf32> to vector<6x16x1xf32>
    %367 = tpu.reciprocal %366 {approx = true} : vector<6x16x1xf32> -> vector<6x16x1xf32>
    %368 = vector.broadcast %367 : vector<6x16x1xf32> to vector<6x16x16xf32>
    %369 = arith.mulf %364, %368 : vector<6x16x16xf32>
    "tpu.trace_start"() <{level = 10 : i32, message = "gnm,gmc->gnc"}> : () -> ()
    %cst_69 = arith.constant dense<0.000000e+00> : vector<6x16x4xf32>
    %370 = tpu.matmul %369, %358, %cst_69 {dimension_numbers = #tpu.dot_dimension_numbers<[2], [1], [1], [2], [0, 0, 0, 1, 1, 2], [0], [0]>} : vector<6x16x16xf32>, vector<6x16x4xf32>, vector<6x16x4xf32> -> vector<6x16x4xf32>
    "tpu.trace_stop"() : () -> ()
    %371 = vector.shape_cast %370 : vector<6x16x4xf32> to vector<96x4xf32>
    %c5 = arith.constant 5 : index
    %c0_70 = arith.constant 0 : index
    %c0_71 = arith.constant 0 : index
    %372 = vector.load %arg4[%c5, %c0_70, %c0_71] : memref<8x4x32xf32, #tpu.memory_space<vmem>>, vector<1x4x32xf32>
    %373 = vector.shape_cast %372 : vector<1x4x32xf32> to vector<4x32xf32>
    %cst_72 = arith.constant dense<0.000000e+00> : vector<96x32xf32>
    %374 = tpu.matmul %371, %373, %cst_72 {dimension_numbers = #tpu.dot_dimension_numbers<[1], [0], [0], [1], [0, 0, 1, 1], [], []>} : vector<96x4xf32>, vector<4x32xf32>, vector<96x32xf32> -> vector<96x32xf32>
    %375 = arith.addf %313, %374 : vector<96x32xf32>
    %376 = vector.extract_strided_slice %0 {offsets = [0, 0, 6, 0, 0], sizes = [6, 1, 1, 16, 4], strides = [1, 1, 1, 1, 1]} : vector<6x3x8x16x4xbf16> to vector<6x1x1x16x4xbf16>
    %377 = vector.shape_cast %376 : vector<6x1x1x16x4xbf16> to vector<6x16x4xbf16>
    %378 = arith.extf %377 : vector<6x16x4xbf16> to vector<6x16x4xf32>
    %379 = vector.extract_strided_slice %1 {offsets = [0, 6, 0, 0], sizes = [1, 1, 1, 4], strides = [1, 1, 1, 1]} : vector<3x8x1x4xf32> to vector<1x1x1x4xf32>
    %380 = vector.shape_cast %379 : vector<1x1x1x4xf32> to vector<1x4xf32>
    %381 = vector.shape_cast %380 : vector<1x4xf32> to vector<1x1x4xf32>
    %382 = vector.broadcast %381 : vector<1x1x4xf32> to vector<6x16x4xf32>
    %383 = arith.mulf %378, %382 : vector<6x16x4xf32>
    %384 = vector.extract_strided_slice %2 {offsets = [0, 6, 0, 0], sizes = [1, 1, 1, 4], strides = [1, 1, 1, 1]} : vector<3x8x1x4xf32> to vector<1x1x1x4xf32>
    %385 = vector.shape_cast %384 : vector<1x1x1x4xf32> to vector<1x4xf32>
    %386 = vector.shape_cast %385 : vector<1x4xf32> to vector<1x1x4xf32>
    %387 = vector.broadcast %386 : vector<1x1x4xf32> to vector<6x16x4xf32>
    %388 = arith.addf %383, %387 : vector<6x16x4xf32>
    %cst_73 = arith.constant 0.000000e+00 : f32
    %389 = vector.broadcast %cst_73 : f32 to vector<6x16x4xf32>
    %390 = arith.maximumf %388, %389 : vector<6x16x4xf32>
    %391 = vector.extract_strided_slice %0 {offsets = [0, 1, 6, 0, 0], sizes = [6, 1, 1, 16, 4], strides = [1, 1, 1, 1, 1]} : vector<6x3x8x16x4xbf16> to vector<6x1x1x16x4xbf16>
    %392 = vector.shape_cast %391 : vector<6x1x1x16x4xbf16> to vector<6x16x4xbf16>
    %393 = arith.extf %392 : vector<6x16x4xbf16> to vector<6x16x4xf32>
    %394 = vector.extract_strided_slice %1 {offsets = [1, 6, 0, 0], sizes = [1, 1, 1, 4], strides = [1, 1, 1, 1]} : vector<3x8x1x4xf32> to vector<1x1x1x4xf32>
    %395 = vector.shape_cast %394 : vector<1x1x1x4xf32> to vector<1x4xf32>
    %396 = vector.shape_cast %395 : vector<1x4xf32> to vector<1x1x4xf32>
    %397 = vector.broadcast %396 : vector<1x1x4xf32> to vector<6x16x4xf32>
    %398 = arith.mulf %393, %397 : vector<6x16x4xf32>
    %399 = vector.extract_strided_slice %2 {offsets = [1, 6, 0, 0], sizes = [1, 1, 1, 4], strides = [1, 1, 1, 1]} : vector<3x8x1x4xf32> to vector<1x1x1x4xf32>
    %400 = vector.shape_cast %399 : vector<1x1x1x4xf32> to vector<1x4xf32>
    %401 = vector.shape_cast %400 : vector<1x4xf32> to vector<1x1x4xf32>
    %402 = vector.broadcast %401 : vector<1x1x4xf32> to vector<6x16x4xf32>
    %403 = arith.addf %398, %402 : vector<6x16x4xf32>
    %cst_74 = arith.constant 0.000000e+00 : f32
    %404 = vector.broadcast %cst_74 : f32 to vector<6x16x4xf32>
    %405 = arith.maximumf %403, %404 : vector<6x16x4xf32>
    %406 = vector.extract_strided_slice %0 {offsets = [0, 2, 6, 0, 0], sizes = [6, 1, 1, 16, 4], strides = [1, 1, 1, 1, 1]} : vector<6x3x8x16x4xbf16> to vector<6x1x1x16x4xbf16>
    %407 = vector.shape_cast %406 : vector<6x1x1x16x4xbf16> to vector<6x16x4xbf16>
    %408 = arith.extf %407 : vector<6x16x4xbf16> to vector<6x16x4xf32>
    %409 = vector.extract_strided_slice %1 {offsets = [2, 6, 0, 0], sizes = [1, 1, 1, 4], strides = [1, 1, 1, 1]} : vector<3x8x1x4xf32> to vector<1x1x1x4xf32>
    %410 = vector.shape_cast %409 : vector<1x1x1x4xf32> to vector<1x4xf32>
    %411 = vector.shape_cast %410 : vector<1x4xf32> to vector<1x1x4xf32>
    %412 = vector.broadcast %411 : vector<1x1x4xf32> to vector<6x16x4xf32>
    %413 = arith.mulf %408, %412 : vector<6x16x4xf32>
    %414 = vector.extract_strided_slice %2 {offsets = [2, 6, 0, 0], sizes = [1, 1, 1, 4], strides = [1, 1, 1, 1]} : vector<3x8x1x4xf32> to vector<1x1x1x4xf32>
    %415 = vector.shape_cast %414 : vector<1x1x1x4xf32> to vector<1x4xf32>
    %416 = vector.shape_cast %415 : vector<1x4xf32> to vector<1x1x4xf32>
    %417 = vector.broadcast %416 : vector<1x1x4xf32> to vector<6x16x4xf32>
    %418 = arith.addf %413, %417 : vector<6x16x4xf32>
    %cst_75 = arith.constant 0.000000e+00 : f32
    %419 = vector.broadcast %cst_75 : f32 to vector<6x16x4xf32>
    %420 = arith.maximumf %418, %419 : vector<6x16x4xf32>
    "tpu.trace_start"() <{level = 10 : i32, message = "gnc,gmc->gnm"}> : () -> ()
    %cst_76 = arith.constant dense<0.000000e+00> : vector<6x16x16xf32>
    %421 = tpu.matmul %390, %405, %cst_76 {dimension_numbers = #tpu.dot_dimension_numbers<[2], [2], [1], [1], [0, 0, 0, 1, 1, 1], [0], [0]>} : vector<6x16x4xf32>, vector<6x16x4xf32>, vector<6x16x16xf32> -> vector<6x16x16xf32>
    "tpu.trace_stop"() : () -> ()
    %cst_77 = arith.constant dense<0xFF800000> : vector<6x16xf32>
    %422 = vector.multi_reduction <maximumf>, %421, %cst_77 [2] : vector<6x16x16xf32> to vector<6x16xf32>
    %423 = vector.shape_cast %422 : vector<6x16xf32> to vector<6x16x1xf32>
    %424 = vector.broadcast %423 : vector<6x16x1xf32> to vector<6x16x16xf32>
    %425 = arith.subf %421, %424 : vector<6x16x16xf32>
    %426 = math.exp %425 : vector<6x16x16xf32>
    %cst_78 = arith.constant dense<0.000000e+00> : vector<6x16xf32>
    %427 = vector.multi_reduction <add>, %426, %cst_78 [2] : vector<6x16x16xf32> to vector<6x16xf32>
    %428 = vector.shape_cast %427 : vector<6x16xf32> to vector<6x16x1xf32>
    %429 = tpu.reciprocal %428 {approx = true} : vector<6x16x1xf32> -> vector<6x16x1xf32>
    %430 = vector.broadcast %429 : vector<6x16x1xf32> to vector<6x16x16xf32>
    %431 = arith.mulf %426, %430 : vector<6x16x16xf32>
    "tpu.trace_start"() <{level = 10 : i32, message = "gnm,gmc->gnc"}> : () -> ()
    %cst_79 = arith.constant dense<0.000000e+00> : vector<6x16x4xf32>
    %432 = tpu.matmul %431, %420, %cst_79 {dimension_numbers = #tpu.dot_dimension_numbers<[2], [1], [1], [2], [0, 0, 0, 1, 1, 2], [0], [0]>} : vector<6x16x16xf32>, vector<6x16x4xf32>, vector<6x16x4xf32> -> vector<6x16x4xf32>
    "tpu.trace_stop"() : () -> ()
    %433 = vector.shape_cast %432 : vector<6x16x4xf32> to vector<96x4xf32>
    %c6 = arith.constant 6 : index
    %c0_80 = arith.constant 0 : index
    %c0_81 = arith.constant 0 : index
    %434 = vector.load %arg4[%c6, %c0_80, %c0_81] : memref<8x4x32xf32, #tpu.memory_space<vmem>>, vector<1x4x32xf32>
    %435 = vector.shape_cast %434 : vector<1x4x32xf32> to vector<4x32xf32>
    %cst_82 = arith.constant dense<0.000000e+00> : vector<96x32xf32>
    %436 = tpu.matmul %433, %435, %cst_82 {dimension_numbers = #tpu.dot_dimension_numbers<[1], [0], [0], [1], [0, 0, 1, 1], [], []>} : vector<96x4xf32>, vector<4x32xf32>, vector<96x32xf32> -> vector<96x32xf32>
    %437 = arith.addf %375, %436 : vector<96x32xf32>
    %438 = vector.extract_strided_slice %0 {offsets = [0, 0, 7, 0, 0], sizes = [6, 1, 1, 16, 4], strides = [1, 1, 1, 1, 1]} : vector<6x3x8x16x4xbf16> to vector<6x1x1x16x4xbf16>
    %439 = vector.shape_cast %438 : vector<6x1x1x16x4xbf16> to vector<6x16x4xbf16>
    %440 = arith.extf %439 : vector<6x16x4xbf16> to vector<6x16x4xf32>
    %441 = vector.extract_strided_slice %1 {offsets = [0, 7, 0, 0], sizes = [1, 1, 1, 4], strides = [1, 1, 1, 1]} : vector<3x8x1x4xf32> to vector<1x1x1x4xf32>
    %442 = vector.shape_cast %441 : vector<1x1x1x4xf32> to vector<1x4xf32>
    %443 = vector.shape_cast %442 : vector<1x4xf32> to vector<1x1x4xf32>
    %444 = vector.broadcast %443 : vector<1x1x4xf32> to vector<6x16x4xf32>
    %445 = arith.mulf %440, %444 : vector<6x16x4xf32>
    %446 = vector.extract_strided_slice %2 {offsets = [0, 7, 0, 0], sizes = [1, 1, 1, 4], strides = [1, 1, 1, 1]} : vector<3x8x1x4xf32> to vector<1x1x1x4xf32>
    %447 = vector.shape_cast %446 : vector<1x1x1x4xf32> to vector<1x4xf32>
    %448 = vector.shape_cast %447 : vector<1x4xf32> to vector<1x1x4xf32>
    %449 = vector.broadcast %448 : vector<1x1x4xf32> to vector<6x16x4xf32>
    %450 = arith.addf %445, %449 : vector<6x16x4xf32>
    %cst_83 = arith.constant 0.000000e+00 : f32
    %451 = vector.broadcast %cst_83 : f32 to vector<6x16x4xf32>
    %452 = arith.maximumf %450, %451 : vector<6x16x4xf32>
    %453 = vector.extract_strided_slice %0 {offsets = [0, 1, 7, 0, 0], sizes = [6, 1, 1, 16, 4], strides = [1, 1, 1, 1, 1]} : vector<6x3x8x16x4xbf16> to vector<6x1x1x16x4xbf16>
    %454 = vector.shape_cast %453 : vector<6x1x1x16x4xbf16> to vector<6x16x4xbf16>
    %455 = arith.extf %454 : vector<6x16x4xbf16> to vector<6x16x4xf32>
    %456 = vector.extract_strided_slice %1 {offsets = [1, 7, 0, 0], sizes = [1, 1, 1, 4], strides = [1, 1, 1, 1]} : vector<3x8x1x4xf32> to vector<1x1x1x4xf32>
    %457 = vector.shape_cast %456 : vector<1x1x1x4xf32> to vector<1x4xf32>
    %458 = vector.shape_cast %457 : vector<1x4xf32> to vector<1x1x4xf32>
    %459 = vector.broadcast %458 : vector<1x1x4xf32> to vector<6x16x4xf32>
    %460 = arith.mulf %455, %459 : vector<6x16x4xf32>
    %461 = vector.extract_strided_slice %2 {offsets = [1, 7, 0, 0], sizes = [1, 1, 1, 4], strides = [1, 1, 1, 1]} : vector<3x8x1x4xf32> to vector<1x1x1x4xf32>
    %462 = vector.shape_cast %461 : vector<1x1x1x4xf32> to vector<1x4xf32>
    %463 = vector.shape_cast %462 : vector<1x4xf32> to vector<1x1x4xf32>
    %464 = vector.broadcast %463 : vector<1x1x4xf32> to vector<6x16x4xf32>
    %465 = arith.addf %460, %464 : vector<6x16x4xf32>
    %cst_84 = arith.constant 0.000000e+00 : f32
    %466 = vector.broadcast %cst_84 : f32 to vector<6x16x4xf32>
    %467 = arith.maximumf %465, %466 : vector<6x16x4xf32>
    %468 = vector.extract_strided_slice %0 {offsets = [0, 2, 7, 0, 0], sizes = [6, 1, 1, 16, 4], strides = [1, 1, 1, 1, 1]} : vector<6x3x8x16x4xbf16> to vector<6x1x1x16x4xbf16>
    %469 = vector.shape_cast %468 : vector<6x1x1x16x4xbf16> to vector<6x16x4xbf16>
    %470 = arith.extf %469 : vector<6x16x4xbf16> to vector<6x16x4xf32>
    %471 = vector.extract_strided_slice %1 {offsets = [2, 7, 0, 0], sizes = [1, 1, 1, 4], strides = [1, 1, 1, 1]} : vector<3x8x1x4xf32> to vector<1x1x1x4xf32>
    %472 = vector.shape_cast %471 : vector<1x1x1x4xf32> to vector<1x4xf32>
    %473 = vector.shape_cast %472 : vector<1x4xf32> to vector<1x1x4xf32>
    %474 = vector.broadcast %473 : vector<1x1x4xf32> to vector<6x16x4xf32>
    %475 = arith.mulf %470, %474 : vector<6x16x4xf32>
    %476 = vector.extract_strided_slice %2 {offsets = [2, 7, 0, 0], sizes = [1, 1, 1, 4], strides = [1, 1, 1, 1]} : vector<3x8x1x4xf32> to vector<1x1x1x4xf32>
    %477 = vector.shape_cast %476 : vector<1x1x1x4xf32> to vector<1x4xf32>
    %478 = vector.shape_cast %477 : vector<1x4xf32> to vector<1x1x4xf32>
    %479 = vector.broadcast %478 : vector<1x1x4xf32> to vector<6x16x4xf32>
    %480 = arith.addf %475, %479 : vector<6x16x4xf32>
    %cst_85 = arith.constant 0.000000e+00 : f32
    %481 = vector.broadcast %cst_85 : f32 to vector<6x16x4xf32>
    %482 = arith.maximumf %480, %481 : vector<6x16x4xf32>
    "tpu.trace_start"() <{level = 10 : i32, message = "gnc,gmc->gnm"}> : () -> ()
    %cst_86 = arith.constant dense<0.000000e+00> : vector<6x16x16xf32>
    %483 = tpu.matmul %452, %467, %cst_86 {dimension_numbers = #tpu.dot_dimension_numbers<[2], [2], [1], [1], [0, 0, 0, 1, 1, 1], [0], [0]>} : vector<6x16x4xf32>, vector<6x16x4xf32>, vector<6x16x16xf32> -> vector<6x16x16xf32>
    "tpu.trace_stop"() : () -> ()
    %cst_87 = arith.constant dense<0xFF800000> : vector<6x16xf32>
    %484 = vector.multi_reduction <maximumf>, %483, %cst_87 [2] : vector<6x16x16xf32> to vector<6x16xf32>
    %485 = vector.shape_cast %484 : vector<6x16xf32> to vector<6x16x1xf32>
    %486 = vector.broadcast %485 : vector<6x16x1xf32> to vector<6x16x16xf32>
    %487 = arith.subf %483, %486 : vector<6x16x16xf32>
    %488 = math.exp %487 : vector<6x16x16xf32>
    %cst_88 = arith.constant dense<0.000000e+00> : vector<6x16xf32>
    %489 = vector.multi_reduction <add>, %488, %cst_88 [2] : vector<6x16x16xf32> to vector<6x16xf32>
    %490 = vector.shape_cast %489 : vector<6x16xf32> to vector<6x16x1xf32>
    %491 = tpu.reciprocal %490 {approx = true} : vector<6x16x1xf32> -> vector<6x16x1xf32>
    %492 = vector.broadcast %491 : vector<6x16x1xf32> to vector<6x16x16xf32>
    %493 = arith.mulf %488, %492 : vector<6x16x16xf32>
    "tpu.trace_start"() <{level = 10 : i32, message = "gnm,gmc->gnc"}> : () -> ()
    %cst_89 = arith.constant dense<0.000000e+00> : vector<6x16x4xf32>
    %494 = tpu.matmul %493, %482, %cst_89 {dimension_numbers = #tpu.dot_dimension_numbers<[2], [1], [1], [2], [0, 0, 0, 1, 1, 2], [0], [0]>} : vector<6x16x16xf32>, vector<6x16x4xf32>, vector<6x16x4xf32> -> vector<6x16x4xf32>
    "tpu.trace_stop"() : () -> ()
    %495 = vector.shape_cast %494 : vector<6x16x4xf32> to vector<96x4xf32>
    %c7 = arith.constant 7 : index
    %c0_90 = arith.constant 0 : index
    %c0_91 = arith.constant 0 : index
    %496 = vector.load %arg4[%c7, %c0_90, %c0_91] : memref<8x4x32xf32, #tpu.memory_space<vmem>>, vector<1x4x32xf32>
    %497 = vector.shape_cast %496 : vector<1x4x32xf32> to vector<4x32xf32>
    %cst_92 = arith.constant dense<0.000000e+00> : vector<96x32xf32>
    %498 = tpu.matmul %495, %497, %cst_92 {dimension_numbers = #tpu.dot_dimension_numbers<[1], [0], [0], [1], [0, 0, 1, 1], [], []>} : vector<96x4xf32>, vector<4x32xf32>, vector<96x32xf32> -> vector<96x32xf32>
    %499 = arith.addf %437, %498 : vector<96x32xf32>
    %c0_93 = arith.constant 0 : index
    %c0_94 = arith.constant 0 : index
    %500 = vector.load %arg5[%c0_93, %c0_94] : memref<96x32xf32, #tpu.memory_space<vmem>>, vector<96x32xf32>
    tpu.vector_store %arg5[%c0_93, %c0_94], %499 {strides = array<i32>} : memref<96x32xf32, #tpu.memory_space<vmem>>, vector<96x32xf32>,
    %cst_95 = arith.constant dense<0.000000e+00> : vector<32xf32>
    %501 = vector.multi_reduction <add>, %499, %cst_95 [0] : vector<96x32xf32> to vector<32xf32>
    %502 = vector.shape_cast %501 : vector<32xf32> to vector<1x32xf32>
    %c0_96 = arith.constant 0 : index
    %c0_97 = arith.constant 0 : index
    %503 = vector.load %arg6[%c0_96, %c0_97] : memref<1x32xf32, #tpu.memory_space<vmem>>, vector<1x32xf32>
    tpu.vector_store %arg6[%c0_96, %c0_97], %502 {strides = array<i32>} : memref<1x32xf32, #tpu.memory_space<vmem>>, vector<1x32xf32>,
    %504 = arith.mulf %499, %499 : vector<96x32xf32>
    %cst_98 = arith.constant dense<0.000000e+00> : vector<32xf32>
    %505 = vector.multi_reduction <add>, %504, %cst_98 [0] : vector<96x32xf32> to vector<32xf32>
    %506 = vector.shape_cast %505 : vector<32xf32> to vector<1x32xf32>
    %c0_99 = arith.constant 0 : index
    %c0_100 = arith.constant 0 : index
    %507 = vector.load %arg7[%c0_99, %c0_100] : memref<1x32xf32, #tpu.memory_space<vmem>>, vector<1x32xf32>
    tpu.vector_store %arg7[%c0_99, %c0_100], %506 {strides = array<i32>} : memref<1x32xf32, #tpu.memory_space<vmem>>, vector<1x32xf32>,
    return
  }
  func.func @transform_0(%arg0: i32) -> (i32, i32, i32, i32, i32) {
    %c0_i32 = arith.constant 0 : i32
    %c0_i32_0 = arith.constant 0 : i32
    %c0_i32_1 = arith.constant 0 : i32
    %c0_i32_2 = arith.constant 0 : i32
    %c0_i32_3 = arith.constant 0 : i32
    return %arg0, %c0_i32, %c0_i32_0, %c0_i32_1, %c0_i32_2 : i32, i32, i32, i32, i32
  }
  func.func @transform_1(%arg0: i32) -> (i32, i32, i32, i32) {
    %c0_i32 = arith.constant 0 : i32
    %c0_i32_0 = arith.constant 0 : i32
    %c0_i32_1 = arith.constant 0 : i32
    %c0_i32_2 = arith.constant 0 : i32
    %c0_i32_3 = arith.constant 0 : i32
    return %c0_i32, %c0_i32_0, %c0_i32_1, %c0_i32_2 : i32, i32, i32, i32
  }
  func.func @transform_2(%arg0: i32) -> (i32, i32, i32, i32) {
    %c0_i32 = arith.constant 0 : i32
    %c0_i32_0 = arith.constant 0 : i32
    %c0_i32_1 = arith.constant 0 : i32
    %c0_i32_2 = arith.constant 0 : i32
    %c0_i32_3 = arith.constant 0 : i32
    return %c0_i32, %c0_i32_0, %c0_i32_1, %c0_i32_2 : i32, i32, i32, i32
  }
  func.func @transform_3(%arg0: i32) -> (i32, i32, i32) {
    %c0_i32 = arith.constant 0 : i32
    %c0_i32_0 = arith.constant 0 : i32
    %c0_i32_1 = arith.constant 0 : i32
    %c0_i32_2 = arith.constant 0 : i32
    return %c0_i32, %c0_i32_0, %c0_i32_1 : i32, i32, i32
  }
  func.func @transform_4(%arg0: i32) -> (i32, i32) {
    %c0_i32 = arith.constant 0 : i32
    %c0_i32_0 = arith.constant 0 : i32
    return %arg0, %c0_i32 : i32, i32
  }
  func.func @transform_5(%arg0: i32) -> (i32, i32) {
    %c0_i32 = arith.constant 0 : i32
    %c0_i32_0 = arith.constant 0 : i32
    return %arg0, %c0_i32 : i32, i32
  }
  func.func @transform_6(%arg0: i32) -> (i32, i32) {
    %c0_i32 = arith.constant 0 : i32
    %c0_i32_0 = arith.constant 0 : i32
    return %arg0, %c0_i32 : i32, i32
  }
}

module attributes {stable_mosaic.version = 11 : i64} {
  func.func @_bn_relu_kernel(%arg0: i32, %arg1: memref<24x128xf32, #tpu.memory_space<vmem>>, %arg2: memref<1x128xf32, #tpu.memory_space<vmem>>, %arg3: memref<1x128xf32, #tpu.memory_space<vmem>>, %arg4: memref<24x128xf32, #tpu.memory_space<vmem>>) attributes {dimension_semantics = [#tpu.dimension_semantics<parallel>], iteration_bounds = array<i64: 1>, scalar_prefetch = 0 : i64, scratch_operands = 0 : i64, tpu.core_type = #tpu.core_type<tc>, window_params = [{transform_indices = @transform_0, window_bounds = array<i64: 24, 128>}, {pipeline_mode = #tpu.pipeline_mode<synchronous>, transform_indices = @transform_1, window_bounds = array<i64: 1, 128>}, {pipeline_mode = #tpu.pipeline_mode<synchronous>, transform_indices = @transform_2, window_bounds = array<i64: 1, 128>}, {transform_indices = @transform_3, window_bounds = array<i64: 24, 128>}]} {
    %c0 = arith.constant 0 : index
    %c0_0 = arith.constant 0 : index
    %0 = vector.load %arg1[%c0, %c0_0] : memref<24x128xf32, #tpu.memory_space<vmem>>, vector<24x128xf32>
    %c0_1 = arith.constant 0 : index
    %c0_2 = arith.constant 0 : index
    %1 = vector.load %arg2[%c0_1, %c0_2] : memref<1x128xf32, #tpu.memory_space<vmem>>, vector<1x128xf32>
    %2 = vector.broadcast %1 : vector<1x128xf32> to vector<24x128xf32>
    %3 = arith.mulf %0, %2 : vector<24x128xf32>
    %c0_3 = arith.constant 0 : index
    %c0_4 = arith.constant 0 : index
    %4 = vector.load %arg3[%c0_3, %c0_4] : memref<1x128xf32, #tpu.memory_space<vmem>>, vector<1x128xf32>
    %5 = vector.broadcast %4 : vector<1x128xf32> to vector<24x128xf32>
    %6 = arith.addf %3, %5 : vector<24x128xf32>
    %cst = arith.constant 0.000000e+00 : f32
    %7 = vector.broadcast %cst : f32 to vector<24x128xf32>
    %8 = arith.maximumf %6, %7 : vector<24x128xf32>
    %c0_5 = arith.constant 0 : index
    %c0_6 = arith.constant 0 : index
    %9 = vector.load %arg4[%c0_5, %c0_6] : memref<24x128xf32, #tpu.memory_space<vmem>>, vector<24x128xf32>
    tpu.vector_store %arg4[%c0_5, %c0_6], %8 {strides = array<i32>} : memref<24x128xf32, #tpu.memory_space<vmem>>, vector<24x128xf32>,
    return
  }
  func.func @transform_0(%arg0: i32) -> (i32, i32) {
    %c0_i32 = arith.constant 0 : i32
    %c0_i32_0 = arith.constant 0 : i32
    return %arg0, %c0_i32 : i32, i32
  }
  func.func @transform_1(%arg0: i32) -> (i32, i32) {
    %c0_i32 = arith.constant 0 : i32
    %c0_i32_0 = arith.constant 0 : i32
    %c0_i32_1 = arith.constant 0 : i32
    return %c0_i32, %c0_i32_0 : i32, i32
  }
  func.func @transform_2(%arg0: i32) -> (i32, i32) {
    %c0_i32 = arith.constant 0 : i32
    %c0_i32_0 = arith.constant 0 : i32
    %c0_i32_1 = arith.constant 0 : i32
    return %c0_i32, %c0_i32_0 : i32, i32
  }
  func.func @transform_3(%arg0: i32) -> (i32, i32) {
    %c0_i32 = arith.constant 0 : i32
    %c0_i32_0 = arith.constant 0 : i32
    return %arg0, %c0_i32 : i32, i32
  }
}

</mosaic_0001>

<bundles_post_ra>
// kernel: spatial_attention.3
= control target key start
LH: loop header
LB: loop body
LE: loop exit
PB: predicated region body
PF: predicated region fallthrough
CT: control target
= control target key end

     0   :  { %vm89_vm0 = vcmask 523264   ;;  %vm159_vm1 = vcmask 781312   ;;  %vm172_vm2 = vcmask 785408   ;;  %vm202_vm3 = vcmask 778240   ;;  %s466_s1 = inlined_call_operand.vmem [shape: bf16[64,96], index: 1, kind: input, shape index: {}]   ;;  %s467_s0 = inlined_call_operand.vmem [shape: bf16[96,64], index: 0, kind: input, shape index: {}]   ;;  %s468_s2 = inlined_call_operand.vmem [shape: bf16[96,96], index: 2, kind: output, shape index: {0}]   ;;  %s469_s3 = inlined_call_operand.vmem [shape: f32[1,96], index: 3, kind: output, shape index: {1}]   ;;  %s470_s4 = inlined_call_operand.vmem [shape: f32[1,96], index: 4, kind: output, shape index: {2}]  }
   0x1   :  { %v313_v0 = vld [vmem:[%s466_s1 + $0x18] sm:$0xff]  ;;  %v312_v1 = vld [vmem:[%s466_s1 + $0x10] sm:$0xff]  ;;  %v311_v2 = vld [vmem:[%s466_s1 + $0x8] sm:$0xff] }
   0x2   :  { %112 = vmatpush.bf16.msra.mxu0 %v313_v0  ;;  %314 = vmatpush.bf16.msra.mxu1 %v313_v0  ;;  %v310_v3 = vld [vmem:[%s466_s1] sm:$0xff]  ;;  %v305_v5 = vld [vmem:[%s467_s0 + $0x8] sm:$0xff]  ;;  %v307_v7 = vld [vmem:[%s467_s0 + $0x18] sm:$0xff] }
   0x3   :  { %316 = vmatpush.bf16.msra.mxu3 %v313_v0  ;;  %315 = vmatpush.bf16.msra.mxu2 %v313_v0  ;;  %v304_v4 = vld [vmem:[%s467_s0] sm:$0xff]  ;;  %v306_v8 = vld [vmem:[%s467_s0 + $0x10] sm:$0xff]  ;;  %v309_v9 = vld [vmem:[%s467_s0 + $0x28] sm:$0xff] }
   0x4   :  { %v308_v6 = vld [vmem:[%s467_s0 + $0x20] sm:$0xff] }
   0x6   :  { %113 = vmatpush.bf16.msra.mxu0 %v312_v1  ;;  %317 = vmatpush.bf16.msra.mxu1 %v312_v1 }
   0x7   :  { %319 = vmatpush.bf16.msra.mxu3 %v312_v1  ;;  %318 = vmatpush.bf16.msra.mxu2 %v312_v1 }
   0xa   :  { %114 = vmatpush.bf16.msra.mxu0 %v311_v2  ;;  %320 = vmatpush.bf16.msra.mxu1 %v311_v2 }
   0xb   :  { %322 = vmatpush.bf16.msra.mxu3 %v311_v2  ;;  %321 = vmatpush.bf16.msra.mxu2 %v311_v2 }
   0xe   :  { %115 = vmatpush.bf16.msra.mxu0 %v310_v3  ;;  %323 = vmatpush.bf16.msra.mxu1 %v310_v3 }
   0xf   :  { %325 = vmatpush.bf16.msra.mxu3 %v310_v3  ;;  %324 = vmatpush.bf16.msra.mxu2 %v310_v3 }
  0x11   :  { %298 = vmatmul.msk.bf16.vlgmr.msra.gmra.mxu0 %vm89_vm0, %v304_v4  ;;  %299 = vmatmul.msk.bf16.vlgmr.msra.gmra.mxu1 %vm89_vm0, %v305_v5 }
  0x12   :  { %302 = vmatmul.msk.bf16.vlgmr.msra.gmra.mxu3 %vm89_vm0, %v308_v6  ;;  %301 = vmatmul.msk.bf16.vlgmr.msra.gmra.mxu2 %vm89_vm0, %v307_v7 }
  0x21   :  { %300 = vmatmul.msk.bf16.gmra.mxu1 %vm89_vm0, %v306_v8 }
  0x22   :  { %303 = vmatmul.msk.bf16.gmra.mxu3 %vm89_vm0, %v309_v9 }
  0x8e   :  { %v117_v10 = vpop.f32.mrf.mxu0  ;;  %v122_v11 = vpop.f32.mrf.mxu1 }
  0x8f   :  { %v147_v12 = vpack.c.bf16 %v117_v10, %v117_v10  ;;  %v149_v13 = vpack.c.bf16 %v122_v11, %v122_v11  ;;  %v204_v16 = vmul.f32 %v117_v10, %v117_v10  ;;  %v173_v24 = vsel %vm172_vm2, %v117_v10, 0.0 }
  0x90   :  { %v206_v29 = vmul.f32 %v122_v11, %v122_v11  ;;  %v176_v35 = vsel %vm172_vm2, %v122_v11, 0.0 }
  0x91   :  { %160 = vst.msk [vmem:[%s468_s2] sm:$0xf] %vm159_vm1, %v147_v12  ;;  %v216_v26 = vsel %vm172_vm2, %v204_v16, 0.0 }
  0x92   :  { %162 = vst.msk [vmem:[%s468_s2 + $0x8] sm:$0xf] %vm159_vm1, %v149_v13  ;;  %v219_v39 = vsel %vm172_vm2, %v206_v29, 0.0 }
  0x95   :  { %v389_v14 = vpop.f32.mrf.mxu3  ;;  %v132_v15 = vpop.f32.mrf.mxu2 }
  0x96   :  { %v155_v17 = vpack.c.bf16 %v389_v14, %v389_v14  ;;  %v119_v18 = vpop.f32.mrf.mxu0  ;;  %v124_v19 = vpop.f32.mrf.mxu1  ;;  %v153_v23 = vpack.c.bf16 %v132_v15, %v132_v15  ;;  %v210_v53 = vmul.f32 %v132_v15, %v132_v15  ;;  %v184_v59 = vsel %vm172_vm2, %v132_v15, 0.0 }
  0x97   :  { %v148_v20 = vpack.c.bf16 %v119_v18, %v119_v18  ;;  %v205_v21 = vmul.f32 %v119_v18, %v119_v18  ;;  %v150_v22 = vpack.c.bf16 %v124_v19, %v124_v19  ;;  %v174_v25 = vsel %vm172_vm2, %v119_v18, 0.0 }
  0x98   :  { %168 = vst.msk [vmem:[%s468_s2 + $0x20] sm:$0xf] %vm159_vm1, %v155_v17  ;;  %v175_v28 = vadd.f32 %v174_v25, %v173_v24  ;;  %v207_v40 = vmul.f32 %v124_v19, %v124_v19  ;;  %v178_v43 = vsel %vm172_vm2, %v124_v19, 0.0  ;;  %v212_v0 = vmul.f32 %v389_v14, %v389_v14 }
  0x99   :  { %161 = vst.msk [vmem:[%s468_s2 + $0x4] sm:$0xf] %vm159_vm1, %v148_v20  ;;  %v217_v27 = vsel %vm172_vm2, %v205_v21, 0.0  ;;  %v227_v1 = vsel %vm172_vm2, %v210_v53, 0.0  ;;  %v188_v5 = vsel %vm172_vm2, %v389_v14, 0.0 }
  0x9a   :  { %163 = vst.msk [vmem:[%s468_s2 + $0xc] sm:$0xf] %vm159_vm1, %v150_v22  ;;  %v218_v32 = vadd.f32 %v217_v27, %v216_v26  ;;  %v177_v38 = vadd.f32 %v176_v35, %v175_v28  ;;  %v221_v46 = vsel %vm172_vm2, %v207_v40, 0.0  ;;  %v231_v12 = vsel %vm172_vm2, %v212_v0, 0.0 }
  0x9b   :  { %166 = vst.msk [vmem:[%s468_s2 + $0x18] sm:$0xf] %vm159_vm1, %v153_v23 }
  0x9c   :  { %v220_v42 = vadd.f32 %v219_v39, %v218_v32  ;;  %v179_v45 = vadd.f32 %v178_v43, %v177_v38 }
  0x9d   :  { %v139_v30 = vpop.f32.mrf.mxu3  ;;  %v134_v31 = vpop.f32.mrf.mxu2 }
  0x9e   :  { %v156_v33 = vpack.c.bf16 %v139_v30, %v139_v30  ;;  %v127_v34 = vpop.f32.mrf.mxu1  ;;  %v154_v37 = vpack.c.bf16 %v134_v31, %v134_v31  ;;  %v222_v49 = vadd.f32 %v221_v46, %v220_v42  ;;  %v211_v60 = vmul.f32 %v134_v31, %v134_v31 }
  0x9f   :  { %v151_v36 = vpack.c.bf16 %v127_v34, %v127_v34  ;;  %v208_v41 = vmul.f32 %v127_v34, %v127_v34  ;;  %v180_v44 = vsel %vm172_vm2, %v127_v34, 0.0  ;;  %v186_v2 = vsel %vm172_vm2, %v134_v31, 0.0 }
  0xa0   :  { %169 = vst.msk [vmem:[%s468_s2 + $0x24] sm:$0xf] %vm159_vm1, %v156_v33  ;;  %v181_v50 = vadd.f32 %v180_v44, %v179_v45  ;;  %v213_v6 = vmul.f32 %v139_v30, %v139_v30  ;;  %v229_v7 = vsel %vm172_vm2, %v211_v60, 0.0  ;;  %v190_v13 = vsel %vm172_vm2, %v139_v30, 0.0 }
  0xa1   :  { %164 = vst.msk [vmem:[%s468_s2 + $0x10] sm:$0xf] %vm159_vm1, %v151_v36  ;;  %v223_v47 = vsel %vm172_vm2, %v208_v41, 0.0 }
  0xa2   :  { %167 = vst.msk [vmem:[%s468_s2 + $0x1c] sm:$0xf] %vm159_vm1, %v154_v37  ;;  %v224_v57 = vadd.f32 %v223_v47, %v222_v49  ;;  %v233_v14 = vsel %vm172_vm2, %v213_v6, 0.0 }
  0xa5   :  { %v142_v48 = vpop.f32.mrf.mxu3 }
  0xa6   :  { %v157_v51 = vpack.c.bf16 %v142_v48, %v142_v48  ;;  %v129_v52 = vpop.f32.mrf.mxu1  ;;  %v214_v15 = vmul.f32 %v142_v48, %v142_v48  ;;  %v192_v18 = vsel %vm172_vm2, %v142_v48, 0.0 }
  0xa7   :  { %v152_v54 = vpack.c.bf16 %v129_v52, %v129_v52  ;;  %v182_v55 = vsel %vm172_vm2, %v129_v52, 0.0  ;;  %v209_v56 = vmul.f32 %v129_v52, %v129_v52 }
  0xa8   :  { %170 = vst.msk [vmem:[%s468_s2 + $0x28] sm:$0xf] %vm159_vm1, %v157_v51  ;;  %v183_v58 = vadd.f32 %v182_v55, %v181_v50  ;;  %v235_v22 = vsel %vm172_vm2, %v214_v15, 0.0 }
  0xa9   :  { %165 = vst.msk [vmem:[%s468_s2 + $0x14] sm:$0xf] %vm159_vm1, %v152_v54  ;;  %v225_v61 = vsel %vm172_vm2, %v209_v56, 0.0 }
  0xaa   :  { %v185_v62 = vadd.f32 %v184_v59, %v183_v58  ;;  %v226_v63 = vadd.f32 %v225_v61, %v224_v57 }
  0xac   :  { %v187_v3 = vadd.f32 %v186_v2, %v185_v62  ;;  %v228_v4 = vadd.f32 %v227_v1, %v226_v63 }
  0xad   :  { %v144_v8 = vpop.f32.mrf.mxu3 }
  0xae   :  { %v230_v9 = vadd.f32 %v229_v7, %v228_v4  ;;  %v158_v10 = vpack.c.bf16 %v144_v8, %v144_v8  ;;  %v189_v11 = vadd.f32 %v188_v5, %v187_v3  ;;  %v215_v19 = vmul.f32 %v144_v8, %v144_v8 }
  0xaf   :  { %v194_v23 = vsel %vm172_vm2, %v144_v8, 0.0 }
  0xb0   :  { %171 = vst.msk [vmem:[%s468_s2 + $0x2c] sm:$0xf] %vm159_vm1, %v158_v10  ;;  %v191_v16 = vadd.f32 %v190_v13, %v189_v11  ;;  %v232_v17 = vadd.f32 %v231_v12, %v230_v9  ;;  %v237_v26 = vsel %vm172_vm2, %v215_v19, 0.0 }
  0xb2   :  { %v193_v20 = vadd.f32 %v192_v18, %v191_v16  ;;  %v234_v21 = vadd.f32 %v233_v14, %v232_v17 }
  0xb4   :  { %v195_v24 = vadd.f32 %v194_v23, %v193_v20  ;;  %v236_v25 = vadd.f32 %v235_v22, %v234_v21 }
  0xb6   :  { %v196_v27 = vrot.slane %v195_v24, 4  ;;  %v238_v28 = vadd.f32 %v237_v26, %v236_v25 }
  0xb8   :  { %v197_v29 = vadd.f32 %v196_v27, %v195_v24  ;;  %v239_v30 = vrot.slane %v238_v28, 4 }
  0xba   :  { %v198_v31 = vrot.slane %v197_v29, 2  ;;  %v240_v32 = vadd.f32 %v239_v30, %v238_v28 }
  0xbc   :  { %v199_v33 = vadd.f32 %v198_v31, %v197_v29  ;;  %v241_v34 = vrot.slane %v240_v32, 2 }
  0xbe   :  { %v200_v35 = vrot.slane %v199_v33, 1  ;;  %v242_v36 = vadd.f32 %v241_v34, %v240_v32 }
  0xc0   :  { %v201_v37 = vadd.f32 %v200_v35, %v199_v33  ;;  %v243_v38 = vrot.slane %v242_v36, 1 }
  0xc2   :  { %203 = vst.msk [vmem:[%s469_s3] sm:$0x1] %vm202_vm3, %v201_v37  ;;  %v244_v39 = vadd.f32 %v243_v38, %v242_v36 }
  0xc4   :  { %245 = vst.msk [vmem:[%s470_s4] sm:$0x1] %vm202_vm3, %v244_v39 }

// kernel: spatial_attention.5
= control target key start
LH: loop header
LB: loop body
LE: loop exit
PB: predicated region body
PF: predicated region fallthrough
CT: control target
= control target key end

     0   :  { %s87_s0 = inlined_call_operand.vmem [shape: f32[24,128], index: 0, kind: input, shape index: {}]   ;;  %s88_s1 = inlined_call_operand.vmem [shape: f32[1,128], index: 1, kind: input, shape index: {}]   ;;  %s89_s2 = inlined_call_operand.vmem [shape: f32[1,128], index: 2, kind: input, shape index: {}]   ;;  %s90_s3 = inlined_call_operand.vmem [shape: f32[24,128], index: 3, kind: output, shape index: {}]  }
   0x1   :  { %v14_v0 = vld [vmem:[%s87_s0] sm:$0xff]  ;;  %v15_v3 = vld [vmem:[%s87_s0 + $0x8] sm:$0xff]  ;;  %v16_v6 = vld [vmem:[%s87_s0 + $0x10] sm:$0xff] }
   0x2   :  { %v41_v1 = vld [vmem:[%s88_s1] ss:$0 sm:$0xff] }
   0x3   :  { %v42_v2 = vld [vmem:[%s89_s2] ss:$0 sm:$0xff]  ;;  %v21_v4 = vmul.f32 %v41_v1, %v14_v0  ;;  %v22_v5 = vmul.f32 %v41_v1, %v15_v3  ;;  %v23_v7 = vmul.f32 %v41_v1, %v16_v6 }
   0x5   :  { %v28_v8 = vadd.f32 %v42_v2, %v21_v4  ;;  %v29_v9 = vadd.f32 %v42_v2, %v22_v5  ;;  %v30_v10 = vadd.f32 %v42_v2, %v23_v7 }
   0x7   :  { %v31_v11 = vmax.f32 %v28_v8, 0.0  ;;  %v32_v12 = vmax.f32 %v29_v9, 0.0  ;;  %v33_v13 = vmax.f32 %v30_v10, 0.0 }
   0x9   :  { %34 = vst [vmem:[%s90_s3] sm:$0xff] %v31_v11 }
   0xa   :  { %35 = vst [vmem:[%s90_s3 + $0x8] sm:$0xff] %v32_v12 }
   0xb   :  { %36 = vst [vmem:[%s90_s3 + $0x10] sm:$0xff] %v33_v13 }

// kernel: spatial_attention.4
= control target key start
LH: loop header
LB: loop body
LE: loop exit
PB: predicated region body
PF: predicated region fallthrough
CT: control target
= control target key end

     0   :  { %vm518_vm0 = vcmask 31744   ;;  %vm729_vm1 = vcmask 130048   ;;  %vm1753_vm2 = vcmask 1043456   ;;  %vm6606_vm3 = vcmask 261120   ;;  %s11249_s0 = inlined_call_operand.vmem [shape: bf16[6,3,8,16,4], index: 0, kind: input, shape index: {}]   ;;  %s11250_s1 = inlined_call_operand.vmem [shape: f32[3,8,1,4], index: 1, kind: input, shape index: {}]   ;;  %s11251_s2 = inlined_call_operand.vmem [shape: f32[3,8,1,4], index: 2, kind: input, shape index: {}]   ;;  %s11252_s3 = inlined_call_operand.vmem [shape: f32[8,4,32], index: 3, kind: input, shape index: {}]   ;;  %s11253_s4 = inlined_call_operand.vmem [shape: f32[96,32], index: 4, kind: output, shape index: {0}]   ;;  %s11254_s5 = inlined_call_operand.vmem [shape: f32[1,32], index: 5, kind: output, shape index: {1}]   ;;  %s11255_s6 = inlined_call_operand.vmem [shape: f32[1,32], index: 6, kind: output, shape index: {2}]  }
   0x1   :  { %v7686_v0 = vld [vmem:[%s11249_s0 + $0x40] sm:$0xff]   ;;  %v8309_v3 = vld [vmem:[%s11250_s1 + $0x8] ss:$0 sm:$0xff]  ;;  %vm6648_vm4 = vcmask 253952  }
   0x2   :  { %v7137_v1 = vunpack.c.l.bf16 %v7686_v0  ;;  %v7138_v2 = vunpack.c.h.bf16 %v7686_v0  ;;  %v8314_v4 = vld [vmem:[%s11251_s2 + $0x8] ss:$0 sm:$0xff]  ;;  %v7758_v5 = vld [vmem:[%s11249_s0 + $0x280] sm:$0xff]  }
   0x3   :  { %v7425_v6 = vunpack.c.l.bf16 %v7758_v5  ;;  %v7426_v7 = vunpack.c.h.bf16 %v7758_v5  ;;  %v7104_v8 = vld [vmem:[%s11249_s0] sm:$0xff]  }
   0x4   :  { %v426_v9 = vmul.f32 %v8309_v3, %v7138_v2  ;;  %v425_v10 = vmul.f32 %v8309_v3, %v7137_v1  ;;  %v7105_v11 = vunpack.c.l.bf16 %v7104_v8  ;;  %v8327_v12 = vld [vmem:[%s11250_s1] ss:$0 sm:$0xff]  ;;  %v7106_v15 = vunpack.c.h.bf16 %v7104_v8 }
   0x5   :  { %v8332_v13 = vld [vmem:[%s11251_s2] ss:$0 sm:$0xff]  ;;  %v432_v16 = vmul.f32 %v8309_v3, %v7426_v7  ;;  %v431_v17 = vmul.f32 %v8309_v3, %v7425_v6 }
   0x6   :  { %v7734_v14 = vld [vmem:[%s11249_s0 + $0x1c0] sm:$0xff]   ;;  %v441_v21 = vadd.f32 %v8314_v4, %v426_v9  ;;  %v440_v22 = vadd.f32 %v8314_v4, %v425_v10  ;;  %v371_v23 = vmul.f32 %v8327_v12, %v7105_v11  ;;  %v372_v34 = vmul.f32 %v8327_v12, %v7106_v15 }
   0x7   :  { %v7330_v18 = vunpack.c.h.bf16 %v7734_v14  ;;  %v7750_v19 = vld [vmem:[%s11249_s0 + $0x240] sm:$0xff]   ;;  %v7329_v20 = vunpack.c.l.bf16 %v7734_v14  ;;  %v447_v25 = vadd.f32 %v8314_v4, %v432_v16  ;;  %v446_v26 = vadd.f32 %v8314_v4, %v431_v17 }
   0x8   :  { %v7393_v24 = vunpack.c.l.bf16 %v7750_v19  ;;  %v453_v28 = vmax.f32 %v441_v21, 0.0  ;;  %v386_v29 = vadd.f32 %v8332_v13, %v371_v23  ;;  %v452_v32 = vmax.f32 %v440_v22, 0.0  ;;  %v7710_v35 = vld [vmem:[%s11249_s0 + $0x100] sm:$0xff]  }
   0x9   :  { %v430_v27 = vmul.f32 %v8309_v3, %v7330_v18  ;;  %v459_v31 = vmax.f32 %v447_v25, 0.0  ;;  %v458_v36 = vmax.f32 %v446_v26, 0.0  ;;  %v429_v38 = vmul.f32 %v8309_v3, %v7329_v20  ;;  %v7702_v40 = vld [vmem:[%s11249_s0 + $0xc0] sm:$0xff]  }
   0xa   :  { %v377_v30 = vmul.f32 %v8327_v12, %v7393_v24  ;;  %6704 = vmatpush.xpose.msk.msra.mxu0 %vm518_vm0, %v453_v28  ;;  %v7394_v39 = vunpack.c.h.bf16 %v7750_v19  ;;  %v7782_v42 = vld [vmem:[%s11249_s0 + $0x340] sm:$0xff]   ;;  %v398_v43 = vmax.f32 %v386_v29, 0.0  ;;  %v7233_v47 = vunpack.c.l.bf16 %v7710_v35 }
   0xb   :  { %v445_v33 = vadd.f32 %v8314_v4, %v430_v27  ;;  %6716 = vmatpush.xpose.msk.msra.mxu3 %vm518_vm0, %v459_v31  ;;  %v444_v44 = vadd.f32 %v8314_v4, %v429_v38  ;;  %v7726_v46 = vld [vmem:[%s11249_s0 + $0x180] sm:$0xff]   ;;  %v387_v48 = vadd.f32 %v8332_v13, %v372_v34  ;;  %v7234_v49 = vunpack.c.h.bf16 %v7710_v35 }
   0xc   :  { %v392_v37 = vadd.f32 %v8332_v13, %v377_v30  ;;  %v378_v45 = vmul.f32 %v8327_v12, %v7394_v39  ;;  %v7201_v50 = vunpack.c.l.bf16 %v7702_v40  ;;  %v427_v53 = vmul.f32 %v8309_v3, %v7233_v47  ;;  %v7806_v0 = vld [vmem:[%s11249_s0 + $0x400] sm:$0xff]  }
   0xd   :  { %v457_v41 = vmax.f32 %v445_v33, 0.0  ;;  %v456_v52 = vmax.f32 %v444_v44, 0.0  ;;  %v7522_v54 = vunpack.c.h.bf16 %v7782_v42  ;;  %v428_v56 = vmul.f32 %v8309_v3, %v7234_v49  ;;  %v7798_v27 = vld [vmem:[%s11249_s0 + $0x3c0] sm:$0xff]  }
   0xe   :  { %6705 = vmatpush.xpose.msk.msra.mxu0 %vm518_vm0, %v452_v32  ;;  %v404_v51 = vmax.f32 %v392_v37, 0.0  ;;  %v393_v55 = vadd.f32 %v8332_v13, %v378_v45  ;;  %v7521_v57 = vunpack.c.l.bf16 %v7782_v42  ;;  %v373_v58 = vmul.f32 %v8327_v12, %v7201_v50  ;;  %v7774_v31 = vld [vmem:[%s11249_s0 + $0x300] sm:$0xff]  }
   0xf   :  { %6717 = vmatpush.xpose.msk.msra.mxu3 %vm518_vm0, %v458_v36  ;;  %v434_v59 = vmul.f32 %v8309_v3, %v7522_v54  ;;  %v7297_v60 = vunpack.c.l.bf16 %v7726_v46  ;;  %v443_v61 = vadd.f32 %v8314_v4, %v428_v56  ;;  %v442_v62 = vadd.f32 %v8314_v4, %v427_v53 }
  0x10   :  { %v433_v63 = vmul.f32 %v8309_v3, %v7521_v57  ;;  %v399_v1 = vmax.f32 %v387_v48, 0.0  ;;  %v405_v5 = vmax.f32 %v393_v55, 0.0  ;;  %v7618_v8 = vunpack.c.h.bf16 %v7806_v0 }
  0x11   :  { %6706 = vmatmul.msk.f32.vlgmr.msra.gmra.mxu0 %vm518_vm0, %v398_v43  ;;  %v449_v2 = vadd.f32 %v8314_v4, %v434_v59  ;;  %v455_v6 = vmax.f32 %v443_v61, 0.0  ;;  %v388_v9 = vadd.f32 %v8332_v13, %v373_v58  ;;  %v7202_v11 = vunpack.c.h.bf16 %v7702_v40 }
  0x12   :  { %6712 = vmatpush.xpose.msk.msrb.mxu0 %vm518_vm0, %v457_v41  ;;  %6718 = vmatmul.msk.f32.vlgmr.msra.gmra.mxu3 %vm518_vm0, %v404_v51  ;;  %v448_v7 = vadd.f32 %v8314_v4, %v433_v63  ;;  %v7617_v14 = vunpack.c.l.bf16 %v7806_v0  ;;  %v375_v15 = vmul.f32 %v8327_v12, %v7297_v60  ;;  %v454_v16 = vmax.f32 %v442_v62, 0.0 }
  0x13   :  { %v461_v10 = vmax.f32 %v449_v2, 0.0  ;;  %6708 = vmatpush.xpose.msk.msra.mxu1 %vm518_vm0, %v455_v6  ;;  %v436_v18 = vmul.f32 %v8309_v3, %v7618_v8  ;;  %v400_v21 = vmax.f32 %v388_v9, 0.0  ;;  %v374_v22 = vmul.f32 %v8327_v12, %v7202_v11 }
  0x14   :  { %v460_v17 = vmax.f32 %v448_v7, 0.0  ;;  %v435_v19 = vmul.f32 %v8309_v3, %v7617_v14  ;;  %v390_v24 = vadd.f32 %v8332_v13, %v375_v15  ;;  %v7298_v25 = vunpack.c.h.bf16 %v7726_v46 }
  0x15   :  { %v451_v20 = vadd.f32 %v8314_v4, %v436_v18  ;;  %v7585_v28 = vunpack.c.l.bf16 %v7798_v27  ;;  %v7489_v35 = vunpack.c.l.bf16 %v7774_v31  ;;  %v7490_v42 = vunpack.c.h.bf16 %v7774_v31 }
  0x16   :  { %6713 = vmatpush.xpose.msk.msrb.mxu0 %vm518_vm0, %v456_v52  ;;  %v450_v23 = vadd.f32 %v8314_v4, %v435_v19  ;;  %v389_v4 = vadd.f32 %v8332_v13, %v374_v22  ;;  %v402_v29 = vmax.f32 %v390_v24, 0.0  ;;  %v376_v30 = vmul.f32 %v8327_v12, %v7298_v25 }
  0x17   :  { %6709 = vmatpush.xpose.msk.msra.mxu1 %vm518_vm0, %v454_v16  ;;  %v463_v26 = vmax.f32 %v451_v20, 0.0  ;;  %v381_v33 = vmul.f32 %v8327_v12, %v7585_v28  ;;  %v379_v38 = vmul.f32 %v8327_v12, %v7489_v35  ;;  %v7586_v43 = vunpack.c.h.bf16 %v7798_v27 }
  0x18   :  { %v462_v3 = vmax.f32 %v450_v23, 0.0  ;;  %v401_v32 = vmax.f32 %v389_v4, 0.0  ;;  %v391_v34 = vadd.f32 %v8332_v13, %v376_v30  ;;  %v380_v44 = vmul.f32 %v8327_v12, %v7490_v42 }
  0x19   :  { %6707 = vmatmul.msk.f32.gmra.mxu0 %vm518_vm0, %v399_v1  ;;  %v396_v36 = vadd.f32 %v8332_v13, %v381_v33  ;;  %v394_v40 = vadd.f32 %v8332_v13, %v379_v38  ;;  %v382_v45 = vmul.f32 %v8327_v12, %v7586_v43 }
  0x1a   :  { %6720 = vmatpush.xpose.msk.msra.mxu0 %vm518_vm0, %v461_v10  ;;  %6719 = vmatmul.msk.f32.gmra.mxu3 %vm518_vm0, %v405_v5  ;;  %v403_v37 = vmax.f32 %v391_v34, 0.0  ;;  %v395_v46 = vadd.f32 %v8332_v13, %v380_v44 }
  0x1b   :  { %6724 = vmatpush.xpose.msk.msrb.mxu1 %vm518_vm0, %v463_v26  ;;  %v408_v39 = vmax.f32 %v396_v36, 0.0  ;;  %v406_v41 = vmax.f32 %v394_v40, 0.0  ;;  %v397_v47 = vadd.f32 %v8332_v13, %v382_v45  ;;  %v7766_v45 = vld [vmem:[%s11249_s0 + $0x2c0] sm:$0xff]  }
  0x1c   :  { %6710 = vmatmul.msk.f32.vlgmr.msra.gmra.mxu1 %vm518_vm0, %v400_v21  ;;  %v407_v49 = vmax.f32 %v395_v46, 0.0  ;;  %v8496_v46 = vld [vmem:[%s11250_s1 + $0x10] ss:$0 sm:$0xff] }
  0x1d   :  { %v409_v50 = vmax.f32 %v397_v47, 0.0  ;;  %v7458_v47 = vunpack.c.h.bf16 %v7766_v45 }
  0x1e   :  { %6721 = vmatpush.xpose.msk.msra.mxu0 %vm518_vm0, %v460_v17 }
  0x1f   :  { %6725 = vmatpush.xpose.msk.msrb.mxu1 %vm518_vm0, %v462_v3 }
  0x21   :  { %6714 = vmatmul.msk.f32.vlgmr.msrb.gmra.mxu0 %vm518_vm0, %v402_v29 }
  0x24   :  { %6711 = vmatmul.msk.f32.gmra.mxu1 %vm518_vm0, %v401_v32 }
  0x29   :  { %6715 = vmatmul.msk.f32.gmra.mxu0 %vm518_vm0, %v403_v37 }
  0x2c   :  { %6726 = vmatmul.msk.f32.vlgmr.msrb.gmra.mxu1 %vm518_vm0, %v408_v39 }
  0x31   :  { %6722 = vmatmul.msk.f32.vlgmr.msra.gmra.mxu0 %vm518_vm0, %v406_v41 }
  0x34   :  { %6727 = vmatmul.msk.f32.gmra.mxu1 %vm518_vm0, %v409_v50  ;;  %v7457_v50 = vunpack.c.l.bf16 %v7766_v45 }
  0x39   :  { %6723 = vmatmul.msk.f32.gmra.mxu0 %vm518_vm0, %v407_v49  ;;  %v486_v49 = vmul.f32 %v8496_v46, %v7458_v47 }
  0x8e   :  { %v8429_v48 = vpop.f32.mrf.mxu0 }
  0x8f   :  { %v730_v57 = vsel %vm729_vm1, %v8429_v48, -inf }
  0x95   :  { %v653_v51 = vpop.f32.mrf.mxu3 }
  0x96   :  { %v748_v52 = vsel %vm729_vm1, %v653_v51, -inf  ;;  %v8434_v53 = vpop.f32.mrf.mxu0 }
  0x97   :  { %749 = vmax.xlane.f32.xlu2 %v748_v52  ;;  %v733_v19 = vsel %vm729_vm1, %v8434_v53, -inf  ;;  %v485_v52 = vmul.f32 %v8496_v46, %v7457_v50  ;;  %v8557_v50 = vld [vmem:[%s11250_s1 + $0x1] ss:$0 sm:$0xff] }
  0x99   :  { %v8437_v13 = vpop.f32.mrf.mxu1 }
  0x9a   :  { %v736_v28 = vsel %vm729_vm1, %v8437_v13, -inf }
  0x9d   :  { %v656_v12 = vpop.f32.mrf.mxu3 }
  0x9e   :  { %v751_v54 = vsel %vm729_vm1, %v656_v12, -inf  ;;  %v618_v55 = vpop.f32.mrf.mxu0 }
  0x9f   :  { %752 = vmax.xlane.f32.xlu2 %v751_v54  ;;  %v742_v56 = vsel %vm729_vm1, %v618_v55, -inf }
  0xa0   :  { %743 = vmax.xlane.f32.xlu0 %v742_v56  ;;  %v7742_v56 = vld [vmem:[%s11249_s0 + $0x200] sm:$0xff]  }
  0xa1   :  { %v8443_v60 = vpop.f32.mrf.mxu1 }
  0xa2   :  { %v739_v22 = vsel %vm729_vm1, %v8443_v60, -inf }
  0xa6   :  { %v621_v58 = vpop.f32.mrf.mxu0 }
  0xa7   :  { %731 = vmax.xlane.f32.xlu2 %v730_v57  ;;  %v745_v59 = vsel %vm729_vm1, %v621_v58, -inf  ;;  %v7362_v57 = vunpack.c.h.bf16 %v7742_v56 }
  0xa8   :  { %746 = vmax.xlane.f32.xlu0 %v745_v59  ;;  %v7361_v59 = vunpack.c.l.bf16 %v7742_v56  ;;  %v8569_v56 = vld [vmem:[%s11251_s2 + $0x1] ss:$0 sm:$0xff] }
  0xa9   :  { %v723_v63 = vpop.f32.mrf.mxu1 }
  0xaa   :  { %v760_v0 = vsel %vm729_vm1, %v723_v63, -inf }
  0xae   :  { %v688_v61 = vpop.f32.mrf.mxu0 }
  0xaf   :  { %v754_v62 = vsel %vm729_vm1, %v688_v61, -inf }
  0xb0   :  { %755 = vmax.xlane.f32.xlu2 %v754_v62  ;;  %v483_v62 = vmul.f32 %v8496_v46, %v7361_v59 }
  0xb1   :  { %v8463_v25 = vpop.f32.mrf.mxu1 }
  0xb2   :  { %v763_v27 = vsel %vm729_vm1, %v8463_v25, -inf }
  0xb6   :  { %v8474_v32 = vpop.f32.mrf.mxu0 }
  0xb7   :  { %v757_v34 = vsel %vm729_vm1, %v8474_v32, -inf }
  0xb8   :  { %761 = vmax.xlane.f32.xlu2 %v760_v0 }
 0x10a   :  { %v750_v1 = vpop.xlane.xlu2 %749 }
 0x10b   :  { %v772_v2 = vsub.f32 %v653_v51, %v750_v1 }
 0x10d   :  { %v790_v5 = vmul.f32 1.442695, %v772_v2  ;;  %v7687_v2 = vld [vmem:[%s11249_s0 + $0x48] sm:$0xff]  }
 0x10f   :  { %7871 = vpow2.f32 %v790_v5  ;;  %v7142_v5 = vunpack.c.h.bf16 %v7687_v2 }
 0x112   :  { %v753_v11 = vpop.xlane.xlu2 %752 }
 0x113   :  { %v744_v6 = vpop.xlane.xlu0 %743  ;;  %v773_v15 = vsub.f32 %v656_v12, %v753_v11  ;;  %v7141_v11 = vunpack.c.l.bf16 %v7687_v2 }
 0x114   :  { %v770_v7 = vsub.f32 %v618_v55, %v744_v6  ;;  %v8520_v6 = vld [vmem:[%s11250_s1 + $0x9] ss:$0 sm:$0xff] }
 0x115   :  { %v8447_v8 = vpop.eup %7871  ;;  %v792_v21 = vmul.f32 1.442695, %v773_v15  ;;  %v1106_v15 = vmul.f32 %v8520_v6, %v7141_v11 }
 0x116   :  { %v786_v9 = vmul.f32 1.442695, %v770_v7  ;;  %v820_v10 = vsel %vm729_vm1, %v8447_v8, 0.0  ;;  %v8525_v7 = vld [vmem:[%s11251_s2 + $0x9] ss:$0 sm:$0xff] }
 0x117   :  { %821 = vadd.xlane.f32.xlu0 %v820_v10 }
 0x118   :  { %7873 = vpow2.f32 %v786_v9  ;;  %v1107_v9 = vmul.f32 %v8520_v6, %v7142_v5 }
 0x11a   :  { %v732_v4 = vpop.xlane.xlu2 %731  ;;  %v1122_v10 = vadd.f32 %v8525_v7, %v1107_v9 }
 0x11b   :  { %v747_v14 = vpop.xlane.xlu0 %746  ;;  %v766_v29 = vsub.f32 %v8429_v48, %v732_v4  ;;  %v8501_v48 = vld [vmem:[%s11251_s2 + $0x10] ss:$0 sm:$0xff] }
 0x11c   :  { %v771_v16 = vsub.f32 %v621_v58, %v747_v14  ;;  %v501_v51 = vadd.f32 %v8501_v48, %v486_v49  ;;  %v500_v54 = vadd.f32 %v8501_v48, %v485_v52  ;;  %v484_v58 = vmul.f32 %v8496_v46, %v7362_v57 }
 0x11d   :  { %v778_v31 = vmul.f32 1.442695, %v766_v29  ;;  %v498_v0 = vadd.f32 %v8501_v48, %v483_v62  ;;  %v1134_v14 = vmax.f32 %v1122_v10, 0.0 }
 0x11e   :  { %v8451_v17 = vpop.eup %7873  ;;  %v788_v18 = vmul.f32 1.442695, %v771_v16  ;;  %v513_v12 = vmax.f32 %v501_v51, 0.0  ;;  %v512_v55 = vmax.f32 %v500_v54, 0.0  ;;  %v1121_v16 = vadd.f32 %v8525_v7, %v1106_v15 }
 0x11f   :  { %734 = vmax.xlane.f32.xlu0 %v733_v19  ;;  %v814_v20 = vsel %vm729_vm1, %v8451_v17, 0.0  ;;  %v510_v1 = vmax.f32 %v498_v0, 0.0 }
 0x120   :  { %7875 = vpow2.f32 %v788_v18  ;;  %815 = vadd.xlane.f32.xlu1 %v814_v20  ;;  %969 = vmatpush.msra.mxu1 %v513_v12  ;;  %v1133_v18 = vmax.f32 %v1121_v16, 0.0  ;;  %v7783_v20 = vld [vmem:[%s11249_s0 + $0x348] sm:$0xff]  }
 0x121   :  { %7877 = vpow2.f32 %v792_v21  ;;  %v7526_v21 = vunpack.c.h.bf16 %v7783_v20  ;;  %v7525_v29 = vunpack.c.l.bf16 %v7783_v20 }
 0x122   :  { %7879 = vpow2.f32 %v778_v31  ;;  %970 = vmatpush.msra.mxu1 %v512_v55 }
 0x123   :  { %v756_v30 = vpop.xlane.xlu2 %755 }
 0x124   :  { %v774_v33 = vsub.f32 %v688_v61, %v756_v30  ;;  %v499_v61 = vadd.f32 %v8501_v48, %v484_v58 }
 0x126   :  { %v8459_v23 = vpop.eup %7875  ;;  %v794_v35 = vmul.f32 1.442695, %v774_v33  ;;  %v1114_v33 = vmul.f32 %v8520_v6, %v7525_v29 }
 0x127   :  { %740 = vmax.xlane.f32.xlu0 %v739_v22  ;;  %v817_v24 = vsel %vm729_vm1, %v8459_v23, 0.0  ;;  %v8465_v26 = vpop.eup %7877 }
 0x128   :  { %818 = vadd.xlane.f32.xlu1 %v817_v24  ;;  %v823_v3 = vsel %vm729_vm1, %v8465_v26, 0.0  ;;  %v8478_v37 = vpop.eup %7879  ;;  %7881 = vpow2.f32 %v794_v35 }
 0x129   :  { %v802_v39 = vsel %vm729_vm1, %v8478_v37, 0.0 }
 0x12b   :  { %v762_v36 = vpop.xlane.xlu2 %761 }
 0x12c   :  { %v776_v38 = vsub.f32 %v723_v63, %v762_v36  ;;  %v511_v63 = vmax.f32 %v499_v61, 0.0  ;;  %v7790_v61 = vld [vmem:[%s11249_s0 + $0x380] sm:$0xff]  }
 0x12d   :  { %v7553_v11 = vunpack.c.l.bf16 %v7790_v61 }
 0x12e   :  { %v798_v40 = vmul.f32 1.442695, %v776_v38  ;;  %v8482_v41 = vpop.eup %7881  ;;  %940 = vmatpush.msrb.mxu0 %v511_v63  ;;  %v7694_v38 = vld [vmem:[%s11249_s0 + $0x80] sm:$0xff]  }
 0x12f   :  { %764 = vmax.xlane.f32.xlu0 %v763_v27  ;;  %v826_v42 = vsel %vm729_vm1, %v8482_v41, 0.0  ;;  %v7169_v52 = vunpack.c.l.bf16 %v7694_v38  ;;  %v487_v15 = vmul.f32 %v8496_v46, %v7553_v11 }
 0x130   :  { %824 = vadd.xlane.f32.xlu1 %v823_v3  ;;  %7883 = vpow2.f32 %v798_v40  ;;  %941 = vmatpush.msrb.mxu0 %v510_v1  ;;  %v1115_v3 = vmul.f32 %v8520_v6, %v7526_v21  ;;  %v7554_v1 = vunpack.c.h.bf16 %v7790_v61 }
 0x131   :  { %v479_v54 = vmul.f32 %v8496_v46, %v7169_v52  ;;  %v502_v20 = vadd.f32 %v8501_v48, %v487_v15 }
 0x132   :  { %6740 = vmatpush.xpose.msk.msra.mxu0 %vm518_vm0, %v1134_v14  ;;  %v1130_v31 = vadd.f32 %v8525_v7, %v1115_v3  ;;  %v488_v10 = vmul.f32 %v8496_v46, %v7554_v1  ;;  %v7703_v1 = vld [vmem:[%s11249_s0 + $0xc8] sm:$0xff]  }
 0x133   :  { %v494_v58 = vadd.f32 %v8501_v48, %v479_v54  ;;  %v514_v3 = vmax.f32 %v502_v20, 0.0  ;;  %v7807_v20 = vld [vmem:[%s11249_s0 + $0x408] sm:$0xff]  }
 0x134   :  { %v1142_v36 = vmax.f32 %v1130_v31, 0.0 }
 0x135   :  { %v506_v0 = vmax.f32 %v494_v58, 0.0  ;;  %v7711_v58 = vld [vmem:[%s11249_s0 + $0x108] sm:$0xff]  }
 0x136   :  { %v8486_v43 = vpop.eup %7883  ;;  %6741 = vmatpush.xpose.msk.msra.mxu0 %vm518_vm0, %v1133_v18 }
 0x137   :  { %v832_v44 = vsel %vm729_vm1, %v8486_v43, 0.0 }
 0x138   :  { %737 = vmax.xlane.f32.xlu1 %v736_v28 }
 0x140   :  { %758 = vmax.xlane.f32.xlu1 %v757_v34 }
 0x148   :  { %803 = vadd.xlane.f32.xlu1 %v802_v39 }
 0x150   :  { %827 = vadd.xlane.f32.xlu1 %v826_v42 }
 0x158   :  { %833 = vadd.xlane.f32.xlu1 %v832_v44  ;;  %v7170_v44 = vunpack.c.h.bf16 %v7694_v38 }
 0x15a   :  { %v480_v51 = vmul.f32 %v8496_v46, %v7170_v44 }
 0x15c   :  { %v495_v12 = vadd.f32 %v8501_v48, %v480_v51 }
 0x15e   :  { %v507_v57 = vmax.f32 %v495_v12, 0.0 }
 0x160   :  { %882 = vmatpush.msrb.mxu3 %v507_v57 }
 0x162   :  { %883 = vmatpush.msrb.mxu3 %v506_v0 }
 0x18a   :  { %v822_v19 = vpop.xlane.xlu0 %821 }
 0x18b   :  { %7885 = vrcp.f32 %v822_v19 }
 0x191   :  { %v7886_v22 = vpop.eup %7885 }
 0x192   :  { %v856_v24 = vmul.f32 %v7886_v22, %v8447_v8  ;;  %v735_v27 = vpop.xlane.xlu0 %734  ;;  %v7679_v8 = vld [vmem:[%s11249_s0 + $0x8] sm:$0xff]  }
 0x193   :  { %v767_v4 = vsub.f32 %v8434_v53, %v735_v27  ;;  %v816_v28 = vpop.xlane.xlu1 %815  ;;  %v1129_v53 = vadd.f32 %v8525_v7, %v1114_v33  ;;  %v7109_v49 = vunpack.c.l.bf16 %v7679_v8  ;;  %v7110_v9 = vunpack.c.h.bf16 %v7679_v8  ;;  %v7775_v22 = vld [vmem:[%s11249_s0 + $0x308] sm:$0xff]  }
 0x194   :  { %7887 = vrcp.f32 %v816_v28  ;;  %6734 = vmatmul.msk.f32.vlgmr.msra.gmra.mxu1 %vm729_vm1, %v856_v24  ;;  %v7493_v29 = vunpack.c.l.bf16 %v7775_v22 }
 0x195   :  { %v780_v30 = vmul.f32 1.442695, %v767_v4  ;;  %v1052_v55 = vmul.f32 %v8557_v50, %v7109_v49  ;;  %v1053_v18 = vmul.f32 %v8557_v50, %v7110_v9 }
 0x197   :  { %7889 = vpow2.f32 %v780_v30  ;;  %v1067_v5 = vadd.f32 %v8569_v56, %v1052_v55  ;;  %v1068_v28 = vadd.f32 %v8569_v56, %v1053_v18 }
 0x199   :  { %v1079_v16 = vmax.f32 %v1067_v5, 0.0  ;;  %v1080_v33 = vmax.f32 %v1068_v28, 0.0 }
 0x19a   :  { %v7888_v34 = vpop.eup %7887  ;;  %v741_v35 = vpop.xlane.xlu0 %740 }
 0x19b   :  { %v854_v39 = vmul.f32 %v7888_v34, %v8451_v17  ;;  %v769_v40 = vsub.f32 %v8443_v60, %v741_v35  ;;  %v819_v42 = vpop.xlane.xlu1 %818  ;;  %v1141_v17 = vmax.f32 %v1129_v53, 0.0  ;;  %v1060_v34 = vmul.f32 %v8557_v50, %v7493_v29 }
 0x19c   :  { %7891 = vrcp.f32 %v819_v42 }
 0x19d   :  { %v8551_v45 = vpop.eup %7889  ;;  %v784_v47 = vmul.f32 1.442695, %v769_v40  ;;  %6732 = vmatmul.msk.f32.vlgmr.msrb.gmra.mxu0 %vm729_vm1, %v854_v39 }
 0x19e   :  { %v805_v60 = vsel %vm729_vm1, %v8551_v45, 0.0  ;;  %6756 = vmatpush.xpose.msk.msrb.mxu0 %vm518_vm0, %v1142_v36  ;;  %v7494_v36 = vunpack.c.h.bf16 %v7775_v22 }
 0x19f   :  { %7893 = vpow2.f32 %v784_v47  ;;  %806 = vadd.xlane.f32.xlu2 %v805_v60 }
 0x1a0   :  { %v1061_v44 = vmul.f32 %v8557_v50, %v7494_v36 }
 0x1a2   :  { %v7892_v59 = vpop.eup %7891  ;;  %6757 = vmatpush.xpose.msk.msrb.mxu0 %vm518_vm0, %v1141_v17  ;;  %v765_v31 = vpop.xlane.xlu0 %764 }
 0x1a3   :  { %v825_v62 = vpop.xlane.xlu1 %824  ;;  %v855_v63 = vmul.f32 %v7892_v59, %v8459_v23  ;;  %v503_v23 = vadd.f32 %v8501_v48, %v488_v10  ;;  %v7238_v59 = vunpack.c.h.bf16 %v7711_v58 }
 0x1a4   :  { %7895 = vrcp.f32 %v825_v62  ;;  %v7237_v62 = vunpack.c.l.bf16 %v7711_v58 }
 0x1a5   :  { %v8577_v2 = vpop.eup %7893  ;;  %6733 = vmatmul.msk.f32.gmra.mxu0 %vm729_vm1, %v855_v63  ;;  %v515_v19 = vmax.f32 %v503_v23, 0.0 }
 0x1a6   :  { %v811_v14 = vsel %vm729_vm1, %v8577_v2, 0.0  ;;  %v1108_v0 = vmul.f32 %v8520_v6, %v7237_v62 }
 0x1a7   :  { %812 = vadd.xlane.f32.xlu2 %v811_v14  ;;  %998 = vmatpush.msra.mxu2 %v515_v19  ;;  %v7718_v14 = vld [vmem:[%s11249_s0 + $0x140] sm:$0xff]   ;;  %v7206_v19 = vunpack.c.h.bf16 %v7703_v1 }
 0x1a8   :  { %v1123_v5 = vadd.f32 %v8525_v7, %v1108_v0  ;;  %v7266_v23 = vunpack.c.h.bf16 %v7718_v14  ;;  %v7265_v18 = vunpack.c.l.bf16 %v7718_v14 }
 0x1a9   :  { %999 = vmatpush.msra.mxu2 %v514_v3 }
 0x1aa   :  { %v7896_v21 = vpop.eup %7895  ;;  %v1135_v10 = vmax.f32 %v1123_v5, 0.0  ;;  %v481_v22 = vmul.f32 %v8496_v46, %v7265_v18 }
 0x1ab   :  { %v738_v24 = vpop.xlane.xlu1 %737  ;;  %v857_v27 = vmul.f32 %v7896_v21, %v8465_v26  ;;  %v777_v26 = vsub.f32 %v8463_v25, %v765_v31 }
 0x1ac   :  { %v768_v4 = vsub.f32 %v8437_v13, %v738_v24  ;;  %v1075_v13 = vadd.f32 %v8569_v56, %v1060_v34  ;;  %v7622_v24 = vunpack.c.h.bf16 %v7807_v20  ;;  %v7621_v34 = vunpack.c.l.bf16 %v7807_v20 }
 0x1ad   :  { %6735 = vmatmul.msk.f32.gmra.mxu1 %vm729_vm1, %v857_v27  ;;  %6742 = vmatmul.msk.f32.vlgmr.msra.gmra.mxu0 %vm518_vm0, %v1079_v16  ;;  %v800_v40 = vmul.f32 1.442695, %v777_v26  ;;  %v482_v16 = vmul.f32 %v8496_v46, %v7266_v23  ;;  %v1055_v27 = vmul.f32 %v8557_v50, %v7206_v19 }
 0x1ae   :  { %v782_v30 = vmul.f32 1.442695, %v768_v4  ;;  %v1087_v42 = vmax.f32 %v1075_v13, 0.0  ;;  %v496_v4 = vadd.f32 %v8501_v48, %v481_v22  ;;  %v1117_v28 = vmul.f32 %v8520_v6, %v7622_v24  ;;  %v7799_v13 = vld [vmem:[%s11249_s0 + $0x3c8] sm:$0xff]  }
 0x1af   :  { %v497_v21 = vadd.f32 %v8501_v48, %v482_v16  ;;  %v7589_v36 = vunpack.c.l.bf16 %v7799_v13 }
 0x1b0   :  { %7897 = vpow2.f32 %v782_v30  ;;  %v1070_v30 = vadd.f32 %v8569_v56, %v1055_v27  ;;  %v508_v31 = vmax.f32 %v496_v4, 0.0 }
 0x1b1   :  { %v509_v3 = vmax.f32 %v497_v21, 0.0 }
 0x1b3   :  { %v759_v35 = vpop.xlane.xlu1 %758  ;;  %911 = vmatpush.msra.mxu3 %v509_v3 }
 0x1b4   :  { %v775_v8 = vsub.f32 %v8474_v32, %v759_v35  ;;  %v1076_v32 = vadd.f32 %v8569_v56, %v1061_v44  ;;  %v1082_v35 = vmax.f32 %v1070_v30, 0.0 }
 0x1b5   :  { %6743 = vmatmul.msk.f32.gmra.mxu0 %vm518_vm0, %v1080_v33  ;;  %v1132_v33 = vadd.f32 %v8525_v7, %v1117_v28  ;;  %912 = vmatpush.msra.mxu3 %v508_v31 }
 0x1b6   :  { %v8601_v53 = vpop.eup %7897  ;;  %v796_v38 = vmul.f32 1.442695, %v775_v8  ;;  %v1088_v52 = vmax.f32 %v1076_v32, 0.0  ;;  %v1116_v8 = vmul.f32 %v8520_v6, %v7621_v34 }
 0x1b7   :  { %v808_v39 = vsel %vm729_vm1, %v8601_v53, 0.0  ;;  %v1144_v26 = vmax.f32 %v1132_v33, 0.0 }
 0x1b8   :  { %7899 = vpow2.f32 %v796_v38  ;;  %809 = vadd.xlane.f32.xlu0 %v808_v39  ;;  %v1131_v38 = vadd.f32 %v8525_v7, %v1116_v8  ;;  %v1062_v39 = vmul.f32 %v8557_v50, %v7589_v36  ;;  %v7735_v36 = vld [vmem:[%s11249_s0 + $0x1c8] sm:$0xff]  }
 0x1b9   :  { %7901 = vpow2.f32 %v800_v40 }
 0x1ba   :  { %v1077_v32 = vadd.f32 %v8569_v56, %v1062_v39  ;;  %v7695_v39 = vld [vmem:[%s11249_s0 + $0x88] sm:$0xff]  }
 0x1bb   :  { %v804_v25 = vpop.xlane.xlu1 %803 }
 0x1bc   :  { %7903 = vrcp.f32 %v804_v25 }
 0x1bd   :  { %6758 = vmatmul.msk.f32.vlgmr.msrb.gmra.mxu0 %vm518_vm0, %v1087_v42  ;;  %v1143_v42 = vmax.f32 %v1131_v38, 0.0  ;;  %v7727_v38 = vld [vmem:[%s11249_s0 + $0x188] sm:$0xff]  }
 0x1be   :  { %v8608_v47 = vpop.eup %7899 }
 0x1bf   :  { %v829_v49 = vsel %vm729_vm1, %v8608_v47, 0.0  ;;  %v8612_v51 = vpop.eup %7901 }
 0x1c0   :  { %830 = vadd.xlane.f32.xlu0 %v829_v49  ;;  %v835_v54 = vsel %vm729_vm1, %v8612_v51, 0.0  ;;  %v7814_v49 = vld [vmem:[%s11249_s0 + $0x440] sm:$0xff]  }
 0x1c2   :  { %v7904_v60 = vpop.eup %7903 }
 0x1c3   :  { %v828_v17 = vpop.xlane.xlu1 %827  ;;  %v850_v12 = vmul.f32 %v7904_v60, %v8478_v37  ;;  %v1109_v37 = vmul.f32 %v8520_v6, %v7238_v59  ;;  %v1089_v60 = vmax.f32 %v1077_v32, 0.0  ;;  %v7174_v32 = vunpack.c.h.bf16 %v7695_v39 }
 0x1c4   :  { %7905 = vrcp.f32 %v828_v17 }
 0x1c5   :  { %6728 = vmatmul.msk.f32.vlgmr.msrb.gmra.mxu3 %vm729_vm1, %v850_v12  ;;  %6759 = vmatmul.msk.f32.gmra.mxu0 %vm518_vm0, %v1088_v52  ;;  %v1124_v61 = vadd.f32 %v8525_v7, %v1109_v37  ;;  %v7650_v52 = vunpack.c.h.bf16 %v7814_v49  ;;  %v7649_v12 = vunpack.c.l.bf16 %v7814_v49  ;;  %v8715_v49 = vld [vmem:[%s11250_s1 + $0x11] ss:$0 sm:$0xff] }
 0x1c7   :  { %v1136_v63 = vmax.f32 %v1124_v61, 0.0  ;;  %v490_v17 = vmul.f32 %v8496_v46, %v7650_v52 }
 0x1c8   :  { %836 = vadd.xlane.f32.xlu0 %v835_v54  ;;  %v7590_v54 = vunpack.c.h.bf16 %v7799_v13 }
 0x1c9   :  { %6744 = vmatpush.xpose.msk.msrb.mxu1 %vm518_vm0, %v1136_v63 }
 0x1ca   :  { %v7906_v55 = vpop.eup %7905 }
 0x1cb   :  { %v858_v57 = vmul.f32 %v7906_v55, %v8482_v41  ;;  %v7205_v41 = vunpack.c.l.bf16 %v7703_v1  ;;  %v489_v55 = vmul.f32 %v8496_v46, %v7649_v12  ;;  %v834_v14 = vpop.xlane.xlu1 %833 }
 0x1cd   :  { %6736 = vmatmul.msk.f32.vlgmr.msra.gmra.mxu2 %vm729_vm1, %v858_v57  ;;  %v1054_v9 = vmul.f32 %v8557_v50, %v7205_v41  ;;  %6745 = vmatpush.xpose.msk.msrb.mxu1 %vm518_vm0, %v1135_v10  ;;  %v1063_v57 = vmul.f32 %v8557_v50, %v7590_v54  ;;  %v504_v59 = vadd.f32 %v8501_v48, %v489_v55 }
 0x1cf   :  { %v1069_v11 = vadd.f32 %v8569_v56, %v1054_v9  ;;  %v1078_v61 = vadd.f32 %v8569_v56, %v1063_v57  ;;  %v516_v62 = vmax.f32 %v504_v59, 0.0  ;;  %v1161_v57 = vmul.f32 %v8715_v49, %v7174_v32  ;;  %v7688_v32 = vld [vmem:[%s11249_s0 + $0x50] sm:$0xff]  }
 0x1d1   :  { %v1081_v15 = vmax.f32 %v1069_v11, 0.0  ;;  %6760 = vmatpush.xpose.msk.msra.mxu1 %vm518_vm0, %v1144_v26  ;;  %v1090_v63 = vmax.f32 %v1078_v61, 0.0 }
 0x1d3   :  { %6746 = vmatmul.msk.f32.vlgmr.msrb.gmra.mxu1 %vm518_vm0, %v1081_v15 }
 0x1d5   :  { %6761 = vmatpush.xpose.msk.msra.mxu1 %vm518_vm0, %v1143_v42  ;;  %v7333_v42 = vunpack.c.l.bf16 %v7735_v36 }
 0x1db   :  { %6747 = vmatmul.msk.f32.gmra.mxu1 %vm518_vm0, %v1082_v35 }
 0x1e3   :  { %6762 = vmatmul.msk.f32.vlgmr.msra.gmra.mxu1 %vm518_vm0, %v1089_v60 }
 0x1eb   :  { %6763 = vmatmul.msk.f32.gmra.mxu1 %vm518_vm0, %v1090_v63 }
 0x212   :  { %v807_v29 = vpop.xlane.xlu2 %806 }
 0x213   :  { %7907 = vrcp.f32 %v807_v29 }
 0x219   :  { %v7908_v40 = vpop.eup %7907 }
 0x21a   :  { %v8658_v44 = vpop.f32.mrf.mxu0  ;;  %v851_v25 = vmul.f32 %v7908_v40, %v8551_v45  ;;  %v505_v45 = vadd.f32 %v8501_v48, %v490_v17  ;;  %v813_v46 = vpop.xlane.xlu2 %812  ;;  %v7334_v40 = vunpack.c.h.bf16 %v7735_v36  ;;  %v8722_v17 = vld [vmem:[%s11251_s2 + $0x11] ss:$0 sm:$0xff] }
 0x21c   :  { %6729 = vmatmul.msk.f32.gmra.mxu3 %vm729_vm1, %v851_v25  ;;  %v517_v58 = vmax.f32 %v505_v45, 0.0  ;;  %v7301_v25 = vunpack.c.l.bf16 %v7727_v38  ;;  %v1111_v54 = vmul.f32 %v8520_v6, %v7334_v40  ;;  %v1110_v45 = vmul.f32 %v8520_v6, %v7333_v42 }
 0x21e   :  { %1027 = vmatpush.msrb.mxu3 %v517_v58  ;;  %v1056_v55 = vmul.f32 %v8557_v50, %v7301_v25  ;;  %v1126_v59 = vadd.f32 %v8525_v7, %v1111_v54  ;;  %v1125_v61 = vadd.f32 %v8525_v7, %v1110_v45  ;;  %v1036_v25 = vld [vmem:[%s11252_s3] sm:$0xf]  ;;  %v8787_v45 = vld [vmem:[%s11251_s2 + $0xa] ss:$0 sm:$0xff] }
 0x220   :  { %1028 = vmatpush.msrb.mxu3 %v516_v62  ;;  %v1176_v62 = vadd.f32 %v8722_v17, %v1161_v57 }
 0x222   :  { %v8673_v37 = vpop.f32.mrf.mxu0 }
 0x22a   :  { %v1228_v0 = vpop.f32.mrf.mxu0 }
 0x22b   :  { %v810_v1 = vpop.xlane.xlu0 %809  ;;  %v1409_v41 = vsel %vm729_vm1, %v1228_v0, -inf }
 0x22c   :  { %7909 = vrcp.f32 %v810_v1  ;;  %1410 = vmax.xlane.f32.xlu2 %v1409_v41  ;;  %v1071_v41 = vadd.f32 %v8569_v56, %v1056_v55 }
 0x22d   :  { %7911 = vrcp.f32 %v813_v46 }
 0x232   :  { %v7910_v5 = vpop.eup %7909  ;;  %v1231_v48 = vpop.f32.mrf.mxu0 }
 0x233   :  { %v852_v9 = vmul.f32 %v7910_v5, %v8601_v53  ;;  %v831_v10 = vpop.xlane.xlu0 %830  ;;  %v1412_v11 = vsel %vm729_vm1, %v1231_v48, -inf  ;;  %v7912_v23 = vpop.eup %7911  ;;  %v1137_v5 = vmax.f32 %v1125_v61, 0.0 }
 0x234   :  { %7913 = vrcp.f32 %v831_v10  ;;  %1413 = vmax.xlane.f32.xlu1 %v1412_v11  ;;  %v853_v19 = vmul.f32 %v7912_v23, %v8577_v2  ;;  %v1188_v10 = vmax.f32 %v1176_v62, 0.0 }
 0x235   :  { %6730 = vmatmul.msk.f32.vlgmr.msra.gmra.mxu3 %vm729_vm1, %v852_v9  ;;  %7915 = vrcp.f32 %v834_v14  ;;  %v1083_v14 = vmax.f32 %v1071_v41, 0.0 }
 0x23a   :  { %v7914_v15 = vpop.eup %7913  ;;  %v1368_v16 = vpop.f32.mrf.mxu0 }
 0x23b   :  { %v1433_v18 = vsel %vm729_vm1, %v1368_v16, -inf  ;;  %v859_v20 = vmul.f32 %v7914_v15, %v8608_v47  ;;  %v837_v53 = vpop.xlane.xlu0 %836  ;;  %v7916_v21 = vpop.eup %7915 }
 0x23c   :  { %1434 = vmax.xlane.f32.xlu2 %v1433_v18  ;;  %7917 = vrcp.f32 %v837_v53  ;;  %v860_v24 = vmul.f32 %v7916_v21, %v8486_v43  ;;  %v8691_v47 = vpop.f32.mrf.mxu1  ;;  %v7302_v53 = vunpack.c.h.bf16 %v7727_v38 }
 0x23d   :  { %6731 = vmatmul.msk.f32.gmra.mxu3 %vm729_vm1, %v853_v19  ;;  %6737 = vmatmul.msk.f32.gmra.mxu2 %vm729_vm1, %v859_v20 }
 0x23e   :  { %v1057_v21 = vmul.f32 %v8557_v50, %v7302_v53 }
 0x242   :  { %v1371_v22 = vpop.f32.mrf.mxu0  ;;  %v7918_v3 = vpop.eup %7917 }
 0x243   :  { %v1436_v27 = vsel %vm729_vm1, %v1371_v22, -inf  ;;  %v861_v2 = vmul.f32 %v7918_v3, %v8612_v51 }
 0x244   :  { %1437 = vmax.xlane.f32.xlu0 %v1436_v27  ;;  %v8693_v4 = vpop.f32.mrf.mxu1  ;;  %v7173_v27 = vunpack.c.l.bf16 %v7695_v39 }
 0x245   :  { %6738 = vmatmul.msk.f32.vlgmr.msrb.gmra.mxu3 %vm729_vm1, %v860_v24 }
 0x246   :  { %v1160_v3 = vmul.f32 %v8715_v49, %v7173_v27 }
 0x24d   :  { %6739 = vmatmul.msk.f32.gmra.mxu3 %vm729_vm1, %v861_v2  ;;  %v1175_v2 = vadd.f32 %v8722_v17, %v1160_v3 }
 0x250   :  { %v8695_v30 = vpop.f32.mrf.mxu1 }
 0x251   :  { %v1415_v46 = vsel %vm729_vm1, %v8695_v30, -inf }
 0x258   :  { %v8701_v26 = vpop.f32.mrf.mxu1 }
 0x259   :  { %v1418_v15 = vsel %vm729_vm1, %v8701_v26, -inf }
 0x260   :  { %v8730_v58 = vpop.f32.mrf.mxu1 }
 0x261   :  { %v1439_v20 = vsel %vm729_vm1, %v8730_v58, -inf }
 0x268   :  { %v8744_v23 = vpop.f32.mrf.mxu1 }
 0x269   :  { %v1442_v18 = vsel %vm729_vm1, %v8744_v23, -inf }
 0x29f   :  { %v1411_v28 = vpop.xlane.xlu2 %1410 }
 0x2a0   :  { %v1445_v29 = vsub.f32 %v1228_v0, %v1411_v28  ;;  %v1138_v0 = vmax.f32 %v1126_v59, 0.0  ;;  %v1187_v28 = vmax.f32 %v1175_v2, 0.0 }
 0x2a2   :  { %v1457_v31 = vmul.f32 1.442695, %v1445_v29  ;;  %6748 = vmatpush.xpose.msk.msrb.mxu2 %vm518_vm0, %v1138_v0  ;;  %v7791_v29 = vld [vmem:[%s11249_s0 + $0x388] sm:$0xff]  }
 0x2a4   :  { %7919 = vpow2.f32 %v1457_v31  ;;  %v7558_v31 = vunpack.c.h.bf16 %v7791_v29 }
 0x2a6   :  { %6749 = vmatpush.xpose.msk.msrb.mxu2 %vm518_vm0, %v1137_v5 }
 0x2a7   :  { %v1414_v43 = vpop.xlane.xlu1 %1413 }
 0x2a8   :  { %v1446_v33 = vsub.f32 %v1231_v48, %v1414_v43  ;;  %v1169_v43 = vmul.f32 %v8715_v49, %v7558_v31  ;;  %v1001_v31 = vpop.f32.mrf.mxu2 }
 0x2a9   :  { %6750 = vmatmul.msk.f32.vlgmr.msrb.gmra.mxu2 %vm518_vm0, %v1083_v14 }
 0x2aa   :  { %v8697_v34 = vpop.eup %7919  ;;  %v1459_v35 = vmul.f32 1.442695, %v1446_v33  ;;  %1561 = vmatpush.msra.mxu2 %v1188_v10  ;;  %v1184_v33 = vadd.f32 %v8722_v17, %v1169_v43 }
 0x2ab   :  { %v1481_v51 = vsel %vm729_vm1, %v8697_v34, 0.0 }
 0x2ac   :  { %7921 = vpow2.f32 %v1459_v35  ;;  %1482 = vadd.xlane.f32.xlu1 %v1481_v51  ;;  %1562 = vmatpush.msra.mxu2 %v1187_v28  ;;  %v1196_v35 = vmax.f32 %v1184_v33, 0.0  ;;  %v7557_v51 = vunpack.c.l.bf16 %v7791_v29  ;;  %v8823_v28 = vpop.f32.mrf.mxu3 }
 0x2ae   :  { %1677 = vmatpush.msrb.mxu2 %v1196_v35 }
 0x2af   :  { %v1435_v8 = vpop.xlane.xlu2 %1434 }
 0x2b0   :  { %v1453_v13 = vsub.f32 %v1368_v16, %v1435_v8  ;;  %v1168_v8 = vmul.f32 %v8715_v49, %v7557_v51 }
 0x2b2   :  { %v8717_v52 = vpop.eup %7921  ;;  %v1473_v60 = vmul.f32 1.442695, %v1453_v13  ;;  %v1183_v13 = vadd.f32 %v8722_v17, %v1168_v8 }
 0x2b3   :  { %v1484_v12 = vsel %vm729_vm1, %v8717_v52, 0.0 }
 0x2b4   :  { %7923 = vpow2.f32 %v1473_v60  ;;  %1485 = vadd.xlane.f32.xlu2 %v1484_v12  ;;  %v1195_v36 = vmax.f32 %v1183_v13, 0.0  ;;  %v7146_v60 = vunpack.c.h.bf16 %v7688_v32 }
 0x2b6   :  { %1678 = vmatpush.msrb.mxu2 %v1195_v36 }
 0x2b7   :  { %v1438_v63 = vpop.xlane.xlu0 %1437 }
 0x2b8   :  { %v1454_v1 = vsub.f32 %v1371_v22, %v1438_v63  ;;  %v1072_v22 = vadd.f32 %v8569_v56, %v1057_v21 }
 0x2ba   :  { %v8739_v48 = vpop.eup %7923  ;;  %v1475_v9 = vmul.f32 1.442695, %v1454_v1  ;;  %v1084_v24 = vmax.f32 %v1072_v22, 0.0 }
 0x2bb   :  { %v1505_v11 = vsel %vm729_vm1, %v8739_v48, 0.0 }
 0x2bc   :  { %7925 = vpow2.f32 %v1475_v9  ;;  %1506 = vadd.xlane.f32.xlu0 %v1505_v11  ;;  %1416 = vmax.xlane.f32.xlu2 %v1415_v46 }
 0x2bd   :  { %6751 = vmatmul.msk.f32.gmra.mxu2 %vm518_vm0, %v1084_v24 }
 0x2c0   :  { %v1004_v8 = vpop.f32.mrf.mxu2 }
 0x2c2   :  { %v8749_v16 = vpop.eup %7925 }
 0x2c3   :  { %v1508_v19 = vsel %vm729_vm1, %v8749_v16, 0.0 }
 0x2c4   :  { %1419 = vmax.xlane.f32.xlu0 %v1418_v15  ;;  %1509 = vadd.xlane.f32.xlu1 %v1508_v19 }
 0x2c5   :  { %1443 = vmax.xlane.f32.xlu2 %v1442_v18 }
 0x2cc   :  { %1440 = vmax.xlane.f32.xlu1 %v1439_v20 }
 0x31f   :  { %v1483_v38 = vpop.xlane.xlu1 %1482 }
 0x320   :  { %7927 = vrcp.f32 %v1483_v38 }
 0x326   :  { %v7928_v39 = vpop.eup %7927 }
 0x327   :  { %v1529_v40 = vmul.f32 %v7928_v39, %v8697_v34  ;;  %v1486_v42 = vpop.xlane.xlu2 %1485  ;;  %v8781_v34 = vld [vmem:[%s11250_s1 + $0xa] ss:$0 sm:$0xff] }
 0x328   :  { %7929 = vrcp.f32 %v1486_v42  ;;  %v1972_v54 = vmul.f32 %v8781_v34, %v7146_v60 }
 0x329   :  { %6764 = vmatmul.msk.f32.vlgmr.msra.gmra.mxu2 %vm729_vm1, %v1529_v40  ;;  %v7680_v40 = vld [vmem:[%s11249_s0 + $0x10] sm:$0xff]  }
 0x32a   :  { %7822 = vmatpush.msk.msra.mxu2 %vm1753_vm2, %v1036_v25  ;;  %v1987_v63 = vadd.f32 %v8787_v45, %v1972_v54  ;;  %v7113_v42 = vunpack.c.l.bf16 %v7680_v40  ;;  %v8854_v25 = vld [vmem:[%s11250_s1 + $0x2] ss:$0 sm:$0xff] }
 0x32b   :  { %v8863_v54 = vld [vmem:[%s11251_s2 + $0x2] ss:$0 sm:$0xff] }
 0x32c   :  { %v1999_v1 = vmax.f32 %v1987_v63, 0.0  ;;  %v7114_v63 = vunpack.c.h.bf16 %v7680_v40 }
 0x32e   :  { %v7930_v12 = vpop.eup %7929 }
 0x32f   :  { %v1507_v55 = vpop.xlane.xlu0 %1506  ;;  %v1417_v57 = vpop.xlane.xlu2 %1416  ;;  %v1530_v59 = vmul.f32 %v7930_v12, %v8717_v52  ;;  %v1917_v12 = vmul.f32 %v8854_v25, %v7113_v42 }
 0x330   :  { %7931 = vrcp.f32 %v1507_v55  ;;  %v1447_v61 = vsub.f32 %v8695_v30, %v1417_v57 }
 0x331   :  { %6765 = vmatmul.msk.f32.gmra.mxu2 %vm729_vm1, %v1530_v59 }
 0x332   :  { %v1461_v62 = vmul.f32 1.442695, %v1447_v61 }
 0x334   :  { %7933 = vpow2.f32 %v1461_v62  ;;  %v1932_v62 = vadd.f32 %v8863_v54, %v1917_v12 }
 0x336   :  { %v7932_v0 = vpop.eup %7931 }
 0x337   :  { %v1537_v41 = vmul.f32 %v7932_v0, %v8739_v48  ;;  %v1420_v46 = vpop.xlane.xlu0 %1419  ;;  %v1510_v5 = vpop.xlane.xlu1 %1509 }
 0x338   :  { %v1448_v9 = vsub.f32 %v8701_v26, %v1420_v46  ;;  %v1444_v10 = vpop.xlane.xlu2 %1443  ;;  %7935 = vrcp.f32 %v1510_v5 }
 0x339   :  { %v1456_v52 = vsub.f32 %v8744_v23, %v1444_v10  ;;  %6772 = vmatmul.msk.f32.vlgmr.msrb.gmra.mxu2 %vm729_vm1, %v1537_v41  ;;  %v7751_v41 = vld [vmem:[%s11249_s0 + $0x248] sm:$0xff]   ;;  %v1944_v10 = vmax.f32 %v1932_v62, 0.0 }
 0x33a   :  { %v8797_v30 = vpop.eup %7933  ;;  %v1463_v11 = vmul.f32 1.442695, %v1448_v9  ;;  %6803 = vmatpush.xpose.msk.msrb.mxu2 %vm518_vm0, %v1999_v1  ;;  %v7397_v46 = vunpack.c.l.bf16 %v7751_v41 }
 0x33b   :  { %v1479_v14 = vmul.f32 1.442695, %v1456_v52  ;;  %v1487_v15 = vsel %vm729_vm1, %v8797_v30, 0.0  ;;  %v1918_v52 = vmul.f32 %v8854_v25, %v7114_v63 }
 0x33c   :  { %7937 = vpow2.f32 %v1463_v11  ;;  %1488 = vadd.xlane.f32.xlu0 %v1487_v15  ;;  %v1058_v9 = vmul.f32 %v8557_v50, %v7397_v46 }
 0x33d   :  { %7939 = vpow2.f32 %v1479_v14  ;;  %v7728_v14 = vld [vmem:[%s11249_s0 + $0x190] sm:$0xff]  }
 0x33e   :  { %v7936_v48 = vpop.eup %7935 }
 0x33f   :  { %v1441_v26 = vpop.xlane.xlu1 %1440  ;;  %v1538_v18 = vmul.f32 %v7936_v48, %v8749_v16  ;;  %v1933_v48 = vadd.f32 %v8863_v54, %v1918_v52 }
 0x340   :  { %v1455_v23 = vsub.f32 %v8730_v58, %v1441_v26  ;;  %v7145_v58 = vunpack.c.l.bf16 %v7688_v32  ;;  %v7759_v32 = vld [vmem:[%s11249_s0 + $0x288] sm:$0xff]   ;;  %v7398_v26 = vunpack.c.h.bf16 %v7751_v41 }
 0x341   :  { %6773 = vmatmul.msk.f32.gmra.mxu2 %vm729_vm1, %v1538_v18  ;;  %v7430_v60 = vunpack.c.h.bf16 %v7759_v32  ;;  %v7429_v59 = vunpack.c.l.bf16 %v7759_v32 }
 0x342   :  { %v8805_v19 = vpop.eup %7937  ;;  %v1477_v20 = vmul.f32 1.442695, %v1455_v23  ;;  %v1971_v27 = vmul.f32 %v8781_v34, %v7145_v58  ;;  %v1059_v18 = vmul.f32 %v8557_v50, %v7398_v26  ;;  %v1945_v23 = vmax.f32 %v1933_v48, 0.0 }
 0x343   :  { %v8807_v53 = vpop.eup %7939  ;;  %v1490_v21 = vsel %vm729_vm1, %v8805_v19, 0.0  ;;  %v1113_v55 = vmul.f32 %v8520_v6, %v7430_v60  ;;  %v1112_v1 = vmul.f32 %v8520_v6, %v7429_v59  ;;  %v1073_v6 = vadd.f32 %v8569_v56, %v1058_v9  ;;  %v7712_v59 = vld [vmem:[%s11249_s0 + $0x110] sm:$0xff]  }
 0x344   :  { %7941 = vpow2.f32 %v1477_v20  ;;  %1491 = vadd.xlane.f32.xlu1 %v1490_v21  ;;  %v1514_v22 = vsel %vm729_vm1, %v8807_v53, 0.0  ;;  %v1986_v3 = vadd.f32 %v8787_v45, %v1971_v27  ;;  %v1074_v21 = vadd.f32 %v8569_v56, %v1059_v18  ;;  %v7776_v18 = vld [vmem:[%s11249_s0 + $0x310] sm:$0xff]  }
 0x345   :  { %1515 = vadd.xlane.f32.xlu0 %v1514_v22  ;;  %v1128_v57 = vadd.f32 %v8525_v7, %v1113_v55  ;;  %v1127_v5 = vadd.f32 %v8525_v7, %v1112_v1  ;;  %v1085_v15 = vmax.f32 %v1073_v6, 0.0  ;;  %v7305_v7 = vunpack.c.l.bf16 %v7728_v14  ;;  %v7719_v22 = vld [vmem:[%s11249_s0 + $0x148] sm:$0xff]  }
 0x346   :  { %v1998_v2 = vmax.f32 %v1986_v3, 0.0  ;;  %v7270_v58 = vunpack.c.h.bf16 %v7719_v22  ;;  %v7306_v3 = vunpack.c.h.bf16 %v7728_v14  ;;  %v7241_v1 = vunpack.c.l.bf16 %v7712_v59 }
 0x347   :  { %v1140_v0 = vmax.f32 %v1128_v57, 0.0  ;;  %v1139_v11 = vmax.f32 %v1127_v5, 0.0  ;;  %v1921_v20 = vmul.f32 %v8854_v25, %v7305_v7 }
 0x348   :  { %6804 = vmatpush.xpose.msk.msrb.mxu2 %vm518_vm0, %v1998_v2  ;;  %v1163_v2 = vmul.f32 %v8715_v49, %v7270_v58  ;;  %v1973_v41 = vmul.f32 %v8781_v34, %v7241_v1 }
 0x349   :  { %6795 = vmatmul.msk.f32.vlgmr.msra.gmra.mxu2 %vm518_vm0, %v8658_v44  ;;  %v8828_v44 = vpop.f32.mrf.mxu3  ;;  %6752 = vmatpush.xpose.msk.msra.mxu3 %vm518_vm0, %v1140_v0  ;;  %v1936_v27 = vadd.f32 %v8863_v54, %v1921_v20  ;;  %v7497_v20 = vunpack.c.l.bf16 %v7776_v18 }
 0x34a   :  { %v8815_v16 = vpop.eup %7941  ;;  %v1178_v50 = vadd.f32 %v8722_v17, %v1163_v2 }
 0x34b   :  { %v1511_v24 = vsel %vm729_vm1, %v8815_v16, 0.0 }
 0x34c   :  { %1512 = vadd.xlane.f32.xlu2 %v1511_v24  ;;  %v1086_v24 = vmax.f32 %v1074_v21, 0.0 }
 0x34d   :  { %6753 = vmatpush.xpose.msk.msra.mxu3 %vm518_vm0, %v1139_v11  ;;  %v1988_v11 = vadd.f32 %v8787_v45, %v1973_v41 }
 0x350   :  { %6754 = vmatmul.msk.f32.vlgmr.msra.gmra.mxu3 %vm518_vm0, %v1085_v15 }
 0x351   :  { %6796 = vmatmul.msk.f32.gmra.mxu2 %vm518_vm0, %v8673_v37  ;;  %v8832_v29 = vpop.f32.mrf.mxu3  ;;  %v7736_v37 = vld [vmem:[%s11249_s0 + $0x1d0] sm:$0xff]  }
 0x352   :  { %v7338_v43 = vunpack.c.h.bf16 %v7736_v37  ;;  %v7337_v51 = vunpack.c.l.bf16 %v7736_v37  ;;  %v1948_v37 = vmax.f32 %v1936_v27, 0.0 }
 0x354   :  { %v1976_v35 = vmul.f32 %v8781_v34, %v7338_v43  ;;  %v1975_v13 = vmul.f32 %v8781_v34, %v7337_v51  ;;  %v1922_v43 = vmul.f32 %v8854_v25, %v7306_v3 }
 0x356   :  { %v1990_v36 = vadd.f32 %v8787_v45, %v1975_v13 }
 0x358   :  { %v2002_v38 = vmax.f32 %v1990_v36, 0.0  ;;  %6755 = vmatmul.msk.f32.gmra.mxu3 %vm518_vm0, %v1086_v24  ;;  %v7815_v36 = vld [vmem:[%s11249_s0 + $0x448] sm:$0xff]   ;;  %v1925_v24 = vmul.f32 %v8854_v25, %v7497_v20 }
 0x359   :  { %6797 = vmatmul.msk.f32.gmra.mxu2 %vm518_vm0, %v8691_v47  ;;  %v8838_v33 = vpop.f32.mrf.mxu3  ;;  %v1991_v47 = vadd.f32 %v8787_v45, %v1976_v35  ;;  %v1190_v35 = vmax.f32 %v1178_v50, 0.0  ;;  %v7653_v40 = vunpack.c.l.bf16 %v7815_v36 }
 0x35a   :  { %v1940_v2 = vadd.f32 %v8863_v54, %v1925_v24  ;;  %v7800_v24 = vld [vmem:[%s11249_s0 + $0x3d0] sm:$0xff]  }
 0x35b   :  { %1590 = vmatpush.msrb.mxu3 %v1190_v35  ;;  %v1170_v60 = vmul.f32 %v8715_v49, %v7653_v40 }
 0x35d   :  { %v1185_v55 = vadd.f32 %v8722_v17, %v1170_v60 }
 0x35f   :  { %v1197_v57 = vmax.f32 %v1185_v55, 0.0 }
 0x361   :  { %6798 = vmatmul.msk.f32.gmra.mxu2 %vm518_vm0, %v8693_v4  ;;  %v2003_v4 = vmax.f32 %v1991_v47, 0.0  ;;  %v1030_v39 = vpop.f32.mrf.mxu3 }
 0x363   :  { %6811 = vmatpush.xpose.msk.msra.mxu2 %vm518_vm0, %v2003_v4  ;;  %v1937_v4 = vadd.f32 %v8863_v54, %v1922_v43  ;;  %v1952_v43 = vmax.f32 %v1940_v2, 0.0 }
 0x365   :  { %v1949_v13 = vmax.f32 %v1937_v4, 0.0 }
 0x367   :  { %6812 = vmatpush.xpose.msk.msra.mxu2 %vm518_vm0, %v2002_v38  ;;  %v7654_v38 = vunpack.c.h.bf16 %v7815_v36 }
 0x369   :  { %6799 = vmatmul.msk.f32.gmra.mxu2 %vm518_vm0, %v1001_v31  ;;  %v1033_v61 = vpop.f32.mrf.mxu3  ;;  %v7269_v31 = vunpack.c.l.bf16 %v7719_v22 }
 0x36b   :  { %v1162_v56 = vmul.f32 %v8715_v49, %v7269_v31 }
 0x36d   :  { %v1177_v47 = vadd.f32 %v8722_v17, %v1162_v56 }
 0x36f   :  { %v1189_v51 = vmax.f32 %v1177_v47, 0.0 }
 0x371   :  { %6800 = vmatmul.msk.f32.gmra.mxu2 %vm518_vm0, %v1004_v8  ;;  %v8899_v8 = vpop.f32.mrf.mxu2  ;;  %1591 = vmatpush.msrb.mxu3 %v1189_v51  ;;  %v7498_v51 = vunpack.c.h.bf16 %v7776_v18 }
 0x373   :  { %v1926_v36 = vmul.f32 %v8854_v25, %v7498_v51 }
 0x379   :  { %6801 = vmatmul.msk.f32.gmra.mxu2 %vm518_vm0, %v1030_v39  ;;  %v1171_v39 = vmul.f32 %v8715_v49, %v7654_v38  ;;  %v8908_v42 = vpop.f32.mrf.mxu2  ;;  %v7704_v38 = vld [vmem:[%s11249_s0 + $0xd0] sm:$0xff]  }
 0x37a   :  { %v7209_v55 = vunpack.c.l.bf16 %v7704_v38 }
 0x37b   :  { %v1186_v32 = vadd.f32 %v8722_v17, %v1171_v39  ;;  %v7784_v17 = vld [vmem:[%s11249_s0 + $0x350] sm:$0xff]  }
 0x37c   :  { %v7530_v46 = vunpack.c.h.bf16 %v7784_v17  ;;  %v7529_v48 = vunpack.c.l.bf16 %v7784_v17  ;;  %v1919_v1 = vmul.f32 %v8854_v25, %v7209_v55 }
 0x37d   :  { %v1198_v12 = vmax.f32 %v1186_v32, 0.0  ;;  %v1941_v32 = vadd.f32 %v8863_v54, %v1926_v36 }
 0x37e   :  { %v1980_v9 = vmul.f32 %v8781_v34, %v7530_v46  ;;  %v1979_v26 = vmul.f32 %v8781_v34, %v7529_v48  ;;  %v1934_v17 = vadd.f32 %v8863_v54, %v1919_v1  ;;  %v7210_v46 = vunpack.c.h.bf16 %v7704_v38 }
 0x37f   :  { %1706 = vmatpush.msra.mxu3 %v1198_v12  ;;  %v1953_v12 = vmax.f32 %v1941_v32, 0.0 }
 0x380   :  { %v1995_v15 = vadd.f32 %v8787_v45, %v1980_v9  ;;  %v1994_v21 = vadd.f32 %v8787_v45, %v1979_v26 }
 0x381   :  { %6802 = vmatmul.msk.f32.gmra.mxu2 %vm518_vm0, %v1033_v61  ;;  %1707 = vmatpush.msra.mxu3 %v1197_v57  ;;  %v7242_v61 = vunpack.c.h.bf16 %v7712_v59  ;;  %v7808_v59 = vld [vmem:[%s11249_s0 + $0x410] sm:$0xff]  }
 0x382   :  { %v2007_v7 = vmax.f32 %v1995_v15, 0.0  ;;  %v2006_v27 = vmax.f32 %v1994_v21, 0.0  ;;  %v7625_v41 = vunpack.c.l.bf16 %v7808_v59 }
 0x383   :  { %v1974_v63 = vmul.f32 %v8781_v34, %v7242_v61  ;;  %v7626_v61 = vunpack.c.h.bf16 %v7808_v59 }
 0x385   :  { %v1989_v49 = vadd.f32 %v8787_v45, %v1974_v63 }
 0x387   :  { %v2001_v52 = vmax.f32 %v1989_v49, 0.0 }
 0x389   :  { %6805 = vmatmul.msk.f32.vlgmr.msrb.gmra.mxu2 %vm518_vm0, %v1944_v10 }
 0x38a   :  { %6819 = vmatpush.xpose.msk.msrb.mxu2 %vm518_vm0, %v2007_v7 }
 0x38e   :  { %6820 = vmatpush.xpose.msk.msrb.mxu2 %vm518_vm0, %v2006_v27 }
 0x391   :  { %6806 = vmatmul.msk.f32.gmra.mxu2 %vm518_vm0, %v1945_v23  ;;  %v2000_v23 = vmax.f32 %v1988_v11, 0.0  ;;  %v1946_v11 = vmax.f32 %v1934_v17, 0.0 }
 0x399   :  { %6813 = vmatmul.msk.f32.vlgmr.msra.gmra.mxu2 %vm518_vm0, %v1948_v37 }
 0x3a1   :  { %6814 = vmatmul.msk.f32.gmra.mxu2 %vm518_vm0, %v1949_v13 }
 0x3a9   :  { %6821 = vmatmul.msk.f32.vlgmr.msrb.gmra.mxu2 %vm518_vm0, %v1952_v43 }
 0x3ac   :  { %v8916_v62 = vpop.f32.mrf.mxu2 }
 0x3af   :  { %v1489_v0 = vpop.xlane.xlu0 %1488 }
 0x3b0   :  { %7943 = vrcp.f32 %v1489_v0 }
 0x3b1   :  { %6822 = vmatmul.msk.f32.gmra.mxu2 %vm518_vm0, %v1953_v12 }
 0x3b4   :  { %v8924_v5 = vpop.f32.mrf.mxu2 }
 0x3b6   :  { %v7944_v10 = vpop.eup %7943 }
 0x3b7   :  { %v1531_v14 = vmul.f32 %v7944_v10, %v8797_v30  ;;  %v1492_v6 = vpop.xlane.xlu1 %1491  ;;  %v7760_v30 = vld [vmem:[%s11249_s0 + $0x290] sm:$0xff]   ;;  %v1981_v10 = vmul.f32 %v8781_v34, %v7625_v41 }
 0x3b8   :  { %7945 = vrcp.f32 %v1492_v6  ;;  %v7434_v22 = vunpack.c.h.bf16 %v7760_v30  ;;  %v7433_v37 = vunpack.c.l.bf16 %v7760_v30  ;;  %v1516_v4 = vpop.xlane.xlu0 %1515  ;;  %v7752_v6 = vld [vmem:[%s11249_s0 + $0x250] sm:$0xff]  }
 0x3b9   :  { %6766 = vmatmul.msk.f32.vlgmr.msrb.gmra.mxu3 %vm729_vm1, %v1531_v14  ;;  %v1920_v14 = vmul.f32 %v8854_v25, %v7210_v46  ;;  %v1996_v15 = vadd.f32 %v8787_v45, %v1981_v10  ;;  %v7401_v7 = vunpack.c.l.bf16 %v7752_v6 }
 0x3ba   :  { %6807 = vmatpush.xpose.msk.msrb.mxu3 %vm518_vm0, %v2001_v52  ;;  %v1978_v31 = vmul.f32 %v8781_v34, %v7434_v22  ;;  %v1977_v47 = vmul.f32 %v8781_v34, %v7433_v37  ;;  %v7594_v37 = vunpack.c.h.bf16 %v7800_v24 }
 0x3bb   :  { %v1935_v48 = vadd.f32 %v8863_v54, %v1920_v14 }
 0x3bc   :  { %v8941_v58 = vpop.f32.mrf.mxu2  ;;  %v1993_v35 = vadd.f32 %v8787_v45, %v1978_v31  ;;  %v1992_v40 = vadd.f32 %v8787_v45, %v1977_v47  ;;  %v1928_v47 = vmul.f32 %v8854_v25, %v7594_v37 }
 0x3bd   :  { %v1947_v18 = vmax.f32 %v1935_v48, 0.0 }
 0x3be   :  { %v7946_v3 = vpop.eup %7945  ;;  %6808 = vmatpush.xpose.msk.msrb.mxu3 %vm518_vm0, %v2000_v23  ;;  %v2005_v39 = vmax.f32 %v1993_v35, 0.0  ;;  %v2004_v57 = vmax.f32 %v1992_v40, 0.0  ;;  %v1923_v23 = vmul.f32 %v8854_v25, %v7401_v7  ;;  %v1943_v51 = vadd.f32 %v8863_v54, %v1928_v47 }
 0x3bf   :  { %v1513_v50 = vpop.xlane.xlu2 %1512  ;;  %v1532_v56 = vmul.f32 %v7946_v3, %v8805_v19  ;;  %v7593_v3 = vunpack.c.l.bf16 %v7800_v24 }
 0x3c0   :  { %7947 = vrcp.f32 %v1513_v50  ;;  %v1938_v20 = vadd.f32 %v8863_v54, %v1923_v23  ;;  %v1955_v36 = vmax.f32 %v1943_v51, 0.0 }
 0x3c1   :  { %6767 = vmatmul.msk.f32.gmra.mxu3 %vm729_vm1, %v1532_v56  ;;  %7949 = vrcp.f32 %v1516_v4  ;;  %v1927_v50 = vmul.f32 %v8854_v25, %v7593_v3 }
 0x3c2   :  { %v1950_v21 = vmax.f32 %v1938_v20, 0.0 }
 0x3c3   :  { %v1942_v56 = vadd.f32 %v8863_v54, %v1927_v50 }
 0x3c4   :  { %v8953_v13 = vpop.f32.mrf.mxu2 }
 0x3c5   :  { %v1954_v35 = vmax.f32 %v1942_v56, 0.0 }
 0x3c6   :  { %v7948_v19 = vpop.eup %7947 }
 0x3c7   :  { %v1539_v60 = vmul.f32 %v7948_v19, %v8815_v16  ;;  %v7950_v63 = vpop.eup %7949  ;;  %v1982_v16 = vmul.f32 %v8781_v34, %v7626_v61  ;;  %v2008_v34 = vmax.f32 %v1996_v15, 0.0 }
 0x3c8   :  { %v1540_v49 = vmul.f32 %v7950_v63, %v8807_v53 }
 0x3c9   :  { %6774 = vmatmul.msk.f32.vlgmr.msra.gmra.mxu3 %vm729_vm1, %v1539_v60  ;;  %v1997_v9 = vadd.f32 %v8787_v45, %v1982_v16  ;;  %v7402_v45 = vunpack.c.h.bf16 %v7752_v6 }
 0x3ca   :  { %6815 = vmatpush.xpose.msk.msra.mxu3 %vm518_vm0, %v2005_v39 }
 0x3cb   :  { %v2009_v53 = vmax.f32 %v1997_v9, 0.0  ;;  %v1924_v22 = vmul.f32 %v8854_v25, %v7402_v45 }
 0x3cc   :  { %v8968_v0 = vpop.f32.mrf.mxu2 }
 0x3cd   :  { %11256 = vst [vmem:[#allocation2_spill] sm:$0xff] %v8968_v0  ;;  %v1939_v27 = vadd.f32 %v8863_v54, %v1924_v22 }
 0x3ce   :  { %6816 = vmatpush.xpose.msk.msra.mxu3 %vm518_vm0, %v2004_v57 }
 0x3cf   :  { %v1951_v31 = vmax.f32 %v1939_v27, 0.0 }
 0x3d1   :  { %6775 = vmatmul.msk.f32.gmra.mxu3 %vm729_vm1, %v1540_v49 }
 0x3d3   :  { %v9021_v55 = vpop.f32.mrf.mxu3 }
 0x3d4   :  { %v8978_v52 = vpop.f32.mrf.mxu2 }
 0x3d5   :  { %11257 = vst [vmem:[#allocation3_spill] sm:$0xff] %v8978_v52 }
 0x3d9   :  { %6809 = vmatmul.msk.f32.vlgmr.msrb.gmra.mxu3 %vm518_vm0, %v1946_v11 }
 0x3da   :  { %6823 = vmatpush.xpose.msk.msrb.mxu3 %vm518_vm0, %v2009_v53 }
 0x3db   :  { %v9023_v57 = vpop.f32.mrf.mxu3 }
 0x3dc   :  { %v8988_v26 = vpop.f32.mrf.mxu2 }
 0x3de   :  { %6824 = vmatpush.xpose.msk.msrb.mxu3 %vm518_vm0, %v2008_v34 }
 0x3e1   :  { %6810 = vmatmul.msk.f32.gmra.mxu3 %vm518_vm0, %v1947_v18 }
 0x3e4   :  { %v8994_v30 = vpop.f32.mrf.mxu2 }
 0x3e9   :  { %6817 = vmatmul.msk.f32.vlgmr.msra.gmra.mxu3 %vm518_vm0, %v1950_v21 }
 0x3ec   :  { %v9002_v2 = vpop.f32.mrf.mxu2 }
 0x3f1   :  { %6818 = vmatmul.msk.f32.gmra.mxu3 %vm518_vm0, %v1951_v31 }
 0x3f4   :  { %v9007_v43 = vpop.f32.mrf.mxu2 }
 0x3f9   :  { %6825 = vmatmul.msk.f32.vlgmr.msrb.gmra.mxu3 %vm518_vm0, %v1954_v35 }
 0x3fc   :  { %v9012_v4 = vpop.f32.mrf.mxu2 }
 0x401   :  { %6826 = vmatmul.msk.f32.gmra.mxu3 %vm518_vm0, %v1955_v36 }
 0x404   :  { %v9015_v19 = vpop.f32.mrf.mxu2 }
 0x405   :  { %11258 = vst [vmem:[#allocation4_spill] sm:$0xff] %v9015_v19 }
 0x40c   :  { %v2093_v38 = vpop.f32.mrf.mxu2 }
 0x40d   :  { %v2274_v39 = vsel %vm729_vm1, %v2093_v38, -inf }
 0x40e   :  { %2275 = vmax.xlane.f32.xlu1 %v2274_v39  ;;  %v1421_v39 = vsel %vm729_vm1, %v8899_v8, -inf }
 0x414   :  { %v2096_v40 = vpop.f32.mrf.mxu2 }
 0x415   :  { %v2277_v32 = vsel %vm729_vm1, %v2096_v40, -inf }
 0x416   :  { %2278 = vmax.xlane.f32.xlu2 %v2277_v32 }
 0x41c   :  { %v2163_v25 = vpop.f32.mrf.mxu2 }
 0x41d   :  { %v2286_v60 = vsel %vm729_vm1, %v2163_v25, -inf }
 0x41e   :  { %2287 = vmax.xlane.f32.xlu0 %v2286_v60 }
 0x424   :  { %v2166_v54 = vpop.f32.mrf.mxu2 }
 0x425   :  { %v2289_v12 = vsel %vm729_vm1, %v2166_v54, -inf }
 0x426   :  { %2290 = vmax.xlane.f32.xlu2 %v2289_v12  ;;  %v1430_v12 = vsel %vm729_vm1, %v9023_v57, -inf }
 0x42c   :  { %v9034_v41 = vpop.f32.mrf.mxu2 }
 0x42d   :  { %v2298_v17 = vsel %vm729_vm1, %v9034_v41, -inf }
 0x434   :  { %v9042_v10 = vpop.f32.mrf.mxu2 }
 0x435   :  { %v2301_v11 = vsel %vm729_vm1, %v9042_v10, -inf }
 0x43c   :  { %v9025_v59 = vpop.f32.mrf.mxu3 }
 0x444   :  { %v9027_v61 = vpop.f32.mrf.mxu3 }
 0x44c   :  { %v9029_v63 = vpop.f32.mrf.mxu3 }
 0x454   :  { %v9031_v1 = vpop.f32.mrf.mxu3 }
 0x45c   :  { %v2128_v16 = vpop.f32.mrf.mxu3 }
 0x45d   :  { %v2280_v49 = vsel %vm729_vm1, %v2128_v16, -inf }
 0x45e   :  { %2281 = vmax.xlane.f32.xlu1 %v2280_v49 }
 0x464   :  { %v9038_v46 = vpop.f32.mrf.mxu3 }
 0x465   :  { %v2283_v9 = vsel %vm729_vm1, %v9038_v46, -inf }
 0x466   :  { %2299 = vmax.xlane.f32.xlu1 %v2298_v17  ;;  %2284 = vmax.xlane.f32.xlu0 %v2283_v9 }
 0x46c   :  { %v9046_v14 = vpop.f32.mrf.mxu3 }
 0x46d   :  { %v2292_v6 = vsel %vm729_vm1, %v9046_v14, -inf }
 0x46e   :  { %2302 = vmax.xlane.f32.xlu0 %v2301_v11  ;;  %2293 = vmax.xlane.f32.xlu2 %v2292_v6 }
 0x474   :  { %v9050_v53 = vpop.f32.mrf.mxu3 }
 0x475   :  { %v2295_v15 = vsel %vm729_vm1, %v9050_v53, -inf }
 0x476   :  { %2296 = vmax.xlane.f32.xlu1 %v2295_v15 }
 0x47c   :  { %v9054_v48 = vpop.f32.mrf.mxu3 }
 0x47d   :  { %v2304_v7 = vsel %vm729_vm1, %v9054_v48, -inf }
 0x47e   :  { %2305 = vmax.xlane.f32.xlu0 %v2304_v7 }
 0x481   :  { %v2276_v34 = vpop.xlane.xlu1 %2275 }
 0x482   :  { %v2310_v18 = vsub.f32 %v2093_v38, %v2276_v34 }
 0x484   :  { %v2322_v23 = vmul.f32 1.442695, %v2310_v18  ;;  %v9062_v27 = vpop.f32.mrf.mxu3 }
 0x485   :  { %v2307_v50 = vsel %vm729_vm1, %v9062_v27, -inf }
 0x486   :  { %7951 = vpow2.f32 %v2322_v23 }
 0x489   :  { %v2279_v20 = vpop.xlane.xlu2 %2278 }
 0x48a   :  { %v2311_v45 = vsub.f32 %v2096_v40, %v2279_v20 }
 0x48c   :  { %v9058_v21 = vpop.eup %7951  ;;  %v2324_v22 = vmul.f32 1.442695, %v2311_v45 }
 0x48d   :  { %v2346_v24 = vsel %vm729_vm1, %v9058_v21, 0.0 }
 0x48e   :  { %7953 = vpow2.f32 %v2324_v22  ;;  %2347 = vadd.xlane.f32.xlu2 %v2346_v24 }
 0x491   :  { %v2288_v3 = vpop.xlane.xlu0 %2287 }
 0x492   :  { %v2314_v31 = vsub.f32 %v2163_v25, %v2288_v3  ;;  %v1424_v25 = vsel %vm729_vm1, %v8908_v42, -inf }
 0x494   :  { %v9066_v56 = vpop.eup %7953  ;;  %v2330_v37 = vmul.f32 1.442695, %v2314_v31 }
 0x495   :  { %v2349_v35 = vsel %vm729_vm1, %v9066_v56, 0.0 }
 0x496   :  { %7955 = vpow2.f32 %v2330_v37  ;;  %2350 = vadd.xlane.f32.xlu1 %v2349_v35  ;;  %2308 = vmax.xlane.f32.xlu2 %v2307_v50  ;;  %v9106_v50 = vld [vmem:[%s11251_s2 + $0x12] ss:$0 sm:$0xff] }
 0x499   :  { %v2291_v47 = vpop.xlane.xlu2 %2290 }
 0x49a   :  { %v2315_v51 = vsub.f32 %v2166_v54, %v2291_v47  ;;  %v1427_v54 = vsel %vm729_vm1, %v9021_v55, -inf }
 0x49c   :  { %v9070_v36 = vpop.eup %7955  ;;  %v2332_v38 = vmul.f32 1.442695, %v2315_v51 }
 0x49d   :  { %v2358_v40 = vsel %vm729_vm1, %v9070_v36, 0.0 }
 0x49e   :  { %7957 = vpow2.f32 %v2332_v38  ;;  %1422 = vmax.xlane.f32.xlu1 %v1421_v39  ;;  %2359 = vadd.xlane.f32.xlu0 %v2358_v40 }
 0x4a4   :  { %v9076_v32 = vpop.eup %7957 }
 0x4a5   :  { %v2361_v60 = vsel %vm729_vm1, %v9076_v32, 0.0 }
 0x4a6   :  { %1425 = vmax.xlane.f32.xlu1 %v1424_v25  ;;  %2362 = vadd.xlane.f32.xlu0 %v2361_v60 }
 0x4ae   :  { %1428 = vmax.xlane.f32.xlu1 %v1427_v54 }
 0x4b6   :  { %1431 = vmax.xlane.f32.xlu1 %v1430_v12 }
 0x4d1   :  { %v2282_v49 = vpop.xlane.xlu1 %2281 }
 0x4d2   :  { %v2312_v17 = vsub.f32 %v2128_v16, %v2282_v49  ;;  %v7696_v16 = vld [vmem:[%s11249_s0 + $0x90] sm:$0xff]  }
 0x4d3   :  { %v7178_v24 = vunpack.c.h.bf16 %v7696_v16  ;;  %v7177_v37 = vunpack.c.l.bf16 %v7696_v16 }
 0x4d4   :  { %v2326_v9 = vmul.f32 1.442695, %v2312_v17 }
 0x4d6   :  { %7959 = vpow2.f32 %v2326_v9 }
 0x4d9   :  { %v2285_v11 = vpop.xlane.xlu0 %2284  ;;  %v2300_v6 = vpop.xlane.xlu1 %2299 }
 0x4da   :  { %v2313_v15 = vsub.f32 %v9038_v46, %v2285_v11  ;;  %v2318_v7 = vsub.f32 %v9034_v41, %v2300_v6  ;;  %v9098_v41 = vld [vmem:[%s11250_s1 + $0x12] ss:$0 sm:$0xff] }
 0x4db   :  { %v2026_v31 = vmul.f32 %v9098_v41, %v7178_v24 }
 0x4dc   :  { %v9088_v34 = vpop.eup %7959  ;;  %v2328_v18 = vmul.f32 1.442695, %v2313_v15  ;;  %v2338_v23 = vmul.f32 1.442695, %v2318_v7  ;;  %v7744_v7 = vld [vmem:[%s11249_s0 + $0x210] sm:$0xff]  }
 0x4dd   :  { %v2352_v20 = vsel %vm729_vm1, %v9088_v34, 0.0  ;;  %v7369_v16 = vunpack.c.l.bf16 %v7744_v7 }
 0x4de   :  { %7961 = vpow2.f32 %v2328_v18  ;;  %2353 = vadd.xlane.f32.xlu2 %v2352_v20  ;;  %v7370_v18 = vunpack.c.h.bf16 %v7744_v7 }
 0x4df   :  { %7963 = vpow2.f32 %v2338_v23 }
 0x4e0   :  { %v2030_v20 = vmul.f32 %v9098_v41, %v7370_v18 }
 0x4e1   :  { %v2303_v45 = vpop.xlane.xlu0 %2302  ;;  %v2294_v22 = vpop.xlane.xlu2 %2293 }
 0x4e2   :  { %v2319_v46 = vsub.f32 %v9042_v10, %v2303_v45  ;;  %v2316_v3 = vsub.f32 %v9046_v14, %v2294_v22  ;;  %v2041_v10 = vadd.f32 %v9106_v50, %v2026_v31  ;;  %v2025_v14 = vmul.f32 %v9098_v41, %v7177_v37 }
 0x4e4   :  { %v9108_v35 = vpop.eup %7961  ;;  %v2340_v47 = vmul.f32 1.442695, %v2319_v46  ;;  %v2334_v51 = vmul.f32 1.442695, %v2316_v3  ;;  %v2053_v25 = vmax.f32 %v2041_v10, 0.0  ;;  %v2040_v60 = vadd.f32 %v9106_v50, %v2025_v14 }
 0x4e5   :  { %v9110_v38 = vpop.eup %7963  ;;  %v2355_v39 = vsel %vm729_vm1, %v9108_v35, 0.0  ;;  %v2045_v46 = vadd.f32 %v9106_v50, %v2030_v20  ;;  %v2029_v3 = vmul.f32 %v9098_v41, %v7369_v16 }
 0x4e6   :  { %7965 = vpow2.f32 %v2340_v47  ;;  %2356 = vadd.xlane.f32.xlu2 %v2355_v39  ;;  %v2370_v40 = vsel %vm729_vm1, %v9110_v38, 0.0  ;;  %2426 = vmatpush.msra.mxu2 %v2053_v25  ;;  %v2052_v12 = vmax.f32 %v2040_v60, 0.0 }
 0x4e7   :  { %7967 = vpow2.f32 %v2334_v51  ;;  %2371 = vadd.xlane.f32.xlu0 %v2370_v40  ;;  %v2057_v31 = vmax.f32 %v2045_v46, 0.0  ;;  %v2044_v37 = vadd.f32 %v9106_v50, %v2029_v3 }
 0x4e8   :  { %2427 = vmatpush.msra.mxu2 %v2052_v12 }
 0x4e9   :  { %v2297_v54 = vpop.xlane.xlu1 %2296 }
 0x4ea   :  { %v2317_v49 = vsub.f32 %v9050_v53, %v2297_v54  ;;  %2484 = vmatpush.msrb.mxu2 %v2057_v31 }
 0x4ec   :  { %v9120_v17 = vpop.eup %7965  ;;  %v2336_v9 = vmul.f32 1.442695, %v2317_v49 }
 0x4ed   :  { %v9122_v11 = vpop.eup %7967  ;;  %v2373_v6 = vsel %vm729_vm1, %v9120_v17, 0.0 }
 0x4ee   :  { %7969 = vpow2.f32 %v2336_v9  ;;  %v2364_v15 = vsel %vm729_vm1, %v9122_v11, 0.0 }
 0x4ef   :  { %2365 = vadd.xlane.f32.xlu2 %v2364_v15  ;;  %2374 = vadd.xlane.f32.xlu0 %v2373_v6 }
 0x4f1   :  { %v2306_v53 = vpop.xlane.xlu0 %2305 }
 0x4f2   :  { %v2320_v23 = vsub.f32 %v9054_v48, %v2306_v53  ;;  %v2056_v48 = vmax.f32 %v2044_v37, 0.0 }
 0x4f4   :  { %v9133_v45 = vpop.eup %7969  ;;  %v2342_v22 = vmul.f32 1.442695, %v2320_v23  ;;  %2485 = vmatpush.msrb.mxu2 %v2056_v48 }
 0x4f5   :  { %v2367_v24 = vsel %vm729_vm1, %v9133_v45, 0.0 }
 0x4f6   :  { %7971 = vpow2.f32 %v2342_v22 }
 0x4f7   :  { %2368 = vadd.xlane.f32.xlu2 %v2367_v24 }
 0x4fc   :  { %v9140_v47 = vpop.eup %7971 }
 0x4fd   :  { %v2376_v51 = vsel %vm729_vm1, %v9140_v47, 0.0 }
 0x4fe   :  { %2377 = vadd.xlane.f32.xlu0 %v2376_v51 }
 0x501   :  { %v2348_v39 = vpop.xlane.xlu2 %2347 }
 0x502   :  { %7973 = vrcp.f32 %v2348_v39 }
 0x508   :  { %v7974_v10 = vpop.eup %7973 }
 0x509   :  { %v2394_v14 = vmul.f32 %v7974_v10, %v9058_v21  ;;  %v2309_v40 = vpop.xlane.xlu2 %2308  ;;  %v2351_v25 = vpop.xlane.xlu1 %2350 }
 0x50a   :  { %v2321_v60 = vsub.f32 %v9062_v27, %v2309_v40  ;;  %7975 = vrcp.f32 %v2351_v25 }
 0x50b   :  { %6827 = vmatmul.msk.f32.vlgmr.msra.gmra.mxu2 %vm729_vm1, %v2394_v14 }
 0x50c   :  { %v2344_v54 = vmul.f32 1.442695, %v2321_v60 }
 0x50e   :  { %7977 = vpow2.f32 %v2344_v54 }
 0x510   :  { %v7976_v12 = vpop.eup %7975 }
 0x511   :  { %v2360_v49 = vpop.xlane.xlu0 %2359  ;;  %v1423_v9 = vpop.xlane.xlu1 %1422  ;;  %v2395_v6 = vmul.f32 %v7976_v12, %v9066_v56 }
 0x512   :  { %7979 = vrcp.f32 %v2360_v49  ;;  %v1449_v15 = vsub.f32 %v8899_v8, %v1423_v9 }
 0x513   :  { %6828 = vmatmul.msk.f32.gmra.mxu2 %vm729_vm1, %v2395_v6  ;;  %v7792_v6 = vld [vmem:[%s11249_s0 + $0x390] sm:$0xff]  }
 0x514   :  { %v9150_v21 = vpop.eup %7977  ;;  %v1465_v7 = vmul.f32 1.442695, %v1449_v15 }
 0x515   :  { %v2379_v27 = vsel %vm729_vm1, %v9150_v21, 0.0 }
 0x516   :  { %7981 = vpow2.f32 %v1465_v7  ;;  %2380 = vadd.xlane.f32.xlu1 %v2379_v27  ;;  %v7562_v7 = vunpack.c.h.bf16 %v7792_v6 }
 0x518   :  { %v7980_v53 = vpop.eup %7979  ;;  %v2034_v27 = vmul.f32 %v9098_v41, %v7562_v7 }
 0x519   :  { %v2398_v18 = vmul.f32 %v7980_v53, %v9070_v36  ;;  %v2363_v23 = vpop.xlane.xlu0 %2362  ;;  %v1426_v20 = vpop.xlane.xlu1 %1425  ;;  %v7561_v53 = vunpack.c.l.bf16 %v7792_v6 }
 0x51a   :  { %7983 = vrcp.f32 %v2363_v23  ;;  %v1450_v56 = vsub.f32 %v8908_v42, %v1426_v20 }
 0x51b   :  { %6831 = vmatmul.msk.f32.vlgmr.msrb.gmra.mxu2 %vm729_vm1, %v2398_v18  ;;  %v2049_v18 = vadd.f32 %v9106_v50, %v2034_v27  ;;  %v2033_v23 = vmul.f32 %v9098_v41, %v7561_v53 }
 0x51c   :  { %v9157_v8 = vpop.eup %7981  ;;  %v1467_v16 = vmul.f32 1.442695, %v1450_v56 }
 0x51d   :  { %v1493_v22 = vsel %vm729_vm1, %v9157_v8, 0.0  ;;  %v2061_v20 = vmax.f32 %v2049_v18, 0.0  ;;  %v2048_v56 = vadd.f32 %v9106_v50, %v2033_v23  ;;  %v7785_v18 = vld [vmem:[%s11249_s0 + $0x358] sm:$0xff]  }
 0x51e   :  { %7985 = vpow2.f32 %v1467_v16  ;;  %1494 = vadd.xlane.f32.xlu2 %v1493_v22  ;;  %v7768_v16 = vld [vmem:[%s11249_s0 + $0x2d0] sm:$0xff]  }
 0x51f   :  { %2542 = vmatpush.msra.mxu2 %v2061_v20  ;;  %v2060_v22 = vmax.f32 %v2048_v56, 0.0  ;;  %v7534_v56 = vunpack.c.h.bf16 %v7785_v18 }
 0x520   :  { %v7984_v24 = vpop.eup %7983 }
 0x521   :  { %v1429_v46 = vpop.xlane.xlu1 %1428  ;;  %v2399_v3 = vmul.f32 %v7984_v24, %v9076_v32  ;;  %v7466_v24 = vunpack.c.h.bf16 %v7768_v16  ;;  %2543 = vmatpush.msra.mxu2 %v2060_v22 }
 0x522   :  { %v1451_v36 = vsub.f32 %v9021_v55, %v1429_v46  ;;  %v7720_v55 = vld [vmem:[%s11249_s0 + $0x150] sm:$0xff]  }
 0x523   :  { %6832 = vmatmul.msk.f32.gmra.mxu2 %vm729_vm1, %v2399_v3  ;;  %v7274_v14 = vunpack.c.h.bf16 %v7720_v55  ;;  %v7273_v25 = vunpack.c.l.bf16 %v7720_v55  ;;  %v2032_v46 = vmul.f32 %v9098_v41, %v7466_v24  ;;  %v7465_v3 = vunpack.c.l.bf16 %v7768_v16 }
 0x524   :  { %v9164_v31 = vpop.eup %7985  ;;  %v1469_v42 = vmul.f32 1.442695, %v1451_v36  ;;  %v7713_v36 = vld [vmem:[%s11249_s0 + $0x118] sm:$0xff]  }
 0x525   :  { %v1496_v37 = vsel %vm729_vm1, %v9164_v31, 0.0  ;;  %v2028_v40 = vmul.f32 %v9098_v41, %v7274_v14  ;;  %v2027_v12 = vmul.f32 %v9098_v41, %v7273_v25  ;;  %v9210_v14 = vld [vmem:[%s11251_s2 + $0xb] ss:$0 sm:$0xff] }
 0x526   :  { %7987 = vpow2.f32 %v1469_v42  ;;  %1497 = vadd.xlane.f32.xlu0 %v1496_v37  ;;  %v2047_v42 = vadd.f32 %v9106_v50, %v2032_v46  ;;  %v2031_v37 = vmul.f32 %v9098_v41, %v7465_v3 }
 0x527   :  { %v2043_v54 = vadd.f32 %v9106_v50, %v2028_v40  ;;  %v2042_v9 = vadd.f32 %v9106_v50, %v2027_v12 }
 0x529   :  { %v1432_v48 = vpop.xlane.xlu1 %1431  ;;  %v2055_v49 = vmax.f32 %v2043_v54, 0.0  ;;  %v2054_v15 = vmax.f32 %v2042_v9, 0.0 }
 0x52a   :  { %v1452_v51 = vsub.f32 %v9023_v57, %v1432_v48  ;;  %v7246_v48 = vunpack.c.h.bf16 %v7713_v36 }
 0x52b   :  { %2455 = vmatpush.msra.mxu3 %v2055_v49 }
 0x52c   :  { %v9169_v39 = vpop.eup %7987  ;;  %v1471_v10 = vmul.f32 1.442695, %v1452_v51  ;;  %v9203_v51 = vld [vmem:[%s11250_s1 + $0xb] ss:$0 sm:$0xff] }
 0x52d   :  { %v1499_v32 = vsel %vm729_vm1, %v9169_v39, 0.0  ;;  %2456 = vmatpush.msra.mxu3 %v2054_v15  ;;  %v2758_v55 = vmul.f32 %v9203_v51, %v7246_v48  ;;  %v7816_v15 = vld [vmem:[%s11249_s0 + $0x450] sm:$0xff]   ;;  %v7533_v48 = vunpack.c.l.bf16 %v7785_v18  ;;  %v7737_v18 = vld [vmem:[%s11249_s0 + $0x1d8] sm:$0xff]  }
 0x52e   :  { %7989 = vpow2.f32 %v1471_v10  ;;  %1500 = vadd.xlane.f32.xlu1 %v1499_v32  ;;  %v2059_v10 = vmax.f32 %v2047_v42, 0.0  ;;  %v2046_v32 = vadd.f32 %v9106_v50, %v2031_v37  ;;  %v7658_v7 = vunpack.c.h.bf16 %v7816_v15 }
 0x52f   :  { %v2773_v25 = vadd.f32 %v9210_v14, %v2758_v55  ;;  %v7657_v53 = vunpack.c.l.bf16 %v7816_v15  ;;  %v9250_v15 = vld [vmem:[%s11251_s2 + $0x3] ss:$0 sm:$0xff] }
 0x530   :  { %2513 = vmatpush.msrb.mxu3 %v2059_v10  ;;  %v2058_v40 = vmax.f32 %v2046_v32, 0.0  ;;  %v2036_v27 = vmul.f32 %v9098_v41, %v7658_v7  ;;  %v2763_v10 = vmul.f32 %v9203_v51, %v7533_v48  ;;  %v7777_v48 = vld [vmem:[%s11249_s0 + $0x318] sm:$0xff]  }
 0x531   :  { %v2785_v54 = vmax.f32 %v2773_v25, 0.0  ;;  %v2035_v20 = vmul.f32 %v9098_v41, %v7657_v53 }
 0x532   :  { %2514 = vmatpush.msrb.mxu3 %v2058_v40  ;;  %v2051_v23 = vadd.f32 %v9106_v50, %v2036_v27  ;;  %v2778_v40 = vadd.f32 %v9210_v14, %v2763_v10 }
 0x533   :  { %6857 = vmatpush.xpose.msk.msrb.mxu2 %vm518_vm0, %v2785_v54  ;;  %v2050_v24 = vadd.f32 %v9106_v50, %v2035_v20  ;;  %v7342_v20 = vunpack.c.h.bf16 %v7737_v18 }
 0x534   :  { %v9177_v60 = vpop.eup %7989  ;;  %v2063_v22 = vmax.f32 %v2051_v23, 0.0 }
 0x535   :  { %v1502_v57 = vsel %vm729_vm1, %v9177_v60, 0.0  ;;  %v2062_v37 = vmax.f32 %v2050_v24, 0.0 }
 0x536   :  { %1503 = vadd.xlane.f32.xlu2 %v1502_v57  ;;  %v7245_v57 = vunpack.c.l.bf16 %v7713_v36  ;;  %v2764_v36 = vmul.f32 %v9203_v51, %v7534_v56 }
 0x538   :  { %v2757_v12 = vmul.f32 %v9203_v51, %v7245_v57  ;;  %v2779_v41 = vadd.f32 %v9210_v14, %v2764_v36 }
 0x53a   :  { %v2772_v49 = vadd.f32 %v9210_v14, %v2757_v12  ;;  %v2791_v55 = vmax.f32 %v2779_v41, 0.0  ;;  %v7705_v12 = vld [vmem:[%s11249_s0 + $0xd8] sm:$0xff]   ;;  %v7341_v41 = vunpack.c.l.bf16 %v7737_v18 }
 0x53c   :  { %v2784_v9 = vmax.f32 %v2772_v49, 0.0  ;;  %v7213_v49 = vunpack.c.l.bf16 %v7705_v12 }
 0x53e   :  { %6858 = vmatpush.xpose.msk.msrb.mxu2 %vm518_vm0, %v2784_v9 }
 0x551   :  { %v2354_v6 = vpop.xlane.xlu2 %2353 }
 0x552   :  { %7991 = vrcp.f32 %v2354_v6 }
 0x558   :  { %v7992_v16 = vpop.eup %7991 }
 0x559   :  { %v2396_v46 = vmul.f32 %v7992_v16, %v9088_v34  ;;  %v2357_v3 = vpop.xlane.xlu2 %2356  ;;  %v7214_v16 = vunpack.c.h.bf16 %v7705_v12 }
 0x55a   :  { %7993 = vrcp.f32 %v2357_v3  ;;  %v2372_v42 = vpop.xlane.xlu0 %2371 }
 0x55b   :  { %7995 = vrcp.f32 %v2372_v42  ;;  %6829 = vmatmul.msk.f32.vlgmr.msra.gmra.mxu3 %vm729_vm1, %v2396_v46 }
 0x55c   :  { %2571 = vmatpush.msra.mxu3 %v2063_v22  ;;  %v2760_v22 = vmul.f32 %v9203_v51, %v7342_v20 }
 0x55e   :  { %2572 = vmatpush.msra.mxu3 %v2062_v37 }
 0x560   :  { %v7994_v32 = vpop.eup %7993 }
 0x561   :  { %v7996_v50 = vpop.eup %7995  ;;  %v2397_v34 = vmul.f32 %v7994_v32, %v9108_v35  ;;  %v9243_v35 = vld [vmem:[%s11250_s1 + $0x3] ss:$0 sm:$0xff]  ;;  %v2759_v32 = vmul.f32 %v9203_v51, %v7341_v41 }
 0x562   :  { %v2402_v25 = vmul.f32 %v7996_v50, %v9110_v38  ;;  %v2366_v57 = vpop.xlane.xlu2 %2365  ;;  %v2375_v54 = vpop.xlane.xlu0 %2374  ;;  %v2790_v38 = vmax.f32 %v2778_v40, 0.0  ;;  %v2703_v6 = vmul.f32 %v9243_v35, %v7213_v49  ;;  %v2704_v36 = vmul.f32 %v9243_v35, %v7214_v16  ;;  %v8255_v50 = vld [vmem:[%s11250_s1 + $0x11] ss:$0 sm:$0xff] }
 0x563   :  { %7997 = vrcp.f32 %v2366_v57  ;;  %6830 = vmatmul.msk.f32.gmra.mxu3 %vm729_vm1, %v2397_v34  ;;  %v7501_v40 = vunpack.c.l.bf16 %v7777_v48  ;;  %v8256_v57 = vld [vmem:[%s11251_s2 + $0x11] ss:$0 sm:$0xff] }
 0x564   :  { %7999 = vrcp.f32 %v2375_v54  ;;  %6835 = vmatmul.msk.f32.vlgmr.msra.gmra.mxu2 %vm729_vm1, %v2402_v25  ;;  %v2718_v56 = vadd.f32 %v9250_v15, %v2703_v6  ;;  %v2774_v25 = vadd.f32 %v9210_v14, %v2759_v32 }
 0x565   :  { %6869 = vmatpush.xpose.msk.msra.mxu2 %vm518_vm0, %v2791_v55 }
 0x566   :  { %v2730_v3 = vmax.f32 %v2718_v56, 0.0 }
 0x569   :  { %v7998_v9 = vpop.eup %7997  ;;  %6870 = vmatpush.xpose.msk.msra.mxu2 %vm518_vm0, %v2790_v38  ;;  %v2786_v38 = vmax.f32 %v2774_v25, 0.0 }
 0x56a   :  { %v8000_v7 = vpop.eup %7999  ;;  %v2400_v27 = vmul.f32 %v7998_v9, %v9122_v11  ;;  %v2369_v53 = vpop.xlane.xlu2 %2368  ;;  %v2775_v11 = vadd.f32 %v9210_v14, %v2760_v22 }
 0x56b   :  { %8001 = vrcp.f32 %v2369_v53  ;;  %v2403_v23 = vmul.f32 %v8000_v7, %v9120_v17  ;;  %v7743_v17 = vld [vmem:[%s11249_s0 + $0x208] sm:$0xff]   ;;  %v2709_v53 = vmul.f32 %v9243_v35, %v7501_v40 }
 0x56c   :  { %6833 = vmatmul.msk.f32.vlgmr.msrb.gmra.mxu3 %vm729_vm1, %v2400_v27  ;;  %v2787_v42 = vmax.f32 %v2775_v11, 0.0  ;;  %v7366_v10 = vunpack.c.h.bf16 %v7743_v17  ;;  %v7365_v55 = vunpack.c.l.bf16 %v7743_v17 }
 0x56d   :  { %6836 = vmatmul.msk.f32.gmra.mxu2 %vm729_vm1, %v2403_v23  ;;  %v7809_v23 = vld [vmem:[%s11249_s0 + $0x418] sm:$0xff]   ;;  %v2724_v56 = vadd.f32 %v9250_v15, %v2709_v53 }
 0x56e   :  { %6861 = vmatpush.xpose.msk.msrb.mxu3 %vm518_vm0, %v2787_v42  ;;  %v1165_v34 = vmul.f32 %v8255_v50, %v7366_v10  ;;  %v1164_v12 = vmul.f32 %v8255_v50, %v7365_v55  ;;  %v7630_v20 = vunpack.c.h.bf16 %v7809_v23  ;;  %v7729_v55 = vld [vmem:[%s11249_s0 + $0x198] sm:$0xff]  }
 0x56f   :  { %v2736_v11 = vmax.f32 %v2724_v56, 0.0 }
 0x570   :  { %v1180_v54 = vadd.f32 %v8256_v57, %v1165_v34  ;;  %v1179_v6 = vadd.f32 %v8256_v57, %v1164_v12  ;;  %v2766_v16 = vmul.f32 %v9203_v51, %v7630_v20 }
 0x571   :  { %v8002_v24 = vpop.eup %8001  ;;  %v2378_v46 = vpop.xlane.xlu0 %2377 }
 0x572   :  { %8003 = vrcp.f32 %v2378_v46  ;;  %v2401_v37 = vmul.f32 %v8002_v24, %v9133_v45  ;;  %v2719_v45 = vadd.f32 %v9250_v15, %v2704_v36  ;;  %v1192_v9 = vmax.f32 %v1180_v54, 0.0  ;;  %6862 = vmatpush.xpose.msk.msrb.mxu3 %vm518_vm0, %v2786_v38  ;;  %v7767_v46 = vld [vmem:[%s11249_s0 + $0x2c8] sm:$0xff]   ;;  %v6776_v38 = vld [vmem:[%s11252_s3 + $0x4] sm:$0xf] }
 0x573   :  { %v1191_v18 = vmax.f32 %v1179_v6, 0.0  ;;  %v2781_v22 = vadd.f32 %v9210_v14, %v2766_v16  ;;  %v7629_v36 = vunpack.c.l.bf16 %v7809_v23  ;;  %v7462_v42 = vunpack.c.h.bf16 %v7767_v46 }
 0x574   :  { %6834 = vmatmul.msk.f32.gmra.mxu3 %vm729_vm1, %v2401_v37  ;;  %v2731_v27 = vmax.f32 %v2719_v45, 0.0  ;;  %1619 = vmatpush.msra.mxu0 %v1192_v9  ;;  %v7309_v9 = vunpack.c.l.bf16 %v7729_v55 }
 0x575   :  { %6859 = vmatmul.msk.f32.vlgmr.msrb.gmra.mxu2 %vm518_vm0, %v2730_v3  ;;  %v2793_v3 = vmax.f32 %v2781_v22, 0.0  ;;  %v2765_v17 = vmul.f32 %v9203_v51, %v7629_v36  ;;  %v1167_v37 = vmul.f32 %v8255_v50, %v7462_v42  ;;  %v7801_v22 = vld [vmem:[%s11249_s0 + $0x3d8] sm:$0xff]  }
 0x576   :  { %1620 = vmatpush.msra.mxu0 %v1191_v18  ;;  %v7310_v18 = vunpack.c.h.bf16 %v7729_v55 }
 0x577   :  { %v2780_v10 = vadd.f32 %v9210_v14, %v2765_v17  ;;  %v1182_v32 = vadd.f32 %v8256_v57, %v1167_v37  ;;  %v7598_v17 = vunpack.c.h.bf16 %v7801_v22 }
 0x578   :  { %v8004_v49 = vpop.eup %8003  ;;  %6777 = vmatpush.msk.msrb.mxu0 %vm1753_vm2, %v6776_v38  ;;  %v2706_v20 = vmul.f32 %v9243_v35, %v7310_v18 }
 0x579   :  { %v2404_v7 = vmul.f32 %v8004_v49, %v9140_v47  ;;  %v7502_v47 = vunpack.c.h.bf16 %v7777_v48  ;;  %v7461_v48 = vunpack.c.l.bf16 %v7767_v46  ;;  %v2792_v45 = vmax.f32 %v2780_v10, 0.0 }
 0x57a   :  { %v1194_v40 = vmax.f32 %v1182_v32, 0.0 }
 0x57b   :  { %v2710_v24 = vmul.f32 %v9243_v35, %v7502_v47  ;;  %v1166_v34 = vmul.f32 %v8255_v50, %v7461_v48  ;;  %v8257_v50 = vld [vmem:[%s11252_s3] sm:$0xf] }
 0x57c   :  { %6837 = vmatmul.msk.f32.vlgmr.msra.gmra.mxu3 %vm729_vm1, %v2404_v7  ;;  %1648 = vmatpush.msrb.mxu1 %v1194_v40 }
 0x57d   :  { %6860 = vmatmul.msk.f32.gmra.mxu2 %vm518_vm0, %v2731_v27  ;;  %6873 = vmatpush.xpose.msk.msra.mxu3 %vm518_vm0, %v2793_v3  ;;  %v2725_v41 = vadd.f32 %v9250_v15, %v2710_v24  ;;  %v1181_v25 = vadd.f32 %v8256_v57, %v1166_v34  ;;  %v2705_v57 = vmul.f32 %v9243_v35, %v7309_v9 }
 0x57f   :  { %v2737_v12 = vmax.f32 %v2725_v41, 0.0  ;;  %v1193_v49 = vmax.f32 %v1181_v25, 0.0  ;;  %v2720_v53 = vadd.f32 %v9250_v15, %v2705_v57  ;;  %v2712_v41 = vmul.f32 %v9243_v35, %v7598_v17 }
 0x581   :  { %6874 = vmatpush.xpose.msk.msra.mxu3 %vm518_vm0, %v2792_v45  ;;  %1649 = vmatpush.msrb.mxu1 %v1193_v49  ;;  %v2732_v23 = vmax.f32 %v2720_v53, 0.0 }
 0x583   :  { %6790 = vmatpush.msk.msra.mxu1 %vm1753_vm2, %v8257_v50 }
 0x585   :  { %6871 = vmatmul.msk.f32.vlgmr.msra.gmra.mxu2 %vm518_vm0, %v2736_v11  ;;  %v7597_v11 = vunpack.c.l.bf16 %v7801_v22 }
 0x587   :  { %v2711_v3 = vmul.f32 %v9243_v35, %v7597_v11 }
 0x589   :  { %v2381_v54 = vpop.xlane.xlu1 %2380  ;;  %v2726_v42 = vadd.f32 %v9250_v15, %v2711_v3 }
 0x58a   :  { %8005 = vrcp.f32 %v2381_v54 }
 0x58b   :  { %v2738_v48 = vmax.f32 %v2726_v42, 0.0 }
 0x58d   :  { %6872 = vmatmul.msk.f32.gmra.mxu2 %vm518_vm0, %v2737_v12 }
 0x590   :  { %v8006_v6 = vpop.eup %8005 }
 0x591   :  { %v1495_v7 = vpop.xlane.xlu2 %1494  ;;  %v2405_v27 = vmul.f32 %v8006_v6, %v9150_v21  ;;  %v2721_v21 = vadd.f32 %v9250_v15, %v2706_v20 }
 0x592   :  { %8007 = vrcp.f32 %v1495_v7 }
 0x593   :  { %6838 = vmatmul.msk.f32.gmra.mxu3 %vm729_vm1, %v2405_v27  ;;  %v2733_v24 = vmax.f32 %v2721_v21, 0.0  ;;  %v6839_v21 = vld [vmem:[%s11252_s3 + $0x8] sm:$0xf] }
 0x598   :  { %v8008_v56 = vpop.eup %8007 }
 0x599   :  { %v1533_v47 = vmul.f32 %v8008_v56, %v9157_v8  ;;  %v1498_v16 = vpop.xlane.xlu0 %1497 }
 0x59a   :  { %8009 = vrcp.f32 %v1498_v16 }
 0x59b   :  { %6768 = vmatmul.msk.f32.vlgmr.msra.gmra.mxu0 %vm729_vm1, %v1533_v47  ;;  %6863 = vmatmul.msk.f32.vlgmr.msrb.gmra.mxu3 %vm518_vm0, %v2732_v23 }
 0x59c   :  { %6840 = vmatpush.msk.msra.mxu0 %vm1753_vm2, %v6839_v21 }
 0x5a0   :  { %v8010_v46 = vpop.eup %8009 }
 0x5a1   :  { %v1501_v36 = vpop.xlane.xlu1 %1500  ;;  %v1534_v8 = vmul.f32 %v8010_v46, %v9164_v31  ;;  %v2727_v31 = vadd.f32 %v9250_v15, %v2712_v41 }
 0x5a2   :  { %8011 = vrcp.f32 %v1501_v36 }
 0x5a3   :  { %6769 = vmatmul.msk.f32.gmra.mxu0 %vm729_vm1, %v1534_v8  ;;  %6864 = vmatmul.msk.f32.gmra.mxu3 %vm518_vm0, %v2733_v24  ;;  %v2739_v55 = vmax.f32 %v2727_v31, 0.0 }
 0x5a8   :  { %v8012_v37 = vpop.eup %8011 }
 0x5a9   :  { %v1535_v10 = vmul.f32 %v8012_v37, %v9169_v39  ;;  %v1504_v32 = vpop.xlane.xlu2 %1503 }
 0x5aa   :  { %8013 = vrcp.f32 %v1504_v32 }
 0x5ab   :  { %6770 = vmatmul.msk.f32.vlgmr.msrb.gmra.mxu1 %vm729_vm1, %v1535_v10  ;;  %6778 = vmatmul.msk.f32.vlgmr.msrb.gmra.mxu0 %vm518_vm0, %v8916_v62  ;;  %v2429_v62 = vpop.f32.mrf.mxu2 }
 0x5ac   :  { %6875 = vmatmul.msk.f32.vlgmr.msra.gmra.mxu3 %vm518_vm0, %v2738_v48 }
 0x5b0   :  { %v8014_v34 = vpop.eup %8013 }
 0x5b1   :  { %v1536_v45 = vmul.f32 %v8014_v34, %v9177_v60 }
 0x5b3   :  { %6771 = vmatmul.msk.f32.gmra.mxu1 %vm729_vm1, %v1536_v45  ;;  %6779 = vmatmul.msk.f32.gmra.mxu0 %vm518_vm0, %v8924_v5  ;;  %v2432_v39 = vpop.f32.mrf.mxu2 }
 0x5b4   :  { %6876 = vmatmul.msk.f32.gmra.mxu3 %vm518_vm0, %v2739_v55 }
 0x5bb   :  { %6780 = vmatmul.msk.f32.gmra.mxu0 %vm518_vm0, %v9025_v59  ;;  %6791 = vmatmul.msk.f32.vlgmr.msra.gmra.mxu1 %vm518_vm0, %v8823_v28  ;;  %v2487_v5 = vpop.f32.mrf.mxu2 }
 0x5c3   :  { %6781 = vmatmul.msk.f32.gmra.mxu0 %vm518_vm0, %v9027_v61  ;;  %6792 = vmatmul.msk.f32.gmra.mxu1 %vm518_vm0, %v8828_v44  ;;  %v9357_v60 = vpop.f32.mrf.mxu2 }
 0x5cb   :  { %6793 = vmatmul.msk.f32.gmra.mxu1 %vm518_vm0, %v8832_v29 }
 0x5d3   :  { %6794 = vmatmul.msk.f32.gmra.mxu1 %vm518_vm0, %v8838_v33 }
 0x5de   :  { %v2458_v59 = vpop.f32.mrf.mxu3 }
 0x5e6   :  { %v2461_v28 = vpop.f32.mrf.mxu3 }
 0x5e7   :  { %v9359_v40 = vpop.f32.mrf.mxu2 }
 0x5ef   :  { %v9364_v44 = vpop.f32.mrf.mxu3 }
 0x5f0   :  { %v9361_v25 = vpop.f32.mrf.mxu2 }
 0x5f7   :  { %v9367_v33 = vpop.f32.mrf.mxu3 }
 0x5f8   :  { %v2912_v61 = vpop.f32.mrf.mxu2 }
 0x5f9   :  { %v3064_v54 = vsel %vm729_vm1, %v2912_v61, -inf }
 0x5fa   :  { %3065 = vmax.xlane.f32.xlu0 %v3064_v54 }
 0x5ff   :  { %v9370_v9 = vpop.f32.mrf.mxu3 }
 0x600   :  { %v2915_v12 = vpop.f32.mrf.mxu2 }
 0x601   :  { %v3067_v29 = vsel %vm729_vm1, %v2915_v12, -inf }
 0x602   :  { %3068 = vmax.xlane.f32.xlu1 %v3067_v29 }
 0x608   :  { %v3017_v49 = vpop.f32.mrf.mxu2 }
 0x609   :  { %v3082_v38 = vsel %vm729_vm1, %v3017_v49, -inf }
 0x60a   :  { %3083 = vmax.xlane.f32.xlu2 %v3082_v38 }
 0x610   :  { %v3020_v50 = vpop.f32.mrf.mxu2 }
 0x611   :  { %v3085_v57 = vsel %vm729_vm1, %v3020_v50, -inf }
 0x612   :  { %3086 = vmax.xlane.f32.xlu1 %v3085_v57 }
 0x616   :  { %v9373_v6 = vpop.f32.mrf.mxu3 }
 0x618   :  { %v1622_v7 = vpop.f32.mrf.mxu0 }
 0x619   :  { %6782 = vmatmul.msk.f32.gmra.mxu0 %vm518_vm0, %v1622_v7 }
 0x61e   :  { %v2947_v27 = vpop.f32.mrf.mxu3 }
 0x61f   :  { %v3070_v53 = vsel %vm729_vm1, %v2947_v27, -inf }
 0x620   :  { %v1625_v18 = vpop.f32.mrf.mxu0  ;;  %3071 = vmax.xlane.f32.xlu0 %v3070_v53 }
 0x621   :  { %6783 = vmatmul.msk.f32.gmra.mxu0 %vm518_vm0, %v1625_v18 }
 0x626   :  { %v9378_v23 = vpop.f32.mrf.mxu3 }
 0x627   :  { %v3073_v20 = vsel %vm729_vm1, %v9378_v23, -inf }
 0x628   :  { %3074 = vmax.xlane.f32.xlu2 %v3073_v20  ;;  %v1651_v56 = vpop.f32.mrf.mxu1 }
 0x629   :  { %6784 = vmatmul.msk.f32.gmra.mxu0 %vm518_vm0, %v1651_v56 }
 0x62f   :  { %v9383_v47 = vpop.f32.mrf.mxu3 }
 0x630   :  { %v3088_v16 = vsel %vm729_vm1, %v9383_v47, -inf  ;;  %v1654_v22 = vpop.f32.mrf.mxu1 }
 0x631   :  { %3089 = vmax.xlane.f32.xlu0 %v3088_v16  ;;  %6785 = vmatmul.msk.f32.gmra.mxu0 %vm518_vm0, %v1654_v22 }
 0x637   :  { %v9392_v11 = vpop.f32.mrf.mxu3 }
 0x638   :  { %v3091_v24 = vsel %vm729_vm1, %v9392_v11, -inf }
 0x639   :  { %3092 = vmax.xlane.f32.xlu1 %v3091_v24  ;;  %6786 = vmatmul.msk.f32.gmra.mxu0 %vm518_vm0, %v8941_v58 }
 0x641   :  { %6787 = vmatmul.msk.f32.gmra.mxu0 %vm518_vm0, %v8953_v13 }
 0x649   :  { %6788 = vmatmul.msk.f32.gmra.mxu0 %vm518_vm0, %v9029_v63 }
 0x651   :  { %6789 = vmatmul.msk.f32.gmra.mxu0 %vm518_vm0, %v9031_v1 }
 0x659   :  { %6841 = vmatmul.msk.f32.vlgmr.msra.gmra.mxu0 %vm518_vm0, %v2429_v62 }
 0x661   :  { %6842 = vmatmul.msk.f32.gmra.mxu0 %vm518_vm0, %v2432_v39 }
 0x669   :  { %6843 = vmatmul.msk.f32.gmra.mxu0 %vm518_vm0, %v2458_v59  ;;  %v7689_v59 = vld [vmem:[%s11249_s0 + $0x58] sm:$0xff]  }
 0x66a   :  { %v7149_v29 = vunpack.c.l.bf16 %v7689_v59 }
 0x66c   :  { %v2755_v57 = vmul.f32 %v9203_v51, %v7149_v29  ;;  %v7793_v29 = vld [vmem:[%s11249_s0 + $0x398] sm:$0xff]  }
 0x66d   :  { %v3066_v46 = vpop.xlane.xlu0 %3065 }
 0x66e   :  { %v3096_v3 = vsub.f32 %v2912_v61, %v3066_v46 }
 0x670   :  { %v3110_v36 = vmul.f32 1.442695, %v3096_v3 }
 0x671   :  { %6844 = vmatmul.msk.f32.gmra.mxu0 %vm518_vm0, %v2461_v28  ;;  %v7150_v28 = vunpack.c.h.bf16 %v7689_v59  ;;  %v9500_v59 = vld [vmem:[%s11249_s0 + $0x360] sm:$0xff]  }
 0x672   :  { %8015 = vpow2.f32 %v3110_v36 }
 0x673   :  { %v2756_v54 = vmul.f32 %v9203_v51, %v7150_v28  ;;  %v7538_v28 = vunpack.c.h.bf16 %v9500_v59 }
 0x675   :  { %v3069_v58 = vpop.xlane.xlu1 %3068 }
 0x676   :  { %v3097_v13 = vsub.f32 %v2915_v12, %v3069_v58  ;;  %v2771_v12 = vadd.f32 %v9210_v14, %v2756_v54 }
 0x678   :  { %v9408_v8 = vpop.eup %8015  ;;  %v3112_v63 = vmul.f32 1.442695, %v3097_v13 }
 0x679   :  { %v3136_v1 = vsel %vm729_vm1, %v9408_v8, 0.0  ;;  %6845 = vmatmul.msk.f32.gmra.mxu0 %vm518_vm0, %v2487_v5 }
 0x67a   :  { %8017 = vpow2.f32 %v3112_v63  ;;  %3137 = vadd.xlane.f32.xlu2 %v3136_v1 }
 0x67d   :  { %v3084_v42 = vpop.xlane.xlu2 %3083 }
 0x67e   :  { %v3102_v17 = vsub.f32 %v3017_v49, %v3084_v42 }
 0x680   :  { %v9413_v37 = vpop.eup %8017  ;;  %v3122_v48 = vmul.f32 1.442695, %v3102_v17  ;;  %v7721_v17 = vld [vmem:[%s11249_s0 + $0x158] sm:$0xff]  }
 0x681   :  { %v3139_v41 = vsel %vm729_vm1, %v9413_v37, 0.0  ;;  %6846 = vmatmul.msk.f32.gmra.mxu0 %vm518_vm0, %v9357_v60 }
 0x682   :  { %8019 = vpow2.f32 %v3122_v48  ;;  %3140 = vadd.xlane.f32.xlu0 %v3139_v41  ;;  %v7278_v48 = vunpack.c.h.bf16 %v7721_v17  ;;  %v9484_v41 = vld [vmem:[%s11250_s1 + $0x13] ss:$0 sm:$0xff] }
 0x685   :  { %v3087_v10 = vpop.xlane.xlu1 %3086 }
 0x686   :  { %v3103_v32 = vsub.f32 %v3020_v50, %v3087_v10  ;;  %v2783_v50 = vmax.f32 %v2771_v12, 0.0  ;;  %v9490_v10 = vld [vmem:[%s11251_s2 + $0x13] ss:$0 sm:$0xff] }
 0x688   :  { %v9419_v31 = vpop.eup %8019  ;;  %v3124_v34 = vmul.f32 1.442695, %v3103_v32  ;;  %6853 = vmatpush.xpose.msk.msrb.mxu1 %vm518_vm0, %v2783_v50  ;;  %v7277_v32 = vunpack.c.l.bf16 %v7721_v17 }
 0x689   :  { %v3154_v55 = vsel %vm729_vm1, %v9419_v31, 0.0  ;;  %6847 = vmatmul.msk.f32.gmra.mxu0 %vm518_vm0, %v9364_v44 }
 0x68a   :  { %8021 = vpow2.f32 %v3124_v34  ;;  %3155 = vadd.xlane.f32.xlu1 %v3154_v55  ;;  %v2811_v55 = vmul.f32 %v9484_v41, %v7277_v32 }
 0x690   :  { %v9425_v45 = vpop.eup %8021 }
 0x691   :  { %v3157_v62 = vsel %vm729_vm1, %v9425_v45, 0.0  ;;  %6848 = vmatmul.msk.f32.gmra.mxu0 %vm518_vm0, %v9367_v33 }
 0x692   :  { %3158 = vadd.xlane.f32.xlu0 %v3157_v62 }
 0x693   :  { %v3072_v39 = vpop.xlane.xlu0 %3071 }
 0x694   :  { %v3098_v5 = vsub.f32 %v2947_v27, %v3072_v39  ;;  %v2770_v27 = vadd.f32 %v9210_v14, %v2755_v57  ;;  %v2826_v39 = vadd.f32 %v9490_v10, %v2811_v55 }
 0x696   :  { %v3114_v60 = vmul.f32 1.442695, %v3098_v5  ;;  %v2782_v18 = vmax.f32 %v2770_v27, 0.0 }
 0x698   :  { %8023 = vpow2.f32 %v3114_v60  ;;  %6854 = vmatpush.xpose.msk.msrb.mxu1 %vm518_vm0, %v2782_v18  ;;  %v2838_v60 = vmax.f32 %v2826_v39, 0.0 }
 0x699   :  { %6849 = vmatmul.msk.f32.gmra.mxu0 %vm518_vm0, %v9359_v40  ;;  %v7681_v40 = vld [vmem:[%s11249_s0 + $0x18] sm:$0xff]  }
 0x69a   :  { %v7117_v7 = vunpack.c.l.bf16 %v7681_v40  ;;  %v7118_v24 = vunpack.c.h.bf16 %v7681_v40  ;;  %v7565_v40 = vunpack.c.l.bf16 %v7793_v29 }
 0x69b   :  { %v3075_v61 = vpop.xlane.xlu2 %3074 }
 0x69c   :  { %v3099_v44 = vsub.f32 %v9378_v23, %v3075_v61  ;;  %v2701_v53 = vmul.f32 %v9243_v35, %v7117_v7  ;;  %v2702_v46 = vmul.f32 %v9243_v35, %v7118_v24  ;;  %v9506_v61 = vld [vmem:[%s11250_s1 + $0xc] ss:$0 sm:$0xff]  ;;  %v2817_v27 = vmul.f32 %v9484_v41, %v7565_v40 }
 0x69d   :  { %v3548_v54 = vmul.f32 %v9506_v61, %v7538_v28 }
 0x69e   :  { %v9439_v33 = vpop.eup %8023  ;;  %v3116_v49 = vmul.f32 1.442695, %v3099_v44  ;;  %v2716_v20 = vadd.f32 %v9250_v15, %v2701_v53  ;;  %v2717_v3 = vadd.f32 %v9250_v15, %v2702_v46  ;;  %v9512_v44 = vld [vmem:[%s11251_s2 + $0xc] ss:$0 sm:$0xff]  ;;  %v2832_v18 = vadd.f32 %v9490_v10, %v2817_v27 }
 0x69f   :  { %v3142_v38 = vsel %vm729_vm1, %v9439_v33, 0.0  ;;  %v3563_v12 = vadd.f32 %v9512_v44, %v3548_v54 }
 0x6a0   :  { %8025 = vpow2.f32 %v3116_v49  ;;  %3143 = vadd.xlane.f32.xlu2 %v3142_v38  ;;  %v2728_v22 = vmax.f32 %v2716_v20, 0.0  ;;  %v2729_v58 = vmax.f32 %v2717_v3, 0.0  ;;  %v7566_v38 = vunpack.c.h.bf16 %v7793_v29  ;;  %v7745_v20 = vld [vmem:[%s11249_s0 + $0x218] sm:$0xff]  }
 0x6a1   :  { %6850 = vmatmul.msk.f32.gmra.mxu0 %vm518_vm0, %v9361_v25  ;;  %v3575_v49 = vmax.f32 %v3563_v12, 0.0  ;;  %v7373_v55 = vunpack.c.l.bf16 %v7745_v20 }
 0x6a2   :  { %6855 = vmatmul.msk.f32.vlgmr.msrb.gmra.mxu1 %vm518_vm0, %v2728_v22  ;;  %v2818_v57 = vmul.f32 %v9484_v41, %v7566_v38 }
 0x6a3   :  { %6919 = vmatpush.xpose.msk.msrb.mxu0 %vm518_vm0, %v3575_v49 }
 0x6a4   :  { %v3090_v23 = vpop.xlane.xlu0 %3089  ;;  %v2833_v7 = vadd.f32 %v9490_v10, %v2818_v57 }
 0x6a5   :  { %v3104_v56 = vsub.f32 %v9383_v47, %v3090_v23  ;;  %v2844_v23 = vmax.f32 %v2832_v18, 0.0  ;;  %v7537_v18 = vunpack.c.l.bf16 %v9500_v59 }
 0x6a6   :  { %v9455_v16 = vpop.eup %8025  ;;  %v2845_v53 = vmax.f32 %v2833_v7, 0.0  ;;  %v7817_v7 = vld [vmem:[%s11249_s0 + $0x458] sm:$0xff]  }
 0x6a7   :  { %v3126_v21 = vmul.f32 1.442695, %v3104_v56  ;;  %v3145_v25 = vsel %vm729_vm1, %v9455_v16, 0.0  ;;  %v7690_v56 = vld [vmem:[%s11249_s0 + $0x60] sm:$0xff]   ;;  %v7662_v27 = vunpack.c.h.bf16 %v7817_v7 }
 0x6a8   :  { %3146 = vadd.xlane.f32.xlu1 %v3145_v25  ;;  %v7154_v25 = vunpack.c.h.bf16 %v7690_v56  ;;  %v7153_v3 = vunpack.c.l.bf16 %v7690_v56 }
 0x6a9   :  { %8027 = vpow2.f32 %v3126_v21  ;;  %6851 = vmatmul.msk.f32.gmra.mxu0 %vm518_vm0, %v9370_v9  ;;  %v7374_v21 = vunpack.c.h.bf16 %v7745_v20 }
 0x6aa   :  { %6856 = vmatmul.msk.f32.gmra.mxu1 %vm518_vm0, %v2729_v58 }
 0x6ab   :  { %v2814_v24 = vmul.f32 %v9484_v41, %v7374_v21 }
 0x6ac   :  { %v3093_v47 = vpop.xlane.xlu1 %3092 }
 0x6ad   :  { %v3105_v36 = vsub.f32 %v9392_v11, %v3093_v47  ;;  %v9476_v11 = vpop.f32.mrf.mxu0  ;;  %v2829_v46 = vadd.f32 %v9490_v10, %v2814_v24  ;;  %v3540_v47 = vmul.f32 %v9506_v61, %v7154_v25 }
 0x6ae   :  { %11259 = vst [vmem:[#allocation5_spill] sm:$0xff] %v9476_v11 }
 0x6af   :  { %v9465_v13 = vpop.eup %8027  ;;  %v3128_v63 = vmul.f32 1.442695, %v3105_v36  ;;  %v2841_v58 = vmax.f32 %v2829_v46, 0.0 }
 0x6b0   :  { %v3160_v1 = vsel %vm729_vm1, %v9465_v13, 0.0 }
 0x6b1   :  { %8029 = vpow2.f32 %v3128_v63  ;;  %3161 = vadd.xlane.f32.xlu2 %v3160_v1  ;;  %6852 = vmatmul.msk.f32.gmra.mxu0 %vm518_vm0, %v9373_v6  ;;  %v2812_v6 = vmul.f32 %v9484_v41, %v7278_v48  ;;  %v3555_v1 = vadd.f32 %v9512_v44, %v3540_v47  ;;  %v7682_v47 = vld [vmem:[%s11249_s0 + $0x20] sm:$0xff]  }
 0x6b2   :  { %3268 = vmatpush.msrb.mxu3 %v2841_v58 }
 0x6b3   :  { %v2827_v34 = vadd.f32 %v9490_v10, %v2812_v6  ;;  %v3567_v48 = vmax.f32 %v3555_v1, 0.0 }
 0x6b5   :  { %v2839_v62 = vmax.f32 %v2827_v34, 0.0  ;;  %v9495_v5 = vpop.f32.mrf.mxu0 }
 0x6b6   :  { %11260 = vst [vmem:[#allocation6_spill] sm:$0xff] %v9495_v5 }
 0x6b7   :  { %v9472_v9 = vpop.eup %8029  ;;  %3239 = vmatpush.msrb.mxu2 %v2839_v62  ;;  %v7738_v62 = vld [vmem:[%s11249_s0 + $0x1e0] sm:$0xff]  }
 0x6b8   :  { %v3163_v42 = vsel %vm729_vm1, %v9472_v9, 0.0  ;;  %v7346_v28 = vunpack.c.h.bf16 %v7738_v62  ;;  %v7345_v38 = vunpack.c.l.bf16 %v7738_v62 }
 0x6b9   :  { %3164 = vadd.xlane.f32.xlu0 %v3163_v42  ;;  %3240 = vmatpush.msrb.mxu2 %v2838_v60  ;;  %v3539_v42 = vmul.f32 %v9506_v61, %v7153_v3  ;;  %v2813_v60 = vmul.f32 %v9484_v41, %v7373_v55 }
 0x6ba   :  { %v3544_v49 = vmul.f32 %v9506_v61, %v7346_v28  ;;  %v3543_v56 = vmul.f32 %v9506_v61, %v7345_v38 }
 0x6bb   :  { %3326 = vmatpush.msra.mxu2 %v2845_v53  ;;  %v3554_v6 = vadd.f32 %v9512_v44, %v3539_v42  ;;  %v2828_v12 = vadd.f32 %v9490_v10, %v2813_v60  ;;  %v9557_v53 = vpop.f32.mrf.mxu1 }
 0x6bc   :  { %11265 = vst [vmem:[#allocation11_spill] sm:$0xff] %v9557_v53  ;;  %v3559_v20 = vadd.f32 %v9512_v44, %v3544_v49  ;;  %v7714_v49 = vld [vmem:[%s11249_s0 + $0x120] sm:$0xff]  }
 0x6bd   :  { %v9518_v50 = vpop.f32.mrf.mxu0  ;;  %3327 = vmatpush.msra.mxu2 %v2844_v23  ;;  %v3566_v39 = vmax.f32 %v3554_v6, 0.0  ;;  %v2840_v29 = vmax.f32 %v2828_v12, 0.0  ;;  %v2820_v23 = vmul.f32 %v9484_v41, %v7662_v27  ;;  %v9578_v6 = vld [vmem:[%s11250_s1 + $0x4] ss:$0 sm:$0xff] }
 0x6be   :  { %11261 = vst [vmem:[#allocation7_spill] sm:$0xff] %v9518_v50  ;;  %v3571_v3 = vmax.f32 %v3559_v20, 0.0  ;;  %v7249_v20 = vunpack.c.l.bf16 %v7714_v49 }
 0x6bf   :  { %3269 = vmatpush.msrb.mxu3 %v2840_v29  ;;  %v2835_v21 = vadd.f32 %v9490_v10, %v2820_v23  ;;  %v7730_v23 = vld [vmem:[%s11249_s0 + $0x1a0] sm:$0xff]  }
 0x6c1   :  { %v2847_v59 = vmax.f32 %v2835_v21, 0.0 }
 0x6c3   :  { %3355 = vmatpush.msra.mxu3 %v2847_v59  ;;  %v7810_v59 = vld [vmem:[%s11249_s0 + $0x420] sm:$0xff]  }
 0x6c5   :  { %v9531_v22 = vpop.f32.mrf.mxu0 }
 0x6c6   :  { %11262 = vst [vmem:[#allocation8_spill] sm:$0xff] %v9531_v22 }
 0x6cd   :  { %v9536_v63 = vpop.f32.mrf.mxu0 }
 0x6ce   :  { %11263 = vst [vmem:[#allocation9_spill] sm:$0xff] %v9536_v63 }
 0x6d5   :  { %v9548_v54 = vpop.f32.mrf.mxu0 }
 0x6d6   :  { %11264 = vst [vmem:[#allocation10_spill] sm:$0xff] %v9548_v54 }
 0x6dd   :  { %v9567_v46 = vpop.f32.mrf.mxu0 }
 0x6e5   :  { %v9594_v29 = vpop.f32.mrf.mxu0 }
 0x6ed   :  { %v3138_v36 = vpop.xlane.xlu2 %3137 }
 0x6ee   :  { %8031 = vrcp.f32 %v3138_v36  ;;  %v3558_v36 = vadd.f32 %v9512_v44, %v3543_v56  ;;  %v9611_v56 = vld [vmem:[%s11249_s0 + $0x320] sm:$0xff]  }
 0x6ef   :  { %v7505_v21 = vunpack.c.l.bf16 %v9611_v56 }
 0x6f4   :  { %v8032_v17 = vpop.eup %8031 }
 0x6f5   :  { %v3180_v32 = vmul.f32 %v8032_v17, %v9408_v8  ;;  %v3141_v34 = vpop.xlane.xlu0 %3140  ;;  %v7661_v17 = vunpack.c.l.bf16 %v7817_v7 }
 0x6f6   :  { %8033 = vrcp.f32 %v3141_v34  ;;  %v9583_v34 = vpop.f32.mrf.mxu1 }
 0x6f7   :  { %6879 = vmatmul.msk.f32.vlgmr.msrb.gmra.mxu2 %vm729_vm1, %v3180_v32  ;;  %v3570_v32 = vmax.f32 %v3558_v36, 0.0  ;;  %11266 = vst [vmem:[#allocation12_spill] sm:$0xff] %v9583_v34  ;;  %v7313_v36 = vunpack.c.l.bf16 %v7730_v23 }
 0x6f8   :  { %6903 = vmatpush.xpose.msk.msrb.mxu2 %vm518_vm0, %v3567_v48  ;;  %v7121_v48 = vunpack.c.l.bf16 %v7682_v47 }
 0x6fa   :  { %v3485_v62 = vmul.f32 %v9578_v6, %v7121_v48 }
 0x6fc   :  { %v8034_v8 = vpop.eup %8033  ;;  %6904 = vmatpush.xpose.msk.msrb.mxu2 %vm518_vm0, %v3566_v39  ;;  %v9590_v39 = vld [vmem:[%s11251_s2 + $0x4] ss:$0 sm:$0xff] }
 0x6fd   :  { %v3156_v57 = vpop.xlane.xlu1 %3155  ;;  %v3181_v40 = vmul.f32 %v8034_v8, %v9413_v37  ;;  %v3547_v37 = vmul.f32 %v9506_v61, %v7537_v18  ;;  %v7122_v8 = vunpack.c.h.bf16 %v7682_v47  ;;  %v3500_v38 = vadd.f32 %v9590_v39, %v3485_v62 }
 0x6fe   :  { %8035 = vrcp.f32 %v3156_v57  ;;  %v7250_v57 = vunpack.c.h.bf16 %v7714_v49  ;;  %v9603_v27 = vpop.f32.mrf.mxu1  ;;  %v3541_v47 = vmul.f32 %v9506_v61, %v7249_v20  ;;  %v7753_v20 = vld [vmem:[%s11249_s0 + $0x258] sm:$0xff]  }
 0x6ff   :  { %6880 = vmatmul.msk.f32.gmra.mxu2 %vm729_vm1, %v3181_v40  ;;  %v3562_v25 = vadd.f32 %v9512_v44, %v3547_v37  ;;  %v3486_v40 = vmul.f32 %v9578_v6, %v7122_v8  ;;  %11267 = vst [vmem:[#allocation13_spill] sm:$0xff] %v9603_v27  ;;  %v3512_v18 = vmax.f32 %v3500_v38, 0.0  ;;  %v3489_v38 = vmul.f32 %v9578_v6, %v7313_v36 }
 0x700   :  { %v3542_v7 = vmul.f32 %v9506_v61, %v7250_v57 }
 0x701   :  { %v3574_v42 = vmax.f32 %v3562_v25, 0.0  ;;  %v3501_v37 = vadd.f32 %v9590_v39, %v3486_v40  ;;  %v7761_v25 = vld [vmem:[%s11249_s0 + $0x298] sm:$0xff]  }
 0x703   :  { %6920 = vmatpush.xpose.msk.msrb.mxu0 %vm518_vm0, %v3574_v42  ;;  %v9625_v42 = vpop.f32.mrf.mxu0  ;;  %v3513_v48 = vmax.f32 %v3501_v37, 0.0 }
 0x704   :  { %v8036_v24 = vpop.eup %8035 }
 0x705   :  { %v3186_v58 = vmul.f32 %v8036_v24, %v9419_v31  ;;  %v3159_v1 = vpop.xlane.xlu0 %3158  ;;  %v2819_v31 = vmul.f32 %v9484_v41, %v7661_v17  ;;  %v3557_v24 = vadd.f32 %v9512_v44, %v3542_v7 }
 0x706   :  { %8037 = vrcp.f32 %v3159_v1  ;;  %v3493_v1 = vmul.f32 %v9578_v6, %v7505_v21  ;;  %v9639_v37 = vpop.f32.mrf.mxu1  ;;  %v7405_v21 = vunpack.c.l.bf16 %v7753_v20 }
 0x707   :  { %6885 = vmatmul.msk.f32.vlgmr.msra.gmra.mxu2 %vm729_vm1, %v3186_v58  ;;  %v2834_v55 = vadd.f32 %v9490_v10, %v2819_v31  ;;  %v7634_v58 = vunpack.c.h.bf16 %v7810_v59  ;;  %v3569_v62 = vmax.f32 %v3557_v24, 0.0  ;;  %11268 = vst [vmem:[#allocation14_spill] sm:$0xff] %v9639_v37 }
 0x708   :  { %6911 = vmatpush.xpose.msk.msra.mxu2 %vm518_vm0, %v3571_v3  ;;  %v7438_v3 = vunpack.c.h.bf16 %v7761_v25  ;;  %v3508_v31 = vadd.f32 %v9590_v39, %v3493_v1 }
 0x709   :  { %v2846_v28 = vmax.f32 %v2834_v55, 0.0 }
 0x70a   :  { %v2762_v17 = vmul.f32 %v9203_v51, %v7438_v3  ;;  %v3520_v40 = vmax.f32 %v3508_v31, 0.0  ;;  %v2707_v3 = vmul.f32 %v9243_v35, %v7405_v21 }
 0x70b   :  { %3356 = vmatpush.msra.mxu3 %v2846_v28 }
 0x70c   :  { %v8038_v60 = vpop.eup %8037  ;;  %6912 = vmatpush.xpose.msk.msra.mxu2 %vm518_vm0, %v3570_v32  ;;  %v3550_v32 = vmul.f32 %v9506_v61, %v7634_v58  ;;  %v2777_v28 = vadd.f32 %v9210_v14, %v2762_v17  ;;  %6921 = vmatmul.msk.f32.vlgmr.msrb.gmra.mxu0 %vm518_vm0, %v3520_v40  ;;  %v2722_v1 = vadd.f32 %v9250_v15, %v2707_v3 }
 0x70d   :  { %v3187_v12 = vmul.f32 %v8038_v60, %v9425_v45  ;;  %v3556_v60 = vadd.f32 %v9512_v44, %v3541_v47  ;;  %v3504_v47 = vadd.f32 %v9590_v39, %v3489_v38 }
 0x70e   :  { %v3565_v57 = vadd.f32 %v9512_v44, %v3550_v32  ;;  %v2789_v7 = vmax.f32 %v2777_v28, 0.0  ;;  %v9653_v32 = vpop.f32.mrf.mxu0  ;;  %v2734_v31 = vmax.f32 %v2722_v1, 0.0  ;;  %v7506_v28 = vunpack.c.h.bf16 %v9611_v56  ;;  %v7706_v56 = vld [vmem:[%s11249_s0 + $0xe0] sm:$0xff]  }
 0x70f   :  { %6886 = vmatmul.msk.f32.gmra.mxu2 %vm729_vm1, %v3187_v12  ;;  %v7437_v12 = vunpack.c.l.bf16 %v7761_v25  ;;  %v3568_v25 = vmax.f32 %v3556_v60, 0.0  ;;  %v7406_v60 = vunpack.c.h.bf16 %v7753_v20 }
 0x710   :  { %6865 = vmatpush.xpose.msk.msra.mxu1 %vm518_vm0, %v2789_v7  ;;  %v3494_v38 = vmul.f32 %v9578_v6, %v7506_v28 }
 0x712   :  { %v3509_v40 = vadd.f32 %v9590_v39, %v3494_v38 }
 0x713   :  { %v3144_v45 = vpop.xlane.xlu2 %3143 }
 0x714   :  { %8039 = vrcp.f32 %v3144_v45  ;;  %v7633_v45 = vunpack.c.l.bf16 %v7810_v59  ;;  %v7314_v59 = vunpack.c.h.bf16 %v7730_v23  ;;  %v3516_v23 = vmax.f32 %v3504_v47, 0.0 }
 0x716   :  { %v3549_v24 = vmul.f32 %v9506_v61, %v7633_v45 }
 0x717   :  { %6905 = vmatmul.msk.f32.vlgmr.msrb.gmra.mxu2 %vm518_vm0, %v3512_v18  ;;  %v2761_v18 = vmul.f32 %v9203_v51, %v7437_v12 }
 0x718   :  { %v3564_v36 = vadd.f32 %v9512_v44, %v3549_v24  ;;  %v7802_v44 = vld [vmem:[%s11249_s0 + $0x3e0] sm:$0xff]  }
 0x719   :  { %v2776_v51 = vadd.f32 %v9210_v14, %v2761_v18 }
 0x71a   :  { %v8040_v55 = vpop.eup %8039  ;;  %v3576_v14 = vmax.f32 %v3564_v36, 0.0 }
 0x71b   :  { %v3182_v8 = vmul.f32 %v8040_v55, %v9439_v33  ;;  %v3147_v49 = vpop.xlane.xlu1 %3146  ;;  %v3577_v33 = vmax.f32 %v3565_v57, 0.0  ;;  %v2788_v58 = vmax.f32 %v2776_v51, 0.0 }
 0x71c   :  { %8041 = vrcp.f32 %v3147_v49  ;;  %v2708_v49 = vmul.f32 %v9243_v35, %v7406_v60 }
 0x71d   :  { %6881 = vmatmul.msk.f32.vlgmr.msrb.gmra.mxu3 %vm729_vm1, %v3182_v8  ;;  %6923 = vmatpush.xpose.msk.msrb.mxu2 %vm518_vm0, %v3577_v33  ;;  %v7601_v8 = vunpack.c.l.bf16 %v7802_v44  ;;  %v9680_v33 = vpop.f32.mrf.mxu0 }
 0x71e   :  { %6907 = vmatpush.xpose.msk.msrb.mxu3 %vm518_vm0, %v3569_v62  ;;  %6866 = vmatpush.xpose.msk.msra.mxu1 %vm518_vm0, %v2788_v58  ;;  %v2723_v57 = vadd.f32 %v9250_v15, %v2708_v49  ;;  %v7217_v15 = vunpack.c.l.bf16 %v7706_v56 }
 0x71f   :  { %6906 = vmatmul.msk.f32.gmra.mxu2 %vm518_vm0, %v3513_v48  ;;  %v3490_v48 = vmul.f32 %v9578_v6, %v7314_v59  ;;  %v9664_v62 = vpop.f32.mrf.mxu1  ;;  %v3495_v18 = vmul.f32 %v9578_v6, %v7601_v8 }
 0x720   :  { %v2735_v20 = vmax.f32 %v2723_v57, 0.0  ;;  %v3487_v59 = vmul.f32 %v9578_v6, %v7217_v15 }
 0x721   :  { %6924 = vmatpush.xpose.msk.msrb.mxu2 %vm518_vm0, %v3576_v14  ;;  %6867 = vmatmul.msk.f32.vlgmr.msra.gmra.mxu1 %vm518_vm0, %v2734_v31  ;;  %v3505_v12 = vadd.f32 %v9590_v39, %v3490_v48  ;;  %v3510_v47 = vadd.f32 %v9590_v39, %v3495_v18 }
 0x722   :  { %v8042_v17 = vpop.eup %8041  ;;  %6908 = vmatpush.xpose.msk.msrb.mxu3 %vm518_vm0, %v3568_v25  ;;  %v3521_v25 = vmax.f32 %v3509_v40, 0.0  ;;  %v3502_v14 = vadd.f32 %v9590_v39, %v3487_v59 }
 0x723   :  { %v3183_v61 = vmul.f32 %v8042_v17, %v9455_v16  ;;  %v3058_v16 = vsel %vm729_vm1, %v9664_v62, -inf  ;;  %v3517_v45 = vmax.f32 %v3505_v12, 0.0  ;;  %v3522_v36 = vmax.f32 %v3510_v47, 0.0 }
 0x724   :  { %v3162_v55 = vpop.xlane.xlu2 %3161  ;;  %3059 = vmax.xlane.f32.xlu1 %v3058_v16  ;;  %6922 = vmatmul.msk.f32.gmra.mxu0 %vm518_vm0, %v3521_v25  ;;  %v3514_v48 = vmax.f32 %v3502_v14, 0.0 }
 0x725   :  { %8043 = vrcp.f32 %v3162_v55  ;;  %6882 = vmatmul.msk.f32.gmra.mxu3 %vm729_vm1, %v3183_v61  ;;  %v9695_v17 = vpop.f32.mrf.mxu0  ;;  %v7218_v61 = vunpack.c.h.bf16 %v7706_v56 }
 0x727   :  { %6913 = vmatmul.msk.f32.vlgmr.msra.gmra.mxu2 %vm518_vm0, %v3516_v23  ;;  %v9683_v24 = vpop.f32.mrf.mxu1  ;;  %v3488_v31 = vmul.f32 %v9578_v6, %v7218_v61 }
 0x728   :  { %v3061_v51 = vsel %vm729_vm1, %v9683_v24, -inf }
 0x729   :  { %6868 = vmatmul.msk.f32.gmra.mxu1 %vm518_vm0, %v2735_v20  ;;  %3062 = vmax.xlane.f32.xlu0 %v3061_v51 }
 0x72b   :  { %v8044_v7 = vpop.eup %8043 }
 0x72c   :  { %v3188_v21 = vmul.f32 %v8044_v7, %v9465_v13  ;;  %v3165_v35 = vpop.xlane.xlu0 %3164  ;;  %v7602_v13 = vunpack.c.h.bf16 %v7802_v44  ;;  %v3503_v44 = vadd.f32 %v9590_v39, %v3488_v31 }
 0x72d   :  { %8045 = vrcp.f32 %v3165_v35 }
 0x72e   :  { %6887 = vmatmul.msk.f32.vlgmr.msra.gmra.mxu3 %vm729_vm1, %v3188_v21  ;;  %v3496_v58 = vmul.f32 %v9578_v6, %v7602_v13  ;;  %v3515_v60 = vmax.f32 %v3503_v44, 0.0 }
 0x72f   :  { %6914 = vmatmul.msk.f32.gmra.mxu2 %vm518_vm0, %v3517_v45 }
 0x730   :  { %v3511_v23 = vadd.f32 %v9590_v39, %v3496_v58 }
 0x732   :  { %v3523_v55 = vmax.f32 %v3511_v23, 0.0 }
 0x733   :  { %v8046_v3 = vpop.eup %8045 }
 0x734   :  { %v3189_v1 = vmul.f32 %v8046_v3, %v9472_v9  ;;  %v9705_v9 = vpop.f32.mrf.mxu0 }
 0x735   :  { %11269 = vst [vmem:[#allocation15_spill] sm:$0xff] %v9705_v9 }
 0x736   :  { %6888 = vmatmul.msk.f32.gmra.mxu3 %vm729_vm1, %v3189_v1 }
 0x737   :  { %6925 = vmatmul.msk.f32.vlgmr.msrb.gmra.mxu2 %vm518_vm0, %v3522_v36 }
 0x73c   :  { %v9708_v16 = vpop.f32.mrf.mxu0 }
 0x73d   :  { %11270 = vst [vmem:[#allocation16_spill] sm:$0xff] %v9708_v16  ;;  %v7818_v16 = vld [vmem:[%s11249_s0 + $0x460] sm:$0xff]  }
 0x73e   :  { %6909 = vmatmul.msk.f32.vlgmr.msrb.gmra.mxu3 %vm518_vm0, %v3514_v48 }
 0x73f   :  { %6926 = vmatmul.msk.f32.gmra.mxu2 %vm518_vm0, %v3523_v55 }
 0x744   :  { %v9710_v28 = vpop.f32.mrf.mxu0 }
 0x745   :  { %11271 = vst [vmem:[#allocation17_spill] sm:$0xff] %v9710_v28 }
 0x746   :  { %6910 = vmatmul.msk.f32.gmra.mxu3 %vm518_vm0, %v3515_v60 }
 0x74c   :  { %v9712_v12 = vpop.f32.mrf.mxu0 }
 0x74d   :  { %11272 = vst [vmem:[#allocation18_spill] sm:$0xff] %v9712_v12 }
 0x754   :  { %v9714_v8 = vpop.f32.mrf.mxu0 }
 0x755   :  { %11273 = vst [vmem:[#allocation19_spill] sm:$0xff] %v9714_v8 }
 0x75c   :  { %v9716_v6 = vpop.f32.mrf.mxu0 }
 0x75d   :  { %11274 = vst [vmem:[#allocation20_spill] sm:$0xff] %v9716_v6 }
 0x764   :  { %v9720_v39 = vpop.f32.mrf.mxu0 }
 0x76c   :  { %v9724_v57 = vpop.f32.mrf.mxu0 }
 0x774   :  { %v9728_v7 = vpop.f32.mrf.mxu0 }
 0x77a   :  { %v9718_v49 = vpop.f32.mrf.mxu2 }
 0x77c   :  { %v9732_v56 = vpop.f32.mrf.mxu0 }
 0x782   :  { %v9722_v38 = vpop.f32.mrf.mxu2 }
 0x784   :  { %v9740_v35 = vpop.f32.mrf.mxu0 }
 0x78a   :  { %v9726_v40 = vpop.f32.mrf.mxu2 }
 0x78c   :  { %v9745_v47 = vpop.f32.mrf.mxu0 }
 0x78d   :  { %11275 = vst [vmem:[#allocation21_spill] sm:$0xff] %v9745_v47 }
 0x792   :  { %v9730_v45 = vpop.f32.mrf.mxu2 }
 0x794   :  { %v3801_v36 = vpop.f32.mrf.mxu0 }
 0x795   :  { %v3866_v1 = vsel %vm729_vm1, %v3801_v36, -inf }
 0x797   :  { %v3060_v55 = vpop.xlane.xlu1 %3059 }
 0x79a   :  { %v9734_v18 = vpop.f32.mrf.mxu2 }
 0x79c   :  { %v3063_v54 = vpop.xlane.xlu0 %3062 }
 0x79d   :  { %v3095_v8 = vsub.f32 %v9683_v24, %v3063_v54 }
 0x79e   :  { %v9753_v14 = vpop.f32.mrf.mxu1 }
 0x79f   :  { %v3076_v23 = vsel %vm729_vm1, %v9753_v14, -inf }
 0x7a0   :  { %v9736_v20 = vpop.f32.mrf.mxu3 }
 0x7a2   :  { %v9738_v21 = vpop.f32.mrf.mxu2 }
 0x7a6   :  { %v9763_v44 = vpop.f32.mrf.mxu1 }
 0x7a8   :  { %v9742_v25 = vpop.f32.mrf.mxu3 }
 0x7aa   :  { %v3731_v15 = vpop.f32.mrf.mxu2 }
 0x7ab   :  { %v3854_v51 = vsel %vm729_vm1, %v3731_v15, -inf }
 0x7ac   :  { %3855 = vmax.xlane.f32.xlu2 %v3854_v51  ;;  %v3094_v51 = vsub.f32 %v9664_v62, %v3060_v55 }
 0x7b1   :  { %v9747_v13 = vpop.f32.mrf.mxu3 }
 0x7b2   :  { %v3734_v59 = vpop.f32.mrf.mxu2 }
 0x7b3   :  { %v3857_v3 = vsel %vm729_vm1, %v3734_v59, -inf }
 0x7b4   :  { %3858 = vmax.xlane.f32.xlu2 %v3857_v3 }
 0x7b9   :  { %v9750_v58 = vpop.f32.mrf.mxu3 }
 0x7ba   :  { %v9761_v31 = vpop.f32.mrf.mxu2 }
 0x7bb   :  { %v3872_v60 = vsel %vm729_vm1, %v9761_v31, -inf }
 0x7bc   :  { %3867 = vmax.xlane.f32.xlu2 %v3866_v1  ;;  %v3079_v1 = vsel %vm729_vm1, %v9763_v44, -inf }
 0x7c1   :  { %v9755_v61 = vpop.f32.mrf.mxu3 }
 0x7c2   :  { %v3848_v48 = vsel %vm729_vm1, %v9755_v61, -inf  ;;  %v9776_v52 = vpop.f32.mrf.mxu2 }
 0x7c3   :  { %3849 = vmax.xlane.f32.xlu1 %v3848_v48  ;;  %v9774_v48 = vpop.f32.mrf.mxu0  ;;  %v3875_v55 = vsel %vm729_vm1, %v9776_v52, -inf }
 0x7c4   :  { %3077 = vmax.xlane.f32.xlu2 %v3076_v23  ;;  %v3106_v23 = vmul.f32 1.442695, %v3094_v51  ;;  %v3869_v62 = vsel %vm729_vm1, %v9774_v48, -inf }
 0x7c6   :  { %8047 = vpow2.f32 %v3106_v23 }
 0x7c9   :  { %v9768_v3 = vpop.f32.mrf.mxu3 }
 0x7ca   :  { %v3851_v6 = vsel %vm729_vm1, %v9768_v3, -inf }
 0x7cb   :  { %3873 = vmax.xlane.f32.xlu1 %v3872_v60  ;;  %3852 = vmax.xlane.f32.xlu0 %v3851_v6  ;;  %v3108_v60 = vmul.f32 1.442695, %v3095_v8 }
 0x7cc   :  { %3080 = vmax.xlane.f32.xlu2 %v3079_v1  ;;  %v9783_v6 = vpop.eup %8047 }
 0x7cd   :  { %8049 = vpow2.f32 %v3108_v60  ;;  %v3130_v51 = vsel %vm729_vm1, %v9783_v6, 0.0  ;;  %v7697_v60 = vld [vmem:[%s11249_s0 + $0x98] sm:$0xff]  }
 0x7d3   :  { %3870 = vmax.xlane.f32.xlu1 %v3869_v62  ;;  %3876 = vmax.xlane.f32.xlu0 %v3875_v55  ;;  %v9787_v1 = vpop.eup %8049 }
 0x7d4   :  { %v3133_v0 = vsel %vm729_vm1, %v9787_v1, 0.0 }
 0x7db   :  { %3131 = vadd.xlane.f32.xlu0 %v3130_v51 }
 0x7e3   :  { %3134 = vadd.xlane.f32.xlu0 %v3133_v0  ;;  %v7182_v0 = vunpack.c.h.bf16 %v7697_v60 }
 0x81f   :  { %v3856_v63 = vpop.xlane.xlu2 %3855 }
 0x820   :  { %v3882_v23 = vsub.f32 %v3731_v15, %v3856_v63  ;;  %v2810_v63 = vmul.f32 %v9484_v41, %v7182_v0 }
 0x822   :  { %v3898_v12 = vmul.f32 1.442695, %v3882_v23 }
 0x824   :  { %8051 = vpow2.f32 %v3898_v12  ;;  %v7181_v12 = vunpack.c.l.bf16 %v7697_v60 }
 0x827   :  { %v3859_v54 = vpop.xlane.xlu2 %3858 }
 0x828   :  { %v3883_v24 = vsub.f32 %v3734_v59, %v3859_v54  ;;  %v2825_v54 = vadd.f32 %v9490_v10, %v2810_v63 }
 0x82a   :  { %v9791_v8 = vpop.eup %8051  ;;  %v3900_v62 = vmul.f32 1.442695, %v3883_v24  ;;  %v2809_v24 = vmul.f32 %v9484_v41, %v7181_v12 }
 0x82b   :  { %v3926_v55 = vsel %vm729_vm1, %v9791_v8, 0.0 }
 0x82c   :  { %8053 = vpow2.f32 %v3900_v62  ;;  %3927 = vadd.xlane.f32.xlu1 %v3926_v55  ;;  %v2837_v62 = vmax.f32 %v2825_v54, 0.0  ;;  %v2824_v55 = vadd.f32 %v9490_v10, %v2809_v24 }
 0x82e   :  { %3210 = vmatpush.msrb.mxu1 %v2837_v62  ;;  %v2836_v60 = vmax.f32 %v2824_v55, 0.0 }
 0x82f   :  { %v3868_v51 = vpop.xlane.xlu2 %3867 }
 0x830   :  { %v3886_v37 = vsub.f32 %v3801_v36, %v3868_v51  ;;  %3211 = vmatpush.msrb.mxu1 %v2836_v60 }
 0x832   :  { %v9799_v15 = vpop.eup %8053  ;;  %v3906_v59 = vmul.f32 1.442695, %v3886_v37 }
 0x833   :  { %v3929_v23 = vsel %vm729_vm1, %v9799_v15, 0.0 }
 0x834   :  { %8055 = vpow2.f32 %v3906_v59  ;;  %3930 = vadd.xlane.f32.xlu2 %v3929_v23 }
 0x836   :  { %v3850_v22 = vpop.xlane.xlu1 %3849 }
 0x837   :  { %v3078_v36 = vpop.xlane.xlu2 %3077  ;;  %v3880_v51 = vsub.f32 %v9755_v61, %v3850_v22 }
 0x838   :  { %v3100_v37 = vsub.f32 %v9753_v14, %v3078_v36 }
 0x839   :  { %v3894_v0 = vmul.f32 1.442695, %v3880_v51 }
 0x83a   :  { %v9808_v28 = vpop.eup %8055  ;;  %v3118_v63 = vmul.f32 1.442695, %v3100_v37 }
 0x83b   :  { %8057 = vpow2.f32 %v3894_v0  ;;  %v3938_v12 = vsel %vm729_vm1, %v9808_v28, 0.0 }
 0x83c   :  { %8059 = vpow2.f32 %v3118_v63  ;;  %3939 = vadd.xlane.f32.xlu2 %v3938_v12 }
 0x83e   :  { %v3853_v59 = vpop.xlane.xlu0 %3852  ;;  %v3874_v23 = vpop.xlane.xlu1 %3873 }
 0x83f   :  { %v3881_v54 = vsub.f32 %v9768_v3, %v3853_v59  ;;  %v3888_v22 = vsub.f32 %v9761_v31, %v3874_v23  ;;  %v3081_v51 = vpop.xlane.xlu2 %3080 }
 0x840   :  { %v3101_v63 = vsub.f32 %v9763_v44, %v3081_v51 }
 0x841   :  { %v9814_v61 = vpop.eup %8057  ;;  %v3896_v14 = vmul.f32 1.442695, %v3881_v54  ;;  %v3910_v24 = vmul.f32 1.442695, %v3888_v22 }
 0x842   :  { %v9816_v62 = vpop.eup %8059  ;;  %v3920_v55 = vsel %vm729_vm1, %v9814_v61, 0.0 }
 0x843   :  { %8061 = vpow2.f32 %v3896_v14  ;;  %v3148_v36 = vsel %vm729_vm1, %v9816_v62, 0.0  ;;  %3921 = vadd.xlane.f32.xlu1 %v3920_v55 }
 0x844   :  { %3149 = vadd.xlane.f32.xlu2 %v3148_v36  ;;  %8063 = vpow2.f32 %v3910_v24 }
 0x846   :  { %v3877_v3 = vpop.xlane.xlu0 %3876  ;;  %v3871_v60 = vpop.xlane.xlu1 %3870 }
 0x847   :  { %v3889_v31 = vsub.f32 %v9776_v52, %v3877_v3  ;;  %v3887_v37 = vsub.f32 %v9774_v48, %v3871_v60  ;;  %v3120_v52 = vmul.f32 1.442695, %v3101_v63 }
 0x849   :  { %v9824_v0 = vpop.eup %8061  ;;  %v3912_v12 = vmul.f32 1.442695, %v3889_v31  ;;  %v3908_v59 = vmul.f32 1.442695, %v3887_v37 }
 0x84a   :  { %v3923_v23 = vsel %vm729_vm1, %v9824_v0, 0.0  ;;  %v9829_v54 = vpop.eup %8063 }
 0x84b   :  { %8065 = vpow2.f32 %v3912_v12  ;;  %3924 = vadd.xlane.f32.xlu0 %v3923_v23  ;;  %v3944_v22 = vsel %vm729_vm1, %v9829_v54, 0.0  ;;  %v7746_v12 = vld [vmem:[%s11249_s0 + $0x220] sm:$0xff]  }
 0x84c   :  { %8067 = vpow2.f32 %v3908_v59  ;;  %3945 = vadd.xlane.f32.xlu1 %v3944_v22  ;;  %v7851_v59 = vld [vmem:[%s11250_s1 + $0x14] ss:$0 sm:$0xff] }
 0x84d   :  { %v7852_v22 = vld [vmem:[%s11251_s2 + $0x14] ss:$0 sm:$0xff] }
 0x84e   :  { %v3132_v48 = vpop.xlane.xlu0 %3131 }
 0x84f   :  { %8069 = vrcp.f32 %v3132_v48 }
 0x850   :  { %8071 = vpow2.f32 %v3120_v52  ;;  %v7377_v52 = vunpack.c.l.bf16 %v7746_v12 }
 0x851   :  { %v9833_v14 = vpop.eup %8065 }
 0x852   :  { %v9835_v44 = vpop.eup %8067  ;;  %v3947_v24 = vsel %vm729_vm1, %v9833_v14, 0.0 }
 0x853   :  { %3948 = vadd.xlane.f32.xlu0 %v3947_v24  ;;  %v3941_v55 = vsel %vm729_vm1, %v9835_v44, 0.0  ;;  %v3597_v24 = vmul.f32 %v7851_v59, %v7377_v52 }
 0x854   :  { %3942 = vadd.xlane.f32.xlu1 %v3941_v55 }
 0x855   :  { %v8070_v36 = vpop.eup %8069  ;;  %v3612_v55 = vadd.f32 %v7852_v22, %v3597_v24 }
 0x856   :  { %v3178_v51 = vmul.f32 %v8070_v36, %v9783_v6  ;;  %v3135_v3 = vpop.xlane.xlu0 %3134  ;;  %v9842_v60 = vpop.eup %8071  ;;  %v7378_v6 = vunpack.c.h.bf16 %v7746_v12 }
 0x857   :  { %8073 = vrcp.f32 %v3135_v3  ;;  %v3151_v31 = vsel %vm729_vm1, %v9842_v60, 0.0  ;;  %v3624_v36 = vmax.f32 %v3612_v55, 0.0  ;;  %v7769_v3 = vld [vmem:[%s11249_s0 + $0x2d8] sm:$0xff]  }
 0x858   :  { %6877 = vmatmul.msk.f32.vlgmr.msrb.gmra.mxu1 %vm729_vm1, %v3178_v51  ;;  %v3598_v23 = vmul.f32 %v7851_v59, %v7378_v6  ;;  %v7722_v51 = vld [vmem:[%s11249_s0 + $0x160] sm:$0xff]  }
 0x859   :  { %v7281_v6 = vunpack.c.l.bf16 %v7722_v51 }
 0x85a   :  { %v3613_v48 = vadd.f32 %v7852_v22, %v3598_v23  ;;  %v7469_v23 = vunpack.c.l.bf16 %v7769_v3 }
 0x85b   :  { %3152 = vadd.xlane.f32.xlu0 %v3151_v31  ;;  %v7282_v31 = vunpack.c.h.bf16 %v7722_v51 }
 0x85d   :  { %v8074_v37 = vpop.eup %8073 }
 0x85e   :  { %v3179_v63 = vmul.f32 %v8074_v37, %v9787_v1  ;;  %v3625_v1 = vmax.f32 %v3613_v48, 0.0  ;;  %v7470_v37 = vunpack.c.h.bf16 %v7769_v3  ;;  %v3595_v48 = vmul.f32 %v7851_v59, %v7281_v6 }
 0x860   :  { %6878 = vmatmul.msk.f32.gmra.mxu1 %vm729_vm1, %v3179_v63  ;;  %4052 = vmatpush.msra.mxu2 %v3625_v1  ;;  %v3596_v63 = vmul.f32 %v7851_v59, %v7282_v31  ;;  %v2816_v12 = vmul.f32 %v9484_v41, %v7470_v37  ;;  %v2815_v1 = vmul.f32 %v9484_v41, %v7469_v23  ;;  %v7666_v37 = vunpack.c.h.bf16 %v7818_v16 }
 0x861   :  { %v7665_v41 = vunpack.c.l.bf16 %v7818_v16 }
 0x862   :  { %4053 = vmatpush.msra.mxu2 %v3624_v36  ;;  %v3611_v52 = vadd.f32 %v7852_v22, %v3596_v63  ;;  %v2831_v24 = vadd.f32 %v9490_v10, %v2816_v12  ;;  %v3610_v36 = vadd.f32 %v7852_v22, %v3595_v48  ;;  %v2830_v50 = vadd.f32 %v9490_v10, %v2815_v1  ;;  %v7794_v48 = vld [vmem:[%s11249_s0 + $0x3a0] sm:$0xff]  }
 0x863   :  { %v3604_v63 = vmul.f32 %v7851_v59, %v7666_v37  ;;  %v3603_v12 = vmul.f32 %v7851_v59, %v7665_v41  ;;  %v7569_v16 = vunpack.c.l.bf16 %v7794_v48 }
 0x864   :  { %v3623_v55 = vmax.f32 %v3611_v52, 0.0  ;;  %v2843_v27 = vmax.f32 %v2831_v24, 0.0  ;;  %v3622_v51 = vmax.f32 %v3610_v36, 0.0  ;;  %v2842_v3 = vmax.f32 %v2830_v50, 0.0  ;;  %v7715_v36 = vld [vmem:[%s11249_s0 + $0x128] sm:$0xff]  }
 0x865   :  { %v3619_v6 = vadd.f32 %v7852_v22, %v3604_v63  ;;  %v3618_v52 = vadd.f32 %v7852_v22, %v3603_v12  ;;  %v7254_v37 = vunpack.c.h.bf16 %v7715_v36 }
 0x866   :  { %4023 = vmatpush.msra.mxu0 %v3623_v55  ;;  %3297 = vmatpush.msra.mxu1 %v2843_v27  ;;  %v7570_v27 = vunpack.c.h.bf16 %v7794_v48 }
 0x867   :  { %v3631_v23 = vmax.f32 %v3619_v6, 0.0  ;;  %v3630_v50 = vmax.f32 %v3618_v52, 0.0 }
 0x868   :  { %4024 = vmatpush.msra.mxu0 %v3622_v51  ;;  %3298 = vmatpush.msra.mxu1 %v2842_v3  ;;  %v3602_v55 = vmul.f32 %v7851_v59, %v7570_v27  ;;  %v3601_v51 = vmul.f32 %v7851_v59, %v7569_v16  ;;  %v9887_v3 = vld [vmem:[%s11251_s2 + $0xd] ss:$0 sm:$0xff] }
 0x869   :  { %4139 = vmatpush.msrb.mxu2 %v3631_v23 }
 0x86a   :  { %v3616_v41 = vadd.f32 %v7852_v22, %v3601_v51 }
 0x86b   :  { %4140 = vmatpush.msrb.mxu2 %v3630_v50 }
 0x89f   :  { %v3928_v31 = vpop.xlane.xlu1 %3927 }
 0x8a0   :  { %8075 = vrcp.f32 %v3928_v31  ;;  %v9882_v31 = vld [vmem:[%s11250_s1 + $0xd] ss:$0 sm:$0xff] }
 0x8a1   :  { %v4326_v6 = vmul.f32 %v9882_v31, %v7254_v37 }
 0x8a3   :  { %v4341_v48 = vadd.f32 %v9887_v3, %v4326_v6 }
 0x8a5   :  { %v4353_v59 = vmax.f32 %v4341_v48, 0.0 }
 0x8a6   :  { %v8076_v10 = vpop.eup %8075 }
 0x8a7   :  { %v3966_v24 = vmul.f32 %v8076_v10, %v9791_v8  ;;  %v3931_v1 = vpop.xlane.xlu2 %3930  ;;  %v3617_v8 = vadd.f32 %v7852_v22, %v3602_v55  ;;  %v3628_v10 = vmax.f32 %v3616_v41, 0.0  ;;  %v7691_v22 = vld [vmem:[%s11249_s0 + $0x68] sm:$0xff]  }
 0x8a8   :  { %8077 = vrcp.f32 %v3931_v1  ;;  %v7158_v27 = vunpack.c.h.bf16 %v7691_v22 }
 0x8a9   :  { %6931 = vmatmul.msk.f32.vlgmr.msra.gmra.mxu2 %vm729_vm1, %v3966_v24  ;;  %v3629_v63 = vmax.f32 %v3617_v8, 0.0  ;;  %v7253_v24 = vunpack.c.l.bf16 %v7715_v36  ;;  %v7157_v8 = vunpack.c.l.bf16 %v7691_v22 }
 0x8aa   :  { %6957 = vmatpush.xpose.msk.msra.mxu2 %vm518_vm0, %v4353_v59  ;;  %v4324_v50 = vmul.f32 %v9882_v31, %v7158_v27 }
 0x8ab   :  { %4110 = vmatpush.msrb.mxu0 %v3629_v63  ;;  %v4325_v1 = vmul.f32 %v9882_v31, %v7253_v24  ;;  %v4323_v37 = vmul.f32 %v9882_v31, %v7157_v8  ;;  %v7787_v63 = vld [vmem:[%s11249_s0 + $0x368] sm:$0xff]  }
 0x8ac   :  { %v4339_v51 = vadd.f32 %v9887_v3, %v4324_v50  ;;  %v7542_v41 = vunpack.c.h.bf16 %v7787_v63  ;;  %v7541_v27 = vunpack.c.l.bf16 %v7787_v63 }
 0x8ad   :  { %4111 = vmatpush.msrb.mxu0 %v3628_v10  ;;  %v6889_v10 = vld [vmem:[%s11252_s3 + $0xc] sm:$0xf] }
 0x8ae   :  { %v8078_v12 = vpop.eup %8077  ;;  %6890 = vmatpush.msk.msrb.mxu1 %vm1753_vm2, %v6889_v10  ;;  %v4332_v22 = vmul.f32 %v9882_v31, %v7542_v41  ;;  %v7707_v41 = vld [vmem:[%s11249_s0 + $0xe8] sm:$0xff]  }
 0x8af   :  { %v3940_v23 = vpop.xlane.xlu2 %3939  ;;  %v3967_v52 = vmul.f32 %v8078_v12, %v9799_v15  ;;  %v4340_v15 = vadd.f32 %v9887_v3, %v4325_v1  ;;  %v4351_v12 = vmax.f32 %v4339_v51, 0.0 }
 0x8b1   :  { %6932 = vmatmul.msk.f32.gmra.mxu2 %vm729_vm1, %v3967_v52  ;;  %v4352_v55 = vmax.f32 %v4340_v15, 0.0  ;;  %v4338_v52 = vadd.f32 %v9887_v3, %v4323_v37 }
 0x8b3   :  { %6958 = vmatpush.xpose.msk.msra.mxu2 %vm518_vm0, %v4352_v55  ;;  %v4350_v50 = vmax.f32 %v4338_v52, 0.0  ;;  %v4347_v55 = vadd.f32 %v9887_v3, %v4332_v22 }
 0x8b6   :  { %v3922_v16 = vpop.xlane.xlu1 %3921 }
 0x8b7   :  { %v3150_v36 = vpop.xlane.xlu2 %3149  ;;  %8079 = vrcp.f32 %v3922_v16  ;;  %v4331_v16 = vmul.f32 %v9882_v31, %v7541_v27  ;;  %v7683_v27 = vld [vmem:[%s11249_s0 + $0x28] sm:$0xff]  }
 0x8b8   :  { %8081 = vrcp.f32 %v3150_v36 }
 0x8bd   :  { %v8080_v6 = vpop.eup %8079 }
 0x8be   :  { %v8082_v48 = vpop.eup %8081  ;;  %v3964_v24 = vmul.f32 %v8080_v6, %v9814_v61  ;;  %v3925_v59 = vpop.xlane.xlu0 %3924  ;;  %v7739_v61 = vld [vmem:[%s11249_s0 + $0x1e8] sm:$0xff]   ;;  %v4359_v6 = vmax.f32 %v4347_v55, 0.0 }
 0x8bf   :  { %v3184_v1 = vmul.f32 %v8082_v48, %v9816_v62  ;;  %8083 = vrcp.f32 %v3925_v59  ;;  %v3946_v15 = vpop.xlane.xlu1 %3945  ;;  %v7350_v62 = vunpack.c.h.bf16 %v7739_v61  ;;  %v7349_v52 = vunpack.c.l.bf16 %v7739_v61  ;;  %v9937_v59 = vld [vmem:[%s11250_s1 + $0x5] ss:$0 sm:$0xff] }
 0x8c0   :  { %6929 = vmatmul.msk.f32.vlgmr.msra.gmra.mxu0 %vm729_vm1, %v3964_v24  ;;  %8085 = vrcp.f32 %v3946_v15 }
 0x8c1   :  { %6883 = vmatmul.msk.f32.vlgmr.msra.gmra.mxu1 %vm729_vm1, %v3184_v1  ;;  %6953 = vmatpush.xpose.msk.msra.mxu0 %vm518_vm0, %v4351_v12  ;;  %8087 = vrcp.f32 %v3940_v23  ;;  %v4328_v8 = vmul.f32 %v9882_v31, %v7350_v62  ;;  %v4346_v12 = vadd.f32 %v9887_v3, %v4331_v16  ;;  %v4327_v48 = vmul.f32 %v9882_v31, %v7349_v52 }
 0x8c3   :  { %v4343_v23 = vadd.f32 %v9887_v3, %v4328_v8  ;;  %v4358_v22 = vmax.f32 %v4346_v12, 0.0  ;;  %v7125_v8 = vunpack.c.l.bf16 %v7683_v27 }
 0x8c5   :  { %v8084_v36 = vpop.eup %8083  ;;  %6954 = vmatpush.xpose.msk.msra.mxu0 %vm518_vm0, %v4350_v50  ;;  %v4355_v15 = vmax.f32 %v4343_v23, 0.0  ;;  %v4342_v50 = vadd.f32 %v9887_v3, %v4327_v48  ;;  %v4269_v12 = vmul.f32 %v9937_v59, %v7125_v8 }
 0x8c6   :  { %v3949_v51 = vpop.xlane.xlu0 %3948  ;;  %v3965_v37 = vmul.f32 %v8084_v36, %v9824_v0  ;;  %v8086_v63 = vpop.eup %8085  ;;  %v7221_v0 = vunpack.c.l.bf16 %v7707_v41  ;;  %v9950_v36 = vld [vmem:[%s11251_s2 + $0x5] ss:$0 sm:$0xff] }
 0x8c7   :  { %8089 = vrcp.f32 %v3949_v51  ;;  %v3972_v10 = vmul.f32 %v8086_v63, %v9829_v54  ;;  %v3943_v24 = vpop.xlane.xlu1 %3942  ;;  %v8088_v1 = vpop.eup %8087  ;;  %v4354_v51 = vmax.f32 %v4342_v50, 0.0 }
 0x8c8   :  { %6930 = vmatmul.msk.f32.gmra.mxu0 %vm729_vm1, %v3965_v37  ;;  %8091 = vrcp.f32 %v3943_v24  ;;  %v3970_v61 = vmul.f32 %v8088_v1, %v9808_v28  ;;  %v4271_v16 = vmul.f32 %v9937_v59, %v7221_v0  ;;  %v7811_v37 = vld [vmem:[%s11249_s0 + $0x428] sm:$0xff]  }
 0x8c9   :  { %6937 = vmatmul.msk.f32.vlgmr.msrb.gmra.mxu2 %vm729_vm1, %v3972_v10  ;;  %v7779_v0 = vld [vmem:[%s11249_s0 + $0x328] sm:$0xff]   ;;  %v7637_v1 = vunpack.c.l.bf16 %v7811_v37 }
 0x8ca   :  { %6969 = vmatpush.xpose.msk.msrb.mxu2 %vm518_vm0, %v4359_v6  ;;  %v4286_v28 = vadd.f32 %v9950_v36, %v4271_v16  ;;  %v7638_v6 = vunpack.c.h.bf16 %v7811_v37  ;;  %v7509_v50 = vunpack.c.l.bf16 %v7779_v0  ;;  %v7731_v16 = vld [vmem:[%s11249_s0 + $0x1a8] sm:$0xff]  }
 0x8cb   :  { %v7317_v37 = vunpack.c.l.bf16 %v7731_v16 }
 0x8cc   :  { %v4334_v10 = vmul.f32 %v9882_v31, %v7638_v6  ;;  %v4298_v24 = vmax.f32 %v4286_v28, 0.0  ;;  %v4277_v28 = vmul.f32 %v9937_v59, %v7509_v50 }
 0x8cd   :  { %v8090_v54 = vpop.eup %8089 }
 0x8ce   :  { %v3153_v55 = vpop.xlane.xlu0 %3152  ;;  %v3973_v62 = vmul.f32 %v8090_v54, %v9833_v14  ;;  %6970 = vmatpush.xpose.msk.msrb.mxu2 %vm518_vm0, %v4358_v22  ;;  %v7222_v14 = vunpack.c.h.bf16 %v7707_v41  ;;  %v8092_v63 = vpop.eup %8091  ;;  %v4284_v22 = vadd.f32 %v9950_v36, %v4269_v12  ;;  %v7126_v54 = vunpack.c.h.bf16 %v7683_v27 }
 0x8cf   :  { %8093 = vrcp.f32 %v3153_v55  ;;  %v3971_v48 = vmul.f32 %v8092_v63, %v9835_v44  ;;  %v4292_v6 = vadd.f32 %v9950_v36, %v4277_v28  ;;  %v7510_v12 = vunpack.c.h.bf16 %v7779_v0 }
 0x8d0   :  { %6935 = vmatmul.msk.f32.vlgmr.msrb.gmra.mxu0 %vm729_vm1, %v3970_v61  ;;  %v4272_v41 = vmul.f32 %v9937_v59, %v7222_v14  ;;  %v4296_v61 = vmax.f32 %v4284_v22, 0.0  ;;  %v4270_v55 = vmul.f32 %v9937_v59, %v7126_v54 }
 0x8d1   :  { %6961 = vmatpush.xpose.msk.msrb.mxu0 %vm518_vm0, %v4355_v15  ;;  %6938 = vmatmul.msk.f32.gmra.mxu2 %vm729_vm1, %v3973_v62  ;;  %v4349_v15 = vadd.f32 %v9887_v3, %v4334_v10  ;;  %v4273_v10 = vmul.f32 %v9937_v59, %v7317_v37 }
 0x8d2   :  { %v4287_v44 = vadd.f32 %v9950_v36, %v4272_v41  ;;  %v4285_v14 = vadd.f32 %v9950_v36, %v4270_v55 }
 0x8d3   :  { %v4361_v8 = vmax.f32 %v4349_v15, 0.0  ;;  %v4288_v41 = vadd.f32 %v9950_v36, %v4273_v10  ;;  %v7803_v15 = vld [vmem:[%s11249_s0 + $0x3e8] sm:$0xff]   ;;  %v7762_v10 = vld [vmem:[%s11249_s0 + $0x2a0] sm:$0xff]  }
 0x8d4   :  { %v7605_v50 = vunpack.c.l.bf16 %v7803_v15 }
 0x8d5   :  { %v8094_v52 = vpop.eup %8093  ;;  %6962 = vmatpush.xpose.msk.msrb.mxu0 %vm518_vm0, %v4354_v51  ;;  %v3213_v62 = vpop.f32.mrf.mxu1  ;;  %v4299_v51 = vmax.f32 %v4287_v44, 0.0  ;;  %v4300_v22 = vmax.f32 %v4288_v41, 0.0  ;;  %v8259_v41 = vld [vmem:[%s11251_s2 + $0xc] ss:$0 sm:$0xff] }
 0x8d6   :  { %v3185_v23 = vmul.f32 %v8094_v52, %v9842_v60  ;;  %v4333_v60 = vmul.f32 %v9882_v31, %v7637_v1  ;;  %v4297_v52 = vmax.f32 %v4285_v14, 0.0  ;;  %v7318_v1 = vunpack.c.h.bf16 %v7731_v16 }
 0x8d7   :  { %v4279_v55 = vmul.f32 %v9937_v59, %v7605_v50  ;;  %v7606_v16 = vunpack.c.h.bf16 %v7803_v15  ;;  %v7754_v50 = vld [vmem:[%s11249_s0 + $0x260] sm:$0xff]  }
 0x8d8   :  { %6884 = vmatmul.msk.f32.gmra.mxu1 %vm729_vm1, %v3185_v23  ;;  %6936 = vmatmul.msk.f32.gmra.mxu0 %vm729_vm1, %v3971_v48  ;;  %v4348_v27 = vadd.f32 %v9887_v3, %v4333_v60  ;;  %v4304_v23 = vmax.f32 %v4292_v6, 0.0  ;;  %v4278_v48 = vmul.f32 %v9937_v59, %v7510_v12  ;;  %v4274_v54 = vmul.f32 %v9937_v59, %v7318_v1 }
 0x8d9   :  { %6959 = vmatmul.msk.f32.vlgmr.msra.gmra.mxu2 %vm518_vm0, %v4298_v24 }
 0x8da   :  { %v4360_v63 = vmax.f32 %v4348_v27, 0.0  ;;  %v4293_v0 = vadd.f32 %v9950_v36, %v4278_v48  ;;  %v4289_v44 = vadd.f32 %v9950_v36, %v4274_v54  ;;  %v8258_v48 = vld [vmem:[%s11250_s1 + $0xc] ss:$0 sm:$0xff] }
 0x8dc   :  { %v4305_v60 = vmax.f32 %v4293_v0, 0.0  ;;  %v7441_v0 = vunpack.c.l.bf16 %v7762_v10 }
 0x8dd   :  { %v3216_v24 = vpop.f32.mrf.mxu1 }
 0x8e0   :  { %6891 = vmatmul.msk.f32.vlgmr.msrb.gmra.mxu1 %vm518_vm0, %v3213_v62  ;;  %6955 = vmatmul.msk.f32.vlgmr.msra.gmra.mxu0 %vm518_vm0, %v4296_v61  ;;  %v4301_v61 = vmax.f32 %v4289_v44, 0.0  ;;  %v4294_v62 = vadd.f32 %v9950_v36, %v4279_v55  ;;  %v3545_v44 = vmul.f32 %v8258_v48, %v7441_v0 }
 0x8e1   :  { %6973 = vmatpush.xpose.msk.msra.mxu0 %vm518_vm0, %v4361_v8  ;;  %6960 = vmatmul.msk.f32.gmra.mxu2 %vm518_vm0, %v4299_v51 }
 0x8e2   :  { %v4306_v8 = vmax.f32 %v4294_v62, 0.0  ;;  %v3560_v55 = vadd.f32 %v8259_v41, %v3545_v44  ;;  %v8260_v62 = vld [vmem:[%s11250_s1 + $0x4] ss:$0 sm:$0xff] }
 0x8e5   :  { %6974 = vmatpush.xpose.msk.msra.mxu0 %vm518_vm0, %v4360_v63 }
 0x8e8   :  { %6892 = vmatmul.msk.f32.gmra.mxu1 %vm518_vm0, %v3216_v24  ;;  %6956 = vmatmul.msk.f32.gmra.mxu0 %vm518_vm0, %v4297_v52 }
 0x8e9   :  { %6971 = vmatmul.msk.f32.vlgmr.msrb.gmra.mxu2 %vm518_vm0, %v4304_v23  ;;  %v7442_v23 = vunpack.c.h.bf16 %v7762_v10  ;;  %v7410_v10 = vunpack.c.h.bf16 %v7754_v50 }
 0x8eb   :  { %v3546_v24 = vmul.f32 %v8258_v48, %v7442_v23  ;;  %v7763_v23 = vld [vmem:[%s11249_s0 + $0x2a8] sm:$0xff]   ;;  %v3492_v48 = vmul.f32 %v8260_v62, %v7410_v10 }
 0x8ed   :  { %v3561_v1 = vadd.f32 %v8259_v41, %v3546_v24  ;;  %v7446_v24 = vunpack.c.h.bf16 %v7763_v23 }
 0x8f0   :  { %6893 = vmatmul.msk.f32.gmra.mxu1 %vm518_vm0, %v9718_v49  ;;  %6963 = vmatmul.msk.f32.vlgmr.msrb.gmra.mxu0 %vm518_vm0, %v4300_v22  ;;  %v4280_v49 = vmul.f32 %v9937_v59, %v7606_v16 }
 0x8f1   :  { %6972 = vmatmul.msk.f32.gmra.mxu2 %vm518_vm0, %v4305_v60  ;;  %v3573_v60 = vmax.f32 %v3561_v1, 0.0  ;;  %v4330_v1 = vmul.f32 %v9882_v31, %v7446_v24 }
 0x8f2   :  { %v4295_v27 = vadd.f32 %v9950_v36, %v4280_v49 }
 0x8f3   :  { %6915 = vmatpush.xpose.msk.msra.mxu3 %vm518_vm0, %v3573_v60  ;;  %v4345_v60 = vadd.f32 %v9887_v3, %v4330_v1 }
 0x8f4   :  { %v4307_v51 = vmax.f32 %v4295_v27, 0.0 }
 0x8f8   :  { %6894 = vmatmul.msk.f32.gmra.mxu1 %vm518_vm0, %v9722_v38  ;;  %6964 = vmatmul.msk.f32.gmra.mxu0 %vm518_vm0, %v4301_v61  ;;  %v7409_v61 = vunpack.c.l.bf16 %v7754_v50 }
 0x8fa   :  { %v3491_v16 = vmul.f32 %v8260_v62, %v7409_v61  ;;  %v4357_v61 = vmax.f32 %v4345_v60, 0.0 }
 0x8fc   :  { %6965 = vmatpush.xpose.msk.msra.mxu1 %vm518_vm0, %v4357_v61 }
 0x900   :  { %6895 = vmatmul.msk.f32.gmra.mxu1 %vm518_vm0, %v9736_v20  ;;  %6975 = vmatmul.msk.f32.vlgmr.msra.gmra.mxu0 %vm518_vm0, %v4306_v8  ;;  %v3572_v8 = vmax.f32 %v3560_v55, 0.0 }
 0x902   :  { %6916 = vmatpush.xpose.msk.msra.mxu3 %vm518_vm0, %v3572_v8 }
 0x908   :  { %6896 = vmatmul.msk.f32.gmra.mxu1 %vm518_vm0, %v9742_v25  ;;  %6976 = vmatmul.msk.f32.gmra.mxu0 %vm518_vm0, %v4307_v51 }
 0x92c   :  { %v10018_v38 = vpop.f32.mrf.mxu2 }
 0x934   :  { %v10023_v37 = vpop.f32.mrf.mxu2 }
 0x93d   :  { %v10020_v28 = vpop.f32.mrf.mxu0 }
 0x93e   :  { %v3300_v14 = vpop.f32.mrf.mxu1 }
 0x93f   :  { %6897 = vmatmul.msk.f32.gmra.mxu1 %vm518_vm0, %v3300_v14 }
 0x945   :  { %v10025_v20 = vpop.f32.mrf.mxu0 }
 0x94c   :  { %v10027_v63 = vpop.f32.mrf.mxu2 }
 0x94d   :  { %v10029_v6 = vpop.f32.mrf.mxu0 }
 0x954   :  { %v10031_v12 = vpop.f32.mrf.mxu2 }
 0x955   :  { %v3303_v25 = vpop.f32.mrf.mxu1  ;;  %v10033_v52 = vpop.f32.mrf.mxu0 }
 0x956   :  { %6898 = vmatmul.msk.f32.gmra.mxu1 %vm518_vm0, %v3303_v25 }
 0x95c   :  { %v4480_v22 = vpop.f32.mrf.mxu2 }
 0x95d   :  { %v4632_v54 = vsel %vm729_vm1, %v4480_v22, -inf  ;;  %v10046_v15 = vpop.f32.mrf.mxu0 }
 0x95e   :  { %6899 = vmatmul.msk.f32.gmra.mxu1 %vm518_vm0, %v9726_v40  ;;  %4633 = vmax.xlane.f32.xlu1 %v4632_v54  ;;  %v8261_v40 = vld [vmem:[%s11251_s2 + $0x4] ss:$0 sm:$0xff] }
 0x95f   :  { %v3506_v49 = vadd.f32 %v8261_v40, %v3491_v16  ;;  %v3507_v41 = vadd.f32 %v8261_v40, %v3492_v48 }
 0x961   :  { %v3518_v51 = vmax.f32 %v3506_v49, 0.0  ;;  %v3519_v54 = vmax.f32 %v3507_v41, 0.0 }
 0x963   :  { %6917 = vmatmul.msk.f32.vlgmr.msra.gmra.mxu3 %vm518_vm0, %v3518_v51 }
 0x964   :  { %v4483_v27 = vpop.f32.mrf.mxu2 }
 0x965   :  { %v4635_v14 = vsel %vm729_vm1, %v4483_v27, -inf  ;;  %v10062_v25 = vpop.f32.mrf.mxu0 }
 0x966   :  { %6900 = vmatmul.msk.f32.gmra.mxu1 %vm518_vm0, %v9730_v45  ;;  %4636 = vmax.xlane.f32.xlu2 %v4635_v14  ;;  %v7445_v14 = vunpack.c.l.bf16 %v7763_v23 }
 0x968   :  { %v4329_v10 = vmul.f32 %v9882_v31, %v7445_v14  ;;  %v7755_v31 = vld [vmem:[%s11249_s0 + $0x268] sm:$0xff]  }
 0x969   :  { %v7413_v23 = vunpack.c.l.bf16 %v7755_v31 }
 0x96b   :  { %6918 = vmatmul.msk.f32.gmra.mxu3 %vm518_vm0, %v3519_v54 }
 0x96c   :  { %v4585_v0 = vpop.f32.mrf.mxu2 }
 0x96d   :  { %v4650_v44 = vsel %vm729_vm1, %v4585_v0, -inf  ;;  %v4515_v45 = vpop.f32.mrf.mxu0 }
 0x96e   :  { %6901 = vmatmul.msk.f32.gmra.mxu1 %vm518_vm0, %v9747_v13  ;;  %4651 = vmax.xlane.f32.xlu0 %v4650_v44  ;;  %v4638_v50 = vsel %vm729_vm1, %v4515_v45, -inf }
 0x96f   :  { %4639 = vmax.xlane.f32.xlu1 %v4638_v50 }
 0x974   :  { %v4588_v55 = vpop.f32.mrf.mxu2 }
 0x975   :  { %v4653_v62 = vsel %vm729_vm1, %v4588_v55, -inf  ;;  %v4518_v16 = vpop.f32.mrf.mxu0 }
 0x976   :  { %6902 = vmatmul.msk.f32.gmra.mxu1 %vm518_vm0, %v9750_v58  ;;  %4654 = vmax.xlane.f32.xlu2 %v4653_v62  ;;  %v4641_v8 = vsel %vm729_vm1, %v4518_v16, -inf  ;;  %v4344_v58 = vadd.f32 %v9887_v3, %v4329_v10 }
 0x977   :  { %4642 = vmax.xlane.f32.xlu0 %v4641_v8 }
 0x978   :  { %v4356_v48 = vmax.f32 %v4344_v58, 0.0 }
 0x97a   :  { %6966 = vmatpush.xpose.msk.msra.mxu1 %vm518_vm0, %v4356_v48 }
 0x97d   :  { %v10082_v13 = vpop.f32.mrf.mxu0 }
 0x97e   :  { %v4656_v40 = vsel %vm729_vm1, %v10082_v13, -inf }
 0x97f   :  { %4657 = vmax.xlane.f32.xlu1 %v4656_v40  ;;  %v4275_v40 = vmul.f32 %v9937_v59, %v7413_v23 }
 0x981   :  { %v4290_v58 = vadd.f32 %v9950_v36, %v4275_v40 }
 0x983   :  { %v4302_v48 = vmax.f32 %v4290_v58, 0.0 }
 0x985   :  { %v10086_v49 = vpop.f32.mrf.mxu0  ;;  %6967 = vmatmul.msk.f32.vlgmr.msra.gmra.mxu1 %vm518_vm0, %v4302_v48 }
 0x986   :  { %v4659_v51 = vsel %vm729_vm1, %v10086_v49, -inf }
 0x987   :  { %4660 = vmax.xlane.f32.xlu2 %v4659_v51 }
 0x9d1   :  { %v4634_v24 = vpop.xlane.xlu1 %4633 }
 0x9d2   :  { %v4664_v41 = vsub.f32 %v4480_v22, %v4634_v24 }
 0x9d4   :  { %v4678_v1 = vmul.f32 1.442695, %v4664_v41 }
 0x9d6   :  { %8095 = vpow2.f32 %v4678_v1 }
 0x9d9   :  { %v4637_v54 = vpop.xlane.xlu2 %4636 }
 0x9da   :  { %v4665_v60 = vsub.f32 %v4483_v27, %v4637_v54 }
 0x9dc   :  { %v10093_v44 = vpop.eup %8095  ;;  %v4680_v50 = vmul.f32 1.442695, %v4665_v60 }
 0x9dd   :  { %v4704_v61 = vsel %vm729_vm1, %v10093_v44, 0.0 }
 0x9de   :  { %8097 = vpow2.f32 %v4680_v50  ;;  %4705 = vadd.xlane.f32.xlu0 %v4704_v61 }
 0x9e1   :  { %v4652_v3 = vpop.xlane.xlu0 %4651 }
 0x9e2   :  { %v4670_v62 = vsub.f32 %v4585_v0, %v4652_v3  ;;  %v4640_v22 = vpop.xlane.xlu1 %4639  ;;  %v7414_v0 = vunpack.c.h.bf16 %v7755_v31  ;;  %v10123_v31 = vld [vmem:[%s11250_s1 + $0x15] ss:$0 sm:$0xff] }
 0x9e3   :  { %v4666_v8 = vsub.f32 %v4515_v45, %v4640_v22  ;;  %v10129_v22 = vld [vmem:[%s11251_s2 + $0x15] ss:$0 sm:$0xff] }
 0x9e4   :  { %v10101_v27 = vpop.eup %8097  ;;  %v4690_v51 = vmul.f32 1.442695, %v4670_v62  ;;  %v4276_v54 = vmul.f32 %v9937_v59, %v7414_v0  ;;  %v7723_v59 = vld [vmem:[%s11249_s0 + $0x168] sm:$0xff]  }
 0x9e5   :  { %v4682_v14 = vmul.f32 1.442695, %v4666_v8  ;;  %v4707_v10 = vsel %vm729_vm1, %v10101_v27, 0.0 }
 0x9e6   :  { %8099 = vpow2.f32 %v4690_v51  ;;  %4708 = vadd.xlane.f32.xlu1 %v4707_v10  ;;  %v4291_v62 = vadd.f32 %v9950_v36, %v4276_v54  ;;  %v7286_v36 = vunpack.c.h.bf16 %v7723_v59 }
 0x9e7   :  { %8101 = vpow2.f32 %v4682_v14 }
 0x9e8   :  { %v4380_v51 = vmul.f32 %v10123_v31, %v7286_v36 }
 0x9e9   :  { %v4655_v24 = vpop.xlane.xlu2 %4654 }
 0x9ea   :  { %v4671_v45 = vsub.f32 %v4588_v55, %v4655_v24  ;;  %v4643_v41 = vpop.xlane.xlu0 %4642  ;;  %v4395_v24 = vadd.f32 %v10129_v22, %v4380_v51  ;;  %v10165_v51 = vpop.f32.mrf.mxu1 }
 0x9eb   :  { %v4667_v1 = vsub.f32 %v4518_v16, %v4643_v41  ;;  %v4303_v16 = vmax.f32 %v4291_v62, 0.0  ;;  %11276 = vst [vmem:[#allocation22_spill] sm:$0xff] %v10165_v51 }
 0x9ec   :  { %v10108_v60 = vpop.eup %8099  ;;  %v4692_v50 = vmul.f32 1.442695, %v4671_v45  ;;  %v4407_v45 = vmax.f32 %v4395_v24, 0.0 }
 0x9ed   :  { %v10110_v61 = vpop.eup %8101  ;;  %v4684_v3 = vmul.f32 1.442695, %v4667_v1  ;;  %v4722_v23 = vsel %vm729_vm1, %v10108_v60, 0.0  ;;  %6968 = vmatmul.msk.f32.gmra.mxu1 %vm518_vm0, %v4303_v16  ;;  %v3845_v16 = vsel %vm729_vm1, %v9738_v21, -inf }
 0x9ee   :  { %8103 = vpow2.f32 %v4692_v50  ;;  %4723 = vadd.xlane.f32.xlu2 %v4722_v23  ;;  %v4710_v55 = vsel %vm729_vm1, %v10110_v61, 0.0  ;;  %4807 = vmatpush.msra.mxu2 %v4407_v45  ;;  %v3842_v50 = vsel %vm729_vm1, %v9734_v18, -inf  ;;  %v10149_v23 = vpop.f32.mrf.mxu3  ;;  %v7285_v45 = vunpack.c.l.bf16 %v7723_v59 }
 0x9ef   :  { %8105 = vpow2.f32 %v4684_v3  ;;  %4711 = vadd.xlane.f32.xlu0 %v4710_v55  ;;  %v4629_v55 = vsel %vm729_vm1, %v10062_v25, -inf }
 0x9f2   :  { %v4658_v8 = vpop.xlane.xlu1 %4657 }
 0x9f3   :  { %v4672_v40 = vsub.f32 %v10082_v13, %v4658_v8 }
 0x9f4   :  { %v10133_v14 = vpop.eup %8103 }
 0x9f5   :  { %v10135_v10 = vpop.eup %8105  ;;  %v4694_v58 = vmul.f32 1.442695, %v4672_v40  ;;  %v4725_v48 = vsel %vm729_vm1, %v10133_v14, 0.0  ;;  %v3860_v40 = vsel %vm729_vm1, %v10149_v23, -inf }
 0x9f6   :  { %4726 = vadd.xlane.f32.xlu1 %v4725_v48  ;;  %v4713_v0 = vsel %vm729_vm1, %v10135_v10, 0.0  ;;  %v10159_v36 = vpop.f32.mrf.mxu3  ;;  %v10169_v48 = vpop.f32.mrf.mxu1 }
 0x9f7   :  { %8107 = vpow2.f32 %v4694_v58  ;;  %4714 = vadd.xlane.f32.xlu2 %v4713_v0  ;;  %v3863_v8 = vsel %vm729_vm1, %v10159_v36, -inf  ;;  %v4626_v58 = vsel %vm729_vm1, %v10046_v15, -inf  ;;  %11277 = vst [vmem:[#allocation23_spill] sm:$0xff] %v10169_v48 }
 0x9fa   :  { %v4661_v13 = vpop.xlane.xlu2 %4660 }
 0x9fb   :  { %v4673_v41 = vsub.f32 %v10086_v49, %v4661_v13  ;;  %v4379_v13 = vmul.f32 %v10123_v31, %v7285_v45 }
 0x9fd   :  { %v10143_v1 = vpop.eup %8107  ;;  %v4696_v54 = vmul.f32 1.442695, %v4673_v41 }
 0x9fe   :  { %v4728_v3 = vsel %vm729_vm1, %v10143_v1, 0.0  ;;  %v10171_v24 = vpop.f32.mrf.mxu1 }
 0x9ff   :  { %8109 = vpow2.f32 %v4696_v54  ;;  %3843 = vmax.xlane.f32.xlu2 %v3842_v50  ;;  %4729 = vadd.xlane.f32.xlu0 %v4728_v3  ;;  %11278 = vst [vmem:[#allocation24_spill] sm:$0xff] %v10171_v24  ;;  %v4394_v54 = vadd.f32 %v10129_v22, %v4379_v13  ;;  %v7795_v3 = vld [vmem:[%s11249_s0 + $0x3a8] sm:$0xff]  }
 0xa01   :  { %v4406_v50 = vmax.f32 %v4394_v54, 0.0 }
 0xa03   :  { %4808 = vmatpush.msra.mxu2 %v4406_v50  ;;  %v7573_v50 = vunpack.c.l.bf16 %v7795_v3 }
 0xa05   :  { %v10151_v62 = vpop.eup %8109 }
 0xa06   :  { %v4731_v49 = vsel %vm729_vm1, %v10151_v62, 0.0  ;;  %v10173_v0 = vpop.f32.mrf.mxu1 }
 0xa07   :  { %4630 = vmax.xlane.f32.xlu2 %v4629_v55  ;;  %4732 = vadd.xlane.f32.xlu1 %v4731_v49  ;;  %11279 = vst [vmem:[#allocation25_spill] sm:$0xff] %v10173_v0  ;;  %v7747_v55 = vld [vmem:[%s11249_s0 + $0x228] sm:$0xff]   ;;  %v7574_v49 = vunpack.c.h.bf16 %v7795_v3  ;;  %v7692_v3 = vld [vmem:[%s11249_s0 + $0x70] sm:$0xff]  }
 0xa08   :  { %3846 = vmax.xlane.f32.xlu0 %v3845_v16  ;;  %v7382_v16 = vunpack.c.h.bf16 %v7747_v55  ;;  %v7381_v0 = vunpack.c.l.bf16 %v7747_v55  ;;  %v10203_v55 = vld [vmem:[%s11250_s1 + $0xe] ss:$0 sm:$0xff] }
 0xa09   :  { %v4386_v59 = vmul.f32 %v10123_v31, %v7574_v49 }
 0xa0a   :  { %v4381_v49 = vmul.f32 %v10123_v31, %v7381_v0  ;;  %v7819_v0 = vld [vmem:[%s11249_s0 + $0x468] sm:$0xff]  }
 0xa0e   :  { %v10176_v41 = vpop.f32.mrf.mxu1 }
 0xa0f   :  { %4627 = vmax.xlane.f32.xlu1 %v4626_v58  ;;  %3864 = vmax.xlane.f32.xlu2 %v3863_v8  ;;  %11280 = vst [vmem:[#allocation26_spill] sm:$0xff] %v10176_v41  ;;  %v4382_v8 = vmul.f32 %v10123_v31, %v7382_v16  ;;  %v4401_v58 = vadd.f32 %v10129_v22, %v4386_v59 }
 0xa10   :  { %3861 = vmax.xlane.f32.xlu0 %v3860_v40  ;;  %v4385_v41 = vmul.f32 %v10123_v31, %v7573_v50 }
 0xa11   :  { %v4397_v45 = vadd.f32 %v10129_v22, %v4382_v8  ;;  %v4413_v13 = vmax.f32 %v4401_v58, 0.0  ;;  %v7162_v8 = vunpack.c.h.bf16 %v7692_v3 }
 0xa12   :  { %v4400_v24 = vadd.f32 %v10129_v22, %v4385_v41 }
 0xa13   :  { %v4409_v54 = vmax.f32 %v4397_v45, 0.0  ;;  %4894 = vmatpush.msrb.mxu2 %v4413_v13  ;;  %v10215_v45 = vld [vmem:[%s11251_s2 + $0xe] ss:$0 sm:$0xff]  ;;  %v7161_v13 = vunpack.c.l.bf16 %v7692_v3 }
 0xa14   :  { %v4412_v16 = vmax.f32 %v4400_v24, 0.0  ;;  %v7670_v24 = vunpack.c.h.bf16 %v7819_v0 }
 0xa15   :  { %4836 = vmatpush.msrb.mxu0 %v4409_v54 }
 0xa16   :  { %v10187_v40 = vpop.f32.mrf.mxu1  ;;  %4895 = vmatpush.msrb.mxu2 %v4412_v16  ;;  %v4388_v41 = vmul.f32 %v10123_v31, %v7670_v24  ;;  %v7669_v24 = vunpack.c.l.bf16 %v7819_v0  ;;  %v7740_v0 = vld [vmem:[%s11249_s0 + $0x1f0] sm:$0xff]  }
 0xa17   :  { %11281 = vst [vmem:[#allocation27_spill] sm:$0xff] %v10187_v40  ;;  %v4396_v40 = vadd.f32 %v10129_v22, %v4381_v49 }
 0xa18   :  { %v4403_v50 = vadd.f32 %v10129_v22, %v4388_v41  ;;  %v4387_v34 = vmul.f32 %v10123_v31, %v7669_v24 }
 0xa19   :  { %v4408_v59 = vmax.f32 %v4396_v40, 0.0  ;;  %v5108_v40 = vmul.f32 %v10203_v55, %v7162_v8 }
 0xa1a   :  { %v4415_v49 = vmax.f32 %v4403_v50, 0.0  ;;  %v4402_v9 = vadd.f32 %v10129_v22, %v4387_v34  ;;  %v7716_v34 = vld [vmem:[%s11249_s0 + $0x130] sm:$0xff]  }
 0xa1b   :  { %4837 = vmatpush.msrb.mxu0 %v4408_v59  ;;  %v5123_v16 = vadd.f32 %v10215_v45, %v5108_v40  ;;  %v5107_v59 = vmul.f32 %v10203_v55, %v7161_v13  ;;  %v7354_v13 = vunpack.c.h.bf16 %v7740_v0 }
 0xa1d   :  { %4923 = vmatpush.msra.mxu0 %v4415_v49  ;;  %v5135_v5 = vmax.f32 %v5123_v16, 0.0  ;;  %v5122_v51 = vadd.f32 %v10215_v45, %v5107_v59 }
 0xa1e   :  { %v10194_v48 = vpop.f32.mrf.mxu1 }
 0xa1f   :  { %v5134_v40 = vmax.f32 %v5122_v51, 0.0  ;;  %v7257_v51 = vunpack.c.l.bf16 %v7716_v34 }
 0xa26   :  { %v10209_v58 = vpop.f32.mrf.mxu1 }
 0xa2e   :  { %v10224_v41 = vpop.f32.mrf.mxu1 }
 0xa36   :  { %v10239_v24 = vpop.f32.mrf.mxu1 }
 0xa51   :  { %v4706_v54 = vpop.xlane.xlu0 %4705 }
 0xa52   :  { %8111 = vrcp.f32 %v4706_v54  ;;  %v4414_v54 = vmax.f32 %v4402_v9, 0.0  ;;  %v7353_v9 = vunpack.c.l.bf16 %v7740_v0  ;;  %v5109_v0 = vmul.f32 %v10203_v55, %v7257_v51  ;;  %v10255_v51 = vld [vmem:[%s11250_s1 + $0x6] ss:$0 sm:$0xff] }
 0xa54   :  { %4924 = vmatpush.msra.mxu0 %v4414_v54 }
 0xa58   :  { %v8112_v8 = vpop.eup %8111 }
 0xa59   :  { %v4748_v3 = vmul.f32 %v8112_v8, %v10093_v44  ;;  %v4709_v53 = vpop.xlane.xlu1 %4708  ;;  %v7258_v44 = vunpack.c.h.bf16 %v7716_v34 }
 0xa5a   :  { %8113 = vrcp.f32 %v4709_v53  ;;  %v5112_v53 = vmul.f32 %v10203_v55, %v7354_v13 }
 0xa5b   :  { %6979 = vmatmul.msk.f32.vlgmr.msra.gmra.mxu2 %vm729_vm1, %v4748_v3  ;;  %v5110_v59 = vmul.f32 %v10203_v55, %v7258_v44  ;;  %v5111_v3 = vmul.f32 %v10203_v55, %v7353_v9 }
 0xa5c   :  { %7003 = vmatpush.xpose.msk.msra.mxu2 %vm518_vm0, %v5135_v5  ;;  %v5127_v8 = vadd.f32 %v10215_v45, %v5112_v53  ;;  %v5124_v53 = vadd.f32 %v10215_v45, %v5109_v0  ;;  %v10267_v0 = vpop.f32.mrf.mxu1 }
 0xa5d   :  { %v5125_v54 = vadd.f32 %v10215_v45, %v5110_v59  ;;  %v5126_v44 = vadd.f32 %v10215_v45, %v5111_v3 }
 0xa5e   :  { %v5139_v13 = vmax.f32 %v5127_v8, 0.0  ;;  %v5136_v3 = vmax.f32 %v5124_v53, 0.0 }
 0xa60   :  { %v8114_v50 = vpop.eup %8113  ;;  %7004 = vmatpush.xpose.msk.msra.mxu2 %vm518_vm0, %v5134_v40 }
 0xa61   :  { %v4724_v49 = vpop.xlane.xlu2 %4723  ;;  %v4749_v16 = vmul.f32 %v8114_v50, %v10101_v27  ;;  %v7684_v27 = vld [vmem:[%s11249_s0 + $0x30] sm:$0xff]  }
 0xa62   :  { %8115 = vrcp.f32 %v4724_v49  ;;  %v4712_v5 = vpop.xlane.xlu0 %4711 }
 0xa63   :  { %8117 = vrcp.f32 %v4712_v5  ;;  %6980 = vmatmul.msk.f32.gmra.mxu2 %vm729_vm1, %v4749_v16  ;;  %v5137_v16 = vmax.f32 %v5125_v54, 0.0  ;;  %v7129_v5 = vunpack.c.l.bf16 %v7684_v27  ;;  %v7788_v54 = vld [vmem:[%s11249_s0 + $0x370] sm:$0xff]  }
 0xa68   :  { %v8116_v40 = vpop.eup %8115 }
 0xa69   :  { %v8118_v50 = vpop.eup %8117  ;;  %v4754_v34 = vmul.f32 %v8116_v40, %v10108_v60  ;;  %v4727_v49 = vpop.xlane.xlu1 %4726  ;;  %v7812_v60 = vld [vmem:[%s11249_s0 + $0x430] sm:$0xff]   ;;  %v5053_v40 = vmul.f32 %v10255_v51, %v7129_v5 }
 0xa6a   :  { %v4750_v9 = vmul.f32 %v8118_v50, %v10110_v61  ;;  %8119 = vrcp.f32 %v4727_v49  ;;  %v4715_v59 = vpop.xlane.xlu2 %4714  ;;  %v5138_v61 = vmax.f32 %v5126_v44, 0.0  ;;  %v7642_v8 = vunpack.c.h.bf16 %v7812_v60  ;;  %v10273_v50 = vld [vmem:[%s11251_s2 + $0x6] ss:$0 sm:$0xff] }
 0xa6b   :  { %8121 = vrcp.f32 %v4715_v59  ;;  %6985 = vmatmul.msk.f32.vlgmr.msrb.gmra.mxu2 %vm729_vm1, %v4754_v34  ;;  %v7546_v34 = vunpack.c.h.bf16 %v7788_v54  ;;  %v7641_v49 = vunpack.c.l.bf16 %v7812_v60  ;;  %v5068_v47 = vadd.f32 %v10273_v50, %v5053_v40 }
 0xa6c   :  { %6981 = vmatmul.msk.f32.vlgmr.msrb.gmra.mxu0 %vm729_vm1, %v4750_v9  ;;  %7011 = vmatpush.xpose.msk.msrb.mxu2 %vm518_vm0, %v5139_v13  ;;  %v5118_v44 = vmul.f32 %v10203_v55, %v7642_v8  ;;  %v7545_v60 = vunpack.c.l.bf16 %v7788_v54 }
 0xa6d   :  { %7007 = vmatpush.xpose.msk.msrb.mxu0 %vm518_vm0, %v5137_v16  ;;  %v5116_v9 = vmul.f32 %v10203_v55, %v7546_v34  ;;  %v5117_v8 = vmul.f32 %v10203_v55, %v7641_v49  ;;  %v5080_v40 = vmax.f32 %v5068_v47, 0.0 }
 0xa6f   :  { %v5131_v34 = vadd.f32 %v10215_v45, %v5116_v9  ;;  %v5132_v54 = vadd.f32 %v10215_v45, %v5117_v8 }
 0xa70   :  { %v8120_v13 = vpop.eup %8119  ;;  %7012 = vmatpush.xpose.msk.msrb.mxu2 %vm518_vm0, %v5138_v61  ;;  %v7130_v61 = vunpack.c.h.bf16 %v7684_v27  ;;  %v7732_v27 = vld [vmem:[%s11249_s0 + $0x1b0] sm:$0xff]  }
 0xa71   :  { %v8122_v16 = vpop.eup %8121  ;;  %v4755_v53 = vmul.f32 %v8120_v13, %v10133_v14  ;;  %7008 = vmatpush.xpose.msk.msrb.mxu0 %vm518_vm0, %v5136_v3  ;;  %v5133_v14 = vadd.f32 %v10215_v45, %v5118_v44  ;;  %v10290_v13 = vpop.f32.mrf.mxu1  ;;  %v5143_v49 = vmax.f32 %v5131_v34, 0.0  ;;  %v5144_v8 = vmax.f32 %v5132_v54, 0.0 }
 0xa72   :  { %v3844_v59 = vpop.xlane.xlu2 %3843  ;;  %v4730_v5 = vpop.xlane.xlu0 %4729  ;;  %v4751_v11 = vmul.f32 %v8122_v16, %v10135_v10  ;;  %v5115_v10 = vmul.f32 %v10203_v55, %v7545_v60  ;;  %11282 = vst [vmem:[#allocation28_spill] sm:$0xff] %v10290_v13 }
 0xa73   :  { %v3878_v19 = vsub.f32 %v9734_v18, %v3844_v59  ;;  %8123 = vrcp.f32 %v4730_v5  ;;  %6986 = vmatmul.msk.f32.gmra.mxu2 %vm729_vm1, %v4755_v53  ;;  %v5054_v18 = vmul.f32 %v10255_v51, %v7130_v61  ;;  %v7321_v61 = vunpack.c.l.bf16 %v7732_v27 }
 0xa74   :  { %6982 = vmatmul.msk.f32.gmra.mxu0 %vm729_vm1, %v4751_v11  ;;  %v5145_v11 = vmax.f32 %v5133_v14, 0.0  ;;  %v5130_v16 = vadd.f32 %v10215_v45, %v5115_v10 }
 0xa75   :  { %v3890_v3 = vmul.f32 1.442695, %v3878_v19  ;;  %v7708_v19 = vld [vmem:[%s11249_s0 + $0xf0] sm:$0xff]   ;;  %v5069_v5 = vadd.f32 %v10273_v50, %v5054_v18 }
 0xa76   :  { %v7225_v14 = vunpack.c.l.bf16 %v7708_v19 }
 0xa77   :  { %8125 = vpow2.f32 %v3890_v3  ;;  %v5142_v3 = vmax.f32 %v5130_v16, 0.0 }
 0xa79   :  { %v8124_v44 = vpop.eup %8123  ;;  %v10313_v18 = vpop.f32.mrf.mxu1 }
 0xa7a   :  { %v4756_v47 = vmul.f32 %v8124_v44, %v10143_v1  ;;  %v4631_v53 = vpop.xlane.xlu2 %4630  ;;  %v4733_v9 = vpop.xlane.xlu1 %4732 }
 0xa7b   :  { %v3847_v59 = vpop.xlane.xlu0 %3846  ;;  %7005 = vmatmul.msk.f32.vlgmr.msra.gmra.mxu2 %vm518_vm0, %v5080_v40  ;;  %8127 = vrcp.f32 %v4733_v9  ;;  %v4663_v1 = vsub.f32 %v10062_v25, %v4631_v53  ;;  %v5081_v40 = vmax.f32 %v5069_v5, 0.0  ;;  %v4644_v5 = vsel %vm729_vm1, %v10313_v18, -inf }
 0xa7c   :  { %v3879_v60 = vsub.f32 %v9738_v21, %v3847_v59  ;;  %6987 = vmatmul.msk.f32.vlgmr.msra.gmra.mxu0 %vm729_vm1, %v4756_v47  ;;  %7023 = vmatpush.xpose.msk.msra.mxu2 %vm518_vm0, %v5145_v11  ;;  %v5057_v21 = vmul.f32 %v10255_v51, %v7321_v61  ;;  %v5055_v11 = vmul.f32 %v10255_v51, %v7225_v14  ;;  %v7322_v59 = vunpack.c.h.bf16 %v7732_v27 }
 0xa7d   :  { %v10306_v45 = vpop.eup %8125  ;;  %7019 = vmatpush.xpose.msk.msra.mxu0 %vm518_vm0, %v5143_v49  ;;  %v4676_v25 = vmul.f32 1.442695, %v4663_v1 }
 0xa7e   :  { %v3892_v34 = vmul.f32 1.442695, %v3879_v60  ;;  %v3914_v10 = vsel %vm729_vm1, %v10306_v45, 0.0  ;;  %v5072_v9 = vadd.f32 %v10273_v50, %v5057_v21  ;;  %v5070_v61 = vadd.f32 %v10273_v50, %v5055_v11 }
 0xa7f   :  { %3915 = vadd.xlane.f32.xlu1 %v3914_v10  ;;  %v7226_v60 = vunpack.c.h.bf16 %v7708_v19 }
 0xa80   :  { %8129 = vpow2.f32 %v3892_v34  ;;  %7024 = vmatpush.xpose.msk.msra.mxu2 %vm518_vm0, %v5144_v8  ;;  %v5084_v1 = vmax.f32 %v5072_v9, 0.0  ;;  %v5082_v34 = vmax.f32 %v5070_v61, 0.0 }
 0xa81   :  { %v8128_v54 = vpop.eup %8127  ;;  %7020 = vmatpush.xpose.msk.msra.mxu0 %vm518_vm0, %v5142_v3  ;;  %8131 = vpow2.f32 %v4676_v25  ;;  %v5058_v3 = vmul.f32 %v10255_v51, %v7322_v59  ;;  %v5056_v19 = vmul.f32 %v10255_v51, %v7226_v60  ;;  %v10340_v21 = vpop.f32.mrf.mxu1 }
 0xa82   :  { %v4628_v44 = vpop.xlane.xlu1 %4627  ;;  %v4757_v49 = vmul.f32 %v8128_v54, %v10151_v62  ;;  %v3865_v53 = vpop.xlane.xlu2 %3864 }
 0xa83   :  { %v3862_v16 = vpop.xlane.xlu0 %3861  ;;  %7006 = vmatmul.msk.f32.gmra.mxu2 %vm518_vm0, %v5081_v40  ;;  %v4662_v47 = vsub.f32 %v10046_v15, %v4628_v44  ;;  %v3885_v15 = vsub.f32 %v10159_v36, %v3865_v53  ;;  %v7780_v36 = vld [vmem:[%s11249_s0 + $0x330] sm:$0xff]   ;;  %v5073_v54 = vadd.f32 %v10273_v50, %v5058_v3  ;;  %v5071_v44 = vadd.f32 %v10273_v50, %v5056_v19 }
 0xa84   :  { %6988 = vmatmul.msk.f32.gmra.mxu0 %vm729_vm1, %v4757_v49  ;;  %v3884_v62 = vsub.f32 %v10149_v23, %v3862_v16  ;;  %v7804_v23 = vld [vmem:[%s11249_s0 + $0x3f0] sm:$0xff]   ;;  %v7513_v49 = vunpack.c.l.bf16 %v7780_v36  ;;  %v7514_v3 = vunpack.c.h.bf16 %v7780_v36 }
 0xa85   :  { %v4674_v14 = vmul.f32 1.442695, %v4662_v47  ;;  %v3904_v40 = vmul.f32 1.442695, %v3885_v15  ;;  %v7609_v25 = vunpack.c.l.bf16 %v7804_v23  ;;  %v4647_v47 = vsel %vm729_vm1, %v10340_v21, -inf }
 0xa86   :  { %v10327_v8 = vpop.eup %8129  ;;  %v3902_v10 = vmul.f32 1.442695, %v3884_v62  ;;  %v5085_v59 = vmax.f32 %v5073_v54, 0.0  ;;  %v5083_v61 = vmax.f32 %v5071_v44, 0.0  ;;  %v5061_v60 = vmul.f32 %v10255_v51, %v7513_v49 }
 0xa87   :  { %8133 = vpow2.f32 %v4674_v14  ;;  %4645 = vmax.xlane.f32.xlu1 %v4644_v5  ;;  %v3917_v27 = vsel %vm729_vm1, %v10327_v8, 0.0  ;;  %v10342_v11 = vpop.eup %8131  ;;  %v5063_v5 = vmul.f32 %v10255_v51, %v7609_v25  ;;  %v7610_v15 = vunpack.c.h.bf16 %v7804_v23 }
 0xa88   :  { %3918 = vadd.xlane.f32.xlu0 %v3917_v27  ;;  %8135 = vpow2.f32 %v3902_v10  ;;  %v4701_v53 = vsel %vm729_vm1, %v10342_v11, 0.0  ;;  %v5062_v23 = vmul.f32 %v10255_v51, %v7514_v3 }
 0xa89   :  { %8137 = vpow2.f32 %v3904_v40  ;;  %v5078_v14 = vadd.f32 %v10273_v50, %v5063_v5  ;;  %v5064_v40 = vmul.f32 %v10255_v51, %v7610_v15 }
 0xa8a   :  { %v5077_v36 = vadd.f32 %v10273_v50, %v5062_v23 }
 0xa8b   :  { %7013 = vmatmul.msk.f32.vlgmr.msrb.gmra.mxu2 %vm518_vm0, %v5084_v1  ;;  %v5076_v1 = vadd.f32 %v10273_v50, %v5061_v60  ;;  %v5090_v10 = vmax.f32 %v5078_v14, 0.0  ;;  %v5079_v25 = vadd.f32 %v10273_v50, %v5064_v40 }
 0xa8c   :  { %7009 = vmatmul.msk.f32.vlgmr.msrb.gmra.mxu0 %vm518_vm0, %v5082_v34  ;;  %v5089_v49 = vmax.f32 %v5077_v36, 0.0 }
 0xa8d   :  { %v10348_v16 = vpop.eup %8133  ;;  %v5088_v54 = vmax.f32 %v5076_v1, 0.0  ;;  %v5091_v44 = vmax.f32 %v5079_v25, 0.0 }
 0xa8e   :  { %v4698_v9 = vsel %vm729_vm1, %v10348_v16, 0.0  ;;  %v10358_v62 = vpop.eup %8135 }
 0xa8f   :  { %4702 = vadd.xlane.f32.xlu1 %v4701_v53  ;;  %4699 = vadd.xlane.f32.xlu2 %v4698_v9  ;;  %v10362_v27 = vpop.eup %8137  ;;  %v3932_v34 = vsel %vm729_vm1, %v10358_v62, 0.0  ;;  %v8262_v9 = vld [vmem:[%s11250_s1 + $0x14] ss:$0 sm:$0xff] }
 0xa90   :  { %4648 = vmax.xlane.f32.xlu0 %v4647_v47  ;;  %v3935_v19 = vsel %vm729_vm1, %v10362_v27, 0.0  ;;  %v7698_v47 = vld [vmem:[%s11249_s0 + $0xa0] sm:$0xff]  }
 0xa91   :  { %v7186_v53 = vunpack.c.h.bf16 %v7698_v47  ;;  %v7185_v5 = vunpack.c.l.bf16 %v7698_v47 }
 0xa93   :  { %7014 = vmatmul.msk.f32.gmra.mxu2 %vm518_vm0, %v5085_v59  ;;  %v3594_v59 = vmul.f32 %v8262_v9, %v7186_v53  ;;  %v3593_v14 = vmul.f32 %v8262_v9, %v7185_v5  ;;  %v7770_v53 = vld [vmem:[%s11249_s0 + $0x2e0] sm:$0xff]  }
 0xa94   :  { %7010 = vmatmul.msk.f32.gmra.mxu0 %vm518_vm0, %v5083_v61  ;;  %v8263_v61 = vld [vmem:[%s11251_s2 + $0x14] ss:$0 sm:$0xff]  ;;  %v7474_v5 = vunpack.c.h.bf16 %v7770_v53 }
 0xa95   :  { %v3609_v60 = vadd.f32 %v8263_v61, %v3594_v59  ;;  %v3608_v1 = vadd.f32 %v8263_v61, %v3593_v14  ;;  %v7473_v14 = vunpack.c.l.bf16 %v7770_v53 }
 0xa97   :  { %3933 = vadd.xlane.f32.xlu2 %v3932_v34  ;;  %v3621_v15 = vmax.f32 %v3609_v60, 0.0  ;;  %v3620_v3 = vmax.f32 %v3608_v1, 0.0  ;;  %v3600_v60 = vmul.f32 %v8262_v9, %v7474_v5 }
 0xa98   :  { %3936 = vadd.xlane.f32.xlu0 %v3935_v19  ;;  %v7699_v19 = vld [vmem:[%s11249_s0 + $0xa8] sm:$0xff]  }
 0xa99   :  { %3994 = vmatpush.msrb.mxu3 %v3621_v15  ;;  %v3615_v1 = vadd.f32 %v8263_v61, %v3600_v60 }
 0xa9b   :  { %7025 = vmatmul.msk.f32.vlgmr.msra.gmra.mxu2 %vm518_vm0, %v5090_v10  ;;  %3995 = vmatpush.msrb.mxu3 %v3620_v3  ;;  %v7190_v10 = vunpack.c.h.bf16 %v7699_v19  ;;  %v3599_v3 = vmul.f32 %v8262_v9, %v7473_v14 }
 0xa9c   :  { %7021 = vmatmul.msk.f32.vlgmr.msra.gmra.mxu0 %vm518_vm0, %v5088_v54  ;;  %v7189_v54 = vunpack.c.l.bf16 %v7699_v19  ;;  %v3627_v19 = vmax.f32 %v3615_v1, 0.0 }
 0xa9d   :  { %v4378_v40 = vmul.f32 %v10123_v31, %v7190_v10  ;;  %v3614_v10 = vadd.f32 %v8263_v61, %v3599_v3 }
 0xa9e   :  { %v4377_v36 = vmul.f32 %v10123_v31, %v7189_v54  ;;  %4081 = vmatpush.msra.mxu3 %v3627_v19 }
 0xa9f   :  { %v4393_v25 = vadd.f32 %v10129_v22, %v4378_v40 }
 0xaa3   :  { %7026 = vmatmul.msk.f32.gmra.mxu2 %vm518_vm0, %v5091_v44  ;;  %v4405_v44 = vmax.f32 %v4393_v25, 0.0  ;;  %v3626_v25 = vmax.f32 %v3614_v10, 0.0 }
 0xaa4   :  { %7022 = vmatmul.msk.f32.gmra.mxu0 %vm518_vm0, %v5089_v49  ;;  %v4392_v49 = vadd.f32 %v10129_v22, %v4377_v36 }
 0xaa5   :  { %4778 = vmatpush.msrb.mxu1 %v4405_v44  ;;  %4082 = vmatpush.msra.mxu3 %v3626_v25 }
 0xaa6   :  { %v4404_v59 = vmax.f32 %v4392_v49, 0.0 }
 0xaa8   :  { %4779 = vmatpush.msrb.mxu1 %v4404_v59 }
 0xade   :  { %v10387_v34 = vpop.f32.mrf.mxu2 }
 0xae6   :  { %v10393_v23 = vpop.f32.mrf.mxu2 }
 0xae9   :  { %v10398_v47 = vpop.f32.mrf.mxu0 }
 0xaee   :  { %v10403_v15 = vpop.f32.mrf.mxu2 }
 0xaf1   :  { %v10405_v40 = vpop.f32.mrf.mxu0 }
 0xaf2   :  { %v3916_v54 = vpop.xlane.xlu1 %3915 }
 0xaf3   :  { %8139 = vrcp.f32 %v3916_v54 }
 0xaf6   :  { %v10407_v36 = vpop.f32.mrf.mxu2 }
 0xaf9   :  { %v8140_v44 = vpop.eup %8139  ;;  %v10409_v49 = vpop.f32.mrf.mxu0 }
 0xafa   :  { %v3962_v53 = vmul.f32 %v8140_v44, %v10306_v45  ;;  %v4646_v59 = vpop.xlane.xlu1 %4645 }
 0xafb   :  { %v3919_v5 = vpop.xlane.xlu0 %3918  ;;  %v4668_v9 = vsub.f32 %v10313_v18, %v4646_v59 }
 0xafc   :  { %8141 = vrcp.f32 %v3919_v5  ;;  %6927 = vmatmul.msk.f32.vlgmr.msrb.gmra.mxu3 %vm729_vm1, %v3962_v53 }
 0xafd   :  { %v4686_v61 = vmul.f32 1.442695, %v4668_v9 }
 0xafe   :  { %v10414_v60 = vpop.f32.mrf.mxu2 }
 0xaff   :  { %8143 = vpow2.f32 %v4686_v61 }
 0xb01   :  { %v10416_v14 = vpop.f32.mrf.mxu0 }
 0xb02   :  { %v8142_v1 = vpop.eup %8141  ;;  %v4700_v3 = vpop.xlane.xlu2 %4699 }
 0xb03   :  { %v4649_v19 = vpop.xlane.xlu0 %4648  ;;  %8145 = vrcp.f32 %v4700_v3  ;;  %v3963_v10 = vmul.f32 %v8142_v1, %v10327_v8  ;;  %v4703_v25 = vpop.xlane.xlu1 %4702 }
 0xb04   :  { %v4669_v45 = vsub.f32 %v10340_v21, %v4649_v19 }
 0xb05   :  { %v10420_v54 = vpop.eup %8143  ;;  %6928 = vmatmul.msk.f32.gmra.mxu3 %vm729_vm1, %v3963_v10 }
 0xb06   :  { %v4688_v18 = vmul.f32 1.442695, %v4669_v45  ;;  %v10423_v44 = vpop.f32.mrf.mxu2  ;;  %v4716_v53 = vsel %vm729_vm1, %v10420_v54, 0.0 }
 0xb07   :  { %4717 = vadd.xlane.f32.xlu1 %v4716_v53 }
 0xb08   :  { %8147 = vpow2.f32 %v4688_v18 }
 0xb09   :  { %v8146_v59 = vpop.eup %8145  ;;  %8149 = vrcp.f32 %v4703_v25  ;;  %v10427_v5 = vpop.f32.mrf.mxu0 }
 0xb0a   :  { %v4746_v8 = vmul.f32 %v8146_v59, %v10348_v16  ;;  %v3934_v21 = vpop.xlane.xlu2 %3933  ;;  %v5416_v9 = vsel %vm729_vm1, %v10427_v5, -inf }
 0xb0b   :  { %8151 = vrcp.f32 %v3934_v21  ;;  %5417 = vmax.xlane.f32.xlu0 %v5416_v9  ;;  %v3937_v1 = vpop.xlane.xlu0 %3936 }
 0xb0c   :  { %6977 = vmatmul.msk.f32.vlgmr.msrb.gmra.mxu1 %vm729_vm1, %v4746_v8  ;;  %8153 = vrcp.f32 %v3937_v1 }
 0xb0e   :  { %v10433_v61 = vpop.eup %8147  ;;  %v10435_v3 = vpop.f32.mrf.mxu2 }
 0xb0f   :  { %v8150_v19 = vpop.eup %8149  ;;  %v4719_v10 = vsel %vm729_vm1, %v10433_v61, 0.0  ;;  %v5422_v16 = vsel %vm729_vm1, %v10435_v3, -inf }
 0xb10   :  { %4720 = vadd.xlane.f32.xlu2 %v4719_v10  ;;  %5423 = vmax.xlane.f32.xlu1 %v5422_v16  ;;  %v4747_v53 = vmul.f32 %v8150_v19, %v10342_v11 }
 0xb11   :  { %v8152_v45 = vpop.eup %8151  ;;  %v10441_v18 = vpop.f32.mrf.mxu0 }
 0xb12   :  { %v3968_v25 = vmul.f32 %v8152_v45, %v10358_v62  ;;  %v5419_v59 = vsel %vm729_vm1, %v10441_v18, -inf  ;;  %v8154_v21 = vpop.eup %8153 }
 0xb13   :  { %v3969_v62 = vmul.f32 %v8154_v21, %v10362_v27 }
 0xb14   :  { %6933 = vmatmul.msk.f32.vlgmr.msra.gmra.mxu3 %vm729_vm1, %v3968_v25  ;;  %6978 = vmatmul.msk.f32.gmra.mxu1 %vm729_vm1, %v4747_v53  ;;  %v7771_v53 = vld [vmem:[%s11249_s0 + $0x2e8] sm:$0xff]  }
 0xb16   :  { %v10449_v8 = vpop.f32.mrf.mxu2 }
 0xb17   :  { %v5425_v9 = vsel %vm729_vm1, %v10449_v8, -inf }
 0xb18   :  { %5426 = vmax.xlane.f32.xlu0 %v5425_v9  ;;  %5420 = vmax.xlane.f32.xlu2 %v5419_v59  ;;  %v7478_v59 = vunpack.c.h.bf16 %v7771_v53  ;;  %v7477_v9 = vunpack.c.l.bf16 %v7771_v53  ;;  %v6989_v53 = vld [vmem:[%s11252_s3 + $0x14] sm:$0xf] }
 0xb19   :  { %v10453_v1 = vpop.f32.mrf.mxu0 }
 0xb1a   :  { %v5434_v11 = vsel %vm729_vm1, %v10453_v1, -inf  ;;  %v4384_v21 = vmul.f32 %v10123_v31, %v7478_v59 }
 0xb1b   :  { %5435 = vmax.xlane.f32.xlu1 %v5434_v11 }
 0xb1c   :  { %6934 = vmatmul.msk.f32.gmra.mxu3 %vm729_vm1, %v3969_v62  ;;  %v4399_v11 = vadd.f32 %v10129_v22, %v4384_v21  ;;  %v4383_v62 = vmul.f32 %v10123_v31, %v7477_v9 }
 0xb1e   :  { %v10459_v19 = vpop.f32.mrf.mxu2 }
 0xb1f   :  { %v5440_v10 = vsel %vm729_vm1, %v10459_v19, -inf }
 0xb20   :  { %5441 = vmax.xlane.f32.xlu2 %v5440_v10  ;;  %v6939_v10 = vld [vmem:[%s11252_s3 + $0x10] sm:$0xf] }
 0xb21   :  { %v10463_v16 = vpop.f32.mrf.mxu0  ;;  %6940 = vmatpush.msk.msrb.mxu3 %vm1753_vm2, %v6939_v10 }
 0xb22   :  { %v5437_v45 = vsel %vm729_vm1, %v10463_v16, -inf }
 0xb23   :  { %5438 = vmax.xlane.f32.xlu0 %v5437_v45  ;;  %v4411_v45 = vmax.f32 %v4399_v11, 0.0 }
 0xb25   :  { %4865 = vmatpush.msra.mxu1 %v4411_v45 }
 0xb26   :  { %v10467_v25 = vpop.f32.mrf.mxu2 }
 0xb27   :  { %v5443_v27 = vsel %vm729_vm1, %v10467_v25, -inf }
 0xb28   :  { %5444 = vmax.xlane.f32.xlu1 %v5443_v27  ;;  %v4398_v27 = vadd.f32 %v10129_v22, %v4383_v62 }
 0xb2a   :  { %v4410_v13 = vmax.f32 %v4398_v27, 0.0 }
 0xb2c   :  { %4866 = vmatpush.msra.mxu1 %v4410_v13 }
 0xb2e   :  { %6990 = vmatpush.msk.msrb.mxu1 %vm1753_vm2, %v6989_v53 }
 0xb7a   :  { %v4718_v59 = vpop.xlane.xlu1 %4717 }
 0xb7b   :  { %8155 = vrcp.f32 %v4718_v59 }
 0xb7e   :  { %v5418_v31 = vpop.xlane.xlu0 %5417 }
 0xb7f   :  { %v5448_v21 = vsub.f32 %v10427_v5, %v5418_v31  ;;  %v3997_v9 = vpop.f32.mrf.mxu3 }
 0xb80   :  { %6941 = vmatmul.msk.f32.vlgmr.msrb.gmra.mxu3 %vm518_vm0, %v3997_v9 }
 0xb81   :  { %v8156_v11 = vpop.eup %8155  ;;  %v5462_v10 = vmul.f32 1.442695, %v5448_v21 }
 0xb82   :  { %v4752_v22 = vmul.f32 %v8156_v11, %v10420_v54 }
 0xb83   :  { %8157 = vpow2.f32 %v5462_v10  ;;  %v4721_v13 = vpop.xlane.xlu2 %4720  ;;  %v5424_v62 = vpop.xlane.xlu1 %5423 }
 0xb84   :  { %8159 = vrcp.f32 %v4721_v13  ;;  %v5450_v45 = vsub.f32 %v10435_v3, %v5424_v62  ;;  %6983 = vmatmul.msk.f32.vlgmr.msra.gmra.mxu1 %vm729_vm1, %v4752_v22 }
 0xb86   :  { %v5466_v27 = vmul.f32 1.442695, %v5450_v45 }
 0xb88   :  { %8161 = vpow2.f32 %v5466_v27  ;;  %v4000_v53 = vpop.f32.mrf.mxu3 }
 0xb89   :  { %v10491_v59 = vpop.eup %8157  ;;  %6942 = vmatmul.msk.f32.gmra.mxu3 %vm518_vm0, %v4000_v53 }
 0xb8a   :  { %v8160_v5 = vpop.eup %8159  ;;  %v5488_v31 = vsel %vm729_vm1, %v10491_v59, 0.0 }
 0xb8b   :  { %v5427_v54 = vpop.xlane.xlu0 %5426  ;;  %v5421_v21 = vpop.xlane.xlu2 %5420  ;;  %5489 = vadd.xlane.f32.xlu2 %v5488_v31  ;;  %v4753_v9 = vmul.f32 %v8160_v5, %v10433_v61 }
 0xb8c   :  { %v5451_v3 = vsub.f32 %v10449_v8, %v5427_v54  ;;  %v5449_v11 = vsub.f32 %v10441_v18, %v5421_v21  ;;  %v4781_v18 = vpop.f32.mrf.mxu1 }
 0xb8d   :  { %6984 = vmatmul.msk.f32.gmra.mxu1 %vm729_vm1, %v4753_v9 }
 0xb8e   :  { %v10500_v10 = vpop.eup %8161  ;;  %v5468_v22 = vmul.f32 1.442695, %v5451_v3  ;;  %v5464_v13 = vmul.f32 1.442695, %v5449_v11  ;;  %v5436_v62 = vpop.xlane.xlu1 %5435 }
 0xb8f   :  { %v5454_v45 = vsub.f32 %v10453_v1, %v5436_v62  ;;  %v5494_v27 = vsel %vm729_vm1, %v10500_v10, 0.0 }
 0xb90   :  { %8163 = vpow2.f32 %v5468_v22  ;;  %5495 = vadd.xlane.f32.xlu0 %v5494_v27 }
 0xb91   :  { %8165 = vpow2.f32 %v5464_v13  ;;  %v5474_v61 = vmul.f32 1.442695, %v5454_v45  ;;  %6943 = vmatmul.msk.f32.gmra.mxu3 %vm518_vm0, %v10020_v28 }
 0xb93   :  { %8167 = vpow2.f32 %v5474_v61  ;;  %v5442_v8 = vpop.xlane.xlu2 %5441 }
 0xb94   :  { %v5456_v53 = vsub.f32 %v10459_v19, %v5442_v8  ;;  %v4784_v22 = vpop.f32.mrf.mxu1  ;;  %v5410_v8 = vsel %vm729_vm1, %v10414_v60, -inf }
 0xb95   :  { %6991 = vmatmul.msk.f32.vlgmr.msrb.gmra.mxu1 %vm518_vm0, %v4781_v18 }
 0xb96   :  { %v10509_v5 = vpop.eup %8163  ;;  %v5478_v1 = vmul.f32 1.442695, %v5456_v53  ;;  %v5439_v31 = vpop.xlane.xlu0 %5438 }
 0xb97   :  { %v10511_v54 = vpop.eup %8165  ;;  %v5455_v21 = vsub.f32 %v10463_v16, %v5439_v31  ;;  %v5497_v9 = vsel %vm729_vm1, %v10509_v5, 0.0  ;;  %v10560_v31 = vld [vmem:[%s11250_s1 + $0x16] ss:$0 sm:$0xff] }
 0xb98   :  { %8169 = vpow2.f32 %v5478_v1  ;;  %5498 = vadd.xlane.f32.xlu2 %v5497_v9  ;;  %v5491_v28 = vsel %vm729_vm1, %v10511_v54, 0.0 }
 0xb99   :  { %v10518_v3 = vpop.eup %8167  ;;  %v5476_v19 = vmul.f32 1.442695, %v5455_v21  ;;  %5492 = vadd.xlane.f32.xlu1 %v5491_v28  ;;  %6944 = vmatmul.msk.f32.gmra.mxu3 %vm518_vm0, %v10025_v20  ;;  %v10566_v21 = vld [vmem:[%s11251_s2 + $0x16] ss:$0 sm:$0xff] }
 0xb9a   :  { %v5506_v11 = vsel %vm729_vm1, %v10518_v3, 0.0 }
 0xb9b   :  { %8171 = vpow2.f32 %v5476_v19  ;;  %v5445_v16 = vpop.xlane.xlu1 %5444  ;;  %5507 = vadd.xlane.f32.xlu0 %v5506_v11 }
 0xb9c   :  { %v5457_v13 = vsub.f32 %v10467_v25, %v5445_v16 }
 0xb9d   :  { %6992 = vmatmul.msk.f32.gmra.mxu1 %vm518_vm0, %v4784_v22 }
 0xb9e   :  { %v10526_v62 = vpop.eup %8169  ;;  %v5480_v45 = vmul.f32 1.442695, %v5457_v13 }
 0xb9f   :  { %v5512_v27 = vsel %vm729_vm1, %v10526_v62, 0.0 }
 0xba0   :  { %8173 = vpow2.f32 %v5480_v45 }
 0xba1   :  { %v10530_v61 = vpop.eup %8171  ;;  %5513 = vadd.xlane.f32.xlu1 %v5512_v27  ;;  %6945 = vmatmul.msk.f32.gmra.mxu3 %vm518_vm0, %v10018_v38  ;;  %v5413_v38 = vsel %vm729_vm1, %v10423_v44, -inf }
 0xba2   :  { %v5509_v20 = vsel %vm729_vm1, %v10530_v61, 0.0 }
 0xba3   :  { %5510 = vadd.xlane.f32.xlu2 %v5509_v20  ;;  %v7820_v20 = vld [vmem:[%s11249_s0 + $0x470] sm:$0xff]  }
 0xba5   :  { %6993 = vmatmul.msk.f32.gmra.mxu1 %vm518_vm0, %v10387_v34  ;;  %v4084_v34 = vpop.f32.mrf.mxu3 }
 0xba6   :  { %v10538_v25 = vpop.eup %8173 }
 0xba7   :  { %v5515_v18 = vsel %vm729_vm1, %v10538_v25, 0.0 }
 0xba8   :  { %5516 = vadd.xlane.f32.xlu0 %v5515_v18  ;;  %v7674_v18 = vunpack.c.h.bf16 %v7820_v20 }
 0xba9   :  { %5411 = vmax.xlane.f32.xlu1 %v5410_v8  ;;  %6946 = vmatmul.msk.f32.gmra.mxu3 %vm518_vm0, %v10023_v37  ;;  %v7748_v37 = vld [vmem:[%s11249_s0 + $0x230] sm:$0xff]  }
 0xbaa   :  { %v7386_v1 = vunpack.c.h.bf16 %v7748_v37  ;;  %v7385_v22 = vunpack.c.l.bf16 %v7748_v37  ;;  %v5172_v8 = vmul.f32 %v10560_v31, %v7674_v18  ;;  %v10616_v18 = vld [vmem:[%s11251_s2 + $0xf] ss:$0 sm:$0xff] }
 0xbab   :  { %5414 = vmax.xlane.f32.xlu2 %v5413_v38 }
 0xbac   :  { %v5187_v38 = vadd.f32 %v10566_v21, %v5172_v8 }
 0xbad   :  { %6994 = vmatmul.msk.f32.gmra.mxu1 %vm518_vm0, %v10393_v23  ;;  %v4087_v53 = vpop.f32.mrf.mxu3  ;;  %v5166_v23 = vmul.f32 %v10560_v31, %v7386_v1  ;;  %v7673_v1 = vunpack.c.l.bf16 %v7820_v20 }
 0xbae   :  { %v5199_v37 = vmax.f32 %v5187_v38, 0.0 }
 0xbb1   :  { %6947 = vmatmul.msk.f32.gmra.mxu3 %vm518_vm0, %v4084_v34  ;;  %v7796_v34 = vld [vmem:[%s11249_s0 + $0x3b0] sm:$0xff]  }
 0xbb5   :  { %6995 = vmatmul.msk.f32.gmra.mxu1 %vm518_vm0, %v10398_v47  ;;  %v5181_v47 = vadd.f32 %v10566_v21, %v5166_v23 }
 0xbb7   :  { %v5193_v9 = vmax.f32 %v5181_v47, 0.0  ;;  %v7577_v47 = vunpack.c.l.bf16 %v7796_v34 }
 0xbb9   :  { %6948 = vmatmul.msk.f32.gmra.mxu3 %vm518_vm0, %v4087_v53  ;;  %5620 = vmatpush.msrb.mxu2 %v5193_v9  ;;  %v7578_v53 = vunpack.c.h.bf16 %v7796_v34  ;;  %v5171_v9 = vmul.f32 %v10560_v31, %v7673_v1 }
 0xbbb   :  { %v5170_v23 = vmul.f32 %v10560_v31, %v7578_v53 }
 0xbbd   :  { %6996 = vmatmul.msk.f32.gmra.mxu1 %vm518_vm0, %v10405_v40  ;;  %v7724_v40 = vld [vmem:[%s11249_s0 + $0x170] sm:$0xff]  }
 0xbbe   :  { %v7290_v28 = vunpack.c.h.bf16 %v7724_v40  ;;  %v7289_v11 = vunpack.c.l.bf16 %v7724_v40  ;;  %v5185_v40 = vadd.f32 %v10566_v21, %v5170_v23 }
 0xbc0   :  { %v5164_v19 = vmul.f32 %v10560_v31, %v7290_v28  ;;  %v5163_v16 = vmul.f32 %v10560_v31, %v7289_v11  ;;  %v5169_v28 = vmul.f32 %v10560_v31, %v7577_v47  ;;  %v5197_v11 = vmax.f32 %v5185_v40, 0.0 }
 0xbc1   :  { %6949 = vmatmul.msk.f32.gmra.mxu3 %vm518_vm0, %v10029_v6 }
 0xbc2   :  { %v5179_v6 = vadd.f32 %v10566_v21, %v5164_v19  ;;  %v5178_v13 = vadd.f32 %v10566_v21, %v5163_v16  ;;  %v5186_v19 = vadd.f32 %v10566_v21, %v5171_v9 }
 0xbc4   :  { %v5198_v16 = vmax.f32 %v5186_v19, 0.0 }
 0xbc9   :  { %6950 = vmatmul.msk.f32.gmra.mxu3 %vm518_vm0, %v10033_v52  ;;  %v5191_v52 = vmax.f32 %v5179_v6, 0.0  ;;  %v5184_v6 = vadd.f32 %v10566_v21, %v5169_v28 }
 0xbcb   :  { %5591 = vmatpush.msrb.mxu0 %v5191_v52 }
 0xbd1   :  { %6951 = vmatmul.msk.f32.gmra.mxu3 %vm518_vm0, %v10027_v63  ;;  %v5165_v63 = vmul.f32 %v10560_v31, %v7385_v22  ;;  %v5196_v22 = vmax.f32 %v5184_v6, 0.0 }
 0xbd3   :  { %v5180_v45 = vadd.f32 %v10566_v21, %v5165_v63  ;;  %v7693_v63 = vld [vmem:[%s11249_s0 + $0x78] sm:$0xff]  }
 0xbd4   :  { %v7165_v1 = vunpack.c.l.bf16 %v7693_v63 }
 0xbd5   :  { %v5192_v27 = vmax.f32 %v5180_v45, 0.0  ;;  %v10611_v45 = vld [vmem:[%s11250_s1 + $0xf] ss:$0 sm:$0xff] }
 0xbd6   :  { %v5891_v9 = vmul.f32 %v10611_v45, %v7165_v1  ;;  %v7756_v1 = vld [vmem:[%s11249_s0 + $0x270] sm:$0xff]  }
 0xbd7   :  { %5621 = vmatpush.msrb.mxu2 %v5192_v27  ;;  %v7166_v27 = vunpack.c.h.bf16 %v7693_v63 }
 0xbd9   :  { %6952 = vmatmul.msk.f32.gmra.mxu3 %vm518_vm0, %v10031_v12  ;;  %v5190_v12 = vmax.f32 %v5178_v13, 0.0  ;;  %5707 = vmatpush.msra.mxu2 %v5199_v37  ;;  %v7717_v13 = vld [vmem:[%s11249_s0 + $0x138] sm:$0xff]   ;;  %v5892_v8 = vmul.f32 %v10611_v45, %v7166_v27 }
 0xbda   :  { %v7261_v53 = vunpack.c.l.bf16 %v7717_v13 }
 0xbdb   :  { %5592 = vmatpush.msrb.mxu0 %v5190_v12  ;;  %5708 = vmatpush.msra.mxu2 %v5198_v16  ;;  %v7262_v12 = vunpack.c.h.bf16 %v7717_v13  ;;  %v5907_v37 = vadd.f32 %v10616_v18, %v5892_v8  ;;  %v5906_v16 = vadd.f32 %v10616_v18, %v5891_v9  ;;  %v8264_v8 = vld [vmem:[%s11251_s2 + $0xe] ss:$0 sm:$0xff]  ;;  %v7741_v9 = vld [vmem:[%s11249_s0 + $0x1f8] sm:$0xff]  }
 0xbdc   :  { %v5893_v19 = vmul.f32 %v10611_v45, %v7261_v53 }
 0xbdd   :  { %5678 = vmatpush.msra.mxu0 %v5197_v11  ;;  %v5894_v38 = vmul.f32 %v10611_v45, %v7262_v12  ;;  %v5919_v47 = vmax.f32 %v5907_v37, 0.0  ;;  %v7764_v11 = vld [vmem:[%s11249_s0 + $0x2b0] sm:$0xff]  }
 0xbde   :  { %v7450_v6 = vunpack.c.h.bf16 %v7764_v11  ;;  %v5908_v12 = vadd.f32 %v10616_v18, %v5893_v19  ;;  %v7358_v19 = vunpack.c.h.bf16 %v7741_v9 }
 0xbdf   :  { %5679 = vmatpush.msra.mxu0 %v5196_v22  ;;  %v5909_v28 = vadd.f32 %v10616_v18, %v5894_v38 }
 0xbe0   :  { %v5114_v22 = vmul.f32 %v10203_v55, %v7450_v6 }
 0xbe1   :  { %v5921_v63 = vmax.f32 %v5909_v28, 0.0 }
 0xbe2   :  { %v5129_v38 = vadd.f32 %v8264_v8, %v5114_v22 }
 0xbe4   :  { %v5141_v55 = vmax.f32 %v5129_v38, 0.0 }
 0xbe6   :  { %7015 = vmatpush.xpose.msk.msra.mxu3 %vm518_vm0, %v5141_v55 }
 0xbfe   :  { %v5490_v52 = vpop.xlane.xlu2 %5489 }
 0xbff   :  { %8175 = vrcp.f32 %v5490_v52  ;;  %v5918_v52 = vmax.f32 %v5906_v16, 0.0 }
 0xc01   :  { %v4868_v20 = vpop.f32.mrf.mxu1 }
 0xc02   :  { %6997 = vmatmul.msk.f32.gmra.mxu1 %vm518_vm0, %v4868_v20 }
 0xc03   :  { %v5496_v34 = vpop.xlane.xlu0 %5495 }
 0xc04   :  { %8177 = vrcp.f32 %v5496_v34  ;;  %v7449_v34 = vunpack.c.l.bf16 %v7764_v11 }
 0xc05   :  { %v8176_v23 = vpop.eup %8175 }
 0xc06   :  { %v5532_v40 = vmul.f32 %v8176_v23, %v10491_v59  ;;  %v5920_v23 = vmax.f32 %v5908_v12, 0.0 }
 0xc08   :  { %7029 = vmatmul.msk.f32.vlgmr.msrb.gmra.mxu0 %vm729_vm1, %v5532_v40 }
 0xc09   :  { %7053 = vmatpush.xpose.msk.msrb.mxu0 %vm518_vm0, %v5919_v47  ;;  %v7417_v47 = vunpack.c.l.bf16 %v7756_v1 }
 0xc0a   :  { %v8178_v13 = vpop.eup %8177  ;;  %v4871_v59 = vpop.f32.mrf.mxu1 }
 0xc0b   :  { %v5534_v27 = vmul.f32 %v8178_v13, %v10500_v10  ;;  %v5499_v20 = vpop.xlane.xlu2 %5498  ;;  %6998 = vmatmul.msk.f32.gmra.mxu1 %vm518_vm0, %v4871_v59  ;;  %v8265_v10 = vld [vmem:[%s11250_s1 + $0xe] ss:$0 sm:$0xff]  ;;  %v5059_v11 = vmul.f32 %v10255_v51, %v7417_v47  ;;  %v5896_v59 = vmul.f32 %v10611_v45, %v7358_v19 }
 0xc0c   :  { %8179 = vrcp.f32 %v5499_v20  ;;  %v5493_v53 = vpop.xlane.xlu1 %5492  ;;  %v5113_v37 = vmul.f32 %v8265_v10, %v7449_v34 }
 0xc0d   :  { %8181 = vrcp.f32 %v5493_v53  ;;  %7031 = vmatmul.msk.f32.vlgmr.msrb.gmra.mxu2 %vm729_vm1, %v5534_v27  ;;  %7054 = vmatpush.xpose.msk.msrb.mxu0 %vm518_vm0, %v5918_v52  ;;  %v5074_v22 = vadd.f32 %v10273_v50, %v5059_v11 }
 0xc0e   :  { %7057 = vmatpush.xpose.msk.msrb.mxu2 %vm518_vm0, %v5921_v63  ;;  %v5508_v40 = vpop.xlane.xlu0 %5507  ;;  %v5128_v28 = vadd.f32 %v8264_v8, %v5113_v37  ;;  %v7357_v63 = vunpack.c.l.bf16 %v7741_v9  ;;  %v7418_v8 = vunpack.c.h.bf16 %v7756_v1  ;;  %v7765_v9 = vld [vmem:[%s11249_s0 + $0x2b8] sm:$0xff]  }
 0xc0f   :  { %8183 = vrcp.f32 %v5508_v40  ;;  %v5086_v20 = vmax.f32 %v5074_v22, 0.0 }
 0xc10   :  { %v5140_v6 = vmax.f32 %v5128_v28, 0.0  ;;  %v5060_v53 = vmul.f32 %v10255_v51, %v7418_v8 }
 0xc12   :  { %v8180_v16 = vpop.eup %8179  ;;  %7058 = vmatpush.xpose.msk.msrb.mxu2 %vm518_vm0, %v5920_v23  ;;  %7016 = vmatpush.xpose.msk.msra.mxu3 %vm518_vm0, %v5140_v6  ;;  %v5075_v55 = vadd.f32 %v10273_v50, %v5060_v53  ;;  %v7709_v23 = vld [vmem:[%s11249_s0 + $0xf8] sm:$0xff]  }
 0xc13   :  { %v8182_v52 = vpop.eup %8181  ;;  %6999 = vmatmul.msk.f32.gmra.mxu1 %vm518_vm0, %v10403_v15  ;;  %v5535_v13 = vmul.f32 %v8180_v16, %v10509_v5  ;;  %v5911_v15 = vadd.f32 %v10616_v18, %v5896_v59  ;;  %v5895_v5 = vmul.f32 %v10611_v45, %v7357_v63  ;;  %v7229_v19 = vunpack.c.l.bf16 %v7709_v23  ;;  %v7789_v16 = vld [vmem:[%s11249_s0 + $0x378] sm:$0xff]  }
 0xc14   :  { %v5514_v12 = vpop.xlane.xlu1 %5513  ;;  %v5533_v27 = vmul.f32 %v8182_v52, %v10511_v54  ;;  %v7685_v54 = vld [vmem:[%s11249_s0 + $0x38] sm:$0xff]   ;;  %v5087_v40 = vmax.f32 %v5075_v55, 0.0  ;;  %v7453_v59 = vunpack.c.l.bf16 %v7765_v9  ;;  %v7550_v63 = vunpack.c.h.bf16 %v7789_v16 }
 0xc15   :  { %8185 = vrcp.f32 %v5514_v12  ;;  %7032 = vmatmul.msk.f32.gmra.mxu2 %vm729_vm1, %v5535_v13  ;;  %7017 = vmatmul.msk.f32.vlgmr.msra.gmra.mxu3 %vm518_vm0, %v5086_v20  ;;  %v8184_v38 = vpop.eup %8183  ;;  %v5923_v47 = vmax.f32 %v5911_v15, 0.0  ;;  %v5910_v51 = vadd.f32 %v10616_v18, %v5895_v5  ;;  %v7133_v28 = vunpack.c.l.bf16 %v7685_v54  ;;  %v10700_v13 = vld [vmem:[%s11251_s2 + $0x7] ss:$0 sm:$0xff]  ;;  %v7757_v5 = vld [vmem:[%s11249_s0 + $0x278] sm:$0xff]  }
 0xc16   :  { %7030 = vmatmul.msk.f32.gmra.mxu0 %vm729_vm1, %v5533_v27  ;;  %v5511_v34 = vpop.xlane.xlu2 %5510  ;;  %v5538_v37 = vmul.f32 %v8184_v38, %v10518_v3  ;;  %v7454_v3 = vunpack.c.h.bf16 %v7765_v9  ;;  %v5897_v15 = vmul.f32 %v10611_v45, %v7453_v59  ;;  %v7421_v53 = vunpack.c.l.bf16 %v7757_v5 }
 0xc17   :  { %8187 = vrcp.f32 %v5511_v34  ;;  %v5922_v6 = vmax.f32 %v5910_v51, 0.0  ;;  %v5900_v34 = vmul.f32 %v10611_v45, %v7550_v63 }
 0xc18   :  { %v5898_v11 = vmul.f32 %v10611_v45, %v7454_v3 }
 0xc1b   :  { %v8186_v10 = vpop.eup %8185  ;;  %7000 = vmatmul.msk.f32.gmra.mxu1 %vm518_vm0, %v10407_v36  ;;  %v5517_v1 = vpop.xlane.xlu0 %5516  ;;  %v10685_v36 = vld [vmem:[%s11250_s1 + $0x7] ss:$0 sm:$0xff] }
 0xc1c   :  { %v5540_v50 = vmul.f32 %v8186_v10, %v10526_v62  ;;  %8189 = vrcp.f32 %v5517_v1  ;;  %v5913_v62 = vadd.f32 %v10616_v18, %v5898_v11  ;;  %v5837_v52 = vmul.f32 %v10685_v36, %v7133_v28 }
 0xc1d   :  { %7018 = vmatmul.msk.f32.gmra.mxu3 %vm518_vm0, %v5087_v40  ;;  %v8188_v22 = vpop.eup %8187  ;;  %v5839_v27 = vmul.f32 %v10685_v36, %v7229_v19  ;;  %v7230_v1 = vunpack.c.h.bf16 %v7709_v23  ;;  %v5843_v51 = vmul.f32 %v10685_v36, %v7421_v53 }
 0xc1e   :  { %7035 = vmatmul.msk.f32.vlgmr.msra.gmra.mxu0 %vm729_vm1, %v5538_v37  ;;  %7037 = vmatmul.msk.f32.vlgmr.msra.gmra.mxu2 %vm729_vm1, %v5540_v50  ;;  %v5925_v20 = vmax.f32 %v5913_v62, 0.0  ;;  %v5539_v38 = vmul.f32 %v8188_v22, %v10530_v61  ;;  %v5852_v55 = vadd.f32 %v10700_v13, %v5837_v52  ;;  %v7134_v37 = vunpack.c.h.bf16 %v7685_v54  ;;  %v7733_v54 = vld [vmem:[%s11249_s0 + $0x1b8] sm:$0xff]  }
 0xc1f   :  { %7061 = vmatpush.xpose.msk.msra.mxu0 %vm518_vm0, %v5923_v47  ;;  %v5854_v10 = vadd.f32 %v10700_v13, %v5839_v27  ;;  %v5915_v61 = vadd.f32 %v10616_v18, %v5900_v34  ;;  %v5840_v11 = vmul.f32 %v10685_v36, %v7230_v1  ;;  %v5858_v23 = vadd.f32 %v10700_v13, %v5843_v51  ;;  %v7781_v62 = vld [vmem:[%s11249_s0 + $0x338] sm:$0xff]  }
 0xc20   :  { %7065 = vmatpush.xpose.msk.msra.mxu1 %vm518_vm0, %v5925_v20  ;;  %v5864_v40 = vmax.f32 %v5852_v55, 0.0  ;;  %v5838_v19 = vmul.f32 %v10685_v36, %v7134_v37  ;;  %v7325_v52 = vunpack.c.l.bf16 %v7733_v54  ;;  %v7517_v59 = vunpack.c.l.bf16 %v7781_v62 }
 0xc21   :  { %v5927_v50 = vmax.f32 %v5915_v61, 0.0  ;;  %v5866_v28 = vmax.f32 %v5854_v10, 0.0  ;;  %v5870_v63 = vmax.f32 %v5858_v23, 0.0  ;;  %v7326_v53 = vunpack.c.h.bf16 %v7733_v54 }
 0xc22   :  { %v8190_v12 = vpop.eup %8189  ;;  %v5853_v22 = vadd.f32 %v10700_v13, %v5838_v19 }
 0xc23   :  { %7001 = vmatmul.msk.f32.gmra.mxu1 %vm518_vm0, %v10409_v49  ;;  %v5541_v8 = vmul.f32 %v8190_v12, %v10538_v25  ;;  %7062 = vmatpush.xpose.msk.msra.mxu0 %vm518_vm0, %v5922_v6  ;;  %v5912_v49 = vadd.f32 %v10616_v18, %v5897_v15  ;;  %v7549_v25 = vunpack.c.l.bf16 %v7789_v16  ;;  %v7422_v16 = vunpack.c.h.bf16 %v7757_v5 }
 0xc24   :  { %7069 = vmatpush.xpose.msk.msra.mxu2 %vm518_vm0, %v5927_v50  ;;  %v5865_v27 = vmax.f32 %v5853_v22, 0.0  ;;  %v5845_v15 = vmul.f32 %v10685_v36, %v7517_v59  ;;  %v5842_v37 = vmul.f32 %v10685_v36, %v7326_v53 }
 0xc25   :  { %v5924_v47 = vmax.f32 %v5912_v49, 0.0  ;;  %v5899_v9 = vmul.f32 %v10611_v45, %v7549_v25  ;;  %v5844_v12 = vmul.f32 %v10685_v36, %v7422_v16  ;;  %v7518_v49 = vunpack.c.h.bf16 %v7781_v62 }
 0xc26   :  { %7036 = vmatmul.msk.f32.gmra.mxu0 %vm729_vm1, %v5539_v38  ;;  %7038 = vmatmul.msk.f32.gmra.mxu2 %vm729_vm1, %v5541_v8  ;;  %v5841_v8 = vmul.f32 %v10685_v36, %v7325_v52  ;;  %v10746_v38 = vpop.f32.mrf.mxu3  ;;  %v5860_v55 = vadd.f32 %v10700_v13, %v5845_v15  ;;  %v1885_v52 = vadd.f32 %v8988_v26, %v9567_v46 }
 0xc27   :  { %7066 = vmatpush.xpose.msk.msra.mxu1 %vm518_vm0, %v5924_v47  ;;  %v5914_v3 = vadd.f32 %v10616_v18, %v5899_v9  ;;  %v5859_v5 = vadd.f32 %v10700_v13, %v5844_v12  ;;  %v5846_v61 = vmul.f32 %v10685_v36, %v7518_v49  ;;  %v5857_v47 = vadd.f32 %v10700_v13, %v5842_v37 }
 0xc28   :  { %v5856_v34 = vadd.f32 %v10700_v13, %v5841_v8  ;;  %v5872_v1 = vmax.f32 %v5860_v55, 0.0  ;;  %v2680_v59 = vadd.f32 %v9720_v39, %v1885_v52  ;;  %v1888_v15 = vadd.f32 %v8994_v30, %v9594_v29  ;;  %v7813_v30 = vld [vmem:[%s11249_s0 + $0x438] sm:$0xff]  }
 0xc29   :  { %v5926_v6 = vmax.f32 %v5914_v3, 0.0  ;;  %v5871_v25 = vmax.f32 %v5859_v5, 0.0  ;;  %v5861_v51 = vadd.f32 %v10700_v13, %v5846_v61  ;;  %v5869_v50 = vmax.f32 %v5857_v47, 0.0 }
 0xc2a   :  { %v5868_v10 = vmax.f32 %v5856_v34, 0.0  ;;  %v3464_v12 = vadd.f32 %v10194_v48, %v2680_v59  ;;  %v2681_v5 = vadd.f32 %v9724_v57, %v1888_v15  ;;  %v1891_v26 = vadd.f32 %v9002_v2, %v9625_v42 }
 0xc2b   :  { %7002 = vmatmul.msk.f32.gmra.mxu1 %vm518_vm0, %v10416_v14  ;;  %v5855_v14 = vadd.f32 %v10700_v13, %v5840_v11  ;;  %7070 = vmatpush.xpose.msk.msra.mxu2 %vm518_vm0, %v5926_v6  ;;  %v5873_v3 = vmax.f32 %v5861_v51, 0.0  ;;  %v7646_v29 = vunpack.c.h.bf16 %v7813_v30  ;;  %v1894_v42 = vadd.f32 %v9007_v43, %v9653_v32 }
 0xc2c   :  { %v3465_v34 = vadd.f32 %v10209_v58, %v2681_v5  ;;  %v2682_v39 = vadd.f32 %v9728_v7, %v1891_v26  ;;  %v7645_v61 = vunpack.c.l.bf16 %v7813_v30 }
 0xc2d   :  { %v5867_v20 = vmax.f32 %v5855_v14, 0.0  ;;  %v5902_v58 = vmul.f32 %v10611_v45, %v7646_v29  ;;  %v2683_v51 = vadd.f32 %v9732_v56, %v1894_v42 }
 0xc2e   :  { %7055 = vmatmul.msk.f32.vlgmr.msrb.gmra.mxu0 %vm518_vm0, %v5864_v40  ;;  %7059 = vmatmul.msk.f32.vlgmr.msrb.gmra.mxu2 %vm518_vm0, %v5866_v28  ;;  %v10759_v9 = vpop.f32.mrf.mxu3  ;;  %v10761_v40 = vpop.f32.mrf.mxu1  ;;  %v3466_v57 = vadd.f32 %v10224_v41, %v2682_v39  ;;  %v5901_v41 = vmul.f32 %v10611_v45, %v7645_v61 }
 0xc2f   :  { %v5917_v2 = vadd.f32 %v10616_v18, %v5902_v58  ;;  %v3467_v52 = vadd.f32 %v10239_v24, %v2683_v51 }
 0xc30   :  { %v5916_v43 = vadd.f32 %v10616_v18, %v5901_v41 }
 0xc31   :  { %v5929_v47 = vmax.f32 %v5917_v2, 0.0 }
 0xc33   :  { %7067 = vmatmul.msk.f32.vlgmr.msra.gmra.mxu1 %vm518_vm0, %v5870_v63  ;;  %7073 = vmatpush.xpose.msk.msrb.mxu0 %vm518_vm0, %v5929_v47  ;;  %v5412_v47 = vpop.xlane.xlu1 %5411 }
 0xc34   :  { %v5446_v51 = vsub.f32 %v10414_v60, %v5412_v47 }
 0xc36   :  { %7056 = vmatmul.msk.f32.gmra.mxu0 %vm518_vm0, %v5865_v27  ;;  %7060 = vmatmul.msk.f32.gmra.mxu2 %vm518_vm0, %v5867_v20  ;;  %v10765_v28 = vpop.f32.mrf.mxu3  ;;  %v10767_v19 = vpop.f32.mrf.mxu1 }
 0xc3b   :  { %7068 = vmatmul.msk.f32.gmra.mxu1 %vm518_vm0, %v5871_v25 }
 0xc3e   :  { %7063 = vmatmul.msk.f32.vlgmr.msra.gmra.mxu0 %vm518_vm0, %v5868_v10  ;;  %7071 = vmatmul.msk.f32.vlgmr.msra.gmra.mxu2 %vm518_vm0, %v5872_v1  ;;  %v10769_v11 = vpop.f32.mrf.mxu3  ;;  %v10771_v54 = vpop.f32.mrf.mxu1 }
 0xc46   :  { %7064 = vmatmul.msk.f32.gmra.mxu0 %vm518_vm0, %v5869_v50  ;;  %7072 = vmatmul.msk.f32.gmra.mxu2 %vm518_vm0, %v5873_v3  ;;  %v10773_v23 = vpop.f32.mrf.mxu3  ;;  %v10775_v6 = vpop.f32.mrf.mxu1  ;;  %v7805_v3 = vld [vmem:[%s11249_s0 + $0x3f8] sm:$0xff]  }
 0xc4e   :  { %v10777_v62 = vpop.f32.mrf.mxu3  ;;  %v10779_v16 = vpop.f32.mrf.mxu1 }
 0xc56   :  { %v4224_v22 = vpop.f32.mrf.mxu3  ;;  %v10781_v14 = vpop.f32.mrf.mxu1 }
 0xc57   :  { %v4248_v27 = vadd.f32 %v4224_v22, %v3464_v12  ;;  %v7613_v22 = vunpack.c.l.bf16 %v7805_v3 }
 0xc59   :  { %v5847_v32 = vmul.f32 %v10685_v36, %v7613_v22 }
 0xc5b   :  { %v5862_v45 = vadd.f32 %v10700_v13, %v5847_v32  ;;  %v5458_v32 = vmul.f32 1.442695, %v5446_v51 }
 0xc5d   :  { %v5874_v24 = vmax.f32 %v5862_v45, 0.0  ;;  %8191 = vpow2.f32 %v5458_v32 }
 0xc5e   :  { %v4227_v63 = vpop.f32.mrf.mxu3 }
 0xc5f   :  { %v4249_v55 = vadd.f32 %v4227_v63, %v3465_v34  ;;  %v5928_v63 = vmax.f32 %v5916_v43, 0.0  ;;  %v7614_v34 = vunpack.c.h.bf16 %v7805_v3 }
 0xc61   :  { %7074 = vmatpush.xpose.msk.msrb.mxu0 %vm518_vm0, %v5928_v63 }
 0xc64   :  { %7075 = vmatmul.msk.f32.vlgmr.msrb.gmra.mxu0 %vm518_vm0, %v5874_v24 }
 0xc66   :  { %v4230_v53 = vpop.f32.mrf.mxu3 }
 0xc67   :  { %v4250_v25 = vadd.f32 %v4230_v53, %v3466_v57  ;;  %v11284_v57 = vld [vmem:[#allocation21_spill] sm:$0xff] }
 0xc6e   :  { %v4233_v10 = vpop.f32.mrf.mxu3 }
 0xc6f   :  { %v4251_v59 = vadd.f32 %v4233_v10, %v3467_v52 }
 0xc76   :  { %v4236_v15 = vpop.f32.mrf.mxu3 }
 0xc7e   :  { %v4239_v10 = vpop.f32.mrf.mxu3 }
 0xc7f   :  { %v5008_v20 = vpop.f32.mrf.mxu1 }
 0xc80   :  { %v10787_v8 = vadd.f32 %v5008_v20, %v4248_v27  ;;  %v1897_v27 = vadd.f32 %v9012_v4, %v9680_v33  ;;  %v11283_v33 = vld [vmem:[#allocation4_spill] sm:$0xff] }
 0xc81   :  { %v1900_v39 = vadd.f32 %v11283_v33, %v9695_v17 }
 0xc82   :  { %v2684_v18 = vadd.f32 %v9740_v35, %v1897_v27 }
 0xc83   :  { %v2685_v58 = vadd.f32 %v11284_v57, %v1900_v39 }
 0xc84   :  { %v3468_v53 = vadd.f32 %v10267_v0, %v2684_v18  ;;  %v11285_v0 = vld [vmem:[#allocation28_spill] sm:$0xff] }
 0xc85   :  { %v10798_v48 = vpop.f32.mrf.mxu0 }
 0xc88   :  { %v5011_v49 = vpop.f32.mrf.mxu1 }
 0xc89   :  { %v10795_v46 = vadd.f32 %v5011_v49, %v4249_v55  ;;  %v5848_v55 = vmul.f32 %v10685_v36, %v7614_v34  ;;  %v4252_v49 = vadd.f32 %v4236_v15, %v3468_v53  ;;  %v3469_v36 = vadd.f32 %v11285_v0, %v2685_v58  ;;  %v10881_v34 = vpop.eup %8191 }
 0xc8a   :  { %v5482_v53 = vsel %vm729_vm1, %v10881_v34, 0.0 }
 0xc8b   :  { %v5863_v4 = vadd.f32 %v10700_v13, %v5848_v55 }
 0xc8d   :  { %v5875_v35 = vmax.f32 %v5863_v4, 0.0 }
 0xc8f   :  { %7076 = vmatmul.msk.f32.gmra.mxu0 %vm518_vm0, %v5875_v35 }
 0xc90   :  { %v5014_v37 = vpop.f32.mrf.mxu1  ;;  %v10805_v1 = vpop.f32.mrf.mxu2 }
 0xc91   :  { %v10810_v7 = vadd.f32 %v5014_v37, %v4250_v25  ;;  %v4253_v37 = vadd.f32 %v4239_v10, %v3469_v36 }
 0xc93   :  { %v10813_v50 = vpop.f32.mrf.mxu0 }
 0xc98   :  { %v5017_v56 = vpop.f32.mrf.mxu1  ;;  %v10823_v12 = vpop.f32.mrf.mxu2 }
 0xc99   :  { %v10828_v20 = vadd.f32 %v5017_v56, %v4251_v59  ;;  %v10864_v52 = vpop.f32.mrf.mxu3  ;;  %v5415_v59 = vpop.xlane.xlu2 %5414 }
 0xc9a   :  { %v5428_v63 = vsel %vm729_vm1, %v10864_v52, -inf  ;;  %v5447_v60 = vsub.f32 %v10423_v44, %v5415_v59 }
 0xc9b   :  { %v10832_v5 = vpop.f32.mrf.mxu0 }
 0xc9c   :  { %v5460_v24 = vmul.f32 1.442695, %v5447_v60 }
 0xc9e   :  { %8193 = vpow2.f32 %v5460_v24 }
 0xca0   :  { %v5020_v26 = vpop.f32.mrf.mxu1 }
 0xca1   :  { %v10840_v30 = vadd.f32 %v5020_v26, %v4252_v49  ;;  %v10842_v29 = vpop.f32.mrf.mxu2  ;;  %v10879_v18 = vpop.f32.mrf.mxu3 }
 0xca2   :  { %v5431_v44 = vsel %vm729_vm1, %v10879_v18, -inf }
 0xca3   :  { %v10845_v25 = vpop.f32.mrf.mxu0 }
 0xca4   :  { %v10893_v4 = vpop.eup %8193 }
 0xca5   :  { %v5485_v33 = vsel %vm729_vm1, %v10893_v4, 0.0 }
 0xca8   :  { %v5023_v2 = vpop.f32.mrf.mxu1 }
 0xca9   :  { %v10849_v13 = vadd.f32 %v5023_v2, %v4253_v37  ;;  %v10851_v42 = vpop.f32.mrf.mxu2  ;;  %v7700_v37 = vld [vmem:[%s11249_s0 + $0xb0] sm:$0xff]  }
 0xcaa   :  { %v7194_v2 = vunpack.c.h.bf16 %v7700_v37  ;;  %v7193_v47 = vunpack.c.l.bf16 %v7700_v37 }
 0xcab   :  { %v10853_v17 = vpop.f32.mrf.mxu0 }
 0xcac   :  { %v6194_v61 = vsel %vm729_vm1, %v10853_v17, -inf }
 0xcad   :  { %6195 = vmax.xlane.f32.xlu0 %v6194_v61  ;;  %v5162_v61 = vmul.f32 %v10560_v31, %v7194_v2 }
 0xcaf   :  { %v5177_v51 = vadd.f32 %v10566_v21, %v5162_v61 }
 0xcb0   :  { %v10889_v49 = vpop.f32.mrf.mxu1 }
 0xcb1   :  { %v10858_v41 = vpop.f32.mrf.mxu2  ;;  %v6212_v39 = vsel %vm729_vm1, %v10889_v49, -inf }
 0xcb2   :  { %v6200_v3 = vsel %vm729_vm1, %v10858_v41, -inf }
 0xcb3   :  { %v10862_v22 = vpop.f32.mrf.mxu0  ;;  %6201 = vmax.xlane.f32.xlu2 %v6200_v3  ;;  %v5161_v3 = vmul.f32 %v10560_v31, %v7193_v47 }
 0xcb4   :  { %v6197_v43 = vsel %vm729_vm1, %v10862_v22, -inf }
 0xcb5   :  { %6198 = vmax.xlane.f32.xlu1 %v6197_v43  ;;  %v5189_v43 = vmax.f32 %v5177_v51, 0.0  ;;  %v5176_v32 = vadd.f32 %v10566_v21, %v5161_v3 }
 0xcb7   :  { %5562 = vmatpush.msrb.mxu3 %v5189_v43  ;;  %v5188_v59 = vmax.f32 %v5176_v32, 0.0 }
 0xcb8   :  { %v10899_v35 = vpop.f32.mrf.mxu1 }
 0xcb9   :  { %v10871_v56 = vpop.f32.mrf.mxu2  ;;  %v6215_v58 = vsel %vm729_vm1, %v10899_v35, -inf  ;;  %5563 = vmatpush.msrb.mxu3 %v5188_v59 }
 0xcba   :  { %v6203_v45 = vsel %vm729_vm1, %v10871_v56, -inf }
 0xcbb   :  { %v10875_v27 = vpop.f32.mrf.mxu0  ;;  %5429 = vmax.xlane.f32.xlu2 %v5428_v63  ;;  %6204 = vmax.xlane.f32.xlu0 %v6203_v45 }
 0xcbc   :  { %v6206_v15 = vsel %vm729_vm1, %v10875_v27, -inf }
 0xcbd   :  { %6207 = vmax.xlane.f32.xlu1 %v6206_v15 }
 0xcc1   :  { %v10901_v57 = vpop.f32.mrf.mxu2 }
 0xcc2   :  { %v6218_v10 = vsel %vm729_vm1, %v10901_v57, -inf }
 0xcc3   :  { %v10887_v55 = vpop.f32.mrf.mxu0  ;;  %5432 = vmax.xlane.f32.xlu2 %v5431_v44  ;;  %5483 = vadd.xlane.f32.xlu0 %v5482_v53 }
 0xcc4   :  { %v6209_v26 = vsel %vm729_vm1, %v10887_v55, -inf }
 0xcc5   :  { %6210 = vmax.xlane.f32.xlu1 %v6209_v26 }
 0xcc9   :  { %v10907_v0 = vpop.f32.mrf.mxu2 }
 0xcca   :  { %v6221_v36 = vsel %vm729_vm1, %v10907_v0, -inf }
 0xccb   :  { %5486 = vadd.xlane.f32.xlu0 %v5485_v33 }
 0xccd   :  { %6213 = vmax.xlane.f32.xlu1 %v6212_v39 }
 0xcd3   :  { %6216 = vmax.xlane.f32.xlu0 %v6215_v58 }
 0xcd5   :  { %6219 = vmax.xlane.f32.xlu1 %v6218_v10 }
 0xcdd   :  { %6222 = vmax.xlane.f32.xlu1 %v6221_v36 }
 0xce1   :  { %v10934_v51 = vpop.f32.mrf.mxu0 }
 0xce2   :  { %v6224_v59 = vsel %vm729_vm1, %v10934_v51, -inf }
 0xd20   :  { %v6196_v63 = vpop.xlane.xlu0 %6195 }
 0xd21   :  { %v6230_v60 = vsub.f32 %v10853_v17, %v6196_v63 }
 0xd23   :  { %v6242_v45 = vmul.f32 1.442695, %v6230_v60 }
 0xd25   :  { %8195 = vpow2.f32 %v6242_v45 }
 0xd26   :  { %v6202_v15 = vpop.xlane.xlu2 %6201 }
 0xd27   :  { %v6232_v24 = vsub.f32 %v10858_v41, %v6202_v15 }
 0xd28   :  { %v6199_v44 = vpop.xlane.xlu1 %6198 }
 0xd29   :  { %v6246_v53 = vmul.f32 1.442695, %v6232_v24  ;;  %v6231_v26 = vsub.f32 %v10862_v22, %v6199_v44 }
 0xd2b   :  { %v10921_v33 = vpop.eup %8195  ;;  %8197 = vpow2.f32 %v6246_v53  ;;  %v6244_v31 = vmul.f32 1.442695, %v6231_v26 }
 0xd2c   :  { %v6266_v21 = vsel %vm729_vm1, %v10921_v33, 0.0 }
 0xd2d   :  { %8199 = vpow2.f32 %v6244_v31  ;;  %6267 = vadd.xlane.f32.xlu2 %v6266_v21 }
 0xd2e   :  { %v5430_v39 = vpop.xlane.xlu2 %5429  ;;  %v6205_v17 = vpop.xlane.xlu0 %6204 }
 0xd2f   :  { %v6233_v58 = vsub.f32 %v10871_v56, %v6205_v17  ;;  %v5452_v61 = vsub.f32 %v10864_v52, %v5430_v39 }
 0xd30   :  { %v6208_v10 = vpop.xlane.xlu1 %6207 }
 0xd31   :  { %v10926_v36 = vpop.eup %8197  ;;  %v6248_v41 = vmul.f32 1.442695, %v6233_v58  ;;  %v6234_v37 = vsub.f32 %v10875_v27, %v6208_v10  ;;  %v5470_v43 = vmul.f32 1.442695, %v5452_v61 }
 0xd32   :  { %v6272_v22 = vsel %vm729_vm1, %v10926_v36, 0.0 }
 0xd33   :  { %v10931_v2 = vpop.eup %8199  ;;  %v6250_v47 = vmul.f32 1.442695, %v6234_v37  ;;  %6273 = vadd.xlane.f32.xlu0 %v6272_v22  ;;  %8201 = vpow2.f32 %v6248_v41 }
 0xd34   :  { %v6269_v56 = vsel %vm729_vm1, %v10931_v2, 0.0 }
 0xd35   :  { %8203 = vpow2.f32 %v6250_v47  ;;  %6270 = vadd.xlane.f32.xlu2 %v6269_v56 }
 0xd36   :  { %v5484_v3 = vpop.xlane.xlu0 %5483  ;;  %v5433_v27 = vpop.xlane.xlu2 %5432 }
 0xd37   :  { %8205 = vrcp.f32 %v5484_v3  ;;  %v5453_v45 = vsub.f32 %v10879_v18, %v5433_v27 }
 0xd38   :  { %v6211_v32 = vpop.xlane.xlu1 %6210  ;;  %8207 = vpow2.f32 %v5470_v43 }
 0xd39   :  { %v6235_v52 = vsub.f32 %v10887_v55, %v6211_v32  ;;  %v10941_v63 = vpop.eup %8201  ;;  %v10950_v55 = vpop.f32.mrf.mxu0  ;;  %v5472_v21 = vmul.f32 1.442695, %v5453_v45 }
 0xd3a   :  { %v6275_v24 = vsel %vm729_vm1, %v10941_v63, 0.0  ;;  %v6227_v39 = vsel %vm729_vm1, %v10950_v55, -inf }
 0xd3b   :  { %v10943_v60 = vpop.eup %8203  ;;  %v6252_v15 = vmul.f32 1.442695, %v6235_v52  ;;  %6225 = vmax.xlane.f32.xlu0 %v6224_v59 }
 0xd3c   :  { %v6278_v44 = vsel %vm729_vm1, %v10943_v60, 0.0 }
 0xd3d   :  { %v8206_v53 = vpop.eup %8205  ;;  %8209 = vpow2.f32 %v6252_v15  ;;  %6276 = vadd.xlane.f32.xlu2 %v6275_v24  ;;  %6279 = vadd.xlane.f32.xlu1 %v6278_v44 }
 0xd3e   :  { %v5530_v26 = vmul.f32 %v8206_v53, %v10881_v34  ;;  %v5487_v31 = vpop.xlane.xlu0 %5486  ;;  %v10956_v17 = vpop.eup %8207 }
 0xd3f   :  { %8211 = vrcp.f32 %v5487_v31  ;;  %v5500_v34 = vsel %vm729_vm1, %v10956_v17, 0.0 }
 0xd40   :  { %7027 = vmatmul.msk.f32.vlgmr.msrb.gmra.mxu3 %vm729_vm1, %v5530_v26  ;;  %v6214_v18 = vpop.xlane.xlu1 %6213  ;;  %8213 = vpow2.f32 %v5472_v21 }
 0xd41   :  { %v6236_v58 = vsub.f32 %v10889_v49, %v6214_v18  ;;  %v10996_v18 = vld [vmem:[%s11250_s1 + $0x17] ss:$0 sm:$0xff] }
 0xd43   :  { %v10959_v10 = vpop.eup %8209  ;;  %v6254_v41 = vmul.f32 1.442695, %v6236_v58  ;;  %6228 = vmax.xlane.f32.xlu0 %v6227_v39  ;;  %v11002_v58 = vld [vmem:[%s11251_s2 + $0x17] ss:$0 sm:$0xff] }
 0xd44   :  { %v6281_v37 = vsel %vm729_vm1, %v10959_v10, 0.0 }
 0xd45   :  { %v8212_v22 = vpop.eup %8211  ;;  %8215 = vpow2.f32 %v6254_v41  ;;  %5501 = vadd.xlane.f32.xlu2 %v5500_v34  ;;  %6282 = vadd.xlane.f32.xlu1 %v6281_v37 }
 0xd46   :  { %v6217_v61 = vpop.xlane.xlu0 %6216  ;;  %v5531_v47 = vmul.f32 %v8212_v22, %v10893_v4  ;;  %v10968_v3 = vpop.eup %8213  ;;  %v7725_v22 = vld [vmem:[%s11249_s0 + $0x178] sm:$0xff]  }
 0xd47   :  { %v6237_v49 = vsub.f32 %v10899_v35, %v6217_v61  ;;  %v5503_v52 = vsel %vm729_vm1, %v10968_v3, 0.0 }
 0xd48   :  { %7028 = vmatmul.msk.f32.gmra.mxu3 %vm729_vm1, %v5531_v47  ;;  %v6220_v56 = vpop.xlane.xlu1 %6219 }
 0xd49   :  { %v6256_v43 = vmul.f32 1.442695, %v6237_v49  ;;  %v6238_v27 = vsub.f32 %v10901_v57, %v6220_v56  ;;  %v7294_v49 = vunpack.c.h.bf16 %v7725_v22 }
 0xd4b   :  { %v10971_v32 = vpop.eup %8215  ;;  %8217 = vpow2.f32 %v6256_v43  ;;  %v6258_v59 = vmul.f32 1.442695, %v6238_v27  ;;  %v5948_v43 = vmul.f32 %v10996_v18, %v7294_v49  ;;  %v7293_v27 = vunpack.c.l.bf16 %v7725_v22 }
 0xd4c   :  { %v6284_v4 = vsel %vm729_vm1, %v10971_v32, 0.0 }
 0xd4d   :  { %8219 = vpow2.f32 %v6258_v59  ;;  %5504 = vadd.xlane.f32.xlu2 %v5503_v52  ;;  %6285 = vadd.xlane.f32.xlu0 %v6284_v4  ;;  %v5963_v59 = vadd.f32 %v11002_v58, %v5948_v43  ;;  %v5947_v52 = vmul.f32 %v10996_v18, %v7293_v27 }
 0xd4f   :  { %v5975_v4 = vmax.f32 %v5963_v59, 0.0 }
 0xd50   :  { %v6223_v35 = vpop.xlane.xlu1 %6222 }
 0xd51   :  { %v10977_v45 = vpop.eup %8217  ;;  %v6239_v15 = vsub.f32 %v10907_v0, %v6223_v35  ;;  %v7701_v0 = vld [vmem:[%s11249_s0 + $0xb8] sm:$0xff]   ;;  %v5962_v35 = vadd.f32 %v11002_v58, %v5947_v52  ;;  %6375 = vmatpush.msrb.mxu2 %v5975_v4 }
 0xd52   :  { %v6287_v57 = vsel %vm729_vm1, %v10977_v45, 0.0  ;;  %v7198_v21 = vunpack.c.h.bf16 %v7701_v0  ;;  %v7197_v41 = vunpack.c.l.bf16 %v7701_v0  ;;  %v7773_v4 = vld [vmem:[%s11249_s0 + $0x2f8] sm:$0xff]  }
 0xd53   :  { %v10982_v24 = vpop.eup %8219  ;;  %v6260_v44 = vmul.f32 1.442695, %v6239_v15  ;;  %6288 = vadd.xlane.f32.xlu1 %v6287_v57  ;;  %v5974_v15 = vmax.f32 %v5962_v35, 0.0  ;;  %v7749_v57 = vld [vmem:[%s11249_s0 + $0x238] sm:$0xff]  }
 0xd54   :  { %v6290_v53 = vsel %vm729_vm1, %v10982_v24, 0.0  ;;  %v5946_v39 = vmul.f32 %v10996_v18, %v7198_v21  ;;  %v5945_v37 = vmul.f32 %v10996_v18, %v7197_v41 }
 0xd55   :  { %8221 = vpow2.f32 %v6260_v44  ;;  %6291 = vadd.xlane.f32.xlu2 %v6290_v53  ;;  %6376 = vmatpush.msrb.mxu2 %v5974_v15  ;;  %v7390_v44 = vunpack.c.h.bf16 %v7749_v57 }
 0xd56   :  { %v5961_v34 = vadd.f32 %v11002_v58, %v5946_v39  ;;  %v5960_v47 = vadd.f32 %v11002_v58, %v5945_v37 }
 0xd57   :  { %v5950_v53 = vmul.f32 %v10996_v18, %v7390_v44 }
 0xd58   :  { %v5973_v61 = vmax.f32 %v5961_v34, 0.0  ;;  %v5972_v56 = vmax.f32 %v5960_v47, 0.0  ;;  %v7772_v34 = vld [vmem:[%s11249_s0 + $0x2f0] sm:$0xff]  }
 0xd59   :  { %v5965_v0 = vadd.f32 %v11002_v58, %v5950_v53  ;;  %v7482_v22 = vunpack.c.h.bf16 %v7772_v34  ;;  %v7481_v49 = vunpack.c.l.bf16 %v7772_v34  ;;  %v7485_v53 = vunpack.c.l.bf16 %v7773_v4 }
 0xd5a   :  { %6346 = vmatpush.msrb.mxu1 %v5973_v61  ;;  %v8266_v61 = vld [vmem:[%s11250_s1 + $0x16] ss:$0 sm:$0xff] }
 0xd5b   :  { %v10986_v26 = vpop.eup %8221  ;;  %v5977_v39 = vmax.f32 %v5965_v0, 0.0  ;;  %v5168_v47 = vmul.f32 %v8266_v61, %v7482_v22  ;;  %v5167_v27 = vmul.f32 %v8266_v61, %v7481_v49  ;;  %v5951_v0 = vmul.f32 %v10996_v18, %v7485_v53 }
 0xd5c   :  { %v6293_v31 = vsel %vm729_vm1, %v10986_v26, 0.0  ;;  %6347 = vmatpush.msrb.mxu1 %v5972_v56  ;;  %v8267_v56 = vld [vmem:[%s11251_s2 + $0x16] ss:$0 sm:$0xff] }
 0xd5d   :  { %6294 = vadd.xlane.f32.xlu0 %v6293_v31  ;;  %v7389_v31 = vunpack.c.l.bf16 %v7749_v57  ;;  %6404 = vmatpush.msra.mxu0 %v5977_v39  ;;  %v5183_v43 = vadd.f32 %v8267_v56, %v5168_v47  ;;  %v5182_v52 = vadd.f32 %v8267_v56, %v5167_v27  ;;  %v7486_v57 = vunpack.c.h.bf16 %v7773_v4 }
 0xd5f   :  { %v5949_v21 = vmul.f32 %v10996_v18, %v7389_v31  ;;  %v5195_v59 = vmax.f32 %v5183_v43, 0.0  ;;  %v5194_v15 = vmax.f32 %v5182_v52, 0.0  ;;  %v5952_v44 = vmul.f32 %v10996_v18, %v7486_v57 }
 0xd61   :  { %v5964_v41 = vadd.f32 %v11002_v58, %v5949_v21  ;;  %5649 = vmatpush.msra.mxu3 %v5195_v59  ;;  %v5967_v31 = vadd.f32 %v11002_v58, %v5952_v44 }
 0xd63   :  { %v5976_v37 = vmax.f32 %v5964_v41, 0.0  ;;  %5650 = vmatpush.msra.mxu3 %v5194_v15  ;;  %v5979_v39 = vmax.f32 %v5967_v31, 0.0  ;;  %v5966_v41 = vadd.f32 %v11002_v58, %v5951_v0 }
 0xd65   :  { %6405 = vmatpush.msra.mxu0 %v5976_v37  ;;  %v7797_v37 = vld [vmem:[%s11249_s0 + $0x3b8] sm:$0xff]   ;;  %6433 = vmatpush.msra.mxu1 %v5979_v39  ;;  %v5978_v47 = vmax.f32 %v5966_v41, 0.0 }
 0xd66   :  { %v7582_v49 = vunpack.c.h.bf16 %v7797_v37  ;;  %v7581_v43 = vunpack.c.l.bf16 %v7797_v37 }
 0xd67   :  { %6434 = vmatpush.msra.mxu1 %v5978_v47 }
 0xd68   :  { %v5954_v56 = vmul.f32 %v10996_v18, %v7582_v49  ;;  %v5953_v59 = vmul.f32 %v10996_v18, %v7581_v43 }
 0xd6a   :  { %v5969_v27 = vadd.f32 %v11002_v58, %v5954_v56  ;;  %v5968_v15 = vadd.f32 %v11002_v58, %v5953_v59 }
 0xda0   :  { %v6268_v35 = vpop.xlane.xlu2 %6267 }
 0xda1   :  { %8223 = vrcp.f32 %v6268_v35 }
 0xda6   :  { %v6274_v21 = vpop.xlane.xlu0 %6273 }
 0xda7   :  { %v8224_v34 = vpop.eup %8223  ;;  %8225 = vrcp.f32 %v6274_v21  ;;  %v5980_v21 = vmax.f32 %v5968_v15, 0.0 }
 0xda8   :  { %v6314_v22 = vmul.f32 %v8224_v34, %v10921_v33  ;;  %v6271_v61 = vpop.xlane.xlu2 %6270  ;;  %v5981_v33 = vmax.f32 %v5969_v27, 0.0 }
 0xda9   :  { %8227 = vrcp.f32 %v6271_v61 }
 0xdaa   :  { %7077 = vmatmul.msk.f32.vlgmr.msrb.gmra.mxu1 %vm729_vm1, %v6314_v22  ;;  %6462 = vmatpush.msra.mxu2 %v5981_v33 }
 0xdac   :  { %6463 = vmatpush.msra.mxu2 %v5980_v21 }
 0xdad   :  { %v8226_v52 = vpop.eup %8225 }
 0xdae   :  { %v6316_v4 = vmul.f32 %v8226_v52, %v10926_v36  ;;  %v6226_v35 = vpop.xlane.xlu0 %6225  ;;  %v7039_v36 = vld [vmem:[%s11252_s3 + $0x18] sm:$0xf] }
 0xdaf   :  { %v8228_v57 = vpop.eup %8227  ;;  %v6240_v44 = vsub.f32 %v10934_v51, %v6226_v35  ;;  %7040 = vmatpush.msk.msrb.mxu3 %vm1753_vm2, %v7039_v36 }
 0xdb0   :  { %7079 = vmatmul.msk.f32.vlgmr.msrb.gmra.mxu2 %vm729_vm1, %v6316_v4  ;;  %v6277_v53 = vpop.xlane.xlu2 %6276  ;;  %v6280_v31 = vpop.xlane.xlu1 %6279  ;;  %v6315_v0 = vmul.f32 %v8228_v57, %v10931_v2 }
 0xdb1   :  { %v6262_v39 = vmul.f32 1.442695, %v6240_v44  ;;  %8229 = vrcp.f32 %v6277_v53 }
 0xdb2   :  { %8231 = vrcp.f32 %v6280_v31  ;;  %7078 = vmatmul.msk.f32.gmra.mxu1 %vm729_vm1, %v6315_v0 }
 0xdb3   :  { %8233 = vpow2.f32 %v6262_v39 }
 0xdb6   :  { %v6229_v51 = vpop.xlane.xlu0 %6228 }
 0xdb7   :  { %v8230_v41 = vpop.eup %8229  ;;  %v6241_v34 = vsub.f32 %v10950_v55, %v6229_v51 }
 0xdb8   :  { %v8232_v2 = vpop.eup %8231  ;;  %v5502_v37 = vpop.xlane.xlu2 %5501  ;;  %v6317_v61 = vmul.f32 %v8230_v41, %v10941_v63 }
 0xdb9   :  { %v6283_v22 = vpop.xlane.xlu1 %6282  ;;  %v11057_v47 = vpop.eup %8233  ;;  %v6318_v49 = vmul.f32 %v8232_v2, %v10943_v60  ;;  %v6264_v56 = vmul.f32 1.442695, %v6241_v34  ;;  %8235 = vrcp.f32 %v5502_v37 }
 0xdba   :  { %8237 = vrcp.f32 %v6283_v22  ;;  %7080 = vmatmul.msk.f32.gmra.mxu2 %vm729_vm1, %v6317_v61  ;;  %v6296_v43 = vsel %vm729_vm1, %v11057_v47, 0.0 }
 0xdbb   :  { %8239 = vpow2.f32 %v6264_v56  ;;  %7081 = vmatmul.msk.f32.vlgmr.msra.gmra.mxu0 %vm729_vm1, %v6318_v49  ;;  %6297 = vadd.xlane.f32.xlu1 %v6296_v43 }
 0xdbf   :  { %v8236_v55 = vpop.eup %8235 }
 0xdc0   :  { %v8238_v27 = vpop.eup %8237  ;;  %v5536_v63 = vmul.f32 %v8236_v55, %v10956_v17  ;;  %v5505_v59 = vpop.xlane.xlu2 %5504 }
 0xdc1   :  { %v6286_v52 = vpop.xlane.xlu0 %6285  ;;  %v11065_v4 = vpop.eup %8239  ;;  %8241 = vrcp.f32 %v5505_v59  ;;  %v6319_v60 = vmul.f32 %v8238_v27, %v10959_v10 }
 0xdc2   :  { %8243 = vrcp.f32 %v6286_v52  ;;  %7033 = vmatmul.msk.f32.vlgmr.msra.gmra.mxu3 %vm729_vm1, %v5536_v63  ;;  %v6299_v35 = vsel %vm729_vm1, %v11065_v4, 0.0 }
 0xdc3   :  { %7082 = vmatmul.msk.f32.gmra.mxu0 %vm729_vm1, %v6319_v60  ;;  %6300 = vadd.xlane.f32.xlu2 %v6299_v35  ;;  %v5565_v0 = vpop.f32.mrf.mxu3 }
 0xdc6   :  { %v6289_v33 = vpop.xlane.xlu1 %6288 }
 0xdc7   :  { %v8242_v15 = vpop.eup %8241  ;;  %8245 = vrcp.f32 %v6289_v33 }
 0xdc8   :  { %v8244_v57 = vpop.eup %8243  ;;  %v6292_v17 = vpop.xlane.xlu2 %6291  ;;  %v5537_v44 = vmul.f32 %v8242_v15, %v10968_v3  ;;  %v11286_v15 = vld [vmem:[#allocation5_spill] sm:$0xff] }
 0xdc9   :  { %v6320_v53 = vmul.f32 %v8244_v57, %v10971_v32  ;;  %8247 = vrcp.f32 %v6292_v17  ;;  %v11287_v57 = vld [vmem:[#allocation11_spill] sm:$0xff] }
 0xdca   :  { %7034 = vmatmul.msk.f32.gmra.mxu3 %vm729_vm1, %v5537_v44  ;;  %v1867_v17 = vadd.f32 %v11287_v57, %v11286_v15  ;;  %v11288_v44 = vld [vmem:[#allocation15_spill] sm:$0xff]  ;;  %v11301_v57 = vld [vmem:[#allocation25_spill] sm:$0xff] }
 0xdcb   :  { %7083 = vmatmul.msk.f32.vlgmr.msra.gmra.mxu1 %vm729_vm1, %v6320_v53  ;;  %v5568_v51 = vpop.f32.mrf.mxu3 }
 0xdcc   :  { %v2674_v53 = vadd.f32 %v11288_v44, %v1867_v17 }
 0xdcd   :  { %v8246_v10 = vpop.eup %8245 }
 0xdce   :  { %v6321_v36 = vmul.f32 %v8246_v10, %v10977_v45  ;;  %v7089_v45 = vld [vmem:[%s11252_s3 + $0x1c] sm:$0xf]  ;;  %v11289_v10 = vld [vmem:[#allocation22_spill] sm:$0xff] }
 0xdcf   :  { %v8248_v31 = vpop.eup %8247  ;;  %7090 = vmatpush.msk.msrb.mxu1 %vm1753_vm2, %v7089_v45 }
 0xdd0   :  { %v6322_v21 = vmul.f32 %v8248_v31, %v10982_v24  ;;  %v6295_v39 = vpop.xlane.xlu0 %6294  ;;  %v7821_v24 = vld [vmem:[%s11249_s0 + $0x478] sm:$0xff]   ;;  %v3458_v31 = vadd.f32 %v11289_v10, %v2674_v53 }
 0xdd1   :  { %8249 = vrcp.f32 %v6295_v39 }
 0xdd2   :  { %7041 = vmatmul.msk.f32.vlgmr.msrb.gmra.mxu3 %vm518_vm0, %v5565_v0  ;;  %7085 = vmatmul.msk.f32.vlgmr.msra.gmra.mxu2 %vm729_vm1, %v6322_v21  ;;  %v4242_v0 = vadd.f32 %v10746_v38, %v3458_v31  ;;  %v11291_v21 = vld [vmem:[#allocation12_spill] sm:$0xff]  ;;  %v11294_v38 = vld [vmem:[#allocation7_spill] sm:$0xff] }
 0xdd3   :  { %7084 = vmatmul.msk.f32.gmra.mxu1 %vm729_vm1, %v6321_v36 }
 0xdd4   :  { %v5026_v36 = vadd.f32 %v10761_v40, %v4242_v0  ;;  %v11302_v0 = vld [vmem:[#allocation9_spill] sm:$0xff] }
 0xdd7   :  { %v8250_v3 = vpop.eup %8249 }
 0xdd8   :  { %v6323_v32 = vmul.f32 %v8250_v3, %v10986_v26 }
 0xdda   :  { %7042 = vmatmul.msk.f32.gmra.mxu3 %vm518_vm0, %v5568_v51  ;;  %7086 = vmatmul.msk.f32.gmra.mxu2 %vm729_vm1, %v6323_v32 }
 0xde2   :  { %7043 = vmatmul.msk.f32.gmra.mxu3 %vm518_vm0, %v10798_v48  ;;  %v7678_v48 = vunpack.c.h.bf16 %v7821_v24 }
 0xde4   :  { %v5956_v26 = vmul.f32 %v10996_v18, %v7678_v48 }
 0xdea   :  { %7044 = vmatmul.msk.f32.gmra.mxu3 %vm518_vm0, %v10813_v50  ;;  %v5971_v50 = vadd.f32 %v11002_v58, %v5956_v26 }
 0xdec   :  { %v5983_v41 = vmax.f32 %v5971_v50, 0.0 }
 0xdee   :  { %6491 = vmatpush.msrb.mxu0 %v5983_v41  ;;  %v11295_v41 = vld [vmem:[#allocation13_spill] sm:$0xff] }
 0xdf2   :  { %7045 = vmatmul.msk.f32.gmra.mxu3 %vm518_vm0, %v10805_v1  ;;  %v7677_v1 = vunpack.c.l.bf16 %v7821_v24  ;;  %v11293_v24 = vld [vmem:[#allocation23_spill] sm:$0xff] }
 0xdfa   :  { %7046 = vmatmul.msk.f32.gmra.mxu3 %vm518_vm0, %v10823_v12  ;;  %v5955_v12 = vmul.f32 %v10996_v18, %v7677_v1  ;;  %v1873_v1 = vadd.f32 %v11295_v41, %v11294_v38 }
 0xdfc   :  { %v5970_v34 = vadd.f32 %v11002_v58, %v5955_v12  ;;  %v11296_v12 = vld [vmem:[#allocation17_spill] sm:$0xff] }
 0xdfe   :  { %v5982_v2 = vmax.f32 %v5970_v34, 0.0  ;;  %v2676_v34 = vadd.f32 %v11296_v12, %v1873_v1  ;;  %v11306_v1 = vld [vmem:[#allocation10_spill] sm:$0xff] }
 0xe00   :  { %6492 = vmatpush.msrb.mxu0 %v5982_v2 }
 0xe27   :  { %v6349_v37 = vpop.f32.mrf.mxu1 }
 0xe28   :  { %7091 = vmatmul.msk.f32.vlgmr.msrb.gmra.mxu1 %vm518_vm0, %v6349_v37 }
 0xe2e   :  { %v6298_v22 = vpop.xlane.xlu1 %6297 }
 0xe2f   :  { %8251 = vrcp.f32 %v6298_v22  ;;  %v6352_v61 = vpop.f32.mrf.mxu1  ;;  %v11297_v22 = vld [vmem:[#allocation24_spill] sm:$0xff] }
 0xe30   :  { %7092 = vmatmul.msk.f32.gmra.mxu1 %vm518_vm0, %v6352_v61  ;;  %v3460_v61 = vadd.f32 %v11297_v22, %v2676_v34 }
 0xe33   :  { %v6378_v55 = vpop.f32.mrf.mxu2 }
 0xe35   :  { %v8252_v49 = vpop.eup %8251 }
 0xe36   :  { %v6324_v56 = vmul.f32 %v8252_v49, %v11057_v47  ;;  %v6301_v43 = vpop.xlane.xlu2 %6300 }
 0xe37   :  { %8253 = vrcp.f32 %v6301_v43 }
 0xe38   :  { %7087 = vmatmul.msk.f32.vlgmr.msrb.gmra.mxu0 %vm729_vm1, %v6324_v56  ;;  %7093 = vmatmul.msk.f32.gmra.mxu1 %vm518_vm0, %v6378_v55  ;;  %v6407_v63 = vpop.f32.mrf.mxu0 }
 0xe3d   :  { %v8254_v18 = vpop.eup %8253  ;;  %v6381_v27 = vpop.f32.mrf.mxu2 }
 0xe3e   :  { %v6325_v58 = vmul.f32 %v8254_v18, %v11065_v4 }
 0xe40   :  { %7088 = vmatmul.msk.f32.gmra.mxu0 %vm729_vm1, %v6325_v58  ;;  %7094 = vmatmul.msk.f32.gmra.mxu1 %vm518_vm0, %v6381_v27  ;;  %v6410_v52 = vpop.f32.mrf.mxu0  ;;  %v11298_v27 = vld [vmem:[#allocation8_spill] sm:$0xff] }
 0xe45   :  { %v5652_v59 = vpop.f32.mrf.mxu3 }
 0xe46   :  { %7047 = vmatmul.msk.f32.gmra.mxu3 %vm518_vm0, %v5652_v59 }
 0xe48   :  { %7095 = vmatmul.msk.f32.gmra.mxu1 %vm518_vm0, %v6407_v63  ;;  %v6436_v60 = vpop.f32.mrf.mxu1  ;;  %v11299_v63 = vld [vmem:[#allocation14_spill] sm:$0xff] }
 0xe49   :  { %v1876_v59 = vadd.f32 %v11299_v63, %v11298_v27 }
 0xe4d   :  { %v5655_v47 = vpop.f32.mrf.mxu3 }
 0xe4e   :  { %7048 = vmatmul.msk.f32.gmra.mxu3 %vm518_vm0, %v5655_v47 }
 0xe50   :  { %7096 = vmatmul.msk.f32.gmra.mxu1 %vm518_vm0, %v6410_v52  ;;  %v6439_v4 = vpop.f32.mrf.mxu1 }
 0xe55   :  { %v6465_v35 = vpop.f32.mrf.mxu2 }
 0xe56   :  { %7049 = vmatmul.msk.f32.gmra.mxu3 %vm518_vm0, %v10832_v5  ;;  %v5774_v5 = vpop.f32.mrf.mxu3 }
 0xe57   :  { %v5810_v32 = vadd.f32 %v5774_v5, %v5026_v36 }
 0xe58   :  { %7097 = vmatmul.msk.f32.gmra.mxu1 %vm518_vm0, %v6436_v60 }
 0xe5d   :  { %v6468_v33 = vpop.f32.mrf.mxu2 }
 0xe5e   :  { %7050 = vmatmul.msk.f32.gmra.mxu3 %vm518_vm0, %v10845_v25  ;;  %v5777_v25 = vpop.f32.mrf.mxu3 }
 0xe60   :  { %7098 = vmatmul.msk.f32.gmra.mxu1 %vm518_vm0, %v6439_v4  ;;  %v11300_v4 = vld [vmem:[#allocation18_spill] sm:$0xff] }
 0xe66   :  { %7051 = vmatmul.msk.f32.gmra.mxu3 %vm518_vm0, %v10842_v29  ;;  %v11290_v29 = vld [vmem:[#allocation6_spill] sm:$0xff]  ;;  %v5780_v51 = vpop.f32.mrf.mxu3 }
 0xe67   :  { %v1870_v39 = vadd.f32 %v11291_v21, %v11290_v29  ;;  %v11303_v29 = vld [vmem:[#allocation2_spill] sm:$0xff] }
 0xe68   :  { %7099 = vmatmul.msk.f32.gmra.mxu1 %vm518_vm0, %v6465_v35  ;;  %v2677_v35 = vadd.f32 %v11300_v4, %v1876_v59  ;;  %v1879_v21 = vadd.f32 %v11303_v29, %v11302_v0 }
 0xe6a   :  { %v3461_v17 = vadd.f32 %v11301_v57, %v2677_v35 }
 0xe6c   :  { %v4245_v44 = vadd.f32 %v10769_v11, %v3461_v17 }
 0xe6e   :  { %7052 = vmatmul.msk.f32.gmra.mxu3 %vm518_vm0, %v10851_v42  ;;  %v11292_v42 = vld [vmem:[#allocation16_spill] sm:$0xff]  ;;  %v5783_v43 = vpop.f32.mrf.mxu3 }
 0xe6f   :  { %v2675_v3 = vadd.f32 %v11292_v42, %v1870_v39  ;;  %v5029_v39 = vadd.f32 %v10775_v6, %v4245_v44 }
 0xe70   :  { %7100 = vmatmul.msk.f32.gmra.mxu1 %vm518_vm0, %v6468_v33 }
 0xe71   :  { %v3459_v48 = vadd.f32 %v11293_v24, %v2675_v3  ;;  %v11304_v3 = vld [vmem:[#allocation19_spill] sm:$0xff]  ;;  %v11305_v24 = vld [vmem:[#allocation26_spill] sm:$0xff] }
 0xe72   :  { %v2678_v11 = vadd.f32 %v11304_v3, %v1879_v21 }
 0xe73   :  { %v4243_v50 = vadd.f32 %v10759_v9, %v3459_v48  ;;  %v4244_v9 = vadd.f32 %v10765_v28, %v3460_v61  ;;  %v11308_v61 = vld [vmem:[#allocation20_spill] sm:$0xff] }
 0xe74   :  { %v3462_v48 = vadd.f32 %v11305_v24, %v2678_v11 }
 0xe75   :  { %v5027_v40 = vadd.f32 %v10767_v19, %v4243_v50  ;;  %v5028_v47 = vadd.f32 %v10771_v54, %v4244_v9 }
 0xe76   :  { %v5786_v10 = vpop.f32.mrf.mxu3  ;;  %v4246_v50 = vadd.f32 %v10773_v23, %v3462_v48 }
 0xe77   :  { %v5811_v2 = vadd.f32 %v5777_v25, %v5027_v40  ;;  %v5812_v33 = vadd.f32 %v5780_v51, %v5028_v47  ;;  %v11307_v40 = vld [vmem:[#allocation3_spill] sm:$0xff] }
 0xe78   :  { %v1882_v12 = vadd.f32 %v11307_v40, %v11306_v1  ;;  %v5030_v34 = vadd.f32 %v10779_v16, %v4246_v50 }
 0xe7a   :  { %v2679_v23 = vadd.f32 %v11308_v61, %v1882_v12 }
 0xea5   :  { %v6558_v45 = vpop.f32.mrf.mxu1 }
 0xea6   :  { %v6594_v26 = vadd.f32 %v6558_v45, %v5810_v32  ;;  %v5813_v32 = vadd.f32 %v5783_v43, %v5029_v39  ;;  %v11309_v43 = vld [vmem:[#allocation27_spill] sm:$0xff] }
 0xea7   :  { %v3463_v9 = vadd.f32 %v11309_v43, %v2679_v23 }
 0xea8   :  { %6607 = vst.msk [vmem:[%s11253_s4] sm:$0xff] %vm6606_vm3, %v6594_v26  ;;  %v6650_v49 = vmul.f32 %v6594_v26, %v6594_v26  ;;  %v6619_v55 = vsel %vm6606_vm3, %v6594_v26, 0.0 }
 0xeaa   :  { %v6662_v52 = vsel %vm6606_vm3, %v6650_v49, 0.0  ;;  %v5814_v49 = vadd.f32 %v5786_v10, %v5030_v34 }
 0xead   :  { %v6561_v37 = vpop.f32.mrf.mxu1 }
 0xeae   :  { %v6595_v56 = vadd.f32 %v6561_v37, %v5811_v2  ;;  %v5789_v37 = vpop.f32.mrf.mxu3 }
 0xeb0   :  { %6608 = vst.msk [vmem:[%s11253_s4 + $0x8] sm:$0xff] %vm6606_vm3, %v6595_v56  ;;  %v6620_v19 = vsel %vm6606_vm3, %v6595_v56, 0.0  ;;  %v6651_v18 = vmul.f32 %v6595_v56, %v6595_v56 }
 0xeb1   :  { %v6621_v58 = vadd.f32 %v6620_v19, %v6619_v55  ;;  %v4247_v19 = vadd.f32 %v10777_v62, %v3463_v9 }
 0xeb2   :  { %v6663_v28 = vsel %vm6606_vm3, %v6651_v18, 0.0 }
 0xeb3   :  { %v6664_v60 = vadd.f32 %v6663_v28, %v6662_v52  ;;  %v5031_v27 = vadd.f32 %v10781_v14, %v4247_v19 }
 0xeb5   :  { %v6494_v5 = vpop.f32.mrf.mxu0  ;;  %v6564_v15 = vpop.f32.mrf.mxu1  ;;  %v5815_v52 = vadd.f32 %v5789_v37, %v5031_v27 }
 0xeb6   :  { %v6596_v25 = vadd.f32 %v6564_v15, %v5812_v33  ;;  %7101 = vmatmul.msk.f32.gmra.mxu1 %vm518_vm0, %v6494_v5 }
 0xeb8   :  { %6609 = vst.msk [vmem:[%s11253_s4 + $0x10] sm:$0xff] %vm6606_vm3, %v6596_v25  ;;  %v6622_v54 = vsel %vm6606_vm3, %v6596_v25, 0.0  ;;  %v6652_v53 = vmul.f32 %v6596_v25, %v6596_v25 }
 0xeb9   :  { %v6623_v31 = vadd.f32 %v6622_v54, %v6621_v58 }
 0xeba   :  { %v6665_v36 = vsel %vm6606_vm3, %v6652_v53, 0.0 }
 0xebb   :  { %v6666_v42 = vadd.f32 %v6665_v36, %v6664_v60 }
 0xebd   :  { %v6497_v51 = vpop.f32.mrf.mxu0  ;;  %v6567_v45 = vpop.f32.mrf.mxu1 }
 0xebe   :  { %v6597_v26 = vadd.f32 %v6567_v45, %v5813_v32  ;;  %7102 = vmatmul.msk.f32.gmra.mxu1 %vm518_vm0, %v6497_v51 }
 0xec0   :  { %6610 = vst.msk [vmem:[%s11253_s4 + $0x18] sm:$0xff] %vm6606_vm3, %v6597_v26  ;;  %v6624_v6 = vsel %vm6606_vm3, %v6597_v26, 0.0  ;;  %v6653_v38 = vmul.f32 %v6597_v26, %v6597_v26 }
 0xec1   :  { %v6625_v41 = vadd.f32 %v6624_v6, %v6623_v31 }
 0xec2   :  { %v6667_v2 = vsel %vm6606_vm3, %v6653_v38, 0.0 }
 0xec3   :  { %v6668_v22 = vadd.f32 %v6667_v2, %v6666_v42 }
 0xec5   :  { %v6570_v56 = vpop.f32.mrf.mxu1 }
 0xec6   :  { %v6598_v55 = vadd.f32 %v6570_v56, %v5814_v49 }
 0xec8   :  { %6611 = vst.msk [vmem:[%s11253_s4 + $0x20] sm:$0xff] %vm6606_vm3, %v6598_v55  ;;  %v6626_v16 = vsel %vm6606_vm3, %v6598_v55, 0.0  ;;  %v6654_v18 = vmul.f32 %v6598_v55, %v6598_v55 }
 0xec9   :  { %v6627_v58 = vadd.f32 %v6626_v16, %v6625_v41  ;;  %v5792_v47 = vpop.f32.mrf.mxu3 }
 0xeca   :  { %v6669_v63 = vsel %vm6606_vm3, %v6654_v18, 0.0  ;;  %v5816_v14 = vadd.f32 %v5792_v47, %v10787_v8 }
 0xecb   :  { %v6670_v59 = vadd.f32 %v6669_v63, %v6668_v22 }
 0xecd   :  { %v6573_v28 = vpop.f32.mrf.mxu1 }
 0xece   :  { %v6599_v60 = vadd.f32 %v6573_v28, %v5815_v52 }
 0xed0   :  { %6612 = vst.msk [vmem:[%s11253_s4 + $0x28] sm:$0xff] %vm6606_vm3, %v6599_v60  ;;  %v6628_v62 = vsel %vm6606_vm3, %v6599_v60, 0.0  ;;  %v6655_v4 = vmul.f32 %v6599_v60, %v6599_v60 }
 0xed1   :  { %v6629_v35 = vadd.f32 %v6628_v62, %v6627_v58  ;;  %v5795_v15 = vpop.f32.mrf.mxu3 }
 0xed2   :  { %v6671_v33 = vsel %vm6606_vm3, %v6655_v4, 0.0  ;;  %v5817_v31 = vadd.f32 %v5795_v15, %v10795_v46 }
 0xed3   :  { %v6672_v5 = vadd.f32 %v6671_v33, %v6670_v59 }
 0xed5   :  { %v6576_v57 = vpop.f32.mrf.mxu1 }
 0xed6   :  { %v6600_v17 = vadd.f32 %v6576_v57, %v5816_v14 }
 0xed8   :  { %6613 = vst.msk [vmem:[%s11253_s4 + $0x30] sm:$0xff] %vm6606_vm3, %v6600_v17  ;;  %v6630_v25 = vsel %vm6606_vm3, %v6600_v17, 0.0  ;;  %v6656_v44 = vmul.f32 %v6600_v17, %v6600_v17 }
 0xed9   :  { %v6631_v54 = vadd.f32 %v6630_v25, %v6629_v35  ;;  %v5798_v8 = vpop.f32.mrf.mxu3 }
 0xeda   :  { %v6673_v53 = vsel %vm6606_vm3, %v6656_v44, 0.0  ;;  %v5818_v11 = vadd.f32 %v5798_v8, %v10810_v7 }
 0xedb   :  { %v6674_v10 = vadd.f32 %v6673_v53, %v6672_v5 }
 0xedd   :  { %v6579_v0 = vpop.f32.mrf.mxu1 }
 0xede   :  { %v6601_v29 = vadd.f32 %v6579_v0, %v5817_v31 }
 0xee0   :  { %6614 = vst.msk [vmem:[%s11253_s4 + $0x38] sm:$0xff] %vm6606_vm3, %v6601_v29  ;;  %v6632_v21 = vsel %vm6606_vm3, %v6601_v29, 0.0  ;;  %v6657_v39 = vmul.f32 %v6601_v29, %v6601_v29 }
 0xee1   :  { %v6633_v36 = vadd.f32 %v6632_v21, %v6631_v54  ;;  %v5801_v24 = vpop.f32.mrf.mxu3 }
 0xee2   :  { %v6675_v42 = vsel %vm6606_vm3, %v6657_v39, 0.0  ;;  %v5819_v6 = vadd.f32 %v5801_v24, %v10828_v20 }
 0xee3   :  { %v6676_v3 = vadd.f32 %v6675_v42, %v6674_v10 }
 0xee5   :  { %v6582_v32 = vpop.f32.mrf.mxu1 }
 0xee6   :  { %v6602_v51 = vadd.f32 %v6582_v32, %v5818_v11 }
 0xee8   :  { %6615 = vst.msk [vmem:[%s11253_s4 + $0x40] sm:$0xff] %vm6606_vm3, %v6602_v51  ;;  %v6634_v46 = vsel %vm6606_vm3, %v6602_v51, 0.0  ;;  %v6658_v45 = vmul.f32 %v6602_v51, %v6602_v51 }
 0xee9   :  { %v6635_v48 = vadd.f32 %v6634_v46, %v6633_v36  ;;  %v5804_v2 = vpop.f32.mrf.mxu3 }
 0xeea   :  { %v6677_v26 = vsel %vm6606_vm3, %v6658_v45, 0.0  ;;  %v5820_v37 = vadd.f32 %v5804_v2, %v10840_v30 }
 0xeeb   :  { %v6678_v50 = vadd.f32 %v6677_v26, %v6676_v3 }
 0xeed   :  { %v6585_v38 = vpop.f32.mrf.mxu1 }
 0xeee   :  { %v6603_v41 = vadd.f32 %v6585_v38, %v5819_v6 }
 0xef0   :  { %6616 = vst.msk [vmem:[%s11253_s4 + $0x48] sm:$0xff] %vm6606_vm3, %v6603_v41  ;;  %v6636_v7 = vsel %vm6606_vm3, %v6603_v41, 0.0  ;;  %v6659_v1 = vmul.f32 %v6603_v41, %v6603_v41 }
 0xef1   :  { %v6637_v40 = vadd.f32 %v6636_v7, %v6635_v48  ;;  %v5807_v49 = vpop.f32.mrf.mxu3 }
 0xef2   :  { %v6679_v12 = vsel %vm6606_vm3, %v6659_v1, 0.0  ;;  %v5821_v55 = vadd.f32 %v5807_v49, %v10849_v13 }
 0xef3   :  { %v6680_v34 = vadd.f32 %v6679_v12, %v6678_v50 }
 0xf33   :  { %v6588_v22 = vpop.f32.mrf.mxu1 }
 0xf34   :  { %v6604_v61 = vadd.f32 %v6588_v22, %v5820_v37 }
 0xf36   :  { %6617 = vst.msk [vmem:[%s11253_s4 + $0x50] sm:$0xff] %vm6606_vm3, %v6604_v61  ;;  %v6638_v20 = vsel %vm6606_vm3, %v6604_v61, 0.0  ;;  %v6660_v23 = vmul.f32 %v6604_v61, %v6604_v61 }
 0xf37   :  { %v6639_v56 = vadd.f32 %v6638_v20, %v6637_v40 }
 0xf38   :  { %v6681_v43 = vsel %vm6606_vm3, %v6660_v23, 0.0 }
 0xf39   :  { %v6682_v9 = vadd.f32 %v6681_v43, %v6680_v34 }
 0xf3b   :  { %v6591_v19 = vpop.f32.mrf.mxu1 }
 0xf3c   :  { %v6605_v16 = vadd.f32 %v6591_v19, %v5821_v55 }
 0xf3e   :  { %6618 = vst.msk [vmem:[%s11253_s4 + $0x58] sm:$0xff] %vm6606_vm3, %v6605_v16  ;;  %v6640_v30 = vsel %vm6606_vm3, %v6605_v16, 0.0  ;;  %v6661_v18 = vmul.f32 %v6605_v16, %v6605_v16 }
 0xf3f   :  { %v6641_v58 = vadd.f32 %v6640_v30, %v6639_v56 }
 0xf40   :  { %v6683_v27 = vsel %vm6606_vm3, %v6661_v18, 0.0 }
 0xf41   :  { %v6642_v63 = vrot.slane %v6641_v58, 4  ;;  %v6684_v59 = vadd.f32 %v6683_v27, %v6682_v9 }
 0xf43   :  { %v6643_v47 = vadd.f32 %v6642_v63, %v6641_v58  ;;  %v6685_v52 = vrot.slane %v6684_v59, 4 }
 0xf45   :  { %v6644_v28 = vrot.slane %v6643_v47, 2  ;;  %v6686_v60 = vadd.f32 %v6685_v52, %v6684_v59 }
 0xf47   :  { %v6645_v13 = vadd.f32 %v6644_v28, %v6643_v47  ;;  %v6687_v62 = vrot.slane %v6686_v60, 2 }
 0xf49   :  { %v6646_v4 = vrot.slane %v6645_v13, 1  ;;  %v6688_v35 = vadd.f32 %v6687_v62, %v6686_v60 }
 0xf4b   :  { %v6647_v33 = vadd.f32 %v6646_v4, %v6645_v13  ;;  %v6689_v5 = vrot.slane %v6688_v35, 1 }
 0xf4d   :  { %6649 = vst.msk [vmem:[%s11254_s5] sm:$0x1] %vm6648_vm4, %v6647_v33  ;;  %v6690_v14 = vadd.f32 %v6689_v5, %v6688_v35 }
 0xf4f   :  { %6691 = vst.msk [vmem:[%s11255_s6] sm:$0x1] %vm6648_vm4, %v6690_v14 }

</bundles_post_ra>
